<compile_context>
chip_gen: v5e
topology: v5e:2x2
jax: 0.10.0
libtpu: 0.0.40
codegen_flags: <defaults>
</compile_context>

<pallas_src>
import functools

import jax
import jax.numpy as jnp
from jax.experimental import pallas as pl
from jax.experimental.pallas import tpu as pltpu


# Backbone sizes: all channel widths padded to the 128-lane width.
C = 128
N_CLASSES = 1000


# ----------------------------------------------------------------------------
# Fused Pallas kernel (one grid step == one batch element)
# ----------------------------------------------------------------------------

def _fused_kernel(cols_ref,
                  stem_w_ref, stem_b_ref,
                  exp_w_ref, exp_b_ref,
                  dw_w_ref, dw_b_ref,
                  se1_w_ref, se1_b_ref,
                  se2_w_ref, se2_b_ref,
                  proj_w_ref, proj_b_ref,
                  head_w_ref, head_b_ref,
                  clsfc_w_ref, clsfc_b_ref,
                  out_ref, *, H, W):
    """Whole EfficientNetCounter forward for one batch element.

    Activation layout is (H*W, 128): channels on the lane axis, spatial
    positions on the sublane axis. Everything stays in VMEM/vregs.
    """
    f32 = jnp.float32
    bf16 = jnp.bfloat16
    HW = H * W

    def silu(t):
        return t * jax.nn.sigmoid(t)

    def mm(a, w_ref, b_ref):           # bf16 MXU matmul, f32 accumulation
        return jnp.dot(a.astype(bf16), w_ref[...],
                       preferred_element_type=f32) + b_ref[...]

    # --- stem: 3x3 / stride-2 conv as matmul over im2col patches, + SiLU ----
    cols = cols_ref[0]                                        # (HW, 27) bf16
    h = silu(jnp.dot(cols, stem_w_ref[...],
                     preferred_element_type=f32) + stem_b_ref[...])

    # --- MBConv: expand 1x1 + SiLU ------------------------------------------
    e = silu(mm(h, exp_w_ref, exp_b_ref))                     # (HW, C) f32
    c_dim = e.shape[1]

    # --- MBConv: depthwise 3x3, 'same' zero padding, + SiLU -----------------
    # out[h,w,c] = sum_{dh,dw} k[dh,dw,c] * x[h+dh, w+dw, c]   (zero if OOB)
    # Implemented with XLU sublane rolls + iota boundary masks on the
    # flattened layout (no unaligned slices, no padded scratch buffer).
    row = jax.lax.broadcasted_iota(jnp.int32, (HW, c_dim), 0)
    col_in_row = jnp.bitwise_and(row, W - 1)                  # W is a pow2
    acc = jnp.zeros_like(e) + dw_b_ref[...]
    for dh in (-1, 0, 1):
        for dw in (-1, 0, 1):
            wk = dw_w_ref[(dh + 1) * 3 + (dw + 1), :].reshape(1, c_dim)
            shift = (-(dh * W + dw)) % HW
            if shift == 0:
                tap = e
            else:
                # tap[i] = e[i + dh*W + dw] for in-bounds taps, else 0.
                tap = pltpu.roll(e, shift, axis=0)
                conds = []
                if dh > 0:
                    conds.append(row < (H - dh) * W)
                if dh < 0:
                    conds.append(row >= (-dh) * W)
                if dw > 0:
                    conds.append(col_in_row < (W - dw))
                if dw < 0:
                    conds.append(col_in_row >= (-dw))
                mask = conds[0]
                for extra in conds[1:]:
                    mask = jnp.logical_and(mask, extra)
                tap = jnp.where(mask, tap, 0.0)
            acc = acc + tap * wk
    d = silu(acc)                                             # (HW, C) f32

    # --- MBConv: squeeze-and-excite -----------------------------------------
    # GAP as a tiny f32 MXU matmul (avoids a cross-sublane VPU reduction);
    # 8 identical rows keep the following SE matmuls MXU-friendly.
    ones8 = jnp.ones((8, HW), f32)
    inv_hw = 1.0 / float(HW)
    sq8 = jnp.dot(ones8, d, preferred_element_type=f32) * inv_hw    # (8, C)
    s1 = silu(mm(sq8, se1_w_ref, se1_b_ref))                        # (8, C)
    s2 = jax.nn.sigmoid(mm(s1, se2_w_ref, se2_b_ref))               # (8, C)
    d = d * s2[0:1, :]

    # --- MBConv: project 1x1 (linear), then head 1x1 conv + SiLU ------------
    pr = mm(d, proj_w_ref, proj_b_ref)                        # (HW, C)
    hd = silu(mm(pr, head_w_ref, head_b_ref))                 # (HW, C)

    # --- GAP + folded (classifier 128->1000 . counter fc 1000->1) + ReLU ----
    feat8 = jnp.dot(ones8, hd, preferred_element_type=f32) * inv_hw  # (8, C)
    feat = feat8[0:1, :]                                      # (1, C)
    val = (jnp.sum(feat * clsfc_w_ref[...], axis=1, keepdims=True)
           + clsfc_b_ref[...])                                # (1, 1)
    out_ref[...] = jnp.maximum(val, 0.0).reshape(out_ref.shape)


def _const_spec(arr):
    nd = arr.ndim
    return pl.BlockSpec(arr.shape, lambda b, _nd=nd: (0,) * _nd)


def _fused_pallas_call(cols, weights, H, W):
    B, HW, Kc = cols.shape
    kernel = functools.partial(_fused_kernel, H=H, W=W)
    in_specs = [pl.BlockSpec((1, HW, Kc), lambda b: (b, 0, 0))]
    in_specs += [_const_spec(w) for w in weights]
    return pl.pallas_call(
        kernel,
        out_shape=jax.ShapeDtypeStruct((B, 1, 1), jnp.float32),
        grid=(B,),
        in_specs=in_specs,
        out_specs=pl.BlockSpec((1, 1, 1), lambda b: (b, 0, 0)),
        compiler_params=pltpu.CompilerParams(
            dimension_semantics=("parallel",)),
    )(cols, *weights)


# ----------------------------------------------------------------------------
# Glue (im2col, parameters)
# ----------------------------------------------------------------------------

def im2col(x, kh, kw, stride, pad):
    """x:(B,H,W,C) NHWC -> patches:(B*Ho*Wo, kh*kw*C)."""
    B, H, W, Cin = x.shape
    xp = jnp.pad(x, ((0, 0), (pad, pad), (pad, pad), (0, 0)))
    Ho = (H + 2 * pad - kh) // stride + 1
    Wo = (W + 2 * pad - kw) // stride + 1
    cols = []
    for i in range(kh):
        for j in range(kw):
            cols.append(
                xp[:, i:i + stride * Ho:stride, j:j + stride * Wo:stride, :])
    patches = jnp.concatenate(cols, axis=-1)       # (B, Ho, Wo, kh*kw*C)
    return patches.reshape(B * Ho * Wo, kh * kw * Cin), Ho, Wo


def init_params(key):
    """Deterministic synthetic parameters (BN folded into conv w/b)."""
    def dense(k, fan_in, shape):
        return jax.random.normal(k, shape, jnp.float32) / jnp.sqrt(
            jnp.float32(fan_in))

    ks = jax.random.split(key, 9)
    f32 = jnp.float32
    p = {}
    p["stem_w"] = dense(ks[0], 27, (27, C))
    p["stem_b"] = jnp.zeros((C,), f32)
    p["exp_w"] = dense(ks[1], C, (C, C))
    p["exp_b"] = jnp.zeros((C,), f32)
    p["dw_w"] = dense(ks[2], 9, (9, C))            # 3x3 depthwise taps
    p["dw_b"] = jnp.zeros((C,), f32)
    p["se1_w"] = dense(ks[3], C, (C, C))
    p["se1_b"] = jnp.zeros((C,), f32)
    p["se2_w"] = dense(ks[4], C, (C, C))
    p["se2_b"] = jnp.zeros((C,), f32)
    p["proj_w"] = dense(ks[5], C, (C, C))
    p["proj_b"] = jnp.zeros((C,), f32)
    p["head_w"] = dense(ks[6], C, (C, C))
    p["head_b"] = jnp.zeros((C,), f32)
    p["cls_w"] = dense(ks[7], C, (C, N_CLASSES))   # backbone 1000-way head
    p["cls_b"] = jnp.zeros((N_CLASSES,), f32)
    # Counter head: nn.Linear(1000, 1) + ReLU  (the module-specific part)
    p["fc_w"] = dense(ks[8], N_CLASSES, (N_CLASSES, 1))
    p["fc_b"] = jnp.zeros((1,), f32)
    return p


# ----------------------------------------------------------------------------
# Forward pass (Pallas) and pure-JAX reference
# ----------------------------------------------------------------------------

def efficientnet_counter_forward(x_nchw, p):
    """x_nchw: (B, 3, H, W) float32 -> (B, 1) float32 (>= 0)."""
    x = jnp.transpose(x_nchw, (0, 2, 3, 1)).astype(jnp.float32)  # NCHW->NHWC
    B = x.shape[0]
    cols, Ho, Wo = im2col(x, 3, 3, stride=2, pad=1)              # (B*HW, 27)
    HW = Ho * Wo
    assert (Wo & (Wo - 1)) == 0, "fused kernel assumes W is a power of two"
    cols = cols.reshape(B, HW, -1).astype(jnp.bfloat16)

    bf = lambda w: w.astype(jnp.bfloat16)
    rb = lambda b: b.reshape(1, -1).astype(jnp.float32)

    # Fold classifier (C->1000) with counter fc (1000->1): two consecutive
    # linears with no activation in between -> one exact 128->1 linear.
    w_fold = (p["cls_w"] @ p["fc_w"]).reshape(1, -1).astype(jnp.float32)
    b_fold = (p["cls_b"] @ p["fc_w"] + p["fc_b"]).reshape(1, 1).astype(
        jnp.float32)

    weights = (
        bf(p["stem_w"]), rb(p["stem_b"]),
        bf(p["exp_w"]), rb(p["exp_b"]),
        p["dw_w"].astype(jnp.float32), rb(p["dw_b"]),
        bf(p["se1_w"]), rb(p["se1_b"]),
        bf(p["se2_w"]), rb(p["se2_b"]),
        bf(p["proj_w"]), rb(p["proj_b"]),
        bf(p["head_w"]), rb(p["head_b"]),
        w_fold, b_fold,
    )
    out = _fused_pallas_call(cols, weights, Ho, Wo)
    return out.reshape(B, 1)


def reference_forward(x_nchw, p):
    """Pure-JAX (XLA) reference mirroring the kernel math (bf16 matmuls)."""
    x = jnp.transpose(x_nchw, (0, 2, 3, 1)).astype(jnp.float32)
    B = x.shape[0]
    cols, Ho, Wo = im2col(x, 3, 3, 2, 1)
    bf16 = jnp.bfloat16

    def mm(a, w, b):
        return jnp.dot(a.astype(bf16), w.astype(bf16),
                       preferred_element_type=jnp.float32) + b

    silu = lambda t: t * jax.nn.sigmoid(t)

    h = silu(mm(cols, p["stem_w"], p["stem_b"]))                 # (B*HW, C)
    e = silu(mm(h, p["exp_w"], p["exp_b"]))
    e4 = e.reshape(B, Ho, Wo, -1)
    ep = jnp.pad(e4, ((0, 0), (1, 1), (1, 1), (0, 0)))
    acc = jnp.zeros_like(e4) + p["dw_b"].reshape(1, 1, 1, -1)
    for kh in range(3):
        for kw in range(3):
            acc = acc + (ep[:, kh:kh + Ho, kw:kw + Wo, :]
                         * p["dw_w"][kh * 3 + kw].reshape(1, 1, 1, -1))
    d = silu(acc).reshape(B, Ho * Wo, -1)
    sq = jnp.mean(d, axis=1)                                      # (B, C)
    s1 = silu(mm(sq, p["se1_w"], p["se1_b"]))
    s2 = jax.nn.sigmoid(mm(s1, p["se2_w"], p["se2_b"]))
    d = d * s2[:, None, :]
    pr = mm(d.reshape(B * Ho * Wo, -1), p["proj_w"], p["proj_b"])
    hd = silu(mm(pr, p["head_w"], p["head_b"]))
    feat = jnp.mean(hd.reshape(B, Ho * Wo, -1), axis=1)           # (B, C)
    logits = feat @ p["cls_w"] + p["cls_b"]                       # (B, 1000)
    out = logits @ p["fc_w"] + p["fc_b"]                          # (B, 1)
    return jnp.maximum(out, 0.0)


# ----------------------------------------------------------------------------
# Main
# ----------------------------------------------------------------------------

if __name__ == "__main__":
    key = jax.random.PRNGKey(0)
    kx, kp = jax.random.split(key)

    # PyTorch-style NCHW input at small shapes.
    x = jax.random.normal(kx, (2, 3, 32, 32), jnp.float32)
    params = init_params(kp)

    fwd = jax.jit(efficientnet_counter_forward)
    out = jax.block_until_ready(fwd(x, params))
    ref = jax.block_until_ready(jax.jit(reference_forward)(x, params))

    assert out.shape == (2, 1), out.shape
    assert out.dtype == jnp.float32
    assert bool(jnp.all(out >= 0.0)), "ReLU output must be non-negative"
    assert bool(jnp.all(jnp.isfinite(out)))
    assert bool(jnp.allclose(out, ref, rtol=2e-2, atol=2e-2)), (out, ref)
    print("KERNEL_OK")
</pallas_src>

<mosaic_0001>
module attributes {stable_mosaic.version = 11 : i64} {
  func.func @_fused_kernel(%arg0: i32, %arg1: memref<1x256x27xbf16, #tpu.memory_space<vmem>>, %arg2: memref<27x128xbf16, #tpu.memory_space<vmem>>, %arg3: memref<1x128xf32, #tpu.memory_space<vmem>>, %arg4: memref<128x128xbf16, #tpu.memory_space<vmem>>, %arg5: memref<1x128xf32, #tpu.memory_space<vmem>>, %arg6: memref<9x128xf32, #tpu.memory_space<vmem>>, %arg7: memref<1x128xf32, #tpu.memory_space<vmem>>, %arg8: memref<128x128xbf16, #tpu.memory_space<vmem>>, %arg9: memref<1x128xf32, #tpu.memory_space<vmem>>, %arg10: memref<128x128xbf16, #tpu.memory_space<vmem>>, %arg11: memref<1x128xf32, #tpu.memory_space<vmem>>, %arg12: memref<128x128xbf16, #tpu.memory_space<vmem>>, %arg13: memref<1x128xf32, #tpu.memory_space<vmem>>, %arg14: memref<128x128xbf16, #tpu.memory_space<vmem>>, %arg15: memref<1x128xf32, #tpu.memory_space<vmem>>, %arg16: memref<1x128xf32, #tpu.memory_space<vmem>>, %arg17: memref<1x1xf32, #tpu.memory_space<vmem>>, %arg18: memref<1x1x1xf32, #tpu.memory_space<vmem>>) attributes {dimension_semantics = [#tpu.dimension_semantics<parallel>], iteration_bounds = array<i64: 2>, scalar_prefetch = 0 : i64, scratch_operands = 0 : i64, tpu.core_type = #tpu.core_type<tc>, window_params = [{transform_indices = @transform_0, window_bounds = array<i64: 1, 256, 27>}, {pipeline_mode = #tpu.pipeline_mode<synchronous>, transform_indices = @transform_1, window_bounds = array<i64: 27, 128>}, {pipeline_mode = #tpu.pipeline_mode<synchronous>, transform_indices = @transform_2, window_bounds = array<i64: 1, 128>}, {pipeline_mode = #tpu.pipeline_mode<synchronous>, transform_indices = @transform_3, window_bounds = array<i64: 128, 128>}, {pipeline_mode = #tpu.pipeline_mode<synchronous>, transform_indices = @transform_4, window_bounds = array<i64: 1, 128>}, {pipeline_mode = #tpu.pipeline_mode<synchronous>, transform_indices = @transform_5, window_bounds = array<i64: 9, 128>}, {pipeline_mode = #tpu.pipeline_mode<synchronous>, transform_indices = @transform_6, window_bounds = array<i64: 1, 128>}, {pipeline_mode = #tpu.pipeline_mode<synchronous>, transform_indices = @transform_7, window_bounds = array<i64: 128, 128>}, {pipeline_mode = #tpu.pipeline_mode<synchronous>, transform_indices = @transform_8, window_bounds = array<i64: 1, 128>}, {pipeline_mode = #tpu.pipeline_mode<synchronous>, transform_indices = @transform_9, window_bounds = array<i64: 128, 128>}, {pipeline_mode = #tpu.pipeline_mode<synchronous>, transform_indices = @transform_10, window_bounds = array<i64: 1, 128>}, {pipeline_mode = #tpu.pipeline_mode<synchronous>, transform_indices = @transform_11, window_bounds = array<i64: 128, 128>}, {pipeline_mode = #tpu.pipeline_mode<synchronous>, transform_indices = @transform_12, window_bounds = array<i64: 1, 128>}, {pipeline_mode = #tpu.pipeline_mode<synchronous>, transform_indices = @transform_13, window_bounds = array<i64: 128, 128>}, {pipeline_mode = #tpu.pipeline_mode<synchronous>, transform_indices = @transform_14, window_bounds = array<i64: 1, 128>}, {pipeline_mode = #tpu.pipeline_mode<synchronous>, transform_indices = @transform_15, window_bounds = array<i64: 1, 128>}, {pipeline_mode = #tpu.pipeline_mode<synchronous>, transform_indices = @transform_16, window_bounds = array<i64: 1, 1>}, {transform_indices = @transform_17, window_bounds = array<i64: 1, 1, 1>}]} {
    %c0 = arith.constant 0 : index
    %c0_0 = arith.constant 0 : index
    %c0_1 = arith.constant 0 : index
    %0 = vector.load %arg1[%c0, %c0_0, %c0_1] : memref<1x256x27xbf16, #tpu.memory_space<vmem>>, vector<1x256x27xbf16>
    %1 = vector.shape_cast %0 : vector<1x256x27xbf16> to vector<256x27xbf16>
    %c0_2 = arith.constant 0 : index
    %c0_3 = arith.constant 0 : index
    %2 = vector.load %arg2[%c0_2, %c0_3] : memref<27x128xbf16, #tpu.memory_space<vmem>>, vector<27x128xbf16>
    %cst = arith.constant dense<0.000000e+00> : vector<256x128xf32>
    %3 = tpu.matmul %1, %2, %cst {dimension_numbers = #tpu.dot_dimension_numbers<[1], [0], [0], [1], [0, 0, 1, 1], [], []>} : vector<256x27xbf16>, vector<27x128xbf16>, vector<256x128xf32> -> vector<256x128xf32>
    %c0_4 = arith.constant 0 : index
    %c0_5 = arith.constant 0 : index
    %4 = vector.load %arg3[%c0_4, %c0_5] : memref<1x128xf32, #tpu.memory_space<vmem>>, vector<1x128xf32>
    %5 = vector.broadcast %4 : vector<1x128xf32> to vector<256x128xf32>
    %6 = arith.addf %3, %5 : vector<256x128xf32>
    %7 = arith.negf %6 : vector<256x128xf32>
    %8 = math.exp %7 : vector<256x128xf32>
    %cst_6 = arith.constant 1.000000e+00 : f32
    %9 = vector.broadcast %cst_6 : f32 to vector<256x128xf32>
    %10 = arith.addf %9, %8 : vector<256x128xf32>
    %11 = arith.divf %9, %10 : vector<256x128xf32>
    %12 = arith.mulf %6, %11 : vector<256x128xf32>
    %13 = arith.truncf %12 : vector<256x128xf32> to vector<256x128xbf16>
    %c0_7 = arith.constant 0 : index
    %c0_8 = arith.constant 0 : index
    %14 = vector.load %arg4[%c0_7, %c0_8] : memref<128x128xbf16, #tpu.memory_space<vmem>>, vector<128x128xbf16>
    %cst_9 = arith.constant dense<0.000000e+00> : vector<256x128xf32>
    %15 = tpu.matmul %13, %14, %cst_9 {dimension_numbers = #tpu.dot_dimension_numbers<[1], [0], [0], [1], [0, 0, 1, 1], [], []>} : vector<256x128xbf16>, vector<128x128xbf16>, vector<256x128xf32> -> vector<256x128xf32>
    %c0_10 = arith.constant 0 : index
    %c0_11 = arith.constant 0 : index
    %16 = vector.load %arg5[%c0_10, %c0_11] : memref<1x128xf32, #tpu.memory_space<vmem>>, vector<1x128xf32>
    %17 = vector.broadcast %16 : vector<1x128xf32> to vector<256x128xf32>
    %18 = arith.addf %15, %17 : vector<256x128xf32>
    %19 = arith.negf %18 : vector<256x128xf32>
    %20 = math.exp %19 : vector<256x128xf32>
    %cst_12 = arith.constant 1.000000e+00 : f32
    %21 = vector.broadcast %cst_12 : f32 to vector<256x128xf32>
    %22 = arith.addf %21, %20 : vector<256x128xf32>
    %23 = arith.divf %21, %22 : vector<256x128xf32>
    %24 = arith.mulf %18, %23 : vector<256x128xf32>
    %25 = tpu.iota {dimensions = array<i32: 0>} : vector<256x128xi32>
    %c15_i32 = arith.constant 15 : i32
    %26 = vector.broadcast %c15_i32 : i32 to vector<256x128xi32>
    %27 = arith.andi %25, %26 : vector<256x128xi32>
    %cst_13 = arith.constant 0.000000e+00 : f32
    %28 = vector.broadcast %cst_13 : f32 to vector<256x128xf32>
    %c0_14 = arith.constant 0 : index
    %c0_15 = arith.constant 0 : index
    %29 = vector.load %arg7[%c0_14, %c0_15] : memref<1x128xf32, #tpu.memory_space<vmem>>, vector<1x128xf32>
    %30 = vector.broadcast %29 : vector<1x128xf32> to vector<256x128xf32>
    %31 = arith.addf %28, %30 : vector<256x128xf32>
    %c0_16 = arith.constant 0 : index
    %c0_17 = arith.constant 0 : index
    %32 = vector.load %arg6[%c0_16, %c0_17] : memref<9x128xf32, #tpu.memory_space<vmem>>, vector<1x128xf32>
    %33 = vector.shape_cast %32 : vector<1x128xf32> to vector<128xf32>
    %34 = vector.shape_cast %33 : vector<128xf32> to vector<1x128xf32>
    %c17_i32 = arith.constant 17 : i32
    %35 = tpu.dynamic_rotate %24 by %c17_i32 dim 0 : vector<256x128xf32>, i32 -> vector<256x128xf32>
    %c16_i32 = arith.constant 16 : i32
    %36 = vector.broadcast %c16_i32 : i32 to vector<256x128xi32>
    %37 = arith.cmpi sge, %25, %36 : vector<256x128xi32>
    %c1_i32 = arith.constant 1 : i32
    %38 = vector.broadcast %c1_i32 : i32 to vector<256x128xi32>
    %39 = arith.cmpi sge, %27, %38 : vector<256x128xi32>
    %40 = arith.andi %37, %39 : vector<256x128xi1>
    %cst_18 = arith.constant 0.000000e+00 : f32
    %41 = vector.broadcast %cst_18 : f32 to vector<256x128xf32>
    %42 = arith.select %40, %35, %41 : vector<256x128xi1>, vector<256x128xf32>
    %43 = vector.broadcast %34 : vector<1x128xf32> to vector<256x128xf32>
    %44 = arith.mulf %42, %43 : vector<256x128xf32>
    %45 = arith.addf %31, %44 : vector<256x128xf32>
    %c1 = arith.constant 1 : index
    %c0_19 = arith.constant 0 : index
    %46 = vector.load %arg6[%c1, %c0_19] : memref<9x128xf32, #tpu.memory_space<vmem>>, vector<1x128xf32>
    %47 = vector.shape_cast %46 : vector<1x128xf32> to vector<128xf32>
    %48 = vector.shape_cast %47 : vector<128xf32> to vector<1x128xf32>
    %c16_i32_20 = arith.constant 16 : i32
    %49 = tpu.dynamic_rotate %24 by %c16_i32_20 dim 0 : vector<256x128xf32>, i32 -> vector<256x128xf32>
    %c16_i32_21 = arith.constant 16 : i32
    %50 = vector.broadcast %c16_i32_21 : i32 to vector<256x128xi32>
    %51 = arith.cmpi sge, %25, %50 : vector<256x128xi32>
    %cst_22 = arith.constant 0.000000e+00 : f32
    %52 = vector.broadcast %cst_22 : f32 to vector<256x128xf32>
    %53 = arith.select %51, %49, %52 : vector<256x128xi1>, vector<256x128xf32>
    %54 = vector.broadcast %48 : vector<1x128xf32> to vector<256x128xf32>
    %55 = arith.mulf %53, %54 : vector<256x128xf32>
    %56 = arith.addf %45, %55 : vector<256x128xf32>
    %c2 = arith.constant 2 : index
    %c0_23 = arith.constant 0 : index
    %57 = vector.load %arg6[%c2, %c0_23] : memref<9x128xf32, #tpu.memory_space<vmem>>, vector<1x128xf32>
    %58 = vector.shape_cast %57 : vector<1x128xf32> to vector<128xf32>
    %59 = vector.shape_cast %58 : vector<128xf32> to vector<1x128xf32>
    %c15_i32_24 = arith.constant 15 : i32
    %60 = tpu.dynamic_rotate %24 by %c15_i32_24 dim 0 : vector<256x128xf32>, i32 -> vector<256x128xf32>
    %c16_i32_25 = arith.constant 16 : i32
    %61 = vector.broadcast %c16_i32_25 : i32 to vector<256x128xi32>
    %62 = arith.cmpi sge, %25, %61 : vector<256x128xi32>
    %c15_i32_26 = arith.constant 15 : i32
    %63 = vector.broadcast %c15_i32_26 : i32 to vector<256x128xi32>
    %64 = arith.cmpi slt, %27, %63 : vector<256x128xi32>
    %65 = arith.andi %62, %64 : vector<256x128xi1>
    %cst_27 = arith.constant 0.000000e+00 : f32
    %66 = vector.broadcast %cst_27 : f32 to vector<256x128xf32>
    %67 = arith.select %65, %60, %66 : vector<256x128xi1>, vector<256x128xf32>
    %68 = vector.broadcast %59 : vector<1x128xf32> to vector<256x128xf32>
    %69 = arith.mulf %67, %68 : vector<256x128xf32>
    %70 = arith.addf %56, %69 : vector<256x128xf32>
    %c3 = arith.constant 3 : index
    %c0_28 = arith.constant 0 : index
    %71 = vector.load %arg6[%c3, %c0_28] : memref<9x128xf32, #tpu.memory_space<vmem>>, vector<1x128xf32>
    %72 = vector.shape_cast %71 : vector<1x128xf32> to vector<128xf32>
    %73 = vector.shape_cast %72 : vector<128xf32> to vector<1x128xf32>
    %c1_i32_29 = arith.constant 1 : i32
    %74 = tpu.dynamic_rotate %24 by %c1_i32_29 dim 0 : vector<256x128xf32>, i32 -> vector<256x128xf32>
    %c1_i32_30 = arith.constant 1 : i32
    %75 = vector.broadcast %c1_i32_30 : i32 to vector<256x128xi32>
    %76 = arith.cmpi sge, %27, %75 : vector<256x128xi32>
    %cst_31 = arith.constant 0.000000e+00 : f32
    %77 = vector.broadcast %cst_31 : f32 to vector<256x128xf32>
    %78 = arith.select %76, %74, %77 : vector<256x128xi1>, vector<256x128xf32>
    %79 = vector.broadcast %73 : vector<1x128xf32> to vector<256x128xf32>
    %80 = arith.mulf %78, %79 : vector<256x128xf32>
    %81 = arith.addf %70, %80 : vector<256x128xf32>
    %c4 = arith.constant 4 : index
    %c0_32 = arith.constant 0 : index
    %82 = vector.load %arg6[%c4, %c0_32] : memref<9x128xf32, #tpu.memory_space<vmem>>, vector<1x128xf32>
    %83 = vector.shape_cast %82 : vector<1x128xf32> to vector<128xf32>
    %84 = vector.shape_cast %83 : vector<128xf32> to vector<1x128xf32>
    %85 = vector.broadcast %84 : vector<1x128xf32> to vector<256x128xf32>
    %86 = arith.mulf %24, %85 : vector<256x128xf32>
    %87 = arith.addf %81, %86 : vector<256x128xf32>
    %c5 = arith.constant 5 : index
    %c0_33 = arith.constant 0 : index
    %88 = vector.load %arg6[%c5, %c0_33] : memref<9x128xf32, #tpu.memory_space<vmem>>, vector<1x128xf32>
    %89 = vector.shape_cast %88 : vector<1x128xf32> to vector<128xf32>
    %90 = vector.shape_cast %89 : vector<128xf32> to vector<1x128xf32>
    %c255_i32 = arith.constant 255 : i32
    %91 = tpu.dynamic_rotate %24 by %c255_i32 dim 0 : vector<256x128xf32>, i32 -> vector<256x128xf32>
    %c15_i32_34 = arith.constant 15 : i32
    %92 = vector.broadcast %c15_i32_34 : i32 to vector<256x128xi32>
    %93 = arith.cmpi slt, %27, %92 : vector<256x128xi32>
    %cst_35 = arith.constant 0.000000e+00 : f32
    %94 = vector.broadcast %cst_35 : f32 to vector<256x128xf32>
    %95 = arith.select %93, %91, %94 : vector<256x128xi1>, vector<256x128xf32>
    %96 = vector.broadcast %90 : vector<1x128xf32> to vector<256x128xf32>
    %97 = arith.mulf %95, %96 : vector<256x128xf32>
    %98 = arith.addf %87, %97 : vector<256x128xf32>
    %c6 = arith.constant 6 : index
    %c0_36 = arith.constant 0 : index
    %99 = vector.load %arg6[%c6, %c0_36] : memref<9x128xf32, #tpu.memory_space<vmem>>, vector<1x128xf32>
    %100 = vector.shape_cast %99 : vector<1x128xf32> to vector<128xf32>
    %101 = vector.shape_cast %100 : vector<128xf32> to vector<1x128xf32>
    %c241_i32 = arith.constant 241 : i32
    %102 = tpu.dynamic_rotate %24 by %c241_i32 dim 0 : vector<256x128xf32>, i32 -> vector<256x128xf32>
    %c240_i32 = arith.constant 240 : i32
    %103 = vector.broadcast %c240_i32 : i32 to vector<256x128xi32>
    %104 = arith.cmpi slt, %25, %103 : vector<256x128xi32>
    %c1_i32_37 = arith.constant 1 : i32
    %105 = vector.broadcast %c1_i32_37 : i32 to vector<256x128xi32>
    %106 = arith.cmpi sge, %27, %105 : vector<256x128xi32>
    %107 = arith.andi %104, %106 : vector<256x128xi1>
    %cst_38 = arith.constant 0.000000e+00 : f32
    %108 = vector.broadcast %cst_38 : f32 to vector<256x128xf32>
    %109 = arith.select %107, %102, %108 : vector<256x128xi1>, vector<256x128xf32>
    %110 = vector.broadcast %101 : vector<1x128xf32> to vector<256x128xf32>
    %111 = arith.mulf %109, %110 : vector<256x128xf32>
    %112 = arith.addf %98, %111 : vector<256x128xf32>
    %c7 = arith.constant 7 : index
    %c0_39 = arith.constant 0 : index
    %113 = vector.load %arg6[%c7, %c0_39] : memref<9x128xf32, #tpu.memory_space<vmem>>, vector<1x128xf32>
    %114 = vector.shape_cast %113 : vector<1x128xf32> to vector<128xf32>
    %115 = vector.shape_cast %114 : vector<128xf32> to vector<1x128xf32>
    %c240_i32_40 = arith.constant 240 : i32
    %116 = tpu.dynamic_rotate %24 by %c240_i32_40 dim 0 : vector<256x128xf32>, i32 -> vector<256x128xf32>
    %c240_i32_41 = arith.constant 240 : i32
    %117 = vector.broadcast %c240_i32_41 : i32 to vector<256x128xi32>
    %118 = arith.cmpi slt, %25, %117 : vector<256x128xi32>
    %cst_42 = arith.constant 0.000000e+00 : f32
    %119 = vector.broadcast %cst_42 : f32 to vector<256x128xf32>
    %120 = arith.select %118, %116, %119 : vector<256x128xi1>, vector<256x128xf32>
    %121 = vector.broadcast %115 : vector<1x128xf32> to vector<256x128xf32>
    %122 = arith.mulf %120, %121 : vector<256x128xf32>
    %123 = arith.addf %112, %122 : vector<256x128xf32>
    %c8 = arith.constant 8 : index
    %c0_43 = arith.constant 0 : index
    %124 = vector.load %arg6[%c8, %c0_43] : memref<9x128xf32, #tpu.memory_space<vmem>>, vector<1x128xf32>
    %125 = vector.shape_cast %124 : vector<1x128xf32> to vector<128xf32>
    %126 = vector.shape_cast %125 : vector<128xf32> to vector<1x128xf32>
    %c239_i32 = arith.constant 239 : i32
    %127 = tpu.dynamic_rotate %24 by %c239_i32 dim 0 : vector<256x128xf32>, i32 -> vector<256x128xf32>
    %c240_i32_44 = arith.constant 240 : i32
    %128 = vector.broadcast %c240_i32_44 : i32 to vector<256x128xi32>
    %129 = arith.cmpi slt, %25, %128 : vector<256x128xi32>
    %c15_i32_45 = arith.constant 15 : i32
    %130 = vector.broadcast %c15_i32_45 : i32 to vector<256x128xi32>
    %131 = arith.cmpi slt, %27, %130 : vector<256x128xi32>
    %132 = arith.andi %129, %131 : vector<256x128xi1>
    %cst_46 = arith.constant 0.000000e+00 : f32
    %133 = vector.broadcast %cst_46 : f32 to vector<256x128xf32>
    %134 = arith.select %132, %127, %133 : vector<256x128xi1>, vector<256x128xf32>
    %135 = vector.broadcast %126 : vector<1x128xf32> to vector<256x128xf32>
    %136 = arith.mulf %134, %135 : vector<256x128xf32>
    %137 = arith.addf %123, %136 : vector<256x128xf32>
    %138 = arith.negf %137 : vector<256x128xf32>
    %139 = math.exp %138 : vector<256x128xf32>
    %cst_47 = arith.constant 1.000000e+00 : f32
    %140 = vector.broadcast %cst_47 : f32 to vector<256x128xf32>
    %141 = arith.addf %140, %139 : vector<256x128xf32>
    %142 = arith.divf %140, %141 : vector<256x128xf32>
    %143 = arith.mulf %137, %142 : vector<256x128xf32>
    %cst_48 = arith.constant 1.000000e+00 : f32
    %144 = vector.broadcast %cst_48 : f32 to vector<8x256xf32>
    %cst_49 = arith.constant dense<0.000000e+00> : vector<8x128xf32>
    %145 = tpu.matmul %144, %143, %cst_49 {dimension_numbers = #tpu.dot_dimension_numbers<[1], [0], [0], [1], [0, 0, 1, 1], [], []>} : vector<8x256xf32>, vector<256x128xf32>, vector<8x128xf32> -> vector<8x128xf32>
    %cst_50 = arith.constant 3.906250e-03 : f32
    %146 = vector.broadcast %cst_50 : f32 to vector<8x128xf32>
    %147 = arith.mulf %145, %146 : vector<8x128xf32>
    %148 = arith.truncf %147 : vector<8x128xf32> to vector<8x128xbf16>
    %c0_51 = arith.constant 0 : index
    %c0_52 = arith.constant 0 : index
    %149 = vector.load %arg8[%c0_51, %c0_52] : memref<128x128xbf16, #tpu.memory_space<vmem>>, vector<128x128xbf16>
    %cst_53 = arith.constant dense<0.000000e+00> : vector<8x128xf32>
    %150 = tpu.matmul %148, %149, %cst_53 {dimension_numbers = #tpu.dot_dimension_numbers<[1], [0], [0], [1], [0, 0, 1, 1], [], []>} : vector<8x128xbf16>, vector<128x128xbf16>, vector<8x128xf32> -> vector<8x128xf32>
    %c0_54 = arith.constant 0 : index
    %c0_55 = arith.constant 0 : index
    %151 = vector.load %arg9[%c0_54, %c0_55] : memref<1x128xf32, #tpu.memory_space<vmem>>, vector<1x128xf32>
    %152 = vector.broadcast %151 : vector<1x128xf32> to vector<8x128xf32>
    %153 = arith.addf %150, %152 : vector<8x128xf32>
    %154 = arith.negf %153 : vector<8x128xf32>
    %155 = math.exp %154 : vector<8x128xf32>
    %cst_56 = arith.constant 1.000000e+00 : f32
    %156 = vector.broadcast %cst_56 : f32 to vector<8x128xf32>
    %157 = arith.addf %156, %155 : vector<8x128xf32>
    %158 = arith.divf %156, %157 : vector<8x128xf32>
    %159 = arith.mulf %153, %158 : vector<8x128xf32>
    %160 = arith.truncf %159 : vector<8x128xf32> to vector<8x128xbf16>
    %c0_57 = arith.constant 0 : index
    %c0_58 = arith.constant 0 : index
    %161 = vector.load %arg10[%c0_57, %c0_58] : memref<128x128xbf16, #tpu.memory_space<vmem>>, vector<128x128xbf16>
    %cst_59 = arith.constant dense<0.000000e+00> : vector<8x128xf32>
    %162 = tpu.matmul %160, %161, %cst_59 {dimension_numbers = #tpu.dot_dimension_numbers<[1], [0], [0], [1], [0, 0, 1, 1], [], []>} : vector<8x128xbf16>, vector<128x128xbf16>, vector<8x128xf32> -> vector<8x128xf32>
    %c0_60 = arith.constant 0 : index
    %c0_61 = arith.constant 0 : index
    %163 = vector.load %arg11[%c0_60, %c0_61] : memref<1x128xf32, #tpu.memory_space<vmem>>, vector<1x128xf32>
    %164 = vector.broadcast %163 : vector<1x128xf32> to vector<8x128xf32>
    %165 = arith.addf %162, %164 : vector<8x128xf32>
    %166 = arith.negf %165 : vector<8x128xf32>
    %167 = math.exp %166 : vector<8x128xf32>
    %cst_62 = arith.constant 1.000000e+00 : f32
    %168 = vector.broadcast %cst_62 : f32 to vector<8x128xf32>
    %169 = arith.addf %168, %167 : vector<8x128xf32>
    %170 = arith.divf %168, %169 : vector<8x128xf32>
    %171 = vector.extract_strided_slice %170 {offsets = [0, 0], sizes = [1, 128], strides = [1, 1]} : vector<8x128xf32> to vector<1x128xf32>
    %172 = vector.broadcast %171 : vector<1x128xf32> to vector<256x128xf32>
    %173 = arith.mulf %143, %172 : vector<256x128xf32>
    %174 = arith.truncf %173 : vector<256x128xf32> to vector<256x128xbf16>
    %c0_63 = arith.constant 0 : index
    %c0_64 = arith.constant 0 : index
    %175 = vector.load %arg12[%c0_63, %c0_64] : memref<128x128xbf16, #tpu.memory_space<vmem>>, vector<128x128xbf16>
    %cst_65 = arith.constant dense<0.000000e+00> : vector<256x128xf32>
    %176 = tpu.matmul %174, %175, %cst_65 {dimension_numbers = #tpu.dot_dimension_numbers<[1], [0], [0], [1], [0, 0, 1, 1], [], []>} : vector<256x128xbf16>, vector<128x128xbf16>, vector<256x128xf32> -> vector<256x128xf32>
    %c0_66 = arith.constant 0 : index
    %c0_67 = arith.constant 0 : index
    %177 = vector.load %arg13[%c0_66, %c0_67] : memref<1x128xf32, #tpu.memory_space<vmem>>, vector<1x128xf32>
    %178 = vector.broadcast %177 : vector<1x128xf32> to vector<256x128xf32>
    %179 = arith.addf %176, %178 : vector<256x128xf32>
    %180 = arith.truncf %179 : vector<256x128xf32> to vector<256x128xbf16>
    %c0_68 = arith.constant 0 : index
    %c0_69 = arith.constant 0 : index
    %181 = vector.load %arg14[%c0_68, %c0_69] : memref<128x128xbf16, #tpu.memory_space<vmem>>, vector<128x128xbf16>
    %cst_70 = arith.constant dense<0.000000e+00> : vector<256x128xf32>
    %182 = tpu.matmul %180, %181, %cst_70 {dimension_numbers = #tpu.dot_dimension_numbers<[1], [0], [0], [1], [0, 0, 1, 1], [], []>} : vector<256x128xbf16>, vector<128x128xbf16>, vector<256x128xf32> -> vector<256x128xf32>
    %c0_71 = arith.constant 0 : index
    %c0_72 = arith.constant 0 : index
    %183 = vector.load %arg15[%c0_71, %c0_72] : memref<1x128xf32, #tpu.memory_space<vmem>>, vector<1x128xf32>
    %184 = vector.broadcast %183 : vector<1x128xf32> to vector<256x128xf32>
    %185 = arith.addf %182, %184 : vector<256x128xf32>
    %186 = arith.negf %185 : vector<256x128xf32>
    %187 = math.exp %186 : vector<256x128xf32>
    %cst_73 = arith.constant 1.000000e+00 : f32
    %188 = vector.broadcast %cst_73 : f32 to vector<256x128xf32>
    %189 = arith.addf %188, %187 : vector<256x128xf32>
    %190 = arith.divf %188, %189 : vector<256x128xf32>
    %191 = arith.mulf %185, %190 : vector<256x128xf32>
    %cst_74 = arith.constant dense<0.000000e+00> : vector<8x128xf32>
    %192 = tpu.matmul %144, %191, %cst_74 {dimension_numbers = #tpu.dot_dimension_numbers<[1], [0], [0], [1], [0, 0, 1, 1], [], []>} : vector<8x256xf32>, vector<256x128xf32>, vector<8x128xf32> -> vector<8x128xf32>
    %cst_75 = arith.constant 3.906250e-03 : f32
    %193 = vector.broadcast %cst_75 : f32 to vector<8x128xf32>
    %194 = arith.mulf %192, %193 : vector<8x128xf32>
    %195 = vector.extract_strided_slice %194 {offsets = [0, 0], sizes = [1, 128], strides = [1, 1]} : vector<8x128xf32> to vector<1x128xf32>
    %c0_76 = arith.constant 0 : index
    %c0_77 = arith.constant 0 : index
    %196 = vector.load %arg16[%c0_76, %c0_77] : memref<1x128xf32, #tpu.memory_space<vmem>>, vector<1x128xf32>
    %197 = arith.mulf %195, %196 : vector<1x128xf32>
    %cst_78 = arith.constant dense<0.000000e+00> : vector<1xf32>
    %198 = vector.multi_reduction <add>, %197, %cst_78 [1] : vector<1x128xf32> to vector<1xf32>
    %199 = vector.shape_cast %198 : vector<1xf32> to vector<1x1xf32>
    %c0_79 = arith.constant 0 : index
    %c0_80 = arith.constant 0 : index
    %200 = vector.load %arg17[%c0_79, %c0_80] : memref<1x1xf32, #tpu.memory_space<vmem>>, vector<1x1xf32>
    %201 = arith.addf %199, %200 : vector<1x1xf32>
    %cst_81 = arith.constant 0.000000e+00 : f32
    %202 = vector.broadcast %cst_81 : f32 to vector<1x1xf32>
    %203 = arith.maximumf %201, %202 : vector<1x1xf32>
    %204 = vector.shape_cast %203 : vector<1x1xf32> to vector<1x1x1xf32>
    %c0_82 = arith.constant 0 : index
    %c0_83 = arith.constant 0 : index
    %c0_84 = arith.constant 0 : index
    %205 = vector.load %arg18[%c0_82, %c0_83, %c0_84] : memref<1x1x1xf32, #tpu.memory_space<vmem>>, vector<1x1x1xf32>
    tpu.vector_store %arg18[%c0_82, %c0_83, %c0_84], %204 {strides = array<i32>} : memref<1x1x1xf32, #tpu.memory_space<vmem>>, vector<1x1x1xf32>,
    return
  }
  func.func @transform_0(%arg0: i32) -> (i32, i32, i32) {
    %c0_i32 = arith.constant 0 : i32
    %c0_i32_0 = arith.constant 0 : i32
    %c0_i32_1 = arith.constant 0 : i32
    return %arg0, %c0_i32, %c0_i32_0 : i32, i32, i32
  }
  func.func @transform_1(%arg0: i32) -> (i32, i32) {
    %c0_i32 = arith.constant 0 : i32
    %c0_i32_0 = arith.constant 0 : i32
    %c0_i32_1 = arith.constant 0 : i32
    return %c0_i32, %c0_i32_0 : i32, i32
  }
  func.func @transform_2(%arg0: i32) -> (i32, i32) {
    %c0_i32 = arith.constant 0 : i32
    %c0_i32_0 = arith.constant 0 : i32
    %c0_i32_1 = arith.constant 0 : i32
    return %c0_i32, %c0_i32_0 : i32, i32
  }
  func.func @transform_3(%arg0: i32) -> (i32, i32) {
    %c0_i32 = arith.constant 0 : i32
    %c0_i32_0 = arith.constant 0 : i32
    %c0_i32_1 = arith.constant 0 : i32
    return %c0_i32, %c0_i32_0 : i32, i32
  }
  func.func @transform_4(%arg0: i32) -> (i32, i32) {
    %c0_i32 = arith.constant 0 : i32
    %c0_i32_0 = arith.constant 0 : i32
    %c0_i32_1 = arith.constant 0 : i32
    return %c0_i32, %c0_i32_0 : i32, i32
  }
  func.func @transform_5(%arg0: i32) -> (i32, i32) {
    %c0_i32 = arith.constant 0 : i32
    %c0_i32_0 = arith.constant 0 : i32
    %c0_i32_1 = arith.constant 0 : i32
    return %c0_i32, %c0_i32_0 : i32, i32
  }
  func.func @transform_6(%arg0: i32) -> (i32, i32) {
    %c0_i32 = arith.constant 0 : i32
    %c0_i32_0 = arith.constant 0 : i32
    %c0_i32_1 = arith.constant 0 : i32
    return %c0_i32, %c0_i32_0 : i32, i32
  }
  func.func @transform_7(%arg0: i32) -> (i32, i32) {
    %c0_i32 = arith.constant 0 : i32
    %c0_i32_0 = arith.constant 0 : i32
    %c0_i32_1 = arith.constant 0 : i32
    return %c0_i32, %c0_i32_0 : i32, i32
  }
  func.func @transform_8(%arg0: i32) -> (i32, i32) {
    %c0_i32 = arith.constant 0 : i32
    %c0_i32_0 = arith.constant 0 : i32
    %c0_i32_1 = arith.constant 0 : i32
    return %c0_i32, %c0_i32_0 : i32, i32
  }
  func.func @transform_9(%arg0: i32) -> (i32, i32) {
    %c0_i32 = arith.constant 0 : i32
    %c0_i32_0 = arith.constant 0 : i32
    %c0_i32_1 = arith.constant 0 : i32
    return %c0_i32, %c0_i32_0 : i32, i32
  }
  func.func @transform_10(%arg0: i32) -> (i32, i32) {
    %c0_i32 = arith.constant 0 : i32
    %c0_i32_0 = arith.constant 0 : i32
    %c0_i32_1 = arith.constant 0 : i32
    return %c0_i32, %c0_i32_0 : i32, i32
  }
  func.func @transform_11(%arg0: i32) -> (i32, i32) {
    %c0_i32 = arith.constant 0 : i32
    %c0_i32_0 = arith.constant 0 : i32
    %c0_i32_1 = arith.constant 0 : i32
    return %c0_i32, %c0_i32_0 : i32, i32
  }
  func.func @transform_12(%arg0: i32) -> (i32, i32) {
    %c0_i32 = arith.constant 0 : i32
    %c0_i32_0 = arith.constant 0 : i32
    %c0_i32_1 = arith.constant 0 : i32
    return %c0_i32, %c0_i32_0 : i32, i32
  }
  func.func @transform_13(%arg0: i32) -> (i32, i32) {
    %c0_i32 = arith.constant 0 : i32
    %c0_i32_0 = arith.constant 0 : i32
    %c0_i32_1 = arith.constant 0 : i32
    return %c0_i32, %c0_i32_0 : i32, i32
  }
  func.func @transform_14(%arg0: i32) -> (i32, i32) {
    %c0_i32 = arith.constant 0 : i32
    %c0_i32_0 = arith.constant 0 : i32
    %c0_i32_1 = arith.constant 0 : i32
    return %c0_i32, %c0_i32_0 : i32, i32
  }
  func.func @transform_15(%arg0: i32) -> (i32, i32) {
    %c0_i32 = arith.constant 0 : i32
    %c0_i32_0 = arith.constant 0 : i32
    %c0_i32_1 = arith.constant 0 : i32
    return %c0_i32, %c0_i32_0 : i32, i32
  }
  func.func @transform_16(%arg0: i32) -> (i32, i32) {
    %c0_i32 = arith.constant 0 : i32
    %c0_i32_0 = arith.constant 0 : i32
    %c0_i32_1 = arith.constant 0 : i32
    return %c0_i32, %c0_i32_0 : i32, i32
  }
  func.func @transform_17(%arg0: i32) -> (i32, i32, i32) {
    %c0_i32 = arith.constant 0 : i32
    %c0_i32_0 = arith.constant 0 : i32
    %c0_i32_1 = arith.constant 0 : i32
    return %arg0, %c0_i32, %c0_i32_0 : i32, i32, i32
  }
}

</mosaic_0001>

<bundles_post_ra>
// kernel: efficientnet_counter_forward.1
= control target key start
LH: loop header
LB: loop body
LE: loop exit
PB: predicated region body
PF: predicated region fallthrough
CT: control target
= control target key end

     0   :  { %s6713_s26 = smov 0   ;;  %s11860_s0 = inlined_call_operand.vmem [shape: bf16[2,256,27], index: 0, kind: input, shape index: {}]   ;;  %s11861_s1 = inlined_call_operand.vmem [shape: bf16[27,128], index: 1, kind: input, shape index: {}]   ;;  %s11862_s2 = inlined_call_operand.vmem [shape: f32[1,128], index: 2, kind: input, shape index: {}]   ;;  %s11863_s3 = inlined_call_operand.vmem [shape: bf16[128,128], index: 3, kind: input, shape index: {}]   ;;  %s11864_s4 = inlined_call_operand.vmem [shape: f32[1,128], index: 4, kind: input, shape index: {}]   ;;  %s11865_s5 = inlined_call_operand.vmem [shape: f32[9,128], index: 5, kind: input, shape index: {}]   ;;  %s11866_s6 = inlined_call_operand.vmem [shape: f32[1,128], index: 6, kind: input, shape index: {}]   ;;  %s11867_s7 = inlined_call_operand.vmem [shape: bf16[128,128], index: 7, kind: input, shape index: {}]   ;;  %s11868_s8 = inlined_call_operand.vmem [shape: f32[1,128], index: 8, kind: input, shape index: {}]   ;;  %s11869_s9 = inlined_call_operand.vmem [shape: bf16[128,128], index: 9, kind: input, shape index: {}]   ;;  %s11870_s10 = inlined_call_operand.vmem [shape: f32[1,128], index: 10, kind: input, shape index: {}]   ;;  %s11871_s11 = inlined_call_operand.vmem [shape: bf16[128,128], index: 11, kind: input, shape index: {}]   ;;  %s11872_s12 = inlined_call_operand.vmem [shape: f32[1,128], index: 12, kind: input, shape index: {}]   ;;  %s11873_s13 = inlined_call_operand.vmem [shape: bf16[128,128], index: 13, kind: input, shape index: {}]   ;;  %s11874_s14 = inlined_call_operand.vmem [shape: f32[1,128], index: 14, kind: input, shape index: {}]   ;;  %s11875_s15 = inlined_call_operand.vmem [shape: f32[1,128], index: 15, kind: input, shape index: {}]   ;;  %s11876_s16 = inlined_call_operand.<no memory space> [shape: f32[1,1], index: 16, kind: input, shape index: {}]   ;;  %s11877_s17 = inlined_call_operand.vmem [shape: f32[2,1,1], index: 17, kind: output, shape index: {}]  }
   0x1   :  { %12067 = sst [smem:[#allocation68_spill]] %s11860_s0  ;;  %v22_v0 = vstv %s11876_s16 }
   0x2   :  { %12068 = sst [smem:[#allocation69_spill]] %s11861_s1  ;;  %23 = vst [vmem:[#allocation2] sm:$0x1] %v22_v0 }
   0x3 LB: > { %s5585_s27 = sadd.s32 4294967295, %s6616_s26   ;;  %p5589_p0 = scmp.ge.s32.totalorder %s6616_s26, 1  ;;  %s6616_s26 = sphi %s6713_s26, %s29_s26  }
   0x4   : > { %p489_p1 = scmp.lt.s32.totalorder %s6616_s26, 3 }
   0x6   : > { %p490_p2 = pnand %p5589_p0, %p489_p1 }
   0x8   : > { %493 = sbr.rel (%p490_p2) target bundleno = 2286 (0x8ee), region = 88 }
   0xd   : > { %s12069_s0 = sld [smem:[#allocation69_spill]]  ;;  %vm728_vm0 = vcmask 1044480   ;;  %vm729_vm1 = vcmask 1045504   ;;  %p539_p3 = scmp.lt.s32.totalorder %s5585_s27, 1  ;;  %v6618_v4 = vmov 65535   ;;  %vm679_vm2 = vcmask 220160  }
   0xe   : > { %v730_v5 = vsel %vm728_vm0, 4294967295, %v6618_v4  ;;  %s12070_s22 = sld [smem:[#allocation68_spill]]  ;;  %v5998_v16 = vld [vmem:[%s11863_s3 + $0x38] sm:$0xff]  ;;  %v5997_v18 = vld [vmem:[%s11863_s3 + $0x30] sm:$0xff]  ;;  %v5996_v19 = vld [vmem:[%s11863_s3 + $0x28] sm:$0xff] }
   0xf   : > { %v731_v6 = vsel %vm729_vm1, %v730_v5, 0  ;;  %s12674_s27 = smov (!%p539_p3, %s5585_s27), 1  ;;  %1548 = vmatpush.bf16.msra.mxu1 %v5998_v16  ;;  %v5995_v20 = vld [vmem:[%s11863_s3 + $0x20] sm:$0xff]  ;;  %v5994_v21 = vld [vmem:[%s11863_s3 + $0x18] sm:$0xff]  ;;  %v5993_v24 = vld [vmem:[%s11863_s3 + $0x10] sm:$0xff] }
  0x10   : > { %s5972_s1 = sshll.u32 %s12674_s27, 7  ;;  %v6772_v22 = vld [vmem:[%s11862_s2] ss:$0 sm:$0xff]  ;;  %v5992_v28 = vld [vmem:[%s11863_s3 + $0x8] sm:$0xff]  ;;  %s546_s25 = scalar_lea.vmem %s11877_s17, %s12674_s27 }
  0x11   : > { %v5991_v29 = vld [vmem:[%s11863_s3] sm:$0xff] }
  0x13   : > { %v5662_v1 = vld [vmem:[%s12069_s0 + $0x8] sm:$0xf]  ;;  %v5990_v2 = vld [vmem:[%s12069_s0 + $0x8] sm:$0x30]  ;;  %v5989_v8 = vld [vmem:[%s12069_s0] sm:$0xff]  ;;  %1549 = vmatpush.bf16.msra.mxu1 %v5997_v18 }
  0x14   : > { %v5663_v3 = vor.u32 %v5990_v2, %v5662_v1  ;;  %s6736_s23 = scalar_lea.vmem %s12070_s22, %s5972_s1 }
  0x15   : > { %v5973_v9 = vld [vmem:[%s6736_s23] sm:$0xff]  ;;  %v5974_v10 = vld [vmem:[%s6736_s23 + $0x8] sm:$0xff]  ;;  %v5975_v11 = vld [vmem:[%s6736_s23 + $0x10] sm:$0xff] }
  0x16   : > { %v733_v7 = vand.u32 %v5663_v3, %v731_v6  ;;  %v5976_v12 = vld [vmem:[%s6736_s23 + $0x18] sm:$0xff]  ;;  %v5977_v13 = vld [vmem:[%s6736_s23 + $0x20] sm:$0xff]  ;;  %v5978_v14 = vld [vmem:[%s6736_s23 + $0x28] sm:$0xff] }
  0x17   : > { %v5979_v15 = vld [vmem:[%s6736_s23 + $0x30] sm:$0xff]  ;;  %v5980_v17 = vld [vmem:[%s6736_s23 + $0x38] sm:$0xff]  ;;  %1550 = vmatpush.bf16.msra.mxu1 %v5996_v19  ;;  %v5981_v23 = vld [vmem:[%s6736_s23 + $0x40] sm:$0xff] }
  0x18   : > { %741 = vmatpush.bf16.msra.mxu0 %v733_v7  ;;  %v5982_v35 = vld [vmem:[%s6736_s23 + $0x48] sm:$0xff]  ;;  %v5983_v55 = vld [vmem:[%s6736_s23 + $0x50] sm:$0xff] }
  0x1b   : > { %1551 = vmatpush.bf16.msra.mxu1 %v5995_v20 }
  0x1c   : > { %742 = vmatpush.bf16.msra.mxu0 %v5989_v8 }
  0x1f   : > { %5664 = vmatmul.msk.bf16.vlgmr.msra.gmra.mxu0 %vm679_vm2, %v5973_v9  ;;  %1552 = vmatpush.bf16.msra.mxu1 %v5994_v21 }
  0x23   : > { %1553 = vmatpush.bf16.msra.mxu1 %v5993_v24 }
  0x27   : > { %1554 = vmatpush.bf16.msra.mxu1 %v5992_v28 }
  0x2b   : > { %1555 = vmatpush.bf16.msra.mxu1 %v5991_v29 }
  0x2f   : > { %5665 = vmatmul.msk.bf16.gmra.mxu0 %vm679_vm2, %v5974_v10 }
  0x3f   : > { %5666 = vmatmul.msk.bf16.gmra.mxu0 %vm679_vm2, %v5975_v11 }
  0x4f   : > { %5667 = vmatmul.msk.bf16.gmra.mxu0 %vm679_vm2, %v5976_v12 }
  0x5f   : > { %5668 = vmatmul.msk.bf16.gmra.mxu0 %vm679_vm2, %v5977_v13 }
  0x6f   : > { %5669 = vmatmul.msk.bf16.gmra.mxu0 %vm679_vm2, %v5978_v14 }
  0x7f   : > { %5670 = vmatmul.msk.bf16.gmra.mxu0 %vm679_vm2, %v5979_v15 }
  0x8f   : > { %5671 = vmatmul.msk.bf16.gmra.mxu0 %vm679_vm2, %v5980_v17 }
  0x9c   : > { %v744_v25 = vpop.f32.mrf.mxu0 }
  0x9d   : > { %v6779_v26 = vadd.f32 %v6772_v22, %v744_v25 }
  0x9f   : > { %v5680_v27 = vmul.f32 -1.442695, %v6779_v26  ;;  %5672 = vmatmul.msk.bf16.gmra.mxu0 %vm679_vm2, %v5981_v23 }
  0xa1   : > { %6057 = vpow2.f32 %v5680_v27  ;;  %v5984_v27 = vld [vmem:[%s6736_s23 + $0x58] sm:$0xff] }
  0xa4   : > { %v746_v30 = vpop.f32.mrf.mxu0 }
  0xa5   : > { %v6790_v31 = vadd.f32 %v6772_v22, %v746_v30 }
  0xa7   : > { %v6058_v32 = vpop.eup %6057  ;;  %v5681_v33 = vmul.f32 -1.442695, %v6790_v31 }
  0xa8   : > { %v920_v34 = vadd.f32 1.0, %v6058_v32 }
  0xa9   : > { %6059 = vpow2.f32 %v5681_v33 }
  0xaa   : > { %6061 = vrcp.f32 %v920_v34  ;;  %v963_v53 = vand.u32 2147483648, %v920_v34  ;;  %vm957_vm4 = vweird.f32 %v920_v34  ;;  %v961_v54 = vand.u32 2147483647, %v920_v34 }
  0xac   : > { %v749_v36 = vpop.f32.mrf.mxu0  ;;  %v964_v0 = vor.u32 1.1754944e-38, %v963_v53  ;;  %vm962_vm7 = vcmp.eq.f32.partialorder %v961_v54, 8.507059e+37 }
  0xad   : > { %v6795_v37 = vadd.f32 %v6772_v22, %v749_v36 }
  0xaf   : > { %v6060_v38 = vpop.eup %6059  ;;  %v5682_v39 = vmul.f32 -1.442695, %v6795_v37  ;;  %5673 = vmatmul.msk.bf16.gmra.mxu0 %vm679_vm2, %v5982_v35 }
  0xb0   : > { %v6062_v40 = vpop.eup %6061  ;;  %v921_v41 = vadd.f32 1.0, %v6060_v38 }
  0xb1   : > { %v953_v42 = vmul.f32 %v6062_v40, %v920_v34  ;;  %6063 = vpow2.f32 %v5682_v39  ;;  %vm958_vm3 = vweird.f32 %v6062_v40 }
  0xb2   : > { %6065 = vrcp.f32 %v921_v41  ;;  %vm6807_vm5 = vmor %vm957_vm4, %vm958_vm3  ;;  %v976_v59 = vand.u32 2147483647, %v921_v41  ;;  %v978_v60 = vand.u32 2147483648, %v921_v41  ;;  %vm972_vm8 = vweird.f32 %v921_v41 }
  0xb3   : > { %v954_v43 = vsub.f32 1.0, %v953_v42 }
  0xb4   : > { %v751_v44 = vpop.f32.mrf.mxu0  ;;  %v979_v7 = vor.u32 1.1754944e-38, %v978_v60  ;;  %vm977_vm10 = vcmp.eq.f32.partialorder %v976_v59, 8.507059e+37 }
  0xb5   : > { %v955_v45 = vmul.f32 %v6062_v40, %v954_v43  ;;  %v6800_v46 = vadd.f32 %v6772_v22, %v751_v44 }
  0xb7   : > { %v6064_v47 = vpop.eup %6063  ;;  %v5683_v48 = vmul.f32 -1.442695, %v6800_v46  ;;  %v956_v51 = vadd.f32 %v6062_v40, %v955_v45 }
  0xb8   : > { %v6066_v49 = vpop.eup %6065  ;;  %v6803_v50 = vadd.f32 1.0, %v6064_v47 }
  0xb9   : > { %6067 = vpow2.f32 %v5683_v48  ;;  %v968_v52 = vmul.f32 %v6066_v49, %v921_v41  ;;  %v960_v61 = vsel %vm6807_vm5, %v6062_v40, %v956_v51  ;;  %vm973_vm6 = vweird.f32 %v6066_v49 }
  0xba   : > { %6069 = vrcp.f32 %v6803_v50  ;;  %v965_v5 = vsel %vm962_vm7, %v964_v0, %v960_v61  ;;  %vm974_vm9 = vmor %vm972_vm8, %vm973_vm6  ;;  %v993_v25 = vand.u32 2147483648, %v6803_v50  ;;  %vm987_vm12 = vweird.f32 %v6803_v50 }
  0xbb   : > { %v969_v56 = vsub.f32 1.0, %v968_v52  ;;  %v1432_v11 = vmul.f32 %v965_v5, %v6779_v26  ;;  %v991_v26 = vand.u32 2147483647, %v6803_v50 }
  0xbc   : > { %v754_v58 = vpop.f32.mrf.mxu0  ;;  %v994_v36 = vor.u32 1.1754944e-38, %v993_v25 }
  0xbd   : > { %v6814_v62 = vadd.f32 %v6772_v22, %v754_v58  ;;  %v970_v63 = vmul.f32 %v6066_v49, %v969_v56  ;;  %vm992_vm15 = vcmp.eq.f32.partialorder %v991_v26, 8.507059e+37 }
  0xbf   : > { %v6068_v1 = vpop.eup %6067  ;;  %v5684_v2 = vmul.f32 -1.442695, %v6814_v62  ;;  %5674 = vmatmul.msk.bf16.gmra.mxu0 %vm679_vm2, %v5983_v55  ;;  %v971_v3 = vadd.f32 %v6066_v49, %v970_v63  ;;  %v5985_v63 = vld [vmem:[%s6736_s23 + $0x60] sm:$0xff] }
  0xc0   : > { %v6070_v4 = vpop.eup %6069  ;;  %v923_v6 = vadd.f32 1.0, %v6068_v1 }
  0xc1   : > { %v983_v8 = vmul.f32 %v6070_v4, %v6803_v50  ;;  %6071 = vpow2.f32 %v5684_v2  ;;  %v975_v9 = vsel %vm974_vm9, %v6066_v49, %v971_v3  ;;  %vm988_vm11 = vweird.f32 %v6070_v4 }
  0xc2   : > { %6073 = vrcp.f32 %v923_v6  ;;  %v980_v10 = vsel %vm977_vm10, %v979_v7, %v975_v9  ;;  %vm6832_vm13 = vmor %vm987_vm12, %vm988_vm11  ;;  %v1008_v32 = vand.u32 2147483648, %v923_v6  ;;  %vm1002_vm0 = vweird.f32 %v923_v6 }
  0xc3   : > { %v984_v12 = vsub.f32 1.0, %v983_v8  ;;  %v1433_v13 = vmul.f32 %v980_v10, %v6790_v31  ;;  %v1006_v31 = vand.u32 2147483647, %v923_v6 }
  0xc4   : > { %v756_v14 = vpop.f32.mrf.mxu0  ;;  %v1009_v44 = vor.u32 1.1754944e-38, %v1008_v32 }
  0xc5   : > { %v985_v15 = vmul.f32 %v6070_v4, %v984_v12  ;;  %v6822_v16 = vadd.f32 %v6772_v22, %v756_v14  ;;  %v1464_v17 = vpack.c.bf16 %v1433_v13, %v1432_v11  ;;  %vm1007_vm3 = vcmp.eq.f32.partialorder %v1006_v31, 8.507059e+37 }
  0xc7   : > { %v6072_v18 = vpop.eup %6071  ;;  %v5685_v19 = vmul.f32 -1.442695, %v6822_v16  ;;  %1556 = vmatmul.bf16.vlgmr.msra.gmra.mxu1 %v1464_v17  ;;  %v986_v23 = vadd.f32 %v6070_v4, %v985_v15 }
  0xc8   : > { %v6074_v20 = vpop.eup %6073  ;;  %v6825_v21 = vadd.f32 1.0, %v6072_v18 }
  0xc9   : > { %6075 = vpow2.f32 %v5685_v19  ;;  %v998_v24 = vmul.f32 %v6074_v20, %v923_v6  ;;  %v990_v33 = vsel %vm6832_vm13, %v6070_v4, %v986_v23  ;;  %vm1003_vm14 = vweird.f32 %v6074_v20 }
  0xca   : > { %6077 = vrcp.f32 %v6825_v21  ;;  %v995_v42 = vsel %vm992_vm15, %v994_v36, %v990_v33  ;;  %vm1004_vm1 = vmor %vm1002_vm0, %vm1003_vm14  ;;  %vm1017_vm5 = vweird.f32 %v6825_v21  ;;  %v1021_v61 = vand.u32 2147483647, %v6825_v21 }
  0xcb   : > { %v999_v28 = vsub.f32 1.0, %v998_v24  ;;  %v1434_v49 = vmul.f32 %v995_v42, %v6795_v37 }
  0xcc   : > { %v759_v30 = vpop.f32.mrf.mxu0  ;;  %vm1022_vm8 = vcmp.eq.f32.partialorder %v1021_v61, 8.507059e+37 }
  0xcd   : > { %v6839_v34 = vadd.f32 %v6772_v22, %v759_v30  ;;  %v1000_v35 = vmul.f32 %v6074_v20, %v999_v28 }
  0xcf   : > { %v6076_v38 = vpop.eup %6075  ;;  %v5686_v39 = vmul.f32 -1.442695, %v6839_v34  ;;  %5675 = vmatmul.msk.bf16.gmra.mxu0 %vm679_vm2, %v5984_v27  ;;  %v1001_v40 = vadd.f32 %v6074_v20, %v1000_v35  ;;  %v5986_v35 = vld [vmem:[%s6736_s23 + $0x68] sm:$0xff] }
  0xd0   : > { %v6078_v41 = vpop.eup %6077  ;;  %v925_v43 = vadd.f32 1.0, %v6076_v38 }
  0xd1   : > { %v1013_v45 = vmul.f32 %v6078_v41, %v6825_v21  ;;  %6079 = vpow2.f32 %v5686_v39  ;;  %v1005_v47 = vsel %vm1004_vm1, %v6074_v20, %v1001_v40  ;;  %vm1018_vm4 = vweird.f32 %v6078_v41 }
  0xd2   : > { %6081 = vrcp.f32 %v925_v43  ;;  %v1010_v48 = vsel %vm1007_vm3, %v1009_v44, %v1005_v47  ;;  %vm6857_vm6 = vmor %vm1017_vm5, %vm1018_vm4  ;;  %v1036_v3 = vand.u32 2147483647, %v925_v43  ;;  %v1038_v4 = vand.u32 2147483648, %v925_v43 }
  0xd3   : > { %v1014_v50 = vsub.f32 1.0, %v1013_v45  ;;  %v1435_v51 = vmul.f32 %v1010_v48, %v6800_v46  ;;  %v1023_v46 = vand.u32 2147483648, %v6825_v21  ;;  %vm1032_vm9 = vweird.f32 %v925_v43 }
  0xd4   : > { %v761_v52 = vpop.f32.mrf.mxu0  ;;  %v1039_v15 = vor.u32 1.1754944e-38, %v1038_v4  ;;  %vm1037_vm11 = vcmp.eq.f32.partialorder %v1036_v3, 8.507059e+37 }
  0xd5   : > { %v1015_v53 = vmul.f32 %v6078_v41, %v1014_v50  ;;  %v6847_v54 = vadd.f32 %v6772_v22, %v761_v52  ;;  %v1465_v55 = vpack.c.bf16 %v1435_v51, %v1434_v49  ;;  %v1024_v8 = vor.u32 1.1754944e-38, %v1023_v46 }
  0xd7   : > { %v6080_v56 = vpop.eup %6079  ;;  %v5687_v57 = vmul.f32 -1.442695, %v6847_v54  ;;  %1561 = vmatmul.bf16.gmra.mxu1 %v1465_v55  ;;  %v1016_v60 = vadd.f32 %v6078_v41, %v1015_v53 }
  0xd8   : > { %v6082_v58 = vpop.eup %6081  ;;  %v6850_v59 = vadd.f32 1.0, %v6080_v56 }
  0xd9   : > { %6083 = vpow2.f32 %v5687_v57  ;;  %v1028_v37 = vmul.f32 %v6082_v58, %v925_v43  ;;  %v1020_v5 = vsel %vm6857_vm6, %v6078_v41, %v1016_v60  ;;  %vm1033_vm7 = vweird.f32 %v6082_v58 }
  0xda   : > { %6085 = vrcp.f32 %v6850_v59  ;;  %v1025_v13 = vsel %vm1022_vm8, %v1024_v8, %v1020_v5  ;;  %vm1034_vm10 = vmor %vm1032_vm9, %vm1033_vm7  ;;  %vm1047_vm13 = vweird.f32 %v6850_v59  ;;  %v1051_v33 = vand.u32 2147483647, %v6850_v59 }
  0xdb   : > { %v1029_v0 = vsub.f32 1.0, %v1028_v37  ;;  %v1436_v20 = vmul.f32 %v1025_v13, %v6814_v62 }
  0xdc   : > { %v764_v2 = vpop.f32.mrf.mxu0  ;;  %vm1052_vm0 = vcmp.eq.f32.partialorder %v1051_v33, 8.507059e+37 }
  0xdd   : > { %v6864_v6 = vadd.f32 %v6772_v22, %v764_v2  ;;  %v1030_v7 = vmul.f32 %v6082_v58, %v1029_v0 }
  0xdf   : > { %v6084_v9 = vpop.eup %6083  ;;  %v5688_v10 = vmul.f32 -1.442695, %v6864_v6  ;;  %5676 = vmatmul.msk.bf16.gmra.mxu0 %vm679_vm2, %v5985_v63  ;;  %v1031_v11 = vadd.f32 %v6082_v58, %v1030_v7 }
  0xe0   : > { %v6086_v12 = vpop.eup %6085  ;;  %v927_v14 = vadd.f32 1.0, %v6084_v9 }
  0xe1   : > { %v1043_v17 = vmul.f32 %v6086_v12, %v6850_v59  ;;  %6087 = vpow2.f32 %v5688_v10  ;;  %v1035_v18 = vsel %vm1034_vm10, %v6082_v58, %v1031_v11  ;;  %vm1048_vm12 = vweird.f32 %v6086_v12 }
  0xe2   : > { %6089 = vrcp.f32 %v927_v14  ;;  %v1040_v19 = vsel %vm1037_vm11, %v1039_v15, %v1035_v18  ;;  %vm6882_vm14 = vmor %vm1047_vm13, %vm1048_vm12  ;;  %v1066_v40 = vand.u32 2147483647, %v927_v14  ;;  %v1068_v41 = vand.u32 2147483648, %v927_v14 }
  0xe3   : > { %v1044_v21 = vsub.f32 1.0, %v1043_v17  ;;  %v1437_v23 = vmul.f32 %v1040_v19, %v6822_v16  ;;  %v1053_v16 = vand.u32 2147483648, %v6850_v59  ;;  %vm1062_vm1 = vweird.f32 %v927_v14 }
  0xe4   : > { %v766_v24 = vpop.f32.mrf.mxu0  ;;  %v1069_v53 = vor.u32 1.1754944e-38, %v1068_v41  ;;  %vm1067_vm4 = vcmp.eq.f32.partialorder %v1066_v40, 8.507059e+37 }
  0xe5   : > { %v1045_v25 = vmul.f32 %v6086_v12, %v1044_v21  ;;  %v6872_v26 = vadd.f32 %v6772_v22, %v766_v24  ;;  %v1466_v27 = vpack.c.bf16 %v1437_v23, %v1436_v20  ;;  %v1054_v45 = vor.u32 1.1754944e-38, %v1053_v16 }
  0xe7   : > { %v6088_v28 = vpop.eup %6087  ;;  %v5689_v29 = vmul.f32 -1.442695, %v6872_v26  ;;  %1566 = vmatmul.bf16.gmra.mxu1 %v1466_v27  ;;  %v1046_v32 = vadd.f32 %v6086_v12, %v1045_v25 }
  0xe8   : > { %v6090_v30 = vpop.eup %6089  ;;  %v6875_v31 = vadd.f32 1.0, %v6088_v28 }
  0xe9   : > { %6091 = vpow2.f32 %v5689_v29  ;;  %v1058_v62 = vmul.f32 %v6090_v30, %v927_v14  ;;  %v1050_v42 = vsel %vm6882_vm14, %v6086_v12, %v1046_v32  ;;  %vm1063_vm15 = vweird.f32 %v6090_v30 }
  0xea   : > { %6093 = vrcp.f32 %v6875_v31  ;;  %v1055_v51 = vsel %vm1052_vm0, %v1054_v45, %v1050_v42  ;;  %vm1064_vm3 = vmor %vm1062_vm1, %vm1063_vm15  ;;  %v1083_v5 = vand.u32 2147483648, %v6875_v31  ;;  %vm1077_vm6 = vweird.f32 %v6875_v31  ;;  %v5988_v45 = vld [vmem:[%s6736_s23 + $0x78] sm:$0xff] }
  0xeb   : > { %v1059_v36 = vsub.f32 1.0, %v1058_v62  ;;  %v1438_v58 = vmul.f32 %v1055_v51, %v6839_v34  ;;  %v1081_v9 = vand.u32 2147483647, %v6875_v31 }
  0xec   : > { %v769_v39 = vpop.f32.mrf.mxu0  ;;  %v1084_v19 = vor.u32 1.1754944e-38, %v1083_v5 }
  0xed   : > { %v6889_v43 = vadd.f32 %v6772_v22, %v769_v39  ;;  %v1060_v44 = vmul.f32 %v6090_v30, %v1059_v36  ;;  %vm1082_vm10 = vcmp.eq.f32.partialorder %v1081_v9, 8.507059e+37 }
  0xef   : > { %v6092_v47 = vpop.eup %6091  ;;  %v5690_v48 = vmul.f32 -1.442695, %v6889_v43  ;;  %5677 = vmatmul.msk.bf16.gmra.mxu0 %vm679_vm2, %v5986_v35  ;;  %v1061_v49 = vadd.f32 %v6090_v30, %v1060_v44 }
  0xf0   : > { %v6094_v50 = vpop.eup %6093  ;;  %v929_v52 = vadd.f32 1.0, %v6092_v47 }
  0xf1   : > { %6095 = vpow2.f32 %v5690_v48  ;;  %v1065_v55 = vsel %vm1064_vm3, %v6090_v30, %v1061_v49  ;;  %v1073_v56 = vmul.f32 %v6094_v50, %v6875_v31  ;;  %vm1078_vm5 = vweird.f32 %v6094_v50 }
  0xf2   : > { %6097 = vrcp.f32 %v929_v52  ;;  %v1070_v57 = vsel %vm1067_vm4, %v1069_v53, %v1065_v55  ;;  %v1098_v10 = vand.u32 2147483648, %v929_v52  ;;  %vm6910_vm7 = vmor %vm1077_vm6, %vm1078_vm5  ;;  %v1096_v15 = vand.u32 2147483647, %v929_v52 }
  0xf3   : > { %v1439_v59 = vmul.f32 %v1070_v57, %v6847_v54  ;;  %v1074_v60 = vsub.f32 1.0, %v1073_v56  ;;  %v5987_v54 = vld [vmem:[%s6736_s23 + $0x70] sm:$0xff]  ;;  %vm1092_vm9 = vweird.f32 %v929_v52 }
  0xf4   : > { %v771_v37 = vpop.f32.mrf.mxu0  ;;  %v1099_v24 = vor.u32 1.1754944e-38, %v1098_v10  ;;  %vm1097_vm12 = vcmp.eq.f32.partialorder %v1096_v15, 8.507059e+37 }
  0xf5   : > { %v6897_v46 = vadd.f32 %v6772_v22, %v771_v37  ;;  %v1467_v61 = vpack.c.bf16 %v1439_v59, %v1438_v58  ;;  %v1075_v63 = vmul.f32 %v6094_v50, %v1074_v60 }
  0xf7   : > { %v6096_v0 = vpop.eup %6095  ;;  %v5691_v1 = vmul.f32 -1.442695, %v6897_v46  ;;  %1571 = vmatmul.bf16.gmra.mxu1 %v1467_v61  ;;  %v1076_v34 = vadd.f32 %v6094_v50, %v1075_v63 }
  0xf8   : > { %v6098_v2 = vpop.eup %6097  ;;  %v6900_v3 = vadd.f32 1.0, %v6096_v0 }
  0xf9   : > { %6099 = vpow2.f32 %v5691_v1  ;;  %v1088_v4 = vmul.f32 %v6098_v2, %v929_v52  ;;  %vm1093_vm8 = vweird.f32 %v6098_v2  ;;  %v1080_v14 = vsel %vm6910_vm7, %v6094_v50, %v1076_v34 }
  0xfa   : > { %6101 = vrcp.f32 %v6900_v3  ;;  %vm1094_vm11 = vmor %vm1092_vm9, %vm1093_vm8  ;;  %v1085_v27 = vsel %vm1082_vm10, %v1084_v19, %v1080_v14  ;;  %vm1107_vm14 = vweird.f32 %v6900_v3 }
  0xfb   : > { %v1089_v7 = vsub.f32 1.0, %v1088_v4  ;;  %v1440_v32 = vmul.f32 %v1085_v27, %v6864_v6  ;;  %v1113_v6 = vand.u32 2147483648, %v6900_v3 }
  0xfc   : > { %v774_v8 = vpop.f32.mrf.mxu0 }
  0xfd   : > { %v6908_v11 = vadd.f32 %v6772_v22, %v774_v8  ;;  %v1090_v13 = vmul.f32 %v6098_v2, %v1089_v7  ;;  %v1114_v55 = vor.u32 1.1754944e-38, %v1113_v6 }
  0xff   : > { %v6100_v17 = vpop.eup %6099  ;;  %v5692_v18 = vmul.f32 -1.442695, %v6908_v11  ;;  %5678 = vmatmul.msk.bf16.gmra.mxu0 %vm679_vm2, %v5987_v54  ;;  %v1091_v20 = vadd.f32 %v6098_v2, %v1090_v13 }
 0x100   : > { %v6102_v21 = vpop.eup %6101  ;;  %v931_v23 = vadd.f32 1.0, %v6100_v17 }
 0x101   : > { %v1103_v25 = vmul.f32 %v6102_v21, %v6900_v3  ;;  %6103 = vpow2.f32 %v5692_v18  ;;  %v1095_v28 = vsel %vm1094_vm11, %v6098_v2, %v1091_v20  ;;  %vm1108_vm13 = vweird.f32 %v6102_v21 }
 0x102   : > { %6105 = vrcp.f32 %v931_v23  ;;  %v1100_v30 = vsel %vm1097_vm12, %v1099_v24, %v1095_v28  ;;  %vm6932_vm15 = vmor %vm1107_vm14, %vm1108_vm13  ;;  %v1126_v48 = vand.u32 2147483647, %v931_v23  ;;  %v1128_v49 = vand.u32 2147483648, %v931_v23 }
 0x103   : > { %v1104_v29 = vsub.f32 1.0, %v1103_v25  ;;  %v1441_v62 = vmul.f32 %v1100_v30, %v6872_v26  ;;  %v1111_v26 = vand.u32 2147483647, %v6900_v3  ;;  %vm1122_vm3 = vweird.f32 %v931_v23 }
 0x104   : > { %v776_v31 = vpop.f32.mrf.mxu0  ;;  %v1129_v37 = vor.u32 1.1754944e-38, %v1128_v49  ;;  %vm1127_vm5 = vcmp.eq.f32.partialorder %v1126_v48, 8.507059e+37 }
 0x105   : > { %v1105_v16 = vmul.f32 %v6102_v21, %v1104_v29  ;;  %v6922_v33 = vadd.f32 %v6772_v22, %v776_v31  ;;  %v1468_v35 = vpack.c.bf16 %v1441_v62, %v1440_v32  ;;  %vm1112_vm1 = vcmp.eq.f32.partialorder %v1111_v26, 8.507059e+37 }
 0x107   : > { %v6104_v36 = vpop.eup %6103  ;;  %v5693_v38 = vmul.f32 -1.442695, %v6922_v33  ;;  %1576 = vmatmul.bf16.gmra.mxu1 %v1468_v35  ;;  %v1106_v41 = vadd.f32 %v6102_v21, %v1105_v16 }
 0x108   : > { %v6106_v39 = vpop.eup %6105  ;;  %v6925_v40 = vadd.f32 1.0, %v6104_v36 }
 0x109   : > { %v1118_v42 = vmul.f32 %v6106_v39, %v931_v23  ;;  %6107 = vpow2.f32 %v5693_v38  ;;  %v1110_v51 = vsel %vm6932_vm15, %v6102_v21, %v1106_v41  ;;  %vm1123_vm0 = vweird.f32 %v6106_v39 }
 0x10a   : > { %6109 = vrcp.f32 %v6925_v40  ;;  %v1115_v60 = vsel %vm1112_vm1, %v1114_v55, %v1110_v51  ;;  %vm1124_vm4 = vmor %vm1122_vm3, %vm1123_vm0  ;;  %vm1137_vm6 = vweird.f32 %v6925_v40 }
 0x10b   : > { %v1119_v44 = vsub.f32 1.0, %v1118_v42  ;;  %v1442_v2 = vmul.f32 %v1115_v60, %v6889_v43  ;;  %v1143_v43 = vand.u32 2147483648, %v6925_v40 }
 0x10c   : > { %v779_v50 = vpop.f32.mrf.mxu0 }
 0x10d   : > { %v1120_v52 = vmul.f32 %v6106_v39, %v1119_v44  ;;  %v6939_v53 = vadd.f32 %v6772_v22, %v779_v50  ;;  %v1144_v25 = vor.u32 1.1754944e-38, %v1143_v43 }
 0x10f   : > { %v6108_v56 = vpop.eup %6107  ;;  %v1121_v57 = vadd.f32 %v6106_v39, %v1120_v52  ;;  %v5694_v58 = vmul.f32 -1.442695, %v6939_v53  ;;  %5679 = vmatmul.msk.bf16.gmra.mxu0 %vm679_vm2, %v5988_v45 }
 0x110   : > { %v6110_v59 = vpop.eup %6109  ;;  %v933_v61 = vadd.f32 1.0, %v6108_v56 }
 0x111   : > { %v1125_v63 = vsel %vm1124_vm4, %v6106_v39, %v1121_v57  ;;  %v1133_v0 = vmul.f32 %v6110_v59, %v6925_v40  ;;  %6111 = vpow2.f32 %v5694_v58  ;;  %vm1138_vm2 = vweird.f32 %v6110_v59 }
 0x112   : > { %v1130_v1 = vsel %vm1127_vm5, %v1129_v37, %v1125_v63  ;;  %6113 = vrcp.f32 %v933_v61  ;;  %vm6956_vm7 = vmor %vm1137_vm6, %vm1138_vm2  ;;  %v1156_v18 = vand.u32 2147483647, %v933_v61  ;;  %v1158_v19 = vand.u32 2147483648, %v933_v61 }
 0x113   : > { %v1443_v3 = vmul.f32 %v1130_v1, %v6897_v46  ;;  %v1134_v4 = vsub.f32 1.0, %v1133_v0  ;;  %v1141_v46 = vand.u32 2147483647, %v6925_v40  ;;  %vm1152_vm10 = vweird.f32 %v933_v61 }
 0x114   : > { %v781_v34 = vpop.f32.mrf.mxu0  ;;  %v1159_v32 = vor.u32 1.1754944e-38, %v1158_v19  ;;  %vm1157_vm12 = vcmp.eq.f32.partialorder %v1156_v18, 8.507059e+37 }
 0x115   : > { %v1135_v54 = vmul.f32 %v6110_v59, %v1134_v4  ;;  %v6947_v5 = vadd.f32 %v6772_v22, %v781_v34  ;;  %v1469_v7 = vpack.c.bf16 %v1443_v3, %v1442_v2  ;;  %vm1142_vm9 = vcmp.eq.f32.partialorder %v1141_v46, 8.507059e+37 }
 0x117   : > { %v6112_v8 = vpop.eup %6111  ;;  %v5695_v9 = vmul.f32 -1.442695, %v6947_v5  ;;  %1581 = vmatmul.bf16.gmra.mxu1 %v1469_v7  ;;  %v1136_v13 = vadd.f32 %v6110_v59, %v1135_v54 }
 0x118   : > { %v6114_v10 = vpop.eup %6113  ;;  %v6950_v12 = vadd.f32 1.0, %v6112_v8 }
 0x119   : > { %v1148_v14 = vmul.f32 %v6114_v10, %v933_v61  ;;  %6115 = vpow2.f32 %v5695_v9  ;;  %v1140_v21 = vsel %vm6956_vm7, %v6110_v59, %v1136_v13  ;;  %vm1153_vm8 = vweird.f32 %v6114_v10 }
 0x11a   : > { %6117 = vrcp.f32 %v6950_v12  ;;  %v1145_v31 = vsel %vm1142_vm9, %v1144_v25, %v1140_v21  ;;  %vm1154_vm11 = vmor %vm1152_vm10, %vm1153_vm8  ;;  %vm1167_vm14 = vweird.f32 %v6950_v12 }
 0x11b   : > { %v1149_v15 = vsub.f32 1.0, %v1148_v14  ;;  %v1444_v38 = vmul.f32 %v1145_v31, %v6908_v11  ;;  %v1173_v11 = vand.u32 2147483648, %v6950_v12 }
 0x11c   : > { %v784_v20 = vpop.f32.mrf.mxu0 }
 0x11d   : > { %v1150_v23 = vmul.f32 %v6114_v10, %v1149_v15  ;;  %v6963_v24 = vadd.f32 %v6772_v22, %v784_v20  ;;  %v1174_v37 = vor.u32 1.1754944e-38, %v1173_v11 }
 0x11f   : > { %v6116_v27 = vpop.eup %6115  ;;  %v1151_v28 = vadd.f32 %v6114_v10, %v1150_v23  ;;  %v5696_v29 = vmul.f32 -1.442695, %v6963_v24 }
 0x120   : > { %v6118_v30 = vpop.eup %6117  ;;  %v935_v62 = vadd.f32 1.0, %v6116_v27 }
 0x121   : > { %v1155_v16 = vsel %vm1154_vm11, %v6114_v10, %v1151_v28  ;;  %v1163_v35 = vmul.f32 %v6118_v30, %v6950_v12  ;;  %6119 = vpow2.f32 %v5696_v29  ;;  %vm1168_vm13 = vweird.f32 %v6118_v30 }
 0x122   : > { %v1160_v36 = vsel %vm1157_vm12, %v1159_v32, %v1155_v16  ;;  %6121 = vrcp.f32 %v935_v62  ;;  %vm6979_vm15 = vmor %vm1167_vm14, %vm1168_vm13  ;;  %v1186_v55 = vand.u32 2147483647, %v935_v62  ;;  %v1188_v56 = vand.u32 2147483648, %v935_v62 }
 0x123   : > { %v1445_v39 = vmul.f32 %v1160_v36, %v6922_v33  ;;  %v1164_v40 = vsub.f32 1.0, %v1163_v35  ;;  %v1171_v33 = vand.u32 2147483647, %v6950_v12  ;;  %vm1182_vm3 = vweird.f32 %v935_v62 }
 0x124   : > { %v786_v41 = vpop.f32.mrf.mxu0  ;;  %v1189_v3 = vor.u32 1.1754944e-38, %v1188_v56  ;;  %vm1187_vm5 = vcmp.eq.f32.partialorder %v1186_v55, 8.507059e+37 }
 0x125   : > { %v1165_v42 = vmul.f32 %v6118_v30, %v1164_v40  ;;  %v6970_v6 = vadd.f32 %v6772_v22, %v786_v41  ;;  %v1470_v26 = vpack.c.bf16 %v1445_v39, %v1444_v38  ;;  %vm1172_vm1 = vcmp.eq.f32.partialorder %v1171_v33, 8.507059e+37 }
 0x127   : > { %v6120_v44 = vpop.eup %6119  ;;  %v5697_v45 = vmul.f32 -1.442695, %v6970_v6  ;;  %1586 = vmatmul.bf16.gmra.mxu1 %v1470_v26  ;;  %v1166_v49 = vadd.f32 %v6118_v30, %v1165_v42 }
 0x128   : > { %v6122_v47 = vpop.eup %6121  ;;  %v6973_v48 = vadd.f32 1.0, %v6120_v44 }
 0x129   : > { %v1178_v50 = vmul.f32 %v6122_v47, %v935_v62  ;;  %6123 = vpow2.f32 %v5697_v45  ;;  %v1170_v58 = vsel %vm6979_vm15, %v6118_v30, %v1166_v49  ;;  %vm1183_vm0 = vweird.f32 %v6122_v47 }
 0x12a   : > { %6125 = vrcp.f32 %v6973_v48  ;;  %v1175_v2 = vsel %vm1172_vm1, %v1174_v37, %v1170_v58  ;;  %vm1184_vm4 = vmor %vm1182_vm3, %vm1183_vm0  ;;  %vm1197_vm6 = vweird.f32 %v6973_v48  ;;  %v1201_v21 = vand.u32 2147483647, %v6973_v48 }
 0x12b   : > { %v1179_v51 = vsub.f32 1.0, %v1178_v50  ;;  %v1446_v8 = vmul.f32 %v1175_v2, %v6939_v53  ;;  %v1203_v53 = vand.u32 2147483648, %v6973_v48 }
 0x12c   : > { %v789_v57 = vpop.f32.mrf.mxu0  ;;  %vm1202_vm10 = vcmp.eq.f32.partialorder %v1201_v21, 8.507059e+37 }
 0x12d   : > { %v1180_v59 = vmul.f32 %v6122_v47, %v1179_v51  ;;  %v6986_v60 = vadd.f32 %v6772_v22, %v789_v57  ;;  %v1204_v32 = vor.u32 1.1754944e-38, %v1203_v53 }
 0x12f   : > { %v6124_v61 = vpop.eup %6123  ;;  %v1181_v63 = vadd.f32 %v6122_v47, %v1180_v59  ;;  %v5698_v0 = vmul.f32 -1.442695, %v6986_v60 }
 0x130   : > { %v6126_v1 = vpop.eup %6125  ;;  %v937_v4 = vadd.f32 1.0, %v6124_v61 }
 0x131   : > { %v1185_v34 = vsel %vm1184_vm4, %v6122_v47, %v1181_v63  ;;  %v1193_v54 = vmul.f32 %v6126_v1, %v6973_v48  ;;  %6127 = vpow2.f32 %v5698_v0  ;;  %vm1198_vm2 = vweird.f32 %v6126_v1 }
 0x132   : > { %v1190_v7 = vsel %vm1187_vm5, %v1189_v3, %v1185_v34  ;;  %6129 = vrcp.f32 %v937_v4  ;;  %v1218_v23 = vand.u32 2147483648, %v937_v4  ;;  %vm7002_vm7 = vmor %vm1197_vm6, %vm1198_vm2  ;;  %v1216_v29 = vand.u32 2147483647, %v937_v4 }
 0x133   : > { %v1447_v9 = vmul.f32 %v1190_v7, %v6947_v5  ;;  %v1194_v10 = vsub.f32 1.0, %v1193_v54  ;;  %vm1212_vm9 = vweird.f32 %v937_v4 }
 0x134   : > { %v791_v12 = vpop.f32.mrf.mxu0  ;;  %v1219_v35 = vor.u32 1.1754944e-38, %v1218_v23  ;;  %vm1217_vm12 = vcmp.eq.f32.partialorder %v1216_v29, 8.507059e+37 }
 0x135   : > { %v6993_v13 = vadd.f32 %v6772_v22, %v791_v12  ;;  %v1471_v14 = vpack.c.bf16 %v1447_v9, %v1446_v8  ;;  %v1195_v43 = vmul.f32 %v6126_v1, %v1194_v10 }
 0x137   : > { %v6128_v46 = vpop.eup %6127  ;;  %v5699_v15 = vmul.f32 -1.442695, %v6993_v13  ;;  %1591 = vmatmul.bf16.gmra.mxu1 %v1471_v14  ;;  %v1196_v20 = vadd.f32 %v6126_v1, %v1195_v43 }
 0x138   : > { %v6130_v17 = vpop.eup %6129  ;;  %v6996_v18 = vadd.f32 1.0, %v6128_v46 }
 0x139   : > { %v1208_v19 = vmul.f32 %v6130_v17, %v937_v4  ;;  %6131 = vpow2.f32 %v5699_v15  ;;  %vm1213_vm8 = vweird.f32 %v6130_v17  ;;  %v1200_v30 = vsel %vm7002_vm7, %v6126_v1, %v1196_v20 }
 0x13a   : > { %6133 = vrcp.f32 %v6996_v18  ;;  %vm1214_vm11 = vmor %vm1212_vm9, %vm1213_vm8  ;;  %v1205_v39 = vsel %vm1202_vm10, %v1204_v32, %v1200_v30  ;;  %vm1227_vm14 = vweird.f32 %v6996_v18  ;;  %v1233_v56 = vand.u32 2147483648, %v6996_v18 }
 0x13b   : > { %v1209_v5 = vsub.f32 1.0, %v1208_v19  ;;  %v1448_v45 = vmul.f32 %v1205_v39, %v6963_v24  ;;  %v1231_v37 = vand.u32 2147483647, %v6996_v18 }
 0x13c   : > { %v794_v25 = vpop.f32.mrf.mxu0  ;;  %v1234_v34 = vor.u32 1.1754944e-38, %v1233_v56 }
 0x13d   : > { %v1210_v28 = vmul.f32 %v6130_v17, %v1209_v5  ;;  %v7009_v38 = vadd.f32 %v6772_v22, %v794_v25  ;;  %vm1232_vm4 = vcmp.eq.f32.partialorder %v1231_v37, 8.507059e+37 }
 0x13f   : > { %v6132_v31 = vpop.eup %6131  ;;  %v1211_v62 = vadd.f32 %v6130_v17, %v1210_v28  ;;  %v5700_v47 = vmul.f32 -1.442695, %v7009_v38 }
 0x140   : > { %v6134_v16 = vpop.eup %6133  ;;  %v939_v36 = vadd.f32 1.0, %v6132_v31 }
 0x141   : > { %v1215_v40 = vsel %vm1214_vm11, %v6130_v17, %v1211_v62  ;;  %v1223_v41 = vmul.f32 %v6134_v16, %v6996_v18  ;;  %vm1228_vm13 = vweird.f32 %v6134_v16 }
 0x142   : > { %v1220_v42 = vsel %vm1217_vm12, %v1219_v35, %v1215_v40  ;;  %6135 = vrcp.f32 %v939_v36  ;;  %v1248_v57 = vand.u32 2147483648, %v939_v36  ;;  %v1246_v63 = vand.u32 2147483647, %v939_v36  ;;  %vm1229_vm0 = vmor %vm1227_vm14, %vm1228_vm13  ;;  %v7055_v35 = vld [vmem:[%s11862_s2] ss:$0 sm:$0xff] }
 0x143   : > { %v1449_v26 = vmul.f32 %v1220_v42, %v6970_v6  ;;  %v1224_v44 = vsub.f32 1.0, %v1223_v41  ;;  %6137 = vpow2.f32 %v5700_v47  ;;  %vm1242_vm1 = vweird.f32 %v939_v36 }
 0x144   : > { %v796_v48 = vpop.f32.mrf.mxu0  ;;  %v7015_v49 = vpop.f32.mrf.mxu1  ;;  %v1249_v54 = vor.u32 1.1754944e-38, %v1248_v57  ;;  %vm1247_vm5 = vcmp.eq.f32.partialorder %v1246_v63, 8.507059e+37 }
 0x145   : > { %v7018_v50 = vadd.f32 %v6772_v22, %v796_v48  ;;  %v1472_v11 = vpack.c.bf16 %v1449_v26, %v1448_v45  ;;  %v1225_v33 = vmul.f32 %v6134_v16, %v1224_v44 }
 0x147   : > { %v5701_v51 = vmul.f32 -1.442695, %v7018_v50  ;;  %1596 = vmatmul.bf16.gmra.mxu1 %v1472_v11  ;;  %v1226_v6 = vadd.f32 %v6134_v16, %v1225_v33 }
 0x148   : > { %v6136_v52 = vpop.eup %6135 }
 0x149   : > { %v1238_v55 = vmul.f32 %v6136_v52, %v939_v36  ;;  %6139 = vpow2.f32 %v5701_v51  ;;  %vm1243_vm15 = vweird.f32 %v6136_v52  ;;  %v6138_v0 = vpop.eup %6137  ;;  %v1230_v2 = vsel %vm1229_vm0, %v6134_v16, %v1226_v6 }
 0x14a   : > { %vm1244_vm3 = vmor %vm1242_vm1, %vm1243_vm15  ;;  %v1235_v9 = vsel %vm1232_vm4, %v1234_v34, %v1230_v2  ;;  %v940_v12 = vadd.f32 1.0, %v6138_v0 }
 0x14b   : > { %v1239_v24 = vsub.f32 1.0, %v1238_v55  ;;  %v1450_v17 = vmul.f32 %v1235_v9, %v6986_v60 }
 0x14c   : > { %v799_v58 = vpop.f32.mrf.mxu0  ;;  %v7023_v59 = vpop.f32.mrf.mxu1  ;;  %v1263_v45 = vand.u32 2147483648, %v940_v12  ;;  %vm1257_vm9 = vweird.f32 %v940_v12 }
 0x14d   : > { %v1240_v61 = vmul.f32 %v6136_v52, %v1239_v24  ;;  %v7027_v4 = vadd.f32 %v6772_v22, %v799_v58 }
 0x14e   : > { %v1264_v37 = vor.u32 1.1754944e-38, %v1263_v45 }
 0x14f   : > { %v6140_v1 = vpop.eup %6139  ;;  %v1241_v3 = vadd.f32 %v6136_v52, %v1240_v61  ;;  %v5702_v43 = vmul.f32 -1.442695, %v7027_v4 }
 0x150   : > { %v7029_v7 = vadd.f32 1.0, %v6140_v1 }
 0x151   : > { %v1245_v8 = vsel %vm1244_vm3, %v6136_v52, %v1241_v3  ;;  %v1261_v52 = vand.u32 2147483647, %v940_v12 }
 0x152   : > { %v1250_v10 = vsel %vm1247_vm5, %v1249_v54, %v1245_v8  ;;  %6141 = vrcp.f32 %v7029_v7  ;;  %v1278_v41 = vand.u32 2147483648, %v7029_v7  ;;  %vm1272_vm7 = vweird.f32 %v7029_v7 }
 0x153   : > { %v1451_v14 = vmul.f32 %v1250_v10, %v6993_v13  ;;  %6143 = vrcp.f32 %v940_v12  ;;  %v1276_v44 = vand.u32 2147483647, %v7029_v7  ;;  %vm1262_vm12 = vcmp.eq.f32.partialorder %v1261_v52, 8.507059e+37 }
 0x154   : > { %v801_v46 = vpop.f32.mrf.mxu0  ;;  %v7034_v15 = vpop.f32.mrf.mxu1  ;;  %6145 = vpow2.f32 %v5702_v43  ;;  %v1279_v24 = vor.u32 1.1754944e-38, %v1278_v41 }
 0x155   : > { %v7038_v18 = vadd.f32 %v6772_v22, %v801_v46  ;;  %v1473_v19 = vpack.c.bf16 %v1451_v14, %v1450_v17  ;;  %vm1277_vm11 = vcmp.eq.f32.partialorder %v1276_v44, 8.507059e+37 }
 0x157   : > { %v5703_v20 = vmul.f32 -1.442695, %v7038_v18  ;;  %1601 = vmatmul.bf16.gmra.mxu1 %v1473_v19 }
 0x158   : > { %v6142_v53 = vpop.eup %6141 }
 0x159   : > { %v6144_v13 = vpop.eup %6143  ;;  %6147 = vpow2.f32 %v5703_v20  ;;  %v1268_v25 = vmul.f32 %v6142_v53, %v7029_v7  ;;  %vm1273_vm2 = vweird.f32 %v6142_v53 }
 0x15a   : > { %v6146_v23 = vpop.eup %6145  ;;  %v1253_v27 = vmul.f32 %v6144_v13, %v940_v12  ;;  %vm1258_vm6 = vweird.f32 %v6144_v13  ;;  %vm7067_vm8 = vmor %vm1272_vm7, %vm1273_vm2 }
 0x15b   : > { %v7044_v60 = vadd.f32 1.0, %v6146_v23  ;;  %v1269_v28 = vsub.f32 1.0, %v1268_v25  ;;  %vm1259_vm10 = vmor %vm1257_vm9, %vm1258_vm6 }
 0x15c   : > { %v804_v5 = vpop.f32.mrf.mxu0  ;;  %v7041_v21 = vpop.f32.mrf.mxu1  ;;  %v1254_v29 = vsub.f32 1.0, %v1253_v27 }
 0x15d   : > { %6149 = vrcp.f32 %v7044_v60  ;;  %v1270_v62 = vmul.f32 %v6142_v53, %v1269_v28  ;;  %v7058_v36 = vadd.f32 %v7055_v35, %v804_v5  ;;  %v1293_v19 = vand.u32 2147483648, %v7044_v60 }
 0x15e   : > { %v1255_v16 = vmul.f32 %v6144_v13, %v1254_v29  ;;  %vm1287_vm1 = vweird.f32 %v7044_v60  ;;  %v1291_v5 = vand.u32 2147483647, %v7044_v60 }
 0x15f   : > { %v6148_v22 = vpop.eup %6147  ;;  %v1271_v39 = vadd.f32 %v6142_v53, %v1270_v62  ;;  %v5704_v11 = vmul.f32 -1.442695, %v7058_v36 }
 0x160   : > { %v7046_v30 = vadd.f32 1.0, %v6148_v22  ;;  %v1256_v26 = vadd.f32 %v6144_v13, %v1255_v16  ;;  %v7125_v22 = vld [vmem:[%s11864_s4] ss:$0 sm:$0xff]  ;;  %vm1292_vm5 = vcmp.eq.f32.partialorder %v1291_v5, 8.507059e+37 }
 0x161   : > { %v1275_v55 = vsel %vm7067_vm8, %v6142_v53, %v1271_v39  ;;  %v7133_v16 = vadd.f32 %v7125_v22, %v7015_v49 }
 0x162   : > { %6151 = vrcp.f32 %v7046_v30  ;;  %v1260_v56 = vsel %vm1259_vm10, %v6144_v13, %v1256_v26  ;;  %v1280_v61 = vsel %vm1277_vm11, %v1279_v24, %v1275_v55  ;;  %vm1302_vm15 = vweird.f32 %v7046_v30 }
 0x163   : > { %v7060_v40 = vpop.eup %6149  ;;  %6153 = vpow2.f32 %v5704_v11  ;;  %v1265_v0 = vsel %vm1262_vm12, %v1264_v37, %v1260_v56  ;;  %v1453_v1 = vmul.f32 %v1280_v61, %v7018_v50  ;;  %v1308_v50 = vand.u32 2147483648, %v7046_v30 }
 0x164   : > { %v806_v31 = vpop.f32.mrf.mxu0  ;;  %v7049_v32 = vpop.f32.mrf.mxu1  ;;  %v1283_v6 = vmul.f32 %v7060_v40, %v7044_v60  ;;  %v1452_v54 = vmul.f32 %v1265_v0, %v7009_v38  ;;  %vm1288_vm14 = vweird.f32 %v7060_v40  ;;  %v1306_v43 = vand.u32 2147483647, %v7046_v30 }
 0x165   : > { %v7081_v58 = vadd.f32 %v7055_v35, %v806_v31  ;;  %vm1289_vm3 = vmor %vm1287_vm1, %vm1288_vm14  ;;  %v1309_v25 = vor.u32 1.1754944e-38, %v1308_v50  ;;  %v5744_v45 = vmul.f32 -1.442695, %v7133_v16  ;;  %v7157_v0 = vadd.f32 %v7125_v22, %v7023_v59 }
 0x166   : > { %v1284_v63 = vsub.f32 1.0, %v1283_v6  ;;  %v1474_v12 = vpack.c.bf16 %v1453_v1, %v1452_v54  ;;  %vm1307_vm4 = vcmp.eq.f32.partialorder %v1306_v43, 8.507059e+37 }
 0x167   : > { %v5705_v3 = vmul.f32 -1.442695, %v7081_v58  ;;  %12093 = vst [vmem:[#allocation3_spill] sm:$0xff] %v7157_v0 }
 0x168   : > { %v7063_v42 = vpop.eup %6151  ;;  %v1285_v7 = vmul.f32 %v7060_v40, %v1284_v63  ;;  %1606 = vmatmul.bf16.gmra.mxu1 %v1474_v12 }
 0x169   : > { %v1298_v48 = vmul.f32 %v7063_v42, %v7046_v30  ;;  %6155 = vpow2.f32 %v5705_v3  ;;  %v6154_v8 = vpop.eup %6153  ;;  %vm1303_vm13 = vweird.f32 %v7063_v42  ;;  %v1294_v30 = vor.u32 1.1754944e-38, %v1293_v19 }
 0x16a   : > { %v1286_v38 = vadd.f32 %v7060_v40, %v1285_v7  ;;  %v7100_v46 = vadd.f32 1.0, %v6154_v8  ;;  %vm7106_vm0 = vmor %vm1302_vm15, %vm1303_vm13 }
 0x16b   : > { %v1299_v57 = vsub.f32 1.0, %v1298_v48 }
 0x16c   : > { %v809_v33 = vpop.f32.mrf.mxu0  ;;  %v7074_v51 = vpop.f32.mrf.mxu1  ;;  %v1290_v29 = vsel %vm1289_vm3, %v7060_v40, %v1286_v38  ;;  %6157 = vrcp.f32 %v7100_v46  ;;  %vm1317_vm9 = vweird.f32 %v7100_v46  ;;  %v1321_v50 = vand.u32 2147483647, %v7100_v46 }
 0x16d   : > { %v1300_v2 = vmul.f32 %v7063_v42, %v1299_v57  ;;  %v7096_v14 = vadd.f32 %v7055_v35, %v809_v33  ;;  %v1295_v62 = vsel %vm1292_vm5, %v1294_v30, %v1290_v29 }
 0x16e   : > { %vm1322_vm12 = vcmp.eq.f32.partialorder %v1321_v50, 8.507059e+37 }
 0x16f   : > { %v1301_v10 = vadd.f32 %v7063_v42, %v1300_v2  ;;  %v5706_v53 = vmul.f32 -1.442695, %v7096_v14  ;;  %v6156_v13 = vpop.eup %6155 }
 0x170   : > { %v7118_v27 = vadd.f32 1.0, %v6156_v13 }
 0x171   : > { %v1305_v23 = vsel %vm7106_vm0, %v7063_v42, %v1301_v10  ;;  %6159 = vpow2.f32 %v5706_v53  ;;  %v1454_v42 = vmul.f32 %v1295_v62, %v7027_v4  ;;  %v1323_v10 = vand.u32 2147483648, %v7100_v46 }
 0x172   : > { %v1310_v31 = vsel %vm1307_vm4, %v1309_v25, %v1305_v23  ;;  %6161 = vrcp.f32 %v7118_v27  ;;  %v6158_v41 = vpop.eup %6157  ;;  %v1338_v54 = vand.u32 2147483648, %v7118_v27  ;;  %vm1332_vm7 = vweird.f32 %v7118_v27 }
 0x173   : > { %v1455_v39 = vmul.f32 %v1310_v31, %v7038_v18  ;;  %v1313_v49 = vmul.f32 %v6158_v41, %v7100_v46  ;;  %vm1318_vm6 = vweird.f32 %v6158_v41  ;;  %v5745_v53 = vmul.f32 -1.442695, %v7157_v0 }
 0x174   : > { %v7086_v34 = vpop.f32.mrf.mxu1  ;;  %v811_v9 = vpop.f32.mrf.mxu0  ;;  %vm1319_vm10 = vmor %vm1317_vm9, %vm1318_vm6  ;;  %v1339_v13 = vor.u32 1.1754944e-38, %v1338_v54  ;;  %v1324_v25 = vor.u32 1.1754944e-38, %v1323_v10 }
 0x175   : > { %v7103_v17 = vadd.f32 %v7055_v35, %v811_v9  ;;  %v1475_v47 = vpack.c.bf16 %v1455_v39, %v1454_v42  ;;  %v1314_v4 = vsub.f32 1.0, %v1313_v49  ;;  %v1336_v9 = vand.u32 2147483647, %v7118_v27 }
 0x177   : > { %v5707_v60 = vmul.f32 -1.442695, %v7103_v17  ;;  %v6160_v26 = vpop.eup %6159  ;;  %v1315_v61 = vmul.f32 %v6158_v41, %v1314_v4  ;;  %vm1337_vm11 = vcmp.eq.f32.partialorder %v1336_v9, 8.507059e+37  ;;  %v7235_v9 = vadd.f32 %v7125_v22, %v7041_v21 }
 0x178   : > { %v6162_v44 = vpop.eup %6161  ;;  %v7142_v52 = vadd.f32 1.0, %v6160_v26  ;;  %1611 = vmatmul.bf16.gmra.mxu1 %v1475_v47 }
 0x179   : > { %6163 = vpow2.f32 %v5707_v60  ;;  %v1328_v11 = vmul.f32 %v6162_v44, %v7118_v27  ;;  %vm1333_vm2 = vweird.f32 %v6162_v44  ;;  %v1316_v8 = vadd.f32 %v6158_v41, %v1315_v61  ;;  %12099 = vst [vmem:[#allocation5_spill] sm:$0xff] %v7235_v9 }
 0x17a   : > { %6165 = vpow2.f32 %v5744_v45  ;;  %vm7170_vm8 = vmor %vm1332_vm7, %vm1333_vm2  ;;  %vm1347_vm1 = vweird.f32 %v7142_v52 }
 0x17b   : > { %v1329_v18 = vsub.f32 1.0, %v1328_v11  ;;  %6167 = vrcp.f32 %v7142_v52  ;;  %v1320_v46 = vsel %vm1319_vm10, %v6158_v41, %v1316_v8 }
 0x17c   : > { %v7120_v28 = vpop.f32.mrf.mxu1  ;;  %v814_v40 = vpop.f32.mrf.mxu0  ;;  %v1325_v60 = vsel %vm1322_vm12, %v1324_v25, %v1320_v46 }
 0x17d   : > { %v1330_v24 = vmul.f32 %v6162_v44, %v1329_v18  ;;  %v7151_v57 = vadd.f32 %v7055_v35, %v814_v40  ;;  %v1456_v42 = vmul.f32 %v1325_v60, %v7058_v36 }
 0x17f   : > { %v6164_v33 = vpop.eup %6163  ;;  %v1331_v1 = vadd.f32 %v6162_v44, %v1330_v24  ;;  %v5708_v7 = vmul.f32 -1.442695, %v7151_v57  ;;  %v1353_v24 = vand.u32 2147483648, %v7142_v52 }
 0x180   : > { %v7144_v55 = vadd.f32 1.0, %v6164_v33  ;;  %v6166_v37 = vpop.eup %6165 }
 0x181   : > { %v7153_v63 = vpop.eup %6167  ;;  %v7161_v3 = vadd.f32 1.0, %v6166_v37  ;;  %v1335_v38 = vsel %vm7170_vm8, %v6162_v44, %v1331_v1  ;;  %v7197_v44 = vadd.f32 %v7125_v22, %v7034_v15  ;;  %v1354_v50 = vor.u32 1.1754944e-38, %v1353_v24 }
 0x182   : > { %6169 = vrcp.f32 %v7144_v55  ;;  %v1343_v43 = vmul.f32 %v7153_v63, %v7142_v52  ;;  %v1340_v27 = vsel %vm1337_vm11, %v1339_v13, %v1335_v38  ;;  %v1368_v36 = vand.u32 2147483648, %v7144_v55 }
 0x183   : > { %6171 = vpow2.f32 %v5708_v7  ;;  %v1457_v31 = vmul.f32 %v1340_v27, %v7081_v58  ;;  %12096 = vst [vmem:[#allocation4_spill] sm:$0xff] %v7197_v44  ;;  %vm1348_vm14 = vweird.f32 %v7153_v63  ;;  %vm1362_vm15 = vweird.f32 %v7144_v55 }
 0x184   : > { %v7138_v48 = vpop.f32.mrf.mxu1  ;;  %v816_v6 = vpop.f32.mrf.mxu0  ;;  %6173 = vrcp.f32 %v7161_v3  ;;  %v1344_v29 = vsub.f32 1.0, %v1343_v43  ;;  %v1366_v4 = vand.u32 2147483647, %v7144_v55  ;;  %vm7239_vm3 = vmor %vm1347_vm1, %vm1348_vm14  ;;  %v5747_v43 = vmul.f32 -1.442695, %v7235_v9 }
 0x185   : > { %v7185_v5 = vadd.f32 %v7055_v35, %v816_v6  ;;  %6175 = vpow2.f32 %v5745_v53  ;;  %v1476_v47 = vpack.c.bf16 %v1457_v31, %v1456_v42  ;;  %v5746_v6 = vmul.f32 -1.442695, %v7197_v44 }
 0x186   : > { %v1345_v41 = vmul.f32 %v7153_v63, %v1344_v29  ;;  %vm1367_vm4 = vcmp.eq.f32.partialorder %v1366_v4, 8.507059e+37  ;;  %v2277_v31 = vlaneseq  ;;  %vm1770_vm6 = vweird.f32 %v7161_v3 }
 0x187   : > { %v5709_v30 = vmul.f32 -1.442695, %v7185_v5 }
 0x188   : > { %v7159_v2 = vpop.eup %6169  ;;  %v1346_v15 = vadd.f32 %v7153_v63, %v1345_v41  ;;  %1616 = vmatmul.bf16.gmra.mxu1 %v1476_v47  ;;  %v1776_v47 = vand.u32 2147483648, %v7161_v3 }
 0x189   : > { %v1358_v59 = vmul.f32 %v7159_v2, %v7144_v55  ;;  %v6172_v39 = vpop.eup %6171  ;;  %6177 = vpow2.f32 %v5709_v30  ;;  %vm1363_vm13 = vweird.f32 %v7159_v2  ;;  %v1351_v55 = vand.u32 2147483647, %v7142_v52 }
 0x18a   : > { %v7191_v40 = vpop.eup %6173  ;;  %v7201_v58 = vadd.f32 1.0, %v6172_v39  ;;  %vm7217_vm0 = vmor %vm1362_vm15, %vm1363_vm13  ;;  %v1369_v52 = vor.u32 1.1754944e-38, %v1368_v36 }
 0x18b   : > { %v1359_v23 = vsub.f32 1.0, %v1358_v59  ;;  %v1766_v33 = vmul.f32 %v7191_v40, %v7161_v3  ;;  %v6176_v18 = vpop.eup %6175  ;;  %vm1352_vm5 = vcmp.eq.f32.partialorder %v1351_v55, 8.507059e+37  ;;  %vm1771_vm2 = vweird.f32 %v7191_v40 }
 0x18c   : > { %v7148_v56 = vpop.f32.mrf.mxu1  ;;  %v819_v19 = vpop.f32.mrf.mxu0  ;;  %6179 = vrcp.f32 %v7201_v58  ;;  %v7231_v8 = vadd.f32 1.0, %v6176_v18  ;;  %vm7281_vm7 = vmor %vm1770_vm6, %vm1771_vm2  ;;  %v1777_v55 = vor.u32 1.1754944e-38, %v1776_v47  ;;  %vm1377_vm12 = vweird.f32 %v7201_v58 }
 0x18d   : > { %v1360_v62 = vmul.f32 %v7159_v2, %v1359_v23  ;;  %v7207_v49 = vadd.f32 %v7055_v35, %v819_v19  ;;  %v1767_v59 = vsub.f32 1.0, %v1766_v33 }
 0x18f   : > { %v1361_v45 = vadd.f32 %v7159_v2, %v1360_v62  ;;  %v5710_v61 = vmul.f32 -1.442695, %v7207_v49  ;;  %v6178_v7 = vpop.eup %6177 }
 0x190   : > { %v7246_v10 = vadd.f32 1.0, %v6178_v7 }
 0x191   : > { %v1365_v54 = vsel %vm7217_vm0, %v7159_v2, %v1361_v45  ;;  %6181 = vpow2.f32 %v5710_v61  ;;  %v1350_v2 = vsel %vm7239_vm3, %v7153_v63, %v1346_v15  ;;  %v1768_v63 = vmul.f32 %v7191_v40, %v1767_v59 }
 0x192   : > { %v1370_v21 = vsel %vm1367_vm4, %v1369_v52, %v1365_v54  ;;  %6183 = vrcp.f32 %v7246_v10  ;;  %v1355_v19 = vsel %vm1352_vm5, %v1354_v50, %v1350_v2  ;;  %v7252_v53 = vpop.eup %6179  ;;  %v1774_v45 = vand.u32 2147483647, %v7161_v3 }
 0x193   : > { %6185 = vrcp.f32 %v7231_v8  ;;  %v1459_v13 = vmul.f32 %v1370_v21, %v7103_v17  ;;  %v1458_v25 = vmul.f32 %v1355_v19, %v7096_v14  ;;  %v1373_v27 = vmul.f32 %v7252_v53, %v7201_v58 }
 0x194   : > { %v7180_v20 = vpop.f32.mrf.mxu1  ;;  %v821_v11 = vpop.f32.mrf.mxu0  ;;  %6187 = vpow2.f32 %v5746_v6  ;;  %v1769_v17 = vadd.f32 %v7191_v40, %v1768_v63  ;;  %v7290_v6 = vshrl.u32 %v2277_v31, 7  ;;  %v7299_v61 = vadd.f32 %v7125_v22, %v7138_v48 }
 0x195   : > { %v7223_v1 = vadd.f32 %v7055_v35, %v821_v11  ;;  %v1477_v62 = vpack.c.bf16 %v1459_v13, %v1458_v25  ;;  %v1374_v36 = vsub.f32 1.0, %v1373_v27  ;;  %vm1775_vm8 = vcmp.eq.f32.partialorder %v1774_v45, 8.507059e+37 }
 0x196   : > { %v1773_v4 = vsel %vm7281_vm7, %v7191_v40, %v1769_v17  ;;  %12104 = vst [vmem:[#allocation6_spill] sm:$0xff] %v7290_v6  ;;  %v7305_v40 = vadd.f32 %v7125_v22, %v7049_v32  ;;  %v1791_v48 = vand.u32 2147483648, %v7231_v8  ;;  %v7327_v19 = vadd.f32 %v7125_v22, %v7074_v51 }
 0x197   : > { %v5711_v38 = vmul.f32 -1.442695, %v7223_v1  ;;  %v6182_v46 = vpop.eup %6181  ;;  %12105 = vst [vmem:[#allocation7_spill] sm:$0xff] %v7299_v61  ;;  %v1375_v52 = vmul.f32 %v7252_v53, %v1374_v36  ;;  %v1778_v59 = vsel %vm1775_vm8, %v1777_v55, %v1773_v4  ;;  %v1398_v63 = vand.u32 2147483648, %v7246_v10 }
 0x198   : > { %v7262_v29 = vadd.f32 1.0, %v6182_v46  ;;  %v7267_v30 = vpop.eup %6183  ;;  %1621 = vmatmul.bf16.gmra.mxu1 %v1477_v62  ;;  %12106 = vst [vmem:[#allocation8_spill] sm:$0xff] %v7305_v40  ;;  %vm1378_vm10 = vweird.f32 %v7252_v53  ;;  %vm1392_vm11 = vweird.f32 %v7246_v10  ;;  %v1396_v25 = vand.u32 2147483647, %v7246_v10 }
 0x199   : > { %6189 = vpow2.f32 %v5711_v38  ;;  %v7273_v14 = vpop.eup %6185  ;;  %v1388_v42 = vmul.f32 %v7267_v30, %v7246_v10  ;;  %vm1393_vm9 = vweird.f32 %v7267_v30  ;;  %v5752_v38 = vmul.f32 -1.442695, %v7299_v61  ;;  %12107 = vst [vmem:[#allocation9_spill] sm:$0xff] %v7327_v19  ;;  %vm7359_vm14 = vmor %vm1377_vm12, %vm1378_vm10 }
 0x19a   : > { %6191 = vpow2.f32 %v5747_v43  ;;  %v7294_v3 = vmul.f32 %v7273_v14, %v7231_v8  ;;  %v5748_v43 = vmul.f32 -1.442695, %v7305_v40  ;;  %v1376_v46 = vadd.f32 %v7252_v53, %v1375_v52  ;;  %vm7337_vm13 = vmor %vm1392_vm11, %vm1393_vm9 }
 0x19b   : > { %v1389_v18 = vsub.f32 1.0, %v1388_v42  ;;  %6193 = vrcp.f32 %v7262_v29  ;;  %v1383_v27 = vand.u32 2147483648, %v7201_v58  ;;  %v1381_v62 = vand.u32 2147483647, %v7201_v58 }
 0x19c   : > { %v1584_v26 = vpop.f32.mrf.mxu1  ;;  %v1782_v32 = vsub.f32 1.0, %v7294_v3  ;;  %v7349_v42 = vadd.f32 %v7125_v22, %v7148_v56  ;;  %v1399_v45 = vor.u32 1.1754944e-38, %v1398_v63  ;;  %v5749_v47 = vmul.f32 -1.442695, %v7327_v19 }
 0x19d   : > { %v7257_v23 = vadd.f32 %v7125_v22, %v1584_v26  ;;  %v6188_v26 = vpop.eup %6187  ;;  %v1390_v37 = vmul.f32 %v7267_v30, %v1389_v18  ;;  %v1380_v56 = vsel %vm7359_vm14, %v7252_v53, %v1376_v46  ;;  %vm1397_vm15 = vcmp.eq.f32.partialorder %v1396_v25, 8.507059e+37 }
 0x19e   : > { %v7301_v54 = vadd.f32 1.0, %v6188_v26  ;;  %v7355_v26 = vadd.f32 %v7125_v22, %v7086_v34  ;;  %v1384_v33 = vor.u32 1.1754944e-38, %v1383_v27  ;;  %vm1382_vm0 = vcmp.eq.f32.partialorder %v1381_v62, 8.507059e+37 }
 0x19f   : > { %v5755_v41 = vmul.f32 -1.442695, %v7257_v23  ;;  %v6190_v11 = vpop.eup %6189  ;;  %v1391_v21 = vadd.f32 %v7267_v30, %v1390_v37  ;;  %v5753_v53 = vmul.f32 -1.442695, %v7349_v42  ;;  %v7384_v55 = vor.u32 1.1754944e-38, %v1791_v48 }
 0x1a0   : > { %v6192_v24 = vpop.eup %6191  ;;  %v7307_v7 = vadd.f32 1.0, %v6190_v11  ;;  %12110 = vst [vmem:[#allocation10_spill] sm:$0xff] %v7355_v26  ;;  %v5750_v52 = vmul.f32 -1.442695, %v7355_v26  ;;  %v7396_v46 = vmul.f32 %v7273_v14, %v1782_v32  ;;  %vm1407_vm5 = vweird.f32 %v7262_v29 }
 0x1a1   : > { %6195 = vpow2.f32 %v5755_v41  ;;  %v7312_v2 = vadd.f32 1.0, %v6192_v24  ;;  %v7317_v50 = vpop.eup %6193  ;;  %v1395_v10 = vsel %vm7337_vm13, %v7267_v30, %v1391_v21  ;;  %v7379_v24 = vadd.f32 %v7125_v22, %v7120_v28  ;;  %12115 = vst [vmem:[#allocation13_spill] sm:$0xff] %v7384_v55 }
 0x1a2   : > { %v1403_v17 = vmul.f32 %v7317_v50, %v7262_v29  ;;  %v1400_v36 = vsel %vm1397_vm15, %v1399_v45, %v1395_v10  ;;  %v1385_v21 = vsel %vm1382_vm0, %v1384_v33, %v1380_v56  ;;  %vm1408_vm3 = vweird.f32 %v7317_v50 }
 0x1a3   : > { %12114 = vst [vmem:[#allocation12_spill] sm:$0xff] %v7379_v24  ;;  %v1461_v28 = vmul.f32 %v1400_v36, %v7185_v5  ;;  %v7408_v5 = vadd.f32 %v7125_v22, %v7180_v20  ;;  %vm1422_vm4 = vweird.f32 %v7307_v7  ;;  %v1426_v20 = vand.u32 2147483647, %v7307_v7  ;;  %vm7452_vm6 = vmor %vm1407_vm5, %vm1408_vm3 }
 0x1a4   : > { %v1587_v12 = vpop.f32.mrf.mxu1  ;;  %v1404_v18 = vsub.f32 1.0, %v1403_v17  ;;  %v1411_v45 = vand.u32 2147483647, %v7262_v29 }
 0x1a5   : > { %v7265_v60 = vadd.f32 %v7125_v22, %v1587_v12  ;;  %vm1427_vm7 = vcmp.eq.f32.partialorder %v1426_v20, 8.507059e+37 }
 0x1a6   : > { %v1405_v48 = vmul.f32 %v7317_v50, %v1404_v18  ;;  %vm1412_vm8 = vcmp.eq.f32.partialorder %v1411_v45, 8.507059e+37 }
 0x1a7   : > { %v5756_v15 = vmul.f32 -1.442695, %v7265_v60  ;;  %v6196_v13 = vpop.eup %6195 }
 0x1a8   : > { %v7363_v30 = vadd.f32 1.0, %v6196_v13  ;;  %v1406_v17 = vadd.f32 %v7317_v50, %v1405_v48 }
 0x1a9   : > { %6197 = vpow2.f32 %v5756_v15 }
 0x1aa   : > { %6199 = vrcp.f32 %v7307_v7  ;;  %vm1935_vm13 = vweird.f32 %v7363_v30 }
 0x1ab   : > { %6201 = vrcp.f32 %v7301_v54 }
 0x1ac   : > { %v7271_v39 = vpop.f32.mrf.mxu1  ;;  %6203 = vrcp.f32 %v7312_v2 }
 0x1ad   : > { %6205 = vpow2.f32 %v5752_v38  ;;  %v7402_v25 = vadd.f32 %v7125_v22, %v7271_v39 }
 0x1ae   : > { %6207 = vpow2.f32 %v5748_v43  ;;  %v7389_v43 = vmul.f32 %v1778_v59, %v7133_v16  ;;  %v1460_v16 = vmul.f32 %v1385_v21, %v7151_v57  ;;  %v5751_v59 = vmul.f32 -1.442695, %v7379_v24 }
 0x1af   : > { %v6198_v31 = vpop.eup %6197  ;;  %6209 = vrcp.f32 %v7363_v30  ;;  %v1428_v57 = vand.u32 2147483648, %v7307_v7 }
 0x1b0   : > { %v7351_v41 = vpop.eup %6199  ;;  %v7373_v15 = vadd.f32 1.0, %v6198_v31  ;;  %12116 = vst [vmem:[#allocation14_spill] sm:$0xff] %v7389_v43  ;;  %6211 = vpow2.f32 %v5749_v47  ;;  %v1478_v39 = vpack.c.bf16 %v1461_v28, %v1460_v16  ;;  %v5757_v31 = vmul.f32 -1.442695, %v7402_v25 }
 0x1b1   : > { %v1418_v34 = vmul.f32 %v7351_v41, %v7307_v7  ;;  %v7371_v11 = vpop.eup %6201  ;;  %vm1423_vm1 = vweird.f32 %v7351_v41  ;;  %v5754_v7 = vmul.f32 -1.442695, %v7408_v5 }
 0x1b2   : > { %12113 = vst [vmem:[#allocation11_spill] sm:$0xff] %v7371_v11  ;;  %v7382_v37 = vpop.eup %6203  ;;  %6213 = vrcp.f32 %v7373_v15  ;;  %vm7432_vm2 = vmor %vm1422_vm4, %vm1423_vm1  ;;  %1626 = vmatmul.bf16.gmra.mxu1 %v1478_v39  ;;  %v7447_v18 = vmul.f32 %v7371_v11, %v7301_v54  ;;  %vm1950_vm10 = vweird.f32 %v7373_v15 }
 0x1b3   : > { %v1419_v3 = vsub.f32 1.0, %v1418_v34  ;;  %v6206_v38 = vpop.eup %6205  ;;  %6215 = vpow2.f32 %v5753_v53 }
 0x1b4   : > { %v7315_v12 = vpop.f32.mrf.mxu1  ;;  %v7393_v13 = vpop.eup %6207  ;;  %6217 = vpow2.f32 %v5750_v52  ;;  %v7410_v32 = vadd.f32 1.0, %v6206_v38  ;;  %12120 = vst [vmem:[#allocation16_spill] sm:$0xff] %v7447_v18  ;;  %v1410_v52 = vsel %vm7452_vm6, %v7317_v50, %v1406_v17 }
 0x1b5   : > { %v1420_v63 = vmul.f32 %v7351_v41, %v1419_v3  ;;  %v7417_v51 = vpop.eup %6209  ;;  %v7424_v62 = vadd.f32 %v7125_v22, %v7315_v12  ;;  %6219 = vpow2.f32 %v5751_v59  ;;  %v1413_v12 = vand.u32 2147483648, %v7262_v29 }
 0x1b6   : > { %v7426_v58 = vpop.eup %6211  ;;  %v1931_v33 = vmul.f32 %v7417_v51, %v7363_v30  ;;  %6221 = vpow2.f32 %v5757_v31  ;;  %v1429_v29 = vor.u32 1.1754944e-38, %v1428_v57  ;;  %vm1936_vm11 = vweird.f32 %v7417_v51 }
 0x1b7   : > { %v1421_v27 = vadd.f32 %v7351_v41, %v1420_v63  ;;  %12117 = vst [vmem:[#allocation15_spill] sm:$0xff] %v7426_v58  ;;  %6223 = vrcp.f32 %v7410_v32  ;;  %v5758_v38 = vmul.f32 -1.442695, %v7424_v62  ;;  %v1414_v59 = vor.u32 1.1754944e-38, %v1413_v12  ;;  %vm7526_vm14 = vmor %vm1935_vm13, %vm1936_vm11 }
 0x1b8   : > { %v7437_v56 = vpop.eup %6213  ;;  %v1932_v21 = vsub.f32 1.0, %v1931_v33  ;;  %6225 = vpow2.f32 %v5754_v7  ;;  %v7488_v33 = vadd.f32 1.0, %v7393_v13 }
 0x1b9   : > { %v1425_v34 = vsel %vm7432_vm2, %v7351_v41, %v1421_v27  ;;  %v6216_v36 = vpop.eup %6215  ;;  %v1946_v41 = vmul.f32 %v7437_v56, %v7373_v15  ;;  %6227 = vpow2.f32 %v5758_v38  ;;  %v1415_v31 = vsel %vm1412_vm8, %v1414_v59, %v1410_v52 }
 0x1ba   : > { %v7458_v3 = vpop.eup %6217  ;;  %v1430_v28 = vsel %vm1427_vm7, %v1429_v29, %v1425_v34  ;;  %v7471_v27 = vadd.f32 1.0, %v6216_v36  ;;  %vm1951_vm9 = vweird.f32 %v7437_v56  ;;  %12123 = vst [vmem:[#allocation17_spill] sm:$0xff] %v7488_v33  ;;  %v1462_v53 = vmul.f32 %v1415_v31, %v7207_v49 }
 0x1bb   : > { %v1947_v63 = vsub.f32 1.0, %v1946_v41  ;;  %v6220_v57 = vpop.eup %6219  ;;  %v1954_v29 = vand.u32 2147483647, %v7373_v15  ;;  %v7499_v52 = vadd.f32 %v7273_v14, %v7396_v46  ;;  %vm7506_vm12 = vmor %vm1950_vm10, %vm1951_vm9  ;;  %vm2380_vm7 = vcmp.lt.s32.totalorder %v7290_v6, 1 }
 0x1bc   : > { %v7375_v4 = vpop.f32.mrf.mxu1  ;;  %v6222_v20 = vpop.eup %6221  ;;  %v7490_v36 = vadd.f32 1.0, %v6220_v57 }
 0x1bd   : > { %v7466_v48 = vadd.f32 %v7125_v22, %v7375_v4  ;;  %v1948_v50 = vmul.f32 %v7437_v56, %v1947_v63  ;;  %v1463_v4 = vmul.f32 %v1430_v28, %v7223_v1  ;;  %v7479_v47 = vpop.eup %6223  ;;  %v7482_v12 = vadd.f32 1.0, %v6222_v20  ;;  %12124 = vst [vmem:[#allocation18_spill] sm:$0xff] %v7499_v52 }
 0x1be   : > { %v1956_v1 = vand.u32 2147483648, %v7373_v15  ;;  %v6226_v41 = vpop.eup %6225  ;;  %v1939_v63 = vand.u32 2147483647, %v7363_v30  ;;  %vm1955_vm15 = vcmp.eq.f32.partialorder %v1954_v29, 8.507059e+37  ;;  %v7544_v29 = vadd.f32 1.0, %v7458_v3 }
 0x1bf   : > { %v5759_v39 = vmul.f32 -1.442695, %v7466_v48  ;;  %v1949_v7 = vadd.f32 %v7437_v56, %v1948_v50  ;;  %v6228_v15 = vpop.eup %6227  ;;  %v1479_v38 = vpack.c.bf16 %v1463_v4, %v1462_v53  ;;  %v1971_v3 = vand.u32 2147483648, %v7482_v12 }
 0x1c0   : > { %v1957_v59 = vor.u32 1.1754944e-38, %v1956_v1  ;;  %v7533_v31 = vadd.f32 1.0, %v6228_v15  ;;  %12129 = vst [vmem:[#allocation19_spill] sm:$0xff] %v7544_v29  ;;  %vm1940_vm0 = vcmp.eq.f32.partialorder %v1939_v63, 8.507059e+37  ;;  %vm1965_vm1 = vweird.f32 %v7482_v12 }
 0x1c1   : > { %6229 = vpow2.f32 %v5759_v39  ;;  %v1953_v46 = vsel %vm7506_vm12, %v7437_v56, %v1949_v7  ;;  %v7522_v39 = vmul.f32 %v7479_v47, %v7410_v32  ;;  %vm2737_vm12 = vcmp.lt.s32.totalorder %v7290_v6, 7 }
 0x1c2   : > { %v1958_v20 = vsel %vm1955_vm15, %v1957_v59, %v1953_v46  ;;  %1631 = vmatmul.bf16.gmra.mxu1 %v1479_v38  ;;  %v7567_v59 = vadd.s32 112, %v7290_v6  ;;  %vm1980_vm2 = vweird.f32 %v7533_v31 }
 0x1c3   : > { %v7549_v49 = vmul.f32 %v1958_v20, %v7265_v60 }
 0x1c4   : > { %v1597_v10 = vpop.f32.mrf.mxu1 }
 0x1c5   : > { %v7469_v16 = vadd.f32 %v7125_v22, %v1597_v10  ;;  %v1933_v10 = vmul.f32 %v7417_v51, %v1932_v21  ;;  %v1941_v21 = vand.u32 2147483648, %v7363_v30  ;;  %12130 = vst [vmem:[#allocation20_spill] sm:$0xff] %v7549_v49 }
 0x1c7   : > { %v5760_v17 = vmul.f32 -1.442695, %v7469_v16  ;;  %v1934_v13 = vadd.f32 %v7417_v51, %v1933_v10  ;;  %v6230_v57 = vpop.eup %6229  ;;  %v1942_v7 = vor.u32 1.1754944e-38, %v1941_v21  ;;  %v1986_v21 = vand.u32 2147483648, %v7533_v31 }
 0x1c8   : > { %v7535_v4 = vadd.f32 1.0, %v6230_v57 }
 0x1c9   : > { %6231 = vpow2.f32 %v5760_v17  ;;  %v1938_v30 = vsel %vm7526_vm14, %v7417_v51, %v1934_v13 }
 0x1ca   : > { %6233 = vrcp.f32 %v7482_v12  ;;  %v1943_v13 = vsel %vm1940_vm0, %v1942_v7, %v1938_v30  ;;  %vm1995_vm6 = vweird.f32 %v7535_v4  ;;  %v1999_v44 = vand.u32 2147483647, %v7535_v4 }
 0x1cb   : > { %6235 = vrcp.f32 %v7471_v27  ;;  %v7570_v57 = vmul.f32 %v1943_v13, %v7257_v23  ;;  %v1972_v13 = vor.u32 1.1754944e-38, %v1971_v3  ;;  %v2001_v40 = vand.u32 2147483648, %v7535_v4 }
 0x1cc   : > { %v1599_v45 = vpop.f32.mrf.mxu1  ;;  %6237 = vrcp.f32 %v7488_v33  ;;  %vm2000_vm14 = vcmp.eq.f32.partialorder %v1999_v44, 8.507059e+37 }
 0x1cd   : > { %v7485_v34 = vadd.f32 %v7125_v22, %v1599_v45  ;;  %6239 = vrcp.f32 %v7490_v36  ;;  %v7537_v45 = vadd.f32 1.0, %v6226_v41  ;;  %v1969_v41 = vand.u32 2147483647, %v7482_v12  ;;  %12132 = vst [vmem:[#allocation22_spill] sm:$0xff] %v7570_v57 }
 0x1cf   : > { %v5761_v28 = vmul.f32 -1.442695, %v7485_v34  ;;  %v6232_v17 = vpop.eup %6231  ;;  %vm7574_vm4 = vcmp.eq.f32.partialorder %v1969_v41, 8.507059e+37 }
 0x1d0   : > { %v6234_v10 = vpop.eup %6233  ;;  %v7539_v1 = vadd.f32 1.0, %v6232_v17 }
 0x1d1   : > { %6241 = vpow2.f32 %v5761_v28  ;;  %v7541_v53 = vpop.eup %6235  ;;  %v1961_v51 = vmul.f32 %v6234_v10, %v7482_v12  ;;  %vm1966_vm3 = vweird.f32 %v6234_v10 }
 0x1d2   : > { %6243 = vrcp.f32 %v7533_v31  ;;  %v7553_v15 = vpop.eup %6237  ;;  %v7563_v60 = vmul.f32 %v7541_v53, %v7471_v27  ;;  %vm1967_vm5 = vmor %vm1965_vm1, %vm1966_vm3  ;;  %v2016_v26 = vand.u32 2147483648, %v7539_v1  ;;  %vm2010_vm15 = vweird.f32 %v7539_v1 }
 0x1d3   : > { %6245 = vrcp.f32 %v7535_v4  ;;  %12131 = vst [vmem:[#allocation21_spill] sm:$0xff] %v7553_v15  ;;  %v1962_v46 = vsub.f32 1.0, %v1961_v51  ;;  %v7558_v28 = vpop.eup %6239  ;;  %v7582_v51 = vadd.s32 120, %v7290_v6 }
 0x1d4   : > { %6247 = vrcp.f32 %v7539_v1  ;;  %v1602_v38 = vpop.f32.mrf.mxu1  ;;  %v2017_v44 = vor.u32 1.1754944e-38, %v2016_v26 }
 0x1d5   : > { %6249 = vrcp.f32 %v7537_v45  ;;  %v1963_v56 = vmul.f32 %v6234_v10, %v1962_v46  ;;  %v7579_v7 = vadd.f32 %v7125_v22, %v1602_v38  ;;  %v1984_v46 = vand.u32 2147483647, %v7533_v31 }
 0x1d7   : > { %v6242_v17 = vpop.eup %6241  ;;  %v1964_v23 = vadd.f32 %v6234_v10, %v1963_v56  ;;  %v5762_v38 = vmul.f32 -1.442695, %v7579_v7  ;;  %vm7601_vm9 = vcmp.eq.f32.partialorder %v1984_v46, 8.507059e+37  ;;  %v1987_v46 = vor.u32 1.1754944e-38, %v1986_v21 }
 0x1d8   : > { %v6244_v50 = vpop.eup %6243  ;;  %v7585_v12 = vadd.f32 1.0, %v6242_v17 }
 0x1d9   : > { %v6246_v35 = vpop.eup %6245  ;;  %v1976_v41 = vmul.f32 %v6244_v50, %v7533_v31  ;;  %v1968_v30 = vsel %vm1967_vm5, %v6234_v10, %v1964_v23  ;;  %vm1981_vm8 = vweird.f32 %v6244_v50  ;;  %v2325_v10 = vand.u32 15, %v7582_v51 }
 0x1da   : > { %v6248_v63 = vpop.eup %6247  ;;  %v1991_v9 = vmul.f32 %v6246_v35, %v7535_v4  ;;  %6251 = vrcp.f32 %v7585_v12  ;;  %v1973_v56 = vsel %vm7574_vm4, %v1972_v13, %v1968_v30  ;;  %vm1996_vm10 = vweird.f32 %v6246_v35  ;;  %vm1982_vm13 = vmor %vm1980_vm2, %vm1981_vm8 }
 0x1db   : > { %v7594_v3 = vpop.eup %6249  ;;  %v1977_v17 = vsub.f32 1.0, %v1976_v41  ;;  %v2006_v43 = vmul.f32 %v6248_v63, %v7539_v1  ;;  %v7607_v19 = vmul.f32 %v1973_v56, %v7402_v25  ;;  %6253 = vpow2.f32 %v5762_v38  ;;  %vm1997_vm0 = vmor %vm1995_vm6, %vm1996_vm10 }
 0x1dc   : > { %v1992_v23 = vsub.f32 1.0, %v1991_v9  ;;  %v2014_v41 = vand.u32 2147483647, %v7539_v1  ;;  %vm2011_vm11 = vweird.f32 %v6248_v63  ;;  %vm2025_vm5 = vweird.f32 %v7585_v12 }
 0x1dd   : > { %12137 = vst [vmem:[#allocation23_spill] sm:$0xff] %v7607_v19  ;;  %v1978_v20 = vmul.f32 %v6244_v50, %v1977_v17  ;;  %v2007_v30 = vsub.f32 1.0, %v2006_v43  ;;  %v2002_v43 = vor.u32 1.1754944e-38, %v2001_v40  ;;  %v11890_v25 = vrot.slane %v7607_v19, 7  ;;  %vm2012_vm1 = vmor %vm2010_vm15, %vm2011_vm11 }
 0x1de   : > { %v1993_v13 = vmul.f32 %v6246_v35, %v1992_v23  ;;  %vm2015_vm3 = vcmp.eq.f32.partialorder %v2014_v41, 8.507059e+37  ;;  %v2029_v41 = vand.u32 2147483647, %v7585_v12  ;;  %vm7663_vm2 = vcmp.lt.s32.totalorder %v2325_v10, 15 }
 0x1df   : > { %v1979_v24 = vadd.f32 %v6244_v50, %v1978_v20  ;;  %v2008_v0 = vmul.f32 %v6248_v63, %v2007_v30  ;;  %v2031_v30 = vand.u32 2147483648, %v7585_v12  ;;  %vm1921_vm10 = vweird.f32 %v7594_v3 }
 0x1e0   : > { %v6252_v15 = vpop.eup %6251  ;;  %v1994_v9 = vadd.f32 %v6246_v35, %v1993_v13  ;;  %v7648_v13 = vld [vmem:[%s11865_s5] ss:$0 sm:$0xff]  ;;  %vm2030_vm8 = vcmp.eq.f32.partialorder %v2029_v41, 8.507059e+37  ;;  %v7732_v41 = vld [vmem:[%s11865_s5 + $0x3] ss:$0 sm:$0xff]  ;;  %vm1920_vm11 = vweird.f32 %v7537_v45  ;;  %vm1905_vm15 = vweird.f32 %v7471_v27 }
 0x1e1   : > { %v1983_v38 = vsel %vm1982_vm13, %v6244_v50, %v1979_v24  ;;  %v2009_v21 = vadd.f32 %v6248_v63, %v2008_v0  ;;  %v2021_v56 = vmul.f32 %v6252_v15, %v7585_v12  ;;  %v6254_v40 = vpop.eup %6253  ;;  %v1916_v0 = vmul.f32 %v7594_v3, %v7537_v45  ;;  %v7679_v12 = vld [vmem:[%s11866_s6] ss:$0 sm:$0xff] }
 0x1e2   : > { %v1988_v17 = vsel %vm7601_vm9, %v1987_v46, %v1983_v38  ;;  %v1998_v31 = vsel %vm1997_vm0, %v6246_v35, %v1994_v9  ;;  %v7629_v20 = vadd.f32 1.0, %v6254_v40  ;;  %v12139_v35 = vrot.slane %v7549_v49, 7  ;;  %v7658_v38 = vpop.f32.mrf.mxu1 }
 0x1e3   : > { %v7625_v1 = vmul.f32 %v1988_v17, %v7424_v62  ;;  %v2003_v24 = vsel %vm2000_vm14, %v2002_v43, %v1998_v31  ;;  %v2013_v50 = vsel %vm2012_vm1, %v6248_v63, %v2009_v21  ;;  %v2022_v23 = vsub.f32 1.0, %v2021_v56  ;;  %12142 = vst [vmem:[#allocation27_spill] sm:$0xff] %v7658_v38 }
 0x1e4   : > { %v2018_v4 = vsel %vm2015_vm3, %v2017_v44, %v2013_v50  ;;  %v7638_v26 = vsel %vm2380_vm7, %v12139_v35, %v11890_v25  ;;  %v7642_v63 = vmul.f32 %v2003_v24, %v7466_v48  ;;  %vm2026_vm4 = vweird.f32 %v6252_v15 }
 0x1e5   : > { %12138 = vst [vmem:[#allocation24_spill] sm:$0xff] %v7625_v1  ;;  %v11889_v62 = vrot.slane %v7625_v1, 1  ;;  %v2023_v51 = vmul.f32 %v6252_v15, %v2022_v23  ;;  %v2324_v46 = vand.u32 15, %v7567_v59  ;;  %v11888_v9 = vrot.slane %v7570_v57, 7  ;;  %vm2027_vm6 = vmor %vm2025_vm5, %vm2026_vm4 }
 0x1e6   : > { %12140 = vst [vmem:[#allocation25_spill] sm:$0xff] %v7642_v63  ;;  %v11893_v43 = vrot.slane %v7607_v19, 1  ;;  %v7655_v48 = vmul.f32 %v2018_v4, %v7469_v16  ;;  %6255 = vrcp.f32 %v7629_v20  ;;  %v2557_v56 = vmul.f32 %v7648_v13, %v7638_v26  ;;  %vm7829_vm4 = vmor %vm1920_vm11, %vm1921_vm10 }
 0x1e7   : > { %v2024_v21 = vadd.f32 %v6252_v15, %v2023_v51  ;;  %v1917_v59 = vsub.f32 1.0, %v1916_v0  ;;  %v11891_v31 = vrot.slane %v7642_v63, 7  ;;  %v2032_v16 = vor.u32 1.1754944e-38, %v2031_v30  ;;  %v7696_v0 = vld [vmem:[%s11865_s5 + $0x1] ss:$0 sm:$0xff] }
 0x1e8   : > { %12141 = vst [vmem:[#allocation26_spill] sm:$0xff] %v7655_v48  ;;  %v7674_v44 = vsel %vm2737_vm12, %v11893_v43, %v11889_v62  ;;  %v12145_v24 = vmov %v12139_v35  ;;  %vm7689_vm9 = vcmp.ge.s32.totalorder %v2324_v46, 1  ;;  %v11897_v4 = vrot.slane %v7655_v48, 1  ;;  %v7706_v30 = vld [vmem:[%s11865_s5 + $0x2] ss:$0 sm:$0xff] }
 0x1e9   : > { %v2028_v40 = vsel %vm2027_vm6, %v6252_v15, %v2024_v21  ;;  %v7687_v50 = vsel %vm2380_vm7, %v11888_v9, %v12145_v24  ;;  %12148 = vst [vmem:[#allocation28_spill] sm:$0xff] %v7696_v0  ;;  %v11892_v15 = vrot.slane %v7625_v1, 7  ;;  %v2849_v35 = vsel %vm7663_vm2, %v7674_v44, 0.0 }
 0x1ea   : > { %v2033_v10 = vsel %vm2030_vm8, %v2032_v16, %v2028_v40  ;;  %v2589_v21 = vadd.f32 %v7679_v12, %v2557_v56  ;;  %v1924_v16 = vand.u32 2147483647, %v7537_v45  ;;  %v1926_v40 = vand.u32 2147483648, %v7537_v45  ;;  %v1607_v61 = vpop.f32.mrf.mxu1 }
 0x1eb   : > { %v7711_v46 = vmul.f32 %v2033_v10, %v7485_v34  ;;  %v11898_v9 = vrot.slane %v7642_v63, 1  ;;  %v7723_v51 = vsel %vm2380_vm7, %v11892_v15, %v11891_v31  ;;  %v2655_v34 = vmul.f32 %v7696_v0, %v7607_v19 }
 0x1ec   : > { %v6256_v24 = vpop.eup %6255  ;;  %12150 = vst [vmem:[#allocation30_spill] sm:$0xff] %v7723_v51  ;;  %v2882_v10 = vmul.f32 %v7706_v30, %v2849_v35  ;;  %v2523_v62 = vsel %vm7689_vm9, %v7687_v50, 0.0  ;;  %v1902_v25 = vsub.f32 1.0, %v7563_v60  ;;  %v1918_v31 = vmul.f32 %v7594_v3, %v1917_v59 }
 0x1ed   : > { %12149 = vst [vmem:[#allocation29_spill] sm:$0xff] %v7711_v46  ;;  %v2036_v56 = vmul.f32 %v6256_v24, %v7629_v20  ;;  %v7746_v35 = vsel %vm2737_vm12, %v11898_v9, %v11897_v4  ;;  %v2687_v38 = vadd.f32 %v2655_v34, %v2589_v21  ;;  %v2980_v60 = vmul.f32 %v7732_v41, %v7723_v51  ;;  %v7762_v21 = vld [vmem:[%s11865_s5 + $0x4] ss:$0 sm:$0xff] }
 0x1ee   : > { %12151 = vst [vmem:[#allocation31_spill] sm:$0xff] %v7746_v35  ;;  %v11899_v59 = vrot.slane %v7655_v48, 7  ;;  %v2044_v33 = vand.u32 2147483647, %v7629_v20  ;;  %v2046_v55 = vand.u32 2147483648, %v7629_v20  ;;  %v2556_v58 = vmul.f32 %v7648_v13, %v2523_v62 }
 0x1ef   : > { %v2037_v43 = vsub.f32 1.0, %v2036_v56  ;;  %vm2041_vm13 = vweird.f32 %v6256_v24  ;;  %v7757_v9 = vadd.f32 %v7125_v22, %v1607_v61  ;;  %v2914_v15 = vadd.f32 %v2882_v10, %v2687_v38 }
 0x1f0   : > { %v1919_v34 = vadd.f32 %v7594_v3, %v1918_v31  ;;  %v11903_v56 = vrot.slane %v7549_v49, 1  ;;  %vm2040_vm14 = vweird.f32 %v7629_v20  ;;  %v3111_v62 = vsel %vm7663_vm2, %v7746_v35, 0.0  ;;  %v7782_v20 = vld [vmem:[%s11865_s5 + $0x5] ss:$0 sm:$0xff] }
 0x1f1   : > { %v2038_v4 = vmul.f32 %v6256_v24, %v2037_v43  ;;  %v5764_v22 = vmul.f32 -1.442695, %v7757_v9  ;;  %v12152_v61 = vrot.slane %v7711_v46, 7  ;;  %v3012_v31 = vadd.f32 %v2980_v60, %v2914_v15  ;;  %vm2042_vm0 = vmor %vm2040_vm14, %vm2041_vm13  ;;  %v7799_v60 = vld [vmem:[%s11865_s5 + $0x6] ss:$0 sm:$0xff] }
 0x1f2   : > { %vm2045_vm1 = vcmp.eq.f32.partialorder %v2044_v33, 8.507059e+37  ;;  %v3046_v15 = vmul.f32 %v7762_v21, %v7642_v63  ;;  %v3144_v11 = vmul.f32 %v7782_v20, %v3111_v62  ;;  %v2588_v18 = vadd.f32 %v7679_v12, %v2556_v58 }
 0x1f3   : > { %v2039_v43 = vadd.f32 %v6256_v24, %v2038_v4  ;;  %v7777_v38 = vsel %vm2380_vm7, %v11899_v59, %v12152_v61  ;;  %v12154_v4 = vrot.slane %v7607_v19, 1  ;;  %v2047_v61 = vor.u32 1.1754944e-38, %v2046_v55 }
 0x1f4   : > { %12153 = vst [vmem:[#allocation32_spill] sm:$0xff] %v7777_v38  ;;  %6257 = vpow2.f32 %v5764_v22  ;;  %v2654_v33 = vmul.f32 %v7696_v0, %v7549_v49  ;;  %v3078_v52 = vadd.f32 %v3046_v15, %v3012_v31  ;;  %vm1906_vm3 = vweird.f32 %v7541_v53  ;;  %v7843_v15 = vld [vmem:[%s11864_s4] ss:$0 sm:$0xff] }
 0x1f5   : > { %v7791_v10 = vsel %vm2737_vm12, %v11903_v56, %v12154_v4  ;;  %v2043_v59 = vsel %vm2042_vm0, %v6256_v24, %v2039_v43  ;;  %v1903_v4 = vmul.f32 %v7541_v53, %v1902_v25  ;;  %v3306_v56 = vmul.f32 %v7799_v60, %v7777_v38  ;;  %vm7884_vm8 = vmor %vm1905_vm15, %vm1906_vm3 }
 0x1f6   : > { %12155 = vst [vmem:[#allocation33_spill] sm:$0xff] %v7791_v10  ;;  %v2048_v55 = vsel %vm2045_vm1, %v2047_v61, %v2043_v59  ;;  %v12157_v24 = vrot.slane %v7625_v1, 7  ;;  %v12158_v43 = vrot.slane %v7607_v19, 7  ;;  %v2881_v25 = vmul.f32 %v7706_v30, %v7791_v10  ;;  %v1609_v61 = vpop.f32.mrf.mxu1 }
 0x1f7   : > { %v7809_v29 = vmul.f32 %v2048_v55, %v7579_v7  ;;  %v12160_v59 = vsub.f32 1.0, %v7522_v39  ;;  %vm7833_vm5 = vcmp.eq.f32.partialorder %v1924_v16, 8.507059e+37  ;;  %v1927_v31 = vor.u32 1.1754944e-38, %v1926_v40 }
 0x1f8   : > { %v7817_v58 = vsel %vm2380_vm7, %v12158_v43, %v12157_v24  ;;  %v1923_v39 = vsel %vm7829_vm4, %v7594_v3, %v1919_v34  ;;  %v7846_v45 = vadd.f32 %v7843_v15, %v1609_v61  ;;  %v3176_v55 = vadd.f32 %v3144_v11, %v3078_v52  ;;  %v7858_v61 = vld [vmem:[%s11865_s5 + $0x7] ss:$0 sm:$0xff] }
 0x1f9   : > { %12156 = vst [vmem:[#allocation34_spill] sm:$0xff] %v7809_v29  ;;  %v1888_v62 = vmul.f32 %v7479_v47, %v12160_v59  ;;  %v2686_v24 = vadd.f32 %v2654_v33, %v2588_v18  ;;  %v1904_v16 = vadd.f32 %v7541_v53, %v1903_v4  ;;  %v2722_v43 = vrot.slane %v7711_v46, 1 }
 0x1fa   : > { %12159 = vst [vmem:[#allocation35_spill] sm:$0xff] %v7817_v58  ;;  %v11905_v40 = vrot.slane %v7809_v29, 1  ;;  %v2946_v3 = vsel %vm7689_vm9, %v7817_v58, 0.0  ;;  %v6258_v34 = vpop.eup %6257  ;;  %v5765_v59 = vmul.f32 -1.442695, %v7846_v45  ;;  %v3338_v7 = vadd.f32 %v3306_v56, %v3176_v55 }
 0x1fb   : > { %v2913_v11 = vadd.f32 %v2881_v25, %v2686_v24  ;;  %v2979_v18 = vmul.f32 %v7732_v41, %v2946_v3  ;;  %vm1890_vm6 = vweird.f32 %v7410_v32  ;;  %v1928_v52 = vsel %vm7833_vm5, %v1927_v31, %v1923_v39  ;;  %v7896_v24 = vld [vmem:[%s11865_s5 + $0x8] ss:$0 sm:$0xff] }
 0x1fc   : > { %v7864_v4 = vadd.f32 1.0, %v6258_v34  ;;  %v7870_v56 = vsel %vm2737_vm12, %v2722_v43, %v11905_v40  ;;  %v12166_v33 = vrot.slane %v7642_v63, 1  ;;  %v12167_v55 = vrot.slane %v7625_v1, 1 }
 0x1fd   : > { %12165 = vst [vmem:[#allocation36_spill] sm:$0xff] %v7870_v56  ;;  %6259 = vpow2.f32 %v5765_v59  ;;  %v3404_v31 = vmul.f32 %v7858_v61, %v7711_v46  ;;  %v3501_v39 = vsel %vm7663_vm2, %v7870_v56, 0.0  ;;  %v3011_v3 = vadd.f32 %v2979_v18, %v2913_v11 }
 0x1fe   : > { %v7878_v25 = vsel %vm2737_vm12, %v12167_v55, %v12166_v33  ;;  %v1908_v34 = vsel %vm7884_vm8, %v7541_v53, %v1904_v16  ;;  %v12171_v33 = vand.u32 2147483648, %v7471_v27  ;;  %6261 = vrcp.f32 %v7864_v4 }
 0x1ff   : > { %12168 = vst [vmem:[#allocation37_spill] sm:$0xff] %v7878_v25  ;;  %v12172_v55 = vrot.slane %v7655_v48, 7  ;;  %v12173_v17 = vrot.slane %v7642_v63, 7  ;;  %v3436_v56 = vadd.f32 %v3404_v31, %v3338_v7  ;;  %v3534_v11 = vmul.f32 %v7896_v24, %v3501_v39 }
 0x200   : > { %v1912_v59 = vor.u32 1.1754944e-38, %v12171_v33  ;;  %v3045_v18 = vmul.f32 %v7762_v21, %v7625_v1  ;;  %v3143_v53 = vmul.f32 %v7782_v20, %v7878_v25  ;;  %vm1891_vm2 = vweird.f32 %v7479_v47 }
 0x201   : > { %v7910_v40 = vsel %vm2380_vm7, %v12173_v17, %v12172_v55  ;;  %v1896_v16 = vand.u32 2147483648, %v7410_v32  ;;  %v12175_v22 = vand.u32 2147483647, %v7471_v27  ;;  %v7922_v33 = vmul.f32 %v1928_v52, %v7408_v5  ;;  %v1612_v55 = vpop.f32.mrf.mxu1 }
 0x202   : > { %12174 = vst [vmem:[#allocation38_spill] sm:$0xff] %v7910_v40  ;;  %v7925_v31 = vadd.f32 %v7843_v15, %v1612_v55  ;;  %v7927_v39 = vadd.f32 %v3534_v11, %v3436_v56  ;;  %v3077_v17 = vadd.f32 %v3045_v18, %v3011_v3  ;;  %v7930_v38 = vadd.f32 %v7479_v47, %v1888_v62 }
 0x203   : > { %vm1910_vm10 = vcmp.eq.f32.partialorder %v12175_v22, 8.507059e+37  ;;  %v12176_v46 = vrot.slane %v7655_v48, 1  ;;  %v3272_v5 = vsel %vm7689_vm9, %v7910_v40, 0.0  ;;  %v2291_v52 = vadd.s32 104, %v7290_v6  ;;  %vm7957_vm9 = vmor %vm1890_vm6, %vm1891_vm2 }
 0x204   : > { %v1913_v7 = vsel %vm1910_vm10, %v1912_v59, %v1908_v34  ;;  %v6260_v34 = vpop.eup %6259  ;;  %v5766_v56 = vmul.f32 -1.442695, %v7925_v31  ;;  %v5791_v3 = vmul.f32 -1.442695, %v7927_v39  ;;  %v3175_v59 = vadd.f32 %v3143_v53, %v3077_v17 }
 0x205   : > { %v7936_v27 = vsel %vm2737_vm12, %v12176_v46, %v2722_v43  ;;  %v3305_v62 = vmul.f32 %v7799_v60, %v3272_v5  ;;  %v6262_v11 = vpop.eup %6261  ;;  %v7946_v18 = vmul.f32 %v1913_v7, %v7349_v42  ;;  %v11920_v46 = vrot.slane %v7922_v33, 7 }
 0x206   : > { %12177 = vst [vmem:[#allocation39_spill] sm:$0xff] %v7936_v27  ;;  %v7949_v43 = vadd.f32 1.0, %v6260_v34  ;;  %v3403_v23 = vmul.f32 %v7858_v61, %v7655_v48  ;;  %v2066_v53 = vmul.f32 %v6262_v11, %v7864_v4  ;;  %6263 = vpow2.f32 %v5766_v56 }
 0x207   : > { %v3337_v42 = vadd.f32 %v3305_v62, %v3175_v59  ;;  %v3533_v55 = vmul.f32 %v7896_v24, %v7936_v27  ;;  %v7968_v17 = vor.u32 1.1754944e-38, %v1896_v16  ;;  %v2323_v5 = vand.u32 15, %v2291_v52 }
 0x208   : > { %6265 = vrcp.f32 %v7949_v43  ;;  %v12180_v34 = vrot.slane %v7570_v57, 7  ;;  %v2067_v59 = vsub.f32 1.0, %v2066_v53  ;;  %v7982_v16 = vmul.f32 %v7696_v0, %v7922_v33 }
 0x209   : > { %6267 = vpow2.f32 %v5791_v3  ;;  %v3435_v62 = vadd.f32 %v3403_v23, %v3337_v42  ;;  %v11929_v7 = vrot.slane %v7922_v33, 1  ;;  %v2716_v52 = vrot.slane %v7570_v57, 1  ;;  %v1614_v48 = vpop.f32.mrf.mxu1 }
 0x20a   : > { %v7977_v56 = vsel %vm2380_vm7, %v11920_v46, %v12180_v34  ;;  %v2653_v40 = vmul.f32 %v7696_v0, %v7570_v57  ;;  %v2068_v29 = vmul.f32 %v6262_v11, %v2067_v59  ;;  %v7989_v34 = vadd.f32 %v7843_v15, %v1614_v48 }
 0x20b   : > { %12181 = vst [vmem:[#allocation40_spill] sm:$0xff] %v7977_v56  ;;  %v7991_v3 = vadd.f32 %v3533_v55, %v3435_v62  ;;  %vm2071_vm11 = vweird.f32 %v6262_v11  ;;  %v2555_v23 = vmul.f32 %v7648_v13, %v7977_v56  ;;  %v12182_v53 = vrot.slane %v7549_v49, 1 }
 0x20c   : > { %vm8001_vm13 = vcmp.lt.s32.totalorder %v2323_v5, 15  ;;  %v6264_v59 = vpop.eup %6263  ;;  %v2069_v46 = vadd.f32 %v6262_v11, %v2068_v29  ;;  %v2074_v48 = vand.u32 2147483647, %v7864_v4  ;;  %v2076_v15 = vand.u32 2147483648, %v7864_v4 }
 0x20d   : > { %v7999_v42 = vsel %vm2737_vm12, %v2716_v52, %v12182_v53  ;;  %v5767_v55 = vmul.f32 -1.442695, %v7989_v34  ;;  %v8012_v57 = vsel %vm2737_vm12, %v11929_v7, %v2716_v52  ;;  %vm2070_vm14 = vweird.f32 %v7864_v4 }
 0x20e   : > { %12183 = vst [vmem:[#allocation41_spill] sm:$0xff] %v7999_v42  ;;  %v6266_v62 = vpop.eup %6265  ;;  %v8015_v5 = vadd.f32 1.0, %v6264_v59  ;;  %v5790_v53 = vmul.f32 -1.442695, %v7991_v3  ;;  %vm8019_vm15 = vmor %vm2070_vm14, %vm2071_vm11  ;;  %v2089_v25 = vand.u32 2147483647, %v7949_v43  ;;  %v2587_v7 = vadd.f32 %v7679_v12, %v2555_v23 }
 0x20f   : > { %v6268_v29 = vpop.eup %6267  ;;  %v2081_v0 = vmul.f32 %v6266_v62, %v7949_v43  ;;  %6269 = vpow2.f32 %v5767_v55  ;;  %v2847_v52 = vsel %vm8001_vm13, %v7999_v42, 0.0  ;;  %v2073_v4 = vsel %vm8019_vm15, %v6262_v11, %v2069_v46 }
 0x210   : > { %v2091_v59 = vand.u32 2147483648, %v7949_v43  ;;  %6271 = vrcp.f32 %v8015_v5  ;;  %vm2075_vm0 = vcmp.eq.f32.partialorder %v2074_v48, 8.507059e+37  ;;  %v2077_v1 = vor.u32 1.1754944e-38, %v2076_v15 }
 0x211   : > { %v2082_v10 = vsub.f32 1.0, %v2081_v0  ;;  %v8033_v49 = vadd.f32 1.0, %v6268_v29  ;;  %vm2085_vm1 = vweird.f32 %v7949_v43  ;;  %6273 = vpow2.f32 %v5790_v53 }
 0x212   : > { %v2880_v55 = vmul.f32 %v7706_v30, %v2847_v52  ;;  %v3109_v11 = vsel %vm8001_vm13, %v7674_v44, 0.0  ;;  %v2078_v46 = vsel %vm2075_vm0, %v2077_v1, %v2073_v4  ;;  %vm2086_vm3 = vweird.f32 %v6266_v62 }
 0x213   : > { %v2083_v56 = vmul.f32 %v6266_v62, %v2082_v10  ;;  %vm8040_vm4 = vcmp.eq.f32.partialorder %v2089_v25, 8.507059e+37  ;;  %v2092_v23 = vor.u32 1.1754944e-38, %v2091_v59  ;;  %6275 = vrcp.f32 %v8033_v49  ;;  %vm2087_vm5 = vmor %vm2085_vm1, %vm2086_vm3 }
 0x214   : > { %v2685_v0 = vadd.f32 %v2653_v40, %v2587_v7  ;;  %v2978_v48 = vmul.f32 %v7732_v41, %v7638_v26  ;;  %v3044_v29 = vmul.f32 %v7762_v21, %v7607_v19  ;;  %v3142_v1 = vmul.f32 %v7782_v20, %v3109_v11 }
 0x215   : > { %v6270_v15 = vpop.eup %6269  ;;  %v2084_v53 = vadd.f32 %v6266_v62, %v2083_v56  ;;  %v3304_v10 = vmul.f32 %v7799_v60, %v7723_v51  ;;  %v8055_v52 = vmul.f32 %v2078_v46, %v7757_v9  ;;  %v2104_v40 = vand.u32 2147483647, %v8015_v5 }
 0x216   : > { %v8052_v25 = vpop.eup %6271  ;;  %v8060_v7 = vadd.f32 1.0, %v6270_v15  ;;  %v2912_v4 = vadd.f32 %v2880_v55, %v2685_v0  ;;  %v8066_v56 = vmul.f32 %v7858_v61, %v7642_v63  ;;  %v2290_v51 = vadd.s32 96, %v7290_v6 }
 0x217   : > { %12190 = vst [vmem:[#allocation42_spill] sm:$0xff] %v8055_v52  ;;  %v2088_v59 = vsel %vm2087_vm5, %v6266_v62, %v2084_v53  ;;  %v2096_v11 = vmul.f32 %v8052_v25, %v8015_v5  ;;  %v6274_v9 = vpop.eup %6273  ;;  %vm2100_vm6 = vweird.f32 %v8015_v5  ;;  %v2106_v0 = vand.u32 2147483648, %v8015_v5 }
 0x218   : > { %v2093_v43 = vsel %vm8040_vm4, %v2092_v23, %v2088_v59  ;;  %6277 = vrcp.f32 %v8060_v7  ;;  %v3010_v46 = vadd.f32 %v2978_v48, %v2912_v4  ;;  %v8077_v15 = vadd.f32 1.0, %v6274_v9 }
 0x219   : > { %v8074_v62 = vmul.f32 %v2093_v43, %v7846_v45  ;;  %v2097_v55 = vsub.f32 1.0, %v2096_v11  ;;  %v6276_v53 = vpop.eup %6275  ;;  %v11942_v63 = vrot.slane %v8055_v52, 7  ;;  %v11944_v19 = vrot.slane %v8055_v52, 1 }
 0x21a   : > { %vm8081_vm8 = vcmp.eq.f32.partialorder %v2104_v40, 8.507059e+37  ;;  %v3499_v23 = vsel %vm8001_vm13, %v7746_v35, 0.0  ;;  %v2322_v59 = vand.u32 15, %v2290_v51  ;;  %vm2101_vm2 = vweird.f32 %v8052_v25 }
 0x21b   : > { %12191 = vst [vmem:[#allocation43_spill] sm:$0xff] %v8074_v62  ;;  %v11941_v45 = vrot.slane %v8074_v62, 7  ;;  %v11943_v48 = vrot.slane %v8074_v62, 1  ;;  %v2098_v4 = vmul.f32 %v8052_v25, %v2097_v55  ;;  %v3937_v11 = vmul.f32 %v6276_v53, %v8033_v49  ;;  %vm8116_vm11 = vmor %vm2100_vm6, %vm2101_vm2 }
 0x21c   : > { %v3945_v40 = vand.u32 2147483647, %v8033_v49  ;;  %v3076_v9 = vadd.f32 %v3044_v29, %v3010_v46  ;;  %6279 = vrcp.f32 %v8077_v15  ;;  %v2107_v46 = vor.u32 1.1754944e-38, %v2106_v0 }
 0x21d   : > { %v8100_v27 = vsel %vm2380_vm7, %v11942_v63, %v11941_v45  ;;  %v8108_v51 = vsel %vm2737_vm12, %v11944_v19, %v11943_v48  ;;  %v2099_v43 = vadd.f32 %v8052_v25, %v2098_v4  ;;  %v3938_v55 = vsub.f32 1.0, %v3937_v11 }
 0x21e   : > { %12194 = vst [vmem:[#allocation44_spill] sm:$0xff] %v8100_v27  ;;  %v6278_v29 = vpop.eup %6277  ;;  %vm3941_vm10 = vweird.f32 %v8033_v49  ;;  %v3947_v45 = vand.u32 2147483648, %v8033_v49  ;;  %v3174_v19 = vadd.f32 %v3142_v1, %v3076_v9  ;;  %v12198_v4 = vrot.slane %v7922_v33, 7 }
 0x21f   : > { %12195 = vst [vmem:[#allocation45_spill] sm:$0xff] %v8108_v51  ;;  %v2111_v48 = vmul.f32 %v6278_v29, %v8060_v7  ;;  %v12199_v35 = vrot.slane %v7946_v18, 7  ;;  %vm8129_vm13 = vcmp.ge.s32.totalorder %v2322_v59, 1  ;;  %v2103_v5 = vsel %vm8116_vm11, %v8052_v25, %v2099_v43 }
 0x220   : > { %v2119_v51 = vand.u32 2147483647, %v8060_v7  ;;  %v3939_v27 = vmul.f32 %v6276_v53, %v3938_v55  ;;  %vm3942_vm14 = vweird.f32 %v6276_v53  ;;  %vm8137_vm15 = vcmp.eq.f32.partialorder %v3945_v40, 8.507059e+37 }
 0x221   : > { %v8127_v0 = vsel %vm2380_vm7, %v12199_v35, %v12198_v4  ;;  %v2112_v1 = vsub.f32 1.0, %v2111_v48  ;;  %v3336_v62 = vadd.f32 %v3304_v10, %v3174_v19  ;;  %v3532_v35 = vmul.f32 %v7896_v24, %v3499_v23  ;;  %vm3943_vm5 = vmor %vm3941_vm10, %vm3942_vm14 }
 0x222   : > { %v2121_v59 = vand.u32 2147483648, %v8060_v7  ;;  %v3940_v4 = vadd.f32 %v6276_v53, %v3939_v27  ;;  %v3948_v52 = vor.u32 1.1754944e-38, %v3947_v45  ;;  %v2521_v63 = vsel %vm8129_vm13, %v8127_v0, 0.0  ;;  %v6280_v25 = vpop.eup %6279 }
 0x223   : > { %vm1786_vm0 = vweird.f32 %v7273_v14  ;;  %v12204_v48 = vand.u32 2147483647, %v7410_v32  ;;  %v2108_v19 = vsel %vm8081_vm8, %v2107_v46, %v2103_v5  ;;  %v2113_v10 = vmul.f32 %v6278_v29, %v2112_v1 }
 0x224   : > { %vm2115_vm3 = vweird.f32 %v8060_v7  ;;  %vm2116_vm4 = vweird.f32 %v6278_v29  ;;  %vm8159_vm6 = vcmp.eq.f32.partialorder %v2119_v51, 8.507059e+37  ;;  %v3944_v32 = vsel %vm3943_vm5, %v6276_v53, %v3940_v4 }
 0x225   : > { %vm8149_vm1 = vcmp.eq.f32.partialorder %v12204_v48, 8.507059e+37  ;;  %v3922_v45 = vmul.f32 %v6280_v25, %v8077_v15  ;;  %v3932_v27 = vand.u32 2147483648, %v8077_v15  ;;  %vm1785_vm2 = vweird.f32 %v7231_v8  ;;  %vm2117_vm8 = vmor %vm2115_vm3, %vm2116_vm4 }
 0x226   : > { %v2114_v42 = vadd.f32 %v6278_v29, %v2113_v10  ;;  %v3949_v7 = vsel %vm8137_vm15, %v3948_v52, %v3944_v32  ;;  %v3434_v43 = vadd.f32 %v8066_v56, %v3336_v62  ;;  %v2554_v49 = vmul.f32 %v7648_v13, %v2521_v63 }
 0x227   : > { %v8171_v51 = vmul.f32 %v2108_v19, %v7925_v31  ;;  %v2122_v46 = vor.u32 1.1754944e-38, %v2121_v59  ;;  %v8174_v53 = vmul.f32 %v3949_v7, %v7927_v39  ;;  %v3923_v55 = vsub.f32 1.0, %v3922_v45 }
 0x228   : > { %v2118_v5 = vsel %vm2117_vm8, %v6278_v29, %v2114_v42  ;;  %v3930_v1 = vand.u32 2147483647, %v8077_v15  ;;  %v8177_v4 = vadd.f32 %v3532_v35, %v3434_v43  ;;  %v2586_v52 = vadd.f32 %v7679_v12, %v2554_v49  ;;  %v12221_v49 = vld [vmem:[#allocation18_spill] sm:$0xff] }
 0x229   : > { %12209 = vst [vmem:[#allocation46_spill] sm:$0xff] %v8171_v51  ;;  %v2123_v56 = vsel %vm8159_vm6, %v2122_v46, %v2118_v5  ;;  %4223 = vmatpush.msrb.mxu0 %v8174_v53  ;;  %v3924_v31 = vmul.f32 %v6280_v25, %v3923_v55  ;;  %vm3927_vm10 = vweird.f32 %v6280_v25  ;;  %v2944_v39 = vsel %vm8129_vm13, %v7687_v50, 0.0  ;;  %v12222_v46 = vld [vmem:[#allocation19_spill] sm:$0xff]  ;;  %v12223_v5 = vld [vmem:[#allocation16_spill] sm:$0xff] }
 0x22a   : > { %12210 = vst [vmem:[#allocation47_spill] sm:$0xff] %v8174_v53  ;;  %v12211_v62 = vand.u32 2147483647, %v7231_v8  ;;  %v8193_v9 = vmul.f32 %v2123_v56, %v7989_v34  ;;  %vm3926_vm14 = vweird.f32 %v8077_v15  ;;  %v3933_v35 = vor.u32 1.1754944e-38, %v3932_v27 }
 0x22b   : > { %v2879_v59 = vmul.f32 %v7706_v30, %v8012_v57  ;;  %v11955_v63 = vrot.slane %v8171_v51, 7  ;;  %v11954_v48 = vrot.slane %v8171_v51, 1  ;;  %v3925_v19 = vadd.f32 %v6280_v25, %v3924_v31  ;;  %vm3928_vm15 = vmor %vm3926_vm14, %vm3927_vm10  ;;  %v12226_v31 = vld [vmem:[#allocation15_spill] sm:$0xff] }
 0x22c   : > { %vm8188_vm11 = vcmp.eq.f32.partialorder %v12211_v62, 8.507059e+37  ;;  %12214 = vst [vmem:[#allocation48_spill] sm:$0xff] %v8193_v9  ;;  %v5789_v10 = vmul.f32 -1.442695, %v8177_v4  ;;  %v11953_v23 = vrot.slane %v8193_v9, 7  ;;  %v11952_v32 = vrot.slane %v8193_v9, 1 }
 0x22d   : > { %v2684_v34 = vadd.f32 %v7982_v16, %v2586_v52  ;;  %v2977_v15 = vmul.f32 %v7732_v41, %v2944_v39  ;;  %v12215_v45 = vsel %vm7957_vm9, %v7479_v47, %v7930_v38  ;;  %v3929_v42 = vsel %vm3928_vm15, %v6280_v25, %v3925_v19  ;;  %vm8233_vm9 = vmor %vm1785_vm2, %vm1786_vm0  ;;  %v12225_v52 = vld [vmem:[#allocation11_spill] sm:$0xff] }
 0x22e   : > { %v1898_v27 = vsel %vm8149_vm1, %v7968_v17, %v12215_v45  ;;  %vm3931_vm3 = vcmp.eq.f32.partialorder %v3930_v1, 8.507059e+37  ;;  %6281 = vpow2.f32 %v5789_v10  ;;  %v8219_v16 = vsel %vm2380_vm7, %v11955_v63, %v11953_v23  ;;  %v12227_v62 = vld [vmem:[#allocation7_spill] sm:$0xff]  ;;  %v12229_v10 = vld [vmem:[#allocation33_spill] sm:$0xff] }
 0x22f   : > { %12216 = vst [vmem:[#allocation49_spill] sm:$0xff] %v8219_v16  ;;  %v8227_v47 = vsel %vm2737_vm12, %v11954_v48, %v11952_v32  ;;  %v3934_v38 = vsel %vm3931_vm3, %v3933_v35, %v3929_v42  ;;  %v2911_v22 = vadd.f32 %v2879_v59, %v2684_v34  ;;  %v1804_v25 = vand.u32 2147483647, %v7301_v54  ;;  %v12228_v59 = vld [vmem:[#allocation20_spill] sm:$0xff]  ;;  %v12230_v42 = vld [vmem:[#allocation13_spill] sm:$0xff] }
 0x230   : > { %12217 = vst [vmem:[#allocation50_spill] sm:$0xff] %v8227_v47  ;;  %v1811_v40 = vmul.f32 %v7382_v37, %v7312_v2  ;;  %v1871_v7 = vmul.f32 %v7558_v28, %v7490_v36  ;;  %v8243_v43 = vmul.f32 %v3934_v38, %v7991_v3  ;;  %v1788_v8 = vsel %vm8233_vm9, %v7273_v14, %v12221_v49  ;;  %v12233_v17 = vld [vmem:[#allocation17_spill] sm:$0xff] }
 0x231   : > { %vm1800_vm0 = vweird.f32 %v7301_v54  ;;  %6283 = vrcp.f32 %v12222_v46  ;;  %v3009_v55 = vadd.f32 %v2977_v15, %v2911_v22  ;;  %v12224_v1 = vsub.f32 1.0, %v12223_v5  ;;  %v12234_v49 = vld [vmem:[#allocation21_spill] sm:$0xff] }
 0x232   : > { %12220 = vst [vmem:[#allocation51_spill] sm:$0xff] %v8243_v43  ;;  %v8255_v39 = vadd.f32 1.0, %v12226_v31  ;;  %v8258_v3 = vmul.f32 %v1898_v27, %v12227_v62  ;;  %4224 = vmatpush.msrb.mxu0 %v8243_v43  ;;  %v3270_v14 = vsel %vm8129_vm13, %v7817_v58, 0.0  ;;  %v1806_v35 = vand.u32 2147483648, %v7301_v54  ;;  %v12239_v54 = vld [vmem:[#allocation24_spill] sm:$0xff]  ;;  %v12240_v48 = vld [vmem:[#allocation37_spill] sm:$0xff] }
 0x233   : > { %v1798_v56 = vmul.f32 %v12225_v52, %v12224_v1  ;;  %v3043_v19 = vmul.f32 %v7762_v21, %v12228_v59  ;;  %v3141_v34 = vmul.f32 %v7782_v20, %v12229_v10  ;;  %v2289_v15 = vadd.s32 88, %v7290_v6 }
 0x234   : > { %v6282_v45 = vpop.eup %6281  ;;  %v1793_v27 = vsel %vm8188_vm11, %v12230_v42, %v1788_v8  ;;  %vm8273_vm1 = vcmp.eq.f32.partialorder %v1804_v25, 8.507059e+37  ;;  %v1812_v11 = vsub.f32 1.0, %v1811_v40  ;;  %v1872_v22 = vsub.f32 1.0, %v1871_v7 }
 0x235   : > { %v1826_v5 = vmul.f32 %v12234_v49, %v12233_v17  ;;  %v8279_v1 = vadd.f32 1.0, %v6282_v45  ;;  %v3075_v31 = vadd.f32 %v3043_v19, %v3009_v55  ;;  %v3303_v62 = vmul.f32 %v7799_v60, %v3270_v14  ;;  %v12235_v45 = vld [vmem:[#allocation3_spill] sm:$0xff] }
 0x236   : > { %v1799_v32 = vadd.f32 %v12225_v52, %v1798_v56  ;;  %vm1801_vm13 = vweird.f32 %v12225_v52  ;;  %6285 = vrcp.f32 %v8255_v39  ;;  %v11956_v29 = vrot.slane %v8258_v3, 7 }
 0x237   : > { %v8286_v25 = vpop.eup %6283  ;;  %v1807_v40 = vor.u32 1.1754944e-38, %v1806_v35  ;;  %6287 = vrcp.f32 %v8279_v1  ;;  %v3173_v7 = vadd.f32 %v3141_v34, %v3075_v31  ;;  %v2321_v8 = vand.u32 15, %v2289_v15  ;;  %vm8304_vm4 = vmor %vm1800_vm0, %vm1801_vm13 }
 0x238   : > { %v8290_v42 = vmul.f32 %v1793_v27, %v12235_v45  ;;  %v1821_v55 = vand.u32 2147483648, %v7312_v2  ;;  %v1873_v56 = vmul.f32 %v7558_v28, %v1872_v22  ;;  %v12236_v14 = vrot.slane %v7946_v18, 7 }
 0x239   : > { %v1813_v34 = vmul.f32 %v7382_v37, %v1812_v11  ;;  %v1827_v15 = vsub.f32 1.0, %v1826_v5  ;;  %v11957_v27 = vrot.slane %v7946_v18, 1  ;;  %v3335_v22 = vadd.f32 %v3303_v62, %v3173_v7 }
 0x23a   : > { %v8300_v19 = vsel %vm2380_vm7, %v11956_v29, %v12236_v14  ;;  %v1803_v31 = vsel %vm8304_vm4, %v12225_v52, %v1799_v32  ;;  %v1856_v14 = vmul.f32 %v8286_v25, %v12222_v46  ;;  %v3401_v23 = vmul.f32 %v7858_v61, %v12239_v54 }
 0x23b   : > { %v3531_v63 = vmul.f32 %v7896_v24, %v12240_v48  ;;  %v2553_v11 = vmul.f32 %v7648_v13, %v8300_v19  ;;  %v12241_v5 = vrot.slane %v7922_v33, 1  ;;  %vm8330_vm5 = vcmp.lt.s32.totalorder %v2321_v8, 15  ;;  %v12246_v48 = vld [vmem:[#allocation28_spill] sm:$0xff] }
 0x23c   : > { %v8334_v62 = vpop.eup %6285  ;;  %v8336_v7 = vor.u32 1.1754944e-38, %v1821_v55  ;;  %v1874_v35 = vadd.f32 %v7558_v28, %v1873_v56  ;;  %vm1876_vm6 = vweird.f32 %v7558_v28  ;;  %v1881_v29 = vand.u32 2147483648, %v7490_v36 }
 0x23d   : > { %v8328_v32 = vsel %vm2737_vm12, %v11957_v27, %v12241_v5  ;;  %v8341_v45 = vpop.eup %6287  ;;  %v8345_v5 = vsel %vm8273_vm1, %v1807_v40, %v1803_v31  ;;  %v8348_v8 = vadd.f32 %v7382_v37, %v1813_v34  ;;  %v1828_v27 = vmul.f32 %v12234_v49, %v1827_v15 }
 0x23e   : > { %v3433_v53 = vadd.f32 %v3401_v23, %v3335_v22  ;;  %v1857_v55 = vsub.f32 1.0, %v1856_v14  ;;  %vm1875_vm2 = vweird.f32 %v7490_v36  ;;  %v1879_v56 = vand.u32 2147483647, %v7490_v36 }
 0x23f   : > { %v2845_v43 = vsel %vm8330_vm5, %v8328_v32, 0.0  ;;  %v1841_v38 = vmul.f32 %v8334_v62, %v8255_v39  ;;  %vm8358_vm8 = vmor %vm1875_vm2, %vm1876_vm6  ;;  %v3907_v34 = vmul.f32 %v8341_v45, %v8279_v1  ;;  %v2585_v15 = vadd.f32 %v7679_v12, %v2553_v11 }
 0x240   : > { %v8364_v23 = vadd.f32 %v3531_v63, %v3433_v53  ;;  %v1878_v31 = vsel %vm8358_vm8, %v7558_v28, %v1874_v35  ;;  %v1882_v14 = vor.u32 1.1754944e-38, %v1881_v29  ;;  %v2651_v58 = vmul.f32 %v12246_v48, %v7946_v18  ;;  %v12247_v29 = vld [vmem:[#allocation40_spill] sm:$0xff] }
 0x241   : > { %v3908_v54 = vsub.f32 1.0, %v3907_v34  ;;  %v2878_v53 = vmul.f32 %v7706_v30, %v2845_v43  ;;  %v8377_v63 = vadd.f32 %v12234_v49, %v1828_v27  ;;  %v1858_v22 = vmul.f32 %v8286_v25, %v1857_v55 }
 0x242   : > { %v5788_v47 = vmul.f32 -1.442695, %v8364_v23  ;;  %vm1880_vm10 = vcmp.eq.f32.partialorder %v1879_v56, 8.507059e+37  ;;  %v1842_v36 = vsub.f32 1.0, %v1841_v38  ;;  %v2683_v28 = vadd.f32 %v2651_v58, %v2585_v15  ;;  %v12248_v38 = vld [vmem:[#allocation12_spill] sm:$0xff]  ;;  %v12249_v15 = vld [vmem:[#allocation41_spill] sm:$0xff] }
 0x243   : > { %v1883_v40 = vsel %vm1880_vm10, %v1882_v14, %v1878_v31  ;;  %v2976_v35 = vmul.f32 %v7732_v41, %v12247_v29  ;;  %vm1816_vm11 = vweird.f32 %v7382_v37  ;;  %v1866_v34 = vand.u32 2147483648, %v12222_v46  ;;  %v8401_v31 = vpop.f32.mrf.mxu1 }
 0x244   : > { %v3909_v43 = vmul.f32 %v8341_v45, %v3908_v54  ;;  %v3917_v27 = vand.u32 2147483648, %v8279_v1  ;;  %6289 = vpow2.f32 %v5788_v47  ;;  %vm1831_vm14 = vweird.f32 %v12234_v49  ;;  %12250 = vst [vmem:[#allocation18_spill] sm:$0xff] %v8401_v31 }
 0x245   : > { %vm1860_vm15 = vweird.f32 %v12222_v46  ;;  %vm3912_vm3 = vweird.f32 %v8341_v45  ;;  %v3915_v58 = vand.u32 2147483647, %v8279_v1  ;;  %v2910_v55 = vadd.f32 %v2878_v53, %v2683_v28 }
 0x246   : > { %vm1815_vm9 = vweird.f32 %v7312_v2  ;;  %v1859_v56 = vadd.f32 %v8286_v25, %v1858_v22  ;;  %vm1861_vm0 = vweird.f32 %v8286_v25  ;;  %v8395_v54 = vmul.f32 %v1883_v40, %v12248_v38 }
 0x247   : > { %v3107_v47 = vsel %vm8330_vm5, %v12249_v15, 0.0  ;;  %vm1830_vm1 = vweird.f32 %v12233_v17  ;;  %v3910_v14 = vadd.f32 %v8341_v45, %v3909_v43  ;;  %vm3911_vm13 = vweird.f32 %v8279_v1  ;;  %vm8412_vm6 = vmor %vm1860_vm15, %vm1861_vm0 }
 0x248   : > { %v3008_v53 = vadd.f32 %v2976_v35, %v2910_v55  ;;  %v2288_v22 = vadd.s32 80, %v7290_v6  ;;  %v1843_v28 = vmul.f32 %v8334_v62, %v1842_v36  ;;  %v1864_v40 = vand.u32 2147483647, %v12222_v46  ;;  %vm3913_vm4 = vmor %vm3911_vm13, %vm3912_vm3  ;;  %v12253_v35 = vld [vmem:[#allocation22_spill] sm:$0xff] }
 0x249   : > { %v1867_v38 = vor.u32 1.1754944e-38, %v1866_v34  ;;  %v3918_v11 = vor.u32 1.1754944e-38, %v3917_v27  ;;  %v3914_v1 = vsel %vm3913_vm4, %v8341_v45, %v3910_v14  ;;  %vm3916_vm2 = vcmp.eq.f32.partialorder %v3915_v58, 8.507059e+37  ;;  %vm8462_vm3 = vmor %vm1815_vm9, %vm1816_vm11 }
 0x24a   : > { %v3042_v43 = vmul.f32 %v7762_v21, %v12253_v35  ;;  %v3140_v36 = vmul.f32 %v7782_v20, %v3107_v47  ;;  %v6290_v55 = vpop.eup %6289  ;;  %v1863_v34 = vsel %vm8412_vm6, %v8286_v25, %v1859_v56  ;;  %v2355_v27 = vrot.slane %v8395_v54, 7  ;;  %vm8486_vm11 = vmor %vm1830_vm1, %vm1831_vm14 }
 0x24b   : > { %v3919_v46 = vsel %vm3916_vm2, %v3918_v11, %v3914_v1  ;;  %v2320_v9 = vand.u32 15, %v2288_v22  ;;  %v8427_v31 = vadd.f32 1.0, %v6290_v55  ;;  %v3302_v58 = vmul.f32 %v7799_v60, %v7638_v26  ;;  %v12261_v22 = vld [vmem:[#allocation23_spill] sm:$0xff] }
 0x24c   : > { %v8425_v51 = vmul.f32 %v3919_v46, %v8177_v4  ;;  %v3074_v45 = vadd.f32 %v3042_v43, %v3008_v53  ;;  %v12255_v47 = vand.u32 2147483647, %v7312_v2  ;;  %vm1865_vm10 = vcmp.eq.f32.partialorder %v1864_v40, 8.507059e+37 }
 0x24d   : > { %v3497_v16 = vsel %vm8330_vm5, %v7674_v44, 0.0  ;;  %v12258_v4 = vrot.slane %v8258_v3, 7  ;;  %vm8446_vm15 = vcmp.ge.s32.totalorder %v2320_v9, 1  ;;  %v1868_v26 = vsel %vm1865_vm10, %v1867_v38, %v1863_v34  ;;  %v12267_v34 = vld [vmem:[#allocation10_spill] sm:$0xff] }
 0x24e   : > { %12254 = vst [vmem:[#allocation19_spill] sm:$0xff] %v8425_v51  ;;  %vm8433_vm8 = vcmp.eq.f32.partialorder %v12255_v47, 8.507059e+37  ;;  %v2713_v56 = vrot.slane %v8258_v3, 1  ;;  %4225 = vmatpush.msrb.mxu0 %v8425_v51  ;;  %6291 = vrcp.f32 %v8427_v31  ;;  %v3172_v53 = vadd.f32 %v3140_v36, %v3074_v45 }
 0x24f   : > { %v8444_v25 = vsel %vm2380_vm7, %v2355_v27, %v12258_v4  ;;  %v1844_v44 = vadd.f32 %v8334_v62, %v1843_v28  ;;  %vm1846_vm5 = vweird.f32 %v8334_v62  ;;  %v1851_v52 = vand.u32 2147483648, %v8255_v39 }
 0x250   : > { %v3400_v9 = vmul.f32 %v7858_v61, %v12261_v22  ;;  %v3334_v38 = vadd.f32 %v3302_v58, %v3172_v53  ;;  %v3530_v1 = vmul.f32 %v7896_v24, %v3497_v16  ;;  %v2519_v28 = vsel %vm8446_vm15, %v8444_v25, 0.0  ;;  %v8511_v16 = vpop.f32.mrf.mxu1  ;;  %v12275_v58 = vld [vmem:[#allocation9_spill] sm:$0xff] }
 0x251   : > { %v12264_v43 = vrot.slane %v7946_v18, 1  ;;  %v1818_v2 = vsel %vm8462_vm3, %v7382_v37, %v8348_v8  ;;  %vm1845_vm9 = vweird.f32 %v8255_v39  ;;  %v8492_v46 = vmul.f32 %v1868_v26, %v12267_v34 }
 0x252   : > { %v2552_v45 = vmul.f32 %v7648_v13, %v2519_v28  ;;  %v1833_v37 = vsel %vm8486_vm11, %v12234_v49, %v8377_v63  ;;  %v12268_v8 = vand.u32 2147483647, %v12233_v17  ;;  %vm8507_vm14 = vmor %vm1845_vm9, %vm1846_vm5  ;;  %v3432_v13 = vadd.f32 %v3400_v9, %v3334_v38 }
 0x253   : > { %v8476_v36 = vsel %vm2737_vm12, %v2713_v56, %v12264_v43  ;;  %v2942_v4 = vsel %vm8446_vm15, %v8127_v0, 0.0  ;;  %v1848_v49 = vsel %vm8507_vm14, %v8334_v62, %v1844_v44  ;;  %v2650_v63 = vmul.f32 %v12246_v48, %v8258_v3 }
 0x254   : > { %vm8501_vm0 = vcmp.eq.f32.partialorder %v12268_v8, 8.507059e+37  ;;  %v2584_v26 = vadd.f32 %v7679_v12, %v2552_v45  ;;  %v2877_v53 = vmul.f32 %v7706_v30, %v8476_v36  ;;  %v6292_v22 = vpop.eup %6291  ;;  %v12273_v40 = vand.u32 2147483648, %v12233_v17 }
 0x255   : > { %v12274_v38 = vand.u32 2147483647, %v8255_v39  ;;  %v1852_v28 = vor.u32 1.1754944e-38, %v1851_v52  ;;  %v8528_v43 = vadd.f32 %v3530_v1, %v3432_v13  ;;  %v2354_v62 = vrot.slane %v8492_v46, 7 }
 0x256   : > { %v1837_v9 = vor.u32 1.1754944e-38, %v12273_v40  ;;  %v3892_v44 = vmul.f32 %v6292_v22, %v8427_v31  ;;  %v2682_v48 = vadd.f32 %v2650_v63, %v2584_v26  ;;  %v2975_v12 = vmul.f32 %v7732_v41, %v2942_v4 }
 0x257   : > { %vm1850_vm1 = vcmp.eq.f32.partialorder %v12274_v38, 8.507059e+37  ;;  %v8536_v30 = vsel %vm8433_vm8, %v8336_v7, %v1818_v2  ;;  %v5787_v52 = vmul.f32 -1.442695, %v8528_v43  ;;  %v8545_v1 = vsel %vm2380_vm7, %v2354_v62, %v2355_v27 }
 0x258   : > { %v1838_v17 = vsel %vm8501_vm0, %v1837_v9, %v1833_v37  ;;  %v1853_v39 = vsel %vm1850_vm1, %v1852_v28, %v1848_v49  ;;  %v3893_v55 = vsub.f32 1.0, %v3892_v44  ;;  %v3900_v34 = vand.u32 2147483647, %v8427_v31  ;;  %v8564_v49 = vld [vmem:[%s11865_s5] ss:$0 sm:$0xff] }
 0x259   : > { %v2909_v45 = vadd.f32 %v2877_v53, %v2682_v48  ;;  %v3902_v14 = vand.u32 2147483648, %v8427_v31  ;;  %6293 = vpow2.f32 %v5787_v52  ;;  %v3041_v7 = vmul.f32 %v7762_v21, %v7922_v33  ;;  %v8570_v53 = vpop.f32.mrf.mxu1  ;;  %v12276_v52 = vld [vmem:[#allocation8_spill] sm:$0xff] }
 0x25a   : > { %v3268_v2 = vsel %vm8446_vm15, %v7687_v50, 0.0  ;;  %v3894_v37 = vmul.f32 %v6292_v22, %v3893_v55  ;;  %vm3897_vm13 = vweird.f32 %v6292_v22  ;;  %v3139_v27 = vmul.f32 %v7782_v20, %v8012_v57 }
 0x25b   : > { %v3007_v8 = vadd.f32 %v2975_v12, %v2909_v45  ;;  %v8557_v47 = vmul.f32 %v1853_v39, %v12275_v58  ;;  %v2712_v13 = vrot.slane %v8395_v54, 1  ;;  %v2287_v4 = vadd.s32 72, %v7290_v6 }
 0x25c   : > { %v2551_v50 = vmul.f32 %v8564_v49, %v8545_v1  ;;  %v3895_v11 = vadd.f32 %v6292_v22, %v3894_v37  ;;  %vm3896_vm4 = vweird.f32 %v8427_v31  ;;  %v3301_v26 = vmul.f32 %v7799_v60, %v3268_v2  ;;  %v8583_v31 = vld [vmem:[%s11866_s6] ss:$0 sm:$0xff] }
 0x25d   : > { %v3073_v63 = vadd.f32 %v3041_v7, %v3007_v8  ;;  %vm3898_vm6 = vmor %vm3896_vm4, %vm3897_vm13  ;;  %vm3901_vm2 = vcmp.eq.f32.partialorder %v3900_v34, 8.507059e+37  ;;  %v3903_v40 = vor.u32 1.1754944e-38, %v3902_v14  ;;  %v2319_v9 = vand.u32 15, %v2287_v4 }
 0x25e   : > { %v8578_v38 = vsel %vm2737_vm12, %v2712_v13, %v2713_v56  ;;  %v3899_v28 = vsel %vm3898_vm6, %v6292_v22, %v3895_v11  ;;  %v2583_v48 = vadd.f32 %v8583_v31, %v2551_v50  ;;  %v2286_v12 = vadd.s32 64, %v7290_v6  ;;  %v8593_v56 = vld [vmem:[%s11865_s5 + $0x1] ss:$0 sm:$0xff] }
 0x25f   : > { %v3171_v44 = vadd.f32 %v3139_v27, %v3073_v63  ;;  %v6294_v39 = vpop.eup %6293  ;;  %v8588_v55 = vmul.f32 %v1838_v17, %v12276_v52  ;;  %v2649_v22 = vmul.f32 %v8593_v56, %v8395_v54  ;;  %v3904_v34 = vsel %vm3901_vm2, %v3903_v40, %v3899_v28  ;;  %v12281_v40 = vld [vmem:[#allocation4_spill] sm:$0xff] }
 0x260   : > { %vm8597_vm8 = vcmp.lt.s32.totalorder %v2319_v9, 15  ;;  %v8602_v14 = vmul.f32 %v3904_v34, %v8364_v23  ;;  %v8604_v7 = vadd.f32 1.0, %v6294_v39  ;;  %v2353_v37 = vrot.slane %v8557_v47, 7  ;;  %v8617_v23 = vld [vmem:[%s11865_s5 + $0x2] ss:$0 sm:$0xff] }
 0x261   : > { %v3333_v17 = vadd.f32 %v3301_v26, %v3171_v44  ;;  %v2843_v2 = vsel %vm8597_vm8, %v8578_v38, 0.0  ;;  %v3399_v8 = vmul.f32 %v7858_v61, %v12228_v59  ;;  %v3529_v27 = vmul.f32 %v7896_v24, %v12229_v10  ;;  %v12280_v59 = vld [vmem:[#allocation14_spill] sm:$0xff] }
 0x262   : > { %12279 = vst [vmem:[#allocation16_spill] sm:$0xff] %v8602_v14  ;;  %v2876_v58 = vmul.f32 %v8617_v23, %v2843_v2  ;;  %4226 = vmatpush.msrb.mxu0 %v8602_v14  ;;  %6295 = vrcp.f32 %v8604_v7  ;;  %v2681_v4 = vadd.f32 %v2649_v22, %v2583_v48  ;;  %v2974_v50 = vmul.f32 %v7732_v41, %v8300_v19  ;;  %v12282_v48 = vld [vmem:[#allocation5_spill] sm:$0xff] }
 0x263   : > { %v2318_v11 = vand.u32 15, %v2286_v12  ;;  %v11967_v63 = vrot.slane %v12280_v59, 7  ;;  %v11968_v10 = vrot.slane %v8290_v42, 7  ;;  %v3105_v26 = vsel %vm8597_vm8, %v8328_v32, 0.0 }
 0x264   : > { %v8631_v9 = vmul.f32 %v8345_v5, %v12281_v40  ;;  %v3431_v28 = vadd.f32 %v3399_v8, %v3333_v17  ;;  %v2908_v44 = vadd.f32 %v2876_v58, %v2681_v4  ;;  %v8637_v41 = vsel %vm2380_vm7, %v2353_v37, %v2354_v62  ;;  %v8661_v8 = vpop.f32.mrf.mxu1 }
 0x265   : > { %v8641_v12 = vmul.f32 %v8536_v30, %v12282_v48  ;;  %v11972_v39 = vrot.slane %v8588_v55, 7  ;;  %v2711_v52 = vrot.slane %v8492_v46, 1  ;;  %v3040_v5 = vmul.f32 %v7762_v21, %v7946_v18 }
 0x266   : > { %v8647_v22 = vadd.f32 %v3529_v27, %v3431_v28  ;;  %v3006_v34 = vadd.f32 %v2974_v50, %v2908_v44  ;;  %v3138_v17 = vmul.f32 %v7782_v20, %v3105_v26  ;;  %vm8650_vm10 = vcmp.ge.s32.totalorder %v2318_v11, 1 }
 0x267   : > { %v8658_v62 = vsel %vm2380_vm7, %v11972_v39, %v2353_v37  ;;  %v11970_v30 = vrot.slane %v8557_v47, 1  ;;  %v3300_v21 = vmul.f32 %v7799_v60, %v12247_v29  ;;  %v2517_v20 = vsel %vm8650_vm10, %v8637_v41, 0.0 }
 0x268   : > { %v6296_v27 = vpop.eup %6295  ;;  %v5786_v58 = vmul.f32 -1.442695, %v8647_v22  ;;  %v3072_v4 = vadd.f32 %v3040_v5, %v3006_v34  ;;  %v2550_v50 = vmul.f32 %v8564_v49, %v2517_v20  ;;  %v8674_v37 = vsel %vm2737_vm12, %v2711_v52, %v2712_v13 }
 0x269   : > { %v2648_v11 = vmul.f32 %v8593_v56, %v8492_v46  ;;  %v3877_v60 = vmul.f32 %v6296_v27, %v8604_v7  ;;  %v3398_v29 = vmul.f32 %v7858_v61, %v12253_v35  ;;  %v3495_v26 = vsel %vm8597_vm8, %v12249_v15, 0.0 }
 0x26a   : > { %v3885_v40 = vand.u32 2147483647, %v8604_v7  ;;  %6297 = vpow2.f32 %v5786_v58  ;;  %v3170_v28 = vadd.f32 %v3138_v17, %v3072_v4  ;;  %v2940_v13 = vsel %vm8650_vm10, %v8444_v25, 0.0  ;;  %v8699_v58 = vld [vmem:[%s11865_s5 + $0x3] ss:$0 sm:$0xff] }
 0x26b   : > { %v3878_v44 = vsub.f32 1.0, %v3877_v60  ;;  %v3887_v48 = vand.u32 2147483648, %v8604_v7  ;;  %v2582_v5 = vadd.f32 %v8583_v31, %v2550_v50  ;;  %v2875_v61 = vmul.f32 %v8617_v23, %v8674_v37 }
 0x26c   : > { %v3332_v35 = vadd.f32 %v3300_v21, %v3170_v28  ;;  %v3528_v45 = vmul.f32 %v7896_v24, %v3495_v26  ;;  %v2285_v15 = vadd.s32 56, %v7290_v6  ;;  %v2549_v34 = vmul.f32 %v8564_v49, %v8658_v62 }
 0x26d   : > { %v3879_v17 = vmul.f32 %v6296_v27, %v3878_v44  ;;  %vm3882_vm15 = vweird.f32 %v6296_v27  ;;  %v2680_v20 = vadd.f32 %v2648_v11, %v2582_v5  ;;  %v2973_v4 = vmul.f32 %v8699_v58, %v2940_v13 }
 0x26e   : > { %v11971_v50 = vrot.slane %v8641_v12, 7  ;;  %vm3881_vm5 = vweird.f32 %v8604_v7  ;;  %v3430_v24 = vadd.f32 %v3398_v29, %v3332_v35  ;;  %v2317_v21 = vand.u32 15, %v2285_v15 }
 0x26f   : > { %v3880_v60 = vadd.f32 %v6296_v27, %v3879_v17  ;;  %vm3886_vm3 = vcmp.eq.f32.partialorder %v3885_v40, 8.507059e+37  ;;  %v2907_v26 = vadd.f32 %v2875_v61, %v2680_v20  ;;  %v8708_v11 = vsel %vm2737_vm12, %v11970_v30, %v2711_v52  ;;  %vm3883_vm11 = vmor %vm3881_vm5, %vm3882_vm15  ;;  %v1627_v40 = vpop.f32.mrf.mxu1  ;;  %v8742_v17 = vld [vmem:[%s11865_s5 + $0x5] ss:$0 sm:$0xff] }
 0x270   : > { %v6298_v28 = vpop.eup %6297  ;;  %v3888_v44 = vor.u32 1.1754944e-38, %v3887_v48  ;;  %v8710_v5 = vadd.f32 %v3528_v45, %v3430_v24  ;;  %v3266_v7 = vsel %vm8650_vm10, %v8127_v0, 0.0  ;;  %v2581_v29 = vadd.f32 %v8583_v31, %v2549_v34 }
 0x271   : > { %v3884_v13 = vsel %vm3883_vm11, %v6296_v27, %v3880_v60  ;;  %v8716_v61 = vadd.f32 1.0, %v6298_v28  ;;  %v3005_v35 = vadd.f32 %v2973_v4, %v2907_v26  ;;  %vm8718_vm9 = vcmp.lt.s32.totalorder %v2317_v21, 15  ;;  %v8735_v27 = vld [vmem:[%s11865_s5 + $0x4] ss:$0 sm:$0xff]  ;;  %v8750_v4 = vld [vmem:[%s11864_s4] ss:$0 sm:$0xff] }
 0x272   : > { %v2647_v52 = vmul.f32 %v8593_v56, %v8557_v47  ;;  %v3889_v48 = vsel %vm3886_vm3, %v3888_v44, %v3884_v13  ;;  %v5785_v45 = vmul.f32 -1.442695, %v8710_v5  ;;  %v2841_v0 = vsel %vm8718_vm9, %v8708_v11, 0.0  ;;  %v8758_v21 = vld [vmem:[%s11865_s5 + $0x6] ss:$0 sm:$0xff] }
 0x273   : > { %v8729_v2 = vmul.f32 %v3889_v48, %v8528_v43  ;;  %6299 = vrcp.f32 %v8716_v61  ;;  %v3039_v34 = vmul.f32 %v8735_v27, %v8258_v3  ;;  %v3137_v20 = vmul.f32 %v8742_v17, %v8476_v36 }
 0x274   : > { %v11969_v43 = vrot.slane %v8631_v9, 7  ;;  %v8753_v24 = vadd.f32 %v8750_v4, %v1627_v40  ;;  %6301 = vpow2.f32 %v5785_v45  ;;  %v3299_v60 = vmul.f32 %v8758_v21, %v3266_v7 }
 0x275   : > { %12287 = vst [vmem:[#allocation11_spill] sm:$0xff] %v8729_v2  ;;  %4227 = vmatpush.msrb.mxu0 %v8729_v2  ;;  %v3071_v26 = vadd.f32 %v3039_v34, %v3005_v35  ;;  %v2679_v28 = vadd.f32 %v2647_v52, %v2581_v29  ;;  %v2874_v44 = vmul.f32 %v8617_v23, %v2841_v0  ;;  %v3103_v0 = vsel %vm8718_vm9, %v8578_v38, 0.0 }
 0x276   : > { %v2972_v13 = vmul.f32 %v8699_v58, %v8545_v1  ;;  %v8771_v40 = vsel %vm2380_vm7, %v11967_v63, %v11968_v10  ;;  %v8779_v7 = vsel %vm2380_vm7, %v11969_v43, %v11971_v50  ;;  %v8783_v29 = vmul.f32 %v8593_v56, %v8641_v12  ;;  %v8811_v50 = vld [vmem:[%s11865_s5 + $0x8] ss:$0 sm:$0xff] }
 0x277   : > { %v2646_v52 = vmul.f32 %v8593_v56, %v8588_v55  ;;  %v3169_v48 = vadd.f32 %v3137_v20, %v3071_v26  ;;  %v2906_v45 = vadd.f32 %v2874_v44, %v2679_v28  ;;  %v8794_v63 = vadd.f32 %v8750_v4, %v8661_v8  ;;  %v8801_v20 = vld [vmem:[%s11865_s5 + $0x7] ss:$0 sm:$0xff] }
 0x278   : > { %v5772_v10 = vmul.f32 -1.442695, %v8753_v24  ;;  %v2284_v43 = vadd.s32 48, %v7290_v6  ;;  %v3397_v26 = vmul.f32 %v8801_v20, %v7922_v33  ;;  %v3038_v44 = vmul.f32 %v8735_v27, %v8395_v54 }
 0x279   : > { %12288 = vst [vmem:[#allocation15_spill] sm:$0xff] %v8794_v63  ;;  %v6300_v35 = vpop.eup %6299  ;;  %v3331_v30 = vadd.f32 %v3299_v60, %v3169_v48  ;;  %v3004_v28 = vadd.f32 %v2972_v13, %v2906_v45  ;;  %v3527_v60 = vmul.f32 %v8811_v50, %v8012_v57  ;;  %v3136_v48 = vmul.f32 %v8742_v17, %v3103_v0 }
 0x27a   : > { %v6302_v8 = vpop.eup %6301  ;;  %v3862_v34 = vmul.f32 %v6300_v35, %v8716_v61  ;;  %v2316_v39 = vand.u32 15, %v2284_v43  ;;  %v3298_v33 = vmul.f32 %v8758_v21, %v8300_v19  ;;  %v3493_v13 = vsel %vm8718_vm9, %v8328_v32, 0.0 }
 0x27b   : > { %v8816_v51 = vadd.f32 1.0, %v6302_v8  ;;  %v12289_v45 = vrot.slane %v8588_v55, 7  ;;  %v12290_v14 = vrot.slane %v8641_v12, 7  ;;  %v3429_v0 = vadd.f32 %v3397_v26, %v3331_v30 }
 0x27c   : > { %v3863_v57 = vsub.f32 1.0, %v3862_v34  ;;  %v3070_v43 = vadd.f32 %v3038_v44, %v3004_v28  ;;  %vm8831_vm0 = vcmp.ge.s32.totalorder %v2316_v39, 1  ;;  %vm3866_vm14 = vweird.f32 %v8716_v61 }
 0x27d   : > { %v8829_v2 = vsel %vm2380_vm7, %v12290_v14, %v12289_v45  ;;  %v3870_v19 = vand.u32 2147483647, %v8716_v61  ;;  %v3872_v32 = vand.u32 2147483648, %v8716_v61  ;;  %6303 = vrcp.f32 %v8816_v51 }
 0x27e   : > { %v3864_v15 = vmul.f32 %v6300_v35, %v3863_v57  ;;  %vm3867_vm1 = vweird.f32 %v6300_v35  ;;  %v8839_v59 = vadd.f32 %v3527_v60, %v3429_v0  ;;  %v3168_v14 = vadd.f32 %v3136_v48, %v3070_v43 }
 0x27f   : > { %v3396_v30 = vmul.f32 %v8801_v20, %v7946_v18  ;;  %v3526_v39 = vmul.f32 %v8811_v50, %v3493_v13  ;;  %v2515_v34 = vsel %vm8831_vm0, %v8829_v2, 0.0  ;;  %v12293_v26 = vrot.slane %v8557_v47, 1  ;;  %vm3868_vm13 = vmor %vm3866_vm14, %vm3867_vm1 }
 0x280   : > { %v12294_v28 = vrot.slane %v8588_v55, 1  ;;  %v3865_v60 = vadd.f32 %v6300_v35, %v3864_v15  ;;  %v5784_v48 = vmul.f32 -1.442695, %v8839_v59  ;;  %v3330_v45 = vadd.f32 %v3298_v33, %v3168_v14 }
 0x281   : > { %v2548_v18 = vmul.f32 %v8564_v49, %v2515_v34  ;;  %6305 = vpow2.f32 %v5772_v10  ;;  %vm3871_vm4 = vcmp.eq.f32.partialorder %v3870_v19, 8.507059e+37  ;;  %v3873_v13 = vor.u32 1.1754944e-38, %v3872_v32 }
 0x282   : > { %v8853_v44 = vsel %vm2737_vm12, %v12294_v28, %v12293_v26  ;;  %v2938_v57 = vsel %vm8831_vm0, %v8637_v41, 0.0  ;;  %v3869_v0 = vsel %vm3868_vm13, %v6300_v35, %v3865_v60  ;;  %6307 = vpow2.f32 %v5784_v48 }
 0x283   : > { %12295 = vst [vmem:[#allocation7_spill] sm:$0xff] %v8853_v44  ;;  %v3428_v43 = vadd.f32 %v3396_v30, %v3330_v45  ;;  %v2580_v15 = vadd.f32 %v8583_v31, %v2548_v18  ;;  %v6304_v26 = vpop.eup %6303  ;;  %v3874_v28 = vsel %vm3871_vm4, %v3873_v13, %v3869_v0  ;;  %vm3851_vm6 = vweird.f32 %v8816_v51 }
 0x284   : > { %v2873_v10 = vmul.f32 %v8617_v23, %v8853_v44  ;;  %v2283_v61 = vadd.s32 40, %v7290_v6  ;;  %v8868_v33 = vmul.f32 %v3874_v28, %v8647_v22  ;;  %v3847_v19 = vmul.f32 %v6304_v26, %v8816_v51 }
 0x285   : > { %v3855_v35 = vand.u32 2147483647, %v8816_v51  ;;  %v8872_v32 = vadd.f32 %v3526_v39, %v3428_v43  ;;  %v2678_v14 = vadd.f32 %v2646_v52, %v2580_v15  ;;  %v2971_v30 = vmul.f32 %v8699_v58, %v2938_v57 }
 0x286   : > { %12296 = vst [vmem:[#allocation20_spill] sm:$0xff] %v8868_v33  ;;  %v2315_v34 = vand.u32 15, %v2283_v61  ;;  %v2547_v60 = vmul.f32 %v8564_v49, %v8779_v7  ;;  %4228 = vmatpush.msrb.mxu0 %v8868_v33  ;;  %v3848_v48 = vsub.f32 1.0, %v3847_v19  ;;  %v3857_v45 = vand.u32 2147483648, %v8816_v51 }
 0x287   : > { %v5783_v22 = vmul.f32 -1.442695, %v8872_v32  ;;  %v12297_v18 = vrot.slane %v8588_v55, 1  ;;  %v12298_v13 = vrot.slane %v8641_v12, 1  ;;  %v6306_v39 = vpop.eup %6305  ;;  %v2905_v57 = vadd.f32 %v2873_v10, %v2678_v14 }
 0x288   : > { %v3037_v0 = vmul.f32 %v8735_v27, %v8492_v46  ;;  %v2579_v43 = vadd.f32 %v8583_v31, %v2547_v60  ;;  %vm8891_vm2 = vcmp.lt.s32.totalorder %v2315_v34, 15  ;;  %v6308_v28 = vpop.eup %6307  ;;  %v3849_v61 = vmul.f32 %v6304_v26, %v3848_v48 }
 0x289   : > { %v8886_v52 = vsel %vm2737_vm12, %v12298_v13, %v12297_v18  ;;  %vm3852_vm8 = vweird.f32 %v6304_v26  ;;  %6309 = vpow2.f32 %v5783_v22  ;;  %v8898_v18 = vadd.f32 1.0, %v6308_v28 }
 0x28a   : > { %v2839_v19 = vsel %vm8891_vm2, %v8886_v52, 0.0  ;;  %v3003_v10 = vadd.f32 %v2971_v30, %v2905_v57  ;;  %v3135_v14 = vmul.f32 %v8742_v17, %v8674_v37  ;;  %v3264_v34 = vsel %vm8831_vm0, %v8444_v25, 0.0  ;;  %vm3853_vm10 = vmor %vm3851_vm6, %vm3852_vm8 }
 0x28b   : > { %v3850_v60 = vadd.f32 %v6304_v26, %v3849_v61  ;;  %v2677_v13 = vadd.f32 %v8783_v29, %v2579_v43  ;;  %v2872_v48 = vmul.f32 %v8617_v23, %v2839_v19  ;;  %v2970_v22 = vmul.f32 %v8699_v58, %v8658_v62 }
 0x28c   : > { %v5771_v33 = vmul.f32 -1.442695, %v8794_v63  ;;  %vm3856_vm15 = vcmp.eq.f32.partialorder %v3855_v35, 8.507059e+37  ;;  %v3858_v30 = vor.u32 1.1754944e-38, %v3857_v45  ;;  %6311 = vrcp.f32 %v8898_v18  ;;  %v1629_v35 = vpop.f32.mrf.mxu1 }
 0x28d   : > { %v3854_v57 = vsel %vm3853_vm10, %v6304_v26, %v3850_v60  ;;  %v3069_v8 = vadd.f32 %v3037_v0, %v3003_v10  ;;  %v3297_v25 = vmul.f32 %v8758_v21, %v3264_v34  ;;  %v2904_v28 = vadd.f32 %v2872_v48, %v2677_v13 }
 0x28e   : > { %v3859_v29 = vsel %vm3856_vm15, %v3858_v30, %v3854_v57  ;;  %v3101_v43 = vsel %vm8891_vm2, %v8708_v11, 0.0  ;;  %v8923_v26 = vmul.f32 %v8564_v49, %v8771_v40  ;;  %v2644_v0 = vmul.f32 %v8593_v56, %v8631_v9 }
 0x28f   : > { %v6310_v61 = vpop.eup %6309  ;;  %v8919_v51 = vmul.f32 %v3859_v29, %v8710_v5  ;;  %v3167_v45 = vadd.f32 %v3135_v14, %v3069_v8  ;;  %v3002_v63 = vadd.f32 %v2970_v22, %v2904_v28  ;;  %6313 = vpow2.f32 %v5771_v33 }
 0x290   : > { %v8927_v10 = vadd.f32 1.0, %v6310_v61  ;;  %v3036_v5 = vmul.f32 %v8735_v27, %v8557_v47  ;;  %v3134_v60 = vmul.f32 %v8742_v17, %v3101_v43  ;;  %v2282_v14 = vadd.s32 32, %v7290_v6 }
 0x291   : > { %12301 = vst [vmem:[#allocation33_spill] sm:$0xff] %v8919_v51  ;;  %4229 = vmatpush.msrb.mxu0 %v8919_v51  ;;  %v3329_v34 = vadd.f32 %v3297_v25, %v3167_v45  ;;  %v8937_v22 = vadd.f32 %v8750_v4, %v1629_v35  ;;  %v3395_v33 = vmul.f32 %v8801_v20, %v8258_v3  ;;  %v8946_v28 = vadd.f32 1.0, %v6306_v39 }
 0x292   : > { %v6312_v13 = vpop.eup %6311  ;;  %6315 = vrcp.f32 %v8927_v10  ;;  %v3525_v57 = vmul.f32 %v8811_v50, %v8476_v36  ;;  %v3068_v8 = vadd.f32 %v3036_v5, %v3002_v63  ;;  %v3296_v25 = vmul.f32 %v8758_v21, %v8545_v1 }
 0x293   : > { %v3832_v30 = vmul.f32 %v6312_v13, %v8898_v18  ;;  %v3840_v29 = vand.u32 2147483647, %v8898_v18  ;;  %v3491_v43 = vsel %vm8891_vm2, %v8578_v38, 0.0  ;;  %v12302_v61 = vrot.slane %v8631_v9, 7 }
 0x294   : > { %v12303_v3 = vrot.slane %v8290_v42, 7  ;;  %v3427_v63 = vadd.f32 %v3395_v33, %v3329_v34  ;;  %v3166_v45 = vadd.f32 %v3134_v60, %v3068_v8  ;;  %v2314_v1 = vand.u32 15, %v2282_v14 }
 0x295   : > { %v3833_v36 = vsub.f32 1.0, %v3832_v30  ;;  %v6314_v39 = vpop.eup %6313  ;;  %vm3836_vm5 = vweird.f32 %v8898_v18  ;;  %vm3837_vm3 = vweird.f32 %v6312_v13  ;;  %v3842_v5 = vand.u32 2147483648, %v8898_v18 }
 0x296   : > { %v8958_v35 = vsel %vm2380_vm7, %v12303_v3, %v12302_v61  ;;  %v5773_v38 = vmul.f32 -1.442695, %v8937_v22  ;;  %v8963_v19 = vadd.f32 %v3525_v57, %v3427_v63  ;;  %v3328_v48 = vadd.f32 %v3296_v25, %v3166_v45  ;;  %vm3838_vm0 = vmor %vm3836_vm5, %vm3837_vm3 }
 0x297   : > { %v3834_v15 = vmul.f32 %v6312_v13, %v3833_v36  ;;  %vm8965_vm11 = vcmp.ge.s32.totalorder %v2314_v1, 1  ;;  %vm8969_vm9 = vcmp.eq.f32.partialorder %v3840_v29, 8.507059e+37  ;;  %v3394_v60 = vmul.f32 %v8801_v20, %v8395_v54 }
 0x298   : > { %v6316_v30 = vpop.eup %6315  ;;  %v3524_v14 = vmul.f32 %v8811_v50, %v3491_v43  ;;  %v2513_v33 = vsel %vm8965_vm11, %v8958_v35, 0.0  ;;  %v5782_v25 = vmul.f32 -1.442695, %v8963_v19  ;;  %v12308_v61 = vrot.slane %v8641_v12, 1 }
 0x299   : > { %v3835_v57 = vadd.f32 %v6312_v13, %v3834_v15  ;;  %v3817_v8 = vmul.f32 %v6316_v30, %v8927_v10  ;;  %v12309_v29 = vrot.slane %v8631_v9, 1  ;;  %v3843_v54 = vor.u32 1.1754944e-38, %v3842_v5 }
 0x29a   : > { %v3827_v43 = vand.u32 2147483648, %v8927_v10  ;;  %v3426_v36 = vadd.f32 %v3394_v60, %v3328_v48  ;;  %v2546_v63 = vmul.f32 %v8564_v49, %v2513_v33  ;;  %6317 = vpow2.f32 %v5782_v25 }
 0x29b   : > { %v8987_v3 = vsel %vm2737_vm12, %v12309_v29, %v12308_v61  ;;  %v3839_v45 = vsel %vm3838_vm0, %v6312_v13, %v3835_v57  ;;  %v3818_v1 = vsub.f32 1.0, %v3817_v8  ;;  %v2936_v15 = vsel %vm8965_vm11, %v8829_v2, 0.0 }
 0x29c   : > { %v3844_v61 = vsel %vm8969_vm9, %v3843_v54, %v3839_v45  ;;  %v8999_v29 = vadd.f32 %v3524_v14, %v3426_v36  ;;  %v2578_v18 = vadd.f32 %v8583_v31, %v2546_v63  ;;  %v2871_v5 = vmul.f32 %v8617_v23, %v8987_v3 }
 0x29d   : > { %v9005_v48 = vmul.f32 %v3844_v61, %v8839_v59  ;;  %v3819_v13 = vmul.f32 %v6316_v30, %v3818_v1  ;;  %vm3822_vm14 = vweird.f32 %v6316_v30  ;;  %v3825_v60 = vand.u32 2147483647, %v8927_v10 }
 0x29e   : > { %6319 = vpow2.f32 %v5773_v38  ;;  %v5781_v33 = vmul.f32 -1.442695, %v8999_v29  ;;  %v2676_v57 = vadd.f32 %v2644_v0, %v2578_v18  ;;  %v2969_v34 = vmul.f32 %v8699_v58, %v2936_v15 }
 0x29f   : > { %12310 = vst [vmem:[#allocation13_spill] sm:$0xff] %v9005_v48  ;;  %v9012_v14 = vadd.f32 %v8750_v4, %v8570_v53  ;;  %4230 = vmatpush.msrb.mxu0 %v9005_v48  ;;  %v3820_v8 = vadd.f32 %v6316_v30, %v3819_v13  ;;  %vm3821_vm1 = vweird.f32 %v8927_v10  ;;  %v2281_v59 = vadd.s32 24, %v7290_v6 }
 0x2a0   : > { %v2577_v25 = vadd.f32 %v8583_v31, %v8923_v26  ;;  %vm3823_vm13 = vmor %vm3821_vm1, %vm3822_vm14  ;;  %v3828_v38 = vor.u32 1.1754944e-38, %v3827_v43  ;;  %6321 = vpow2.f32 %v5781_v33  ;;  %v2903_v0 = vadd.f32 %v2871_v5, %v2676_v57  ;;  %v6318_v54 = vpop.eup %6317 }
 0x2a1   : > { %6323 = vrcp.f32 %v8946_v28  ;;  %v3824_v36 = vsel %vm3823_vm13, %v6316_v30, %v3820_v8  ;;  %vm3826_vm4 = vcmp.eq.f32.partialorder %v3825_v60, 8.507059e+37  ;;  %v2313_v53 = vand.u32 15, %v2281_v59 }
 0x2a2   : > { %v3829_v63 = vsel %vm3826_vm4, %v3828_v38, %v3824_v36  ;;  %v9020_v45 = vadd.f32 1.0, %v6318_v54  ;;  %v3001_v1 = vadd.f32 %v2969_v34, %v2903_v0  ;;  %v12311_v10 = vrot.slane %v8631_v9, 1 }
 0x2a3   : > { %v12312_v15 = vrot.slane %v8290_v42, 1  ;;  %v5770_v43 = vmul.f32 -1.442695, %v9012_v14  ;;  %v9032_v61 = vmul.f32 %v3829_v63, %v8872_v32  ;;  %v3262_v30 = vsel %vm8965_vm11, %v8637_v41, 0.0 }
 0x2a4   : > { %vm9037_vm6 = vcmp.lt.s32.totalorder %v2313_v53, 15  ;;  %v6320_v5 = vpop.eup %6319  ;;  %v9041_v13 = vadd.f32 1.0, %v6314_v39  ;;  %6325 = vrcp.f32 %v9020_v45  ;;  %v3035_v60 = vmul.f32 %v8735_v27, %v8588_v55 }
 0x2a5   : > { %v9028_v26 = vsel %vm2737_vm12, %v12312_v15, %v12311_v10  ;;  %12313 = vst [vmem:[#allocation17_spill] sm:$0xff] %v9032_v61  ;;  %v3133_v32 = vmul.f32 %v8742_v17, %v8853_v44  ;;  %4231 = vmatpush.msrb.mxu0 %v9032_v61  ;;  %v2643_v33 = vmul.f32 %v8593_v56, %v8290_v42  ;;  %6327 = vpow2.f32 %v5770_v43 }
 0x2a6   : > { %v2837_v41 = vsel %vm9037_vm6, %v9028_v26, 0.0  ;;  %v6322_v51 = vpop.eup %6321  ;;  %v3067_v39 = vadd.f32 %v3035_v60, %v3001_v1  ;;  %v3295_v57 = vmul.f32 %v8758_v21, %v3262_v30  ;;  %v9057_v8 = vadd.f32 1.0, %v6320_v5 }
 0x2a7   : > { %v9055_v34 = vpop.eup %6323  ;;  %v9059_v59 = vadd.f32 1.0, %v6322_v51  ;;  %v2870_v38 = vmul.f32 %v8617_v23, %v2837_v41  ;;  %v2675_v0 = vadd.f32 %v2643_v33, %v2577_v25  ;;  %6329 = vrcp.f32 %v9041_v13 }
 0x2a8   : > { %v3165_v54 = vadd.f32 %v3133_v32, %v3067_v39  ;;  %v2968_v36 = vmul.f32 %v8699_v58, %v8779_v7  ;;  %v9067_v53 = vmul.f32 %v8735_v27, %v8290_v42  ;;  %v3099_v63 = vsel %vm9037_vm6, %v8886_v52, 0.0 }
 0x2a9   : > { %6331 = vrcp.f32 %v9059_v59  ;;  %v3393_v25 = vmul.f32 %v8801_v20, %v8492_v46  ;;  %v3523_v15 = vmul.f32 %v8811_v50, %v8674_v37  ;;  %v2902_v43 = vadd.f32 %v2870_v38, %v2675_v0 }
 0x2aa   : > { %v6326_v1 = vpop.eup %6325  ;;  %v3327_v10 = vadd.f32 %v3295_v57, %v3165_v54  ;;  %v9079_v30 = vmul.f32 %v9055_v34, %v8946_v28  ;;  %6333 = vrcp.f32 %v9057_v8  ;;  %v3034_v60 = vmul.f32 %v8735_v27, %v8641_v12 }
 0x2ab   : > { %v3802_v5 = vmul.f32 %v6326_v1, %v9020_v45  ;;  %v3810_v32 = vand.u32 2147483647, %v9020_v45  ;;  %v3000_v51 = vadd.f32 %v2968_v36, %v2902_v43  ;;  %v3132_v46 = vmul.f32 %v8742_v17, %v3099_v63  ;;  %v9087_v33 = vpop.eup %6327 }
 0x2ac   : > { %v3425_v41 = vadd.f32 %v3393_v25, %v3327_v10  ;;  %v3812_v39 = vand.u32 2147483648, %v9020_v45  ;;  %v3294_v57 = vmul.f32 %v8758_v21, %v8658_v62  ;;  %v3392_v38 = vmul.f32 %v8801_v20, %v8557_v47 }
 0x2ad   : > { %v3803_v37 = vsub.f32 1.0, %v3802_v5  ;;  %v9094_v0 = vpop.eup %6329  ;;  %vm3806_vm2 = vweird.f32 %v9020_v45  ;;  %v3066_v36 = vadd.f32 %v3034_v60, %v3000_v51  ;;  %v3489_v63 = vsel %vm9037_vm6, %v8708_v11, 0.0 }
 0x2ae   : > { %v9097_v54 = vadd.f32 %v3523_v15, %v3425_v41  ;;  %vm3807_vm8 = vweird.f32 %v6326_v1  ;;  %v2279_v43 = vadd.s32 8, %v7290_v6  ;;  %v2542_v62 = vmul.f32 0.0, %v8564_v49 }
 0x2af   : > { %v6332_v10 = vpop.eup %6331  ;;  %v3804_v25 = vmul.f32 %v6326_v1, %v3803_v37  ;;  %vm9104_vm10 = vcmp.eq.f32.partialorder %v3810_v32, 8.507059e+37  ;;  %v3164_v60 = vadd.f32 %v3132_v46, %v3066_v36  ;;  %v3813_v11 = vor.u32 1.1754944e-38, %v3812_v39  ;;  %vm3808_vm15 = vmor %vm3806_vm2, %vm3807_vm8 }
 0x2b0   : > { %v3787_v5 = vmul.f32 %v6332_v10, %v9059_v59  ;;  %v5780_v15 = vmul.f32 -1.442695, %v9097_v54  ;;  %v9110_v41 = vpop.eup %6333  ;;  %v2311_v51 = vand.u32 15, %v2279_v43  ;;  %v2574_v37 = vadd.f32 %v8583_v31, %v2542_v62  ;;  %v1632_v62 = vpop.f32.mrf.mxu1 }
 0x2b1   : > { %v3805_v18 = vadd.f32 %v6326_v1, %v3804_v25  ;;  %v3326_v32 = vadd.f32 %v3294_v57, %v3164_v60  ;;  %v3522_v48 = vmul.f32 %v8811_v50, %v3489_v63  ;;  %v3795_v44 = vand.u32 2147483647, %v9059_v59 }
 0x2b2   : > { %v3788_v49 = vsub.f32 1.0, %v3787_v5  ;;  %6335 = vpow2.f32 %v5780_v15  ;;  %v3797_v46 = vand.u32 2147483648, %v9059_v59  ;;  %v2640_v36 = vmul.f32 0.0, %v8593_v56 }
 0x2b3   : > { %v3809_v61 = vsel %vm3808_vm15, %v6326_v1, %v3805_v18  ;;  %vm3792_vm5 = vweird.f32 %v6332_v10  ;;  %v3424_v31 = vadd.f32 %v3392_v38, %v3326_v32  ;;  %vm9124_vm3 = vcmp.lt.s32.totalorder %v2311_v51, 15 }
 0x2b4   : > { %v3814_v39 = vsel %vm9104_vm10, %v3813_v11, %v3809_v61  ;;  %v3789_v25 = vmul.f32 %v6332_v10, %v3788_v49  ;;  %v2672_v43 = vadd.f32 %v2640_v36, %v2574_v37  ;;  %v2867_v1 = vmul.f32 0.0, %v8617_v23 }
 0x2b5   : > { %v9122_v45 = vmul.f32 %v3814_v39, %v8963_v19  ;;  %vm3791_vm11 = vweird.f32 %v9059_v59  ;;  %v9130_v56 = vadd.f32 %v3522_v48, %v3424_v31  ;;  %v2966_v61 = vmul.f32 %v8699_v58, %v8771_v40  ;;  %v12323_v39 = vld [vmem:[#allocation27_spill] sm:$0xff] }
 0x2b6   : > { %v3790_v63 = vadd.f32 %v6332_v10, %v3789_v25  ;;  %vm3793_vm9 = vmor %vm3791_vm11, %vm3792_vm5  ;;  %v3798_v19 = vor.u32 1.1754944e-38, %v3797_v46  ;;  %v9136_v38 = vadd.f32 %v8750_v4, %v1632_v62  ;;  %v9138_v47 = vadd.f32 %v2867_v1, %v2672_v43 }
 0x2b7   : > { %12318 = vst [vmem:[#allocation21_spill] sm:$0xff] %v9122_v45  ;;  %4232 = vmatpush.msrb.mxu0 %v9122_v45  ;;  %v3097_v23 = vsel %vm9124_vm3, %v9028_v26, 0.0  ;;  %v2201_v48 = vmul.f32 %v9110_v41, %v9057_v8  ;;  %vm3796_vm0 = vcmp.eq.f32.partialorder %v3795_v44, 8.507059e+37  ;;  %v5779_v40 = vmul.f32 -1.442695, %v9130_v56 }
 0x2b8   : > { %12321 = vst [vmem:[#allocation3_spill] sm:$0xff] %v9138_v47  ;;  %v6336_v59 = vpop.eup %6335  ;;  %v3794_v5 = vsel %vm3793_vm9, %v6332_v10, %v3790_v63  ;;  %v5774_v18 = vmul.f32 -1.442695, %v9136_v38  ;;  %v2998_v11 = vadd.f32 %v2966_v61, %v9138_v47  ;;  %v2187_v51 = vsub.f32 1.0, %v9079_v30  ;;  %v1634_v32 = vpop.f32.mrf.mxu1 }
 0x2b9   : > { %v3799_v15 = vsel %vm3796_vm0, %v3798_v19, %v3794_v5  ;;  %v9146_v60 = vadd.f32 1.0, %v6336_v59  ;;  %6337 = vpow2.f32 %v5779_v40  ;;  %v3130_v26 = vmul.f32 %v8742_v17, %v3097_v23 }
 0x2ba   : > { %v9152_v37 = vmul.f32 %v3799_v15, %v8999_v29  ;;  %v2171_v44 = vmul.f32 %v9094_v0, %v9041_v13  ;;  %v2202_v10 = vsub.f32 1.0, %v2201_v48  ;;  %v3064_v49 = vadd.f32 %v9067_v53, %v2998_v11 }
 0x2bb   : > { %6339 = vrcp.f32 %v9146_v60  ;;  %v3292_v30 = vmul.f32 %v8758_v21, %v8779_v7  ;;  %v2188_v29 = vmul.f32 %v9055_v34, %v2187_v51  ;;  %v3487_v36 = vsel %vm9124_vm3, %v8886_v52, 0.0 }
 0x2bc   : > { %12322 = vst [vmem:[#allocation28_spill] sm:$0xff] %v9152_v37  ;;  %4233 = vmatpush.msrb.mxu0 %v9152_v37  ;;  %6341 = vpow2.f32 %v5774_v18  ;;  %v3162_v46 = vadd.f32 %v3130_v26, %v3064_v49  ;;  %v9168_v25 = vadd.f32 %v8750_v4, %v12323_v39  ;;  %v9171_v31 = vadd.f32 %v8750_v4, %v1634_v32 }
 0x2bd   : > { %v9174_v53 = vadd.f32 1.0, %v9087_v33  ;;  %v2172_v7 = vsub.f32 1.0, %v2171_v44  ;;  %v2203_v1 = vmul.f32 %v9110_v41, %v2202_v10  ;;  %v3390_v57 = vmul.f32 %v8801_v20, %v8641_v12 }
 0x2be   : > { %v3324_v63 = vadd.f32 %v3292_v30, %v3162_v46  ;;  %v5775_v52 = vmul.f32 -1.442695, %v9171_v31  ;;  %v3520_v19 = vmul.f32 %v8811_v50, %v3487_v36  ;;  %v2189_v59 = vadd.f32 %v9055_v34, %v2188_v29 }
 0x2bf   : > { %v6338_v43 = vpop.eup %6337  ;;  %vm2191_vm14 = vweird.f32 %v9055_v34  ;;  %v2196_v33 = vand.u32 2147483648, %v8946_v28  ;;  %vm2205_vm1 = vweird.f32 %v9057_v8  ;;  %vm2206_vm13 = vweird.f32 %v9110_v41 }
 0x2c0   : > { %v9177_v61 = vadd.f32 1.0, %v6338_v43  ;;  %v3422_v5 = vadd.f32 %v3390_v57, %v3324_v63  ;;  %v2204_v12 = vadd.f32 %v9110_v41, %v2203_v1  ;;  %v2209_v18 = vand.u32 2147483647, %v9057_v8  ;;  %vm9210_vm2 = vmor %vm2205_vm1, %vm2206_vm13 }
 0x2c1   : > { %v6340_v62 = vpop.eup %6339  ;;  %v2211_v11 = vand.u32 2147483648, %v9057_v8  ;;  %v3782_v51 = vand.u32 2147483648, %v9146_v60  ;;  %v3780_v10 = vand.u32 2147483647, %v9146_v60  ;;  %v9201_v49 = vmul.f32 -1.442695, %v9168_v25 }
 0x2c2   : > { %v6342_v23 = vpop.eup %6341  ;;  %v3772_v48 = vmul.f32 %v6340_v62, %v9146_v60  ;;  %6343 = vrcp.f32 %v9177_v61  ;;  %v9196_v26 = vadd.f32 %v3520_v19, %v3422_v5  ;;  %vm3777_vm4 = vweird.f32 %v6340_v62 }
 0x2c3   : > { %v9191_v15 = vadd.f32 1.0, %v6342_v23  ;;  %6345 = vpow2.f32 %v5775_v52  ;;  %vm2190_vm6 = vweird.f32 %v8946_v28  ;;  %v2194_v30 = vand.u32 2147483647, %v8946_v28 }
 0x2c4   : > { %v3773_v40 = vsub.f32 1.0, %v3772_v48  ;;  %v2173_v32 = vmul.f32 %v9094_v0, %v2172_v7  ;;  %vm9217_vm8 = vmor %vm2190_vm6, %vm2191_vm14  ;;  %v2208_v28 = vsel %vm9210_vm2, %v9110_v41, %v2204_v12  ;;  %vm3776_vm10 = vweird.f32 %v9146_v60 }
 0x2c5   : > { %6347 = vrcp.f32 %v9191_v15  ;;  %v2193_v39 = vsel %vm9217_vm8, %v9055_v34, %v2189_v59  ;;  %v2197_v43 = vor.u32 1.1754944e-38, %v2196_v33  ;;  %v2212_v7 = vor.u32 1.1754944e-38, %v2211_v11  ;;  %vm3778_vm15 = vmor %vm3776_vm10, %vm3777_vm4 }
 0x2c6   : > { %v3774_v44 = vmul.f32 %v6340_v62, %v3773_v40  ;;  %6349 = vrcp.f32 %v9174_v53  ;;  %v3783_v1 = vor.u32 1.1754944e-38, %v3782_v51  ;;  %vm2210_vm5 = vcmp.eq.f32.partialorder %v2209_v18, 8.507059e+37 }
 0x2c7   : > { %vm3781_vm3 = vcmp.eq.f32.partialorder %v3780_v10, 8.507059e+37  ;;  %vm2195_vm11 = vcmp.eq.f32.partialorder %v2194_v30, 8.507059e+37  ;;  %v2213_v41 = vsel %vm2210_vm5, %v2212_v7, %v2208_v28  ;;  %vm2175_vm9 = vweird.f32 %v9041_v13 }
 0x2c8   : > { %v3775_v36 = vadd.f32 %v6340_v62, %v3774_v44  ;;  %v6344_v8 = vpop.eup %6343  ;;  %v2198_v34 = vsel %vm2195_vm11, %v2197_v43, %v2193_v39  ;;  %v3767_v5 = vand.u32 2147483648, %v9177_v61  ;;  %v9243_v40 = vmul.f32 %v2213_v41, %v8937_v22 }
 0x2c9   : > { %v6346_v63 = vpop.eup %6345  ;;  %v3757_v57 = vmul.f32 %v6344_v8, %v9177_v61  ;;  %vm3762_vm0 = vweird.f32 %v6344_v8  ;;  %v2174_v11 = vadd.f32 %v9094_v0, %v2173_v32  ;;  %vm2176_vm14 = vweird.f32 %v9094_v0 }
 0x2ca   : > { %v3779_v52 = vsel %vm3778_vm15, %v6340_v62, %v3775_v36  ;;  %v9230_v60 = vadd.f32 1.0, %v6346_v63  ;;  %v2181_v62 = vand.u32 2147483648, %v9041_v13  ;;  %v9250_v51 = vmul.f32 %v2198_v34, %v8753_v24  ;;  %vm9258_vm6 = vmor %vm2175_vm9, %vm2176_vm14 }
 0x2cb   : > { %v3784_v19 = vsel %vm3781_vm3, %v3783_v1, %v3779_v52  ;;  %v6348_v23 = vpop.eup %6347  ;;  %v3758_v33 = vsub.f32 1.0, %v3757_v57  ;;  %vm3761_vm1 = vweird.f32 %v9177_v61  ;;  %v2226_v22 = vand.u32 2147483648, %v9191_v15 }
 0x2cc   : > { %v9234_v59 = vmul.f32 %v3784_v19, %v9097_v54  ;;  %v9236_v48 = vpop.eup %6349  ;;  %v2216_v12 = vmul.f32 %v6348_v23, %v9191_v15  ;;  %6351 = vrcp.f32 %v9230_v60  ;;  %v3765_v54 = vand.u32 2147483647, %v9177_v61  ;;  %12329 = vst [vmem:[#allocation12_spill] sm:$0xff] %v9250_v51  ;;  %vm3763_vm13 = vmor %vm3761_vm1, %vm3762_vm0 }
 0x2cd   : > { %v3759_v18 = vmul.f32 %v6344_v8, %v3758_v33  ;;  %v2309_v30 = vadd.s32 248, %v7290_v6  ;;  %v3768_v29 = vor.u32 1.1754944e-38, %v3767_v5  ;;  %vm2221_vm4 = vweird.f32 %v6348_v23 }
 0x2ce   : > { %12328 = vst [vmem:[#allocation40_spill] sm:$0xff] %v9234_v59  ;;  %4234 = vmatpush.msrb.mxu0 %v9234_v59  ;;  %v2217_v44 = vsub.f32 1.0, %v2216_v12  ;;  %v2224_v28 = vand.u32 2147483647, %v9191_v15  ;;  %v2179_v24 = vand.u32 2147483647, %v9041_v13  ;;  %v2178_v43 = vsel %vm9258_vm6, %v9094_v0, %v2174_v11 }
 0x2cf   : > { %v3760_v10 = vadd.f32 %v6344_v8, %v3759_v18  ;;  %v2377_v61 = vrot.slane %v9243_v40, 7  ;;  %vm3766_vm2 = vcmp.eq.f32.partialorder %v3765_v54, 8.507059e+37  ;;  %vm2220_vm8 = vweird.f32 %v9191_v15  ;;  %v9293_v54 = vld [vmem:[%s11865_s5] ss:$0 sm:$0xff] }
 0x2d0   : > { %v2218_v46 = vmul.f32 %v6348_v23, %v2217_v44  ;;  %v2376_v63 = vrot.slane %v9250_v51, 7  ;;  %vm2222_vm10 = vmor %vm2220_vm8, %vm2221_vm4  ;;  %v2227_v13 = vor.u32 1.1754944e-38, %v2226_v22  ;;  %vm2225_vm15 = vcmp.eq.f32.partialorder %v2224_v28, 8.507059e+37  ;;  %v12336_v22 = vld [vmem:[#allocation15_spill] sm:$0xff] }
 0x2d1   : > { %v3764_v36 = vsel %vm3763_vm13, %v6344_v8, %v3760_v10  ;;  %v2182_v8 = vor.u32 1.1754944e-38, %v2181_v62  ;;  %v2341_v19 = vand.u32 15, %v2309_v30  ;;  %vm2180_vm5 = vcmp.eq.f32.partialorder %v2179_v24, 8.507059e+37  ;;  %v9323_v24 = vld [vmem:[%s11866_s6] ss:$0 sm:$0xff] }
 0x2d2   : > { %v6352_v39 = vpop.eup %6351  ;;  %v3769_v7 = vsel %vm3766_vm2, %v3768_v29, %v3764_v36  ;;  %v2219_v1 = vadd.f32 %v6348_v23, %v2218_v46  ;;  %v9277_v0 = vsel %vm2380_vm7, %v2376_v63, %v2377_v61  ;;  %v9282_v34 = vadd.f32 %v8750_v4, %v8511_v16 }
 0x2d3   : > { %v9270_v52 = vmul.f32 %v3769_v7, %v9130_v56  ;;  %v2231_v57 = vmul.f32 %v6352_v39, %v9230_v60  ;;  %12333 = vst [vmem:[#allocation22_spill] sm:$0xff] %v9277_v0  ;;  %v2183_v33 = vsel %vm2180_vm5, %v2182_v8, %v2178_v43  ;;  %v2241_v62 = vand.u32 2147483648, %v9230_v60  ;;  %v9336_v8 = vld [vmem:[%s11865_s5 + $0x1] ss:$0 sm:$0xff] }
 0x2d4   : > { %v2223_v41 = vsel %vm2222_vm10, %v6348_v23, %v2219_v1  ;;  %v2308_v5 = vadd.s32 240, %v7290_v6  ;;  %vm2236_vm3 = vweird.f32 %v6352_v39  ;;  %v2239_v18 = vand.u32 2147483647, %v9230_v60 }
 0x2d5   : > { %12332 = vst [vmem:[#allocation41_spill] sm:$0xff] %v9270_v52  ;;  %4235 = vmatpush.msrb.mxu0 %v9270_v52  ;;  %v2228_v15 = vsel %vm2225_vm15, %v2227_v13, %v2223_v41  ;;  %v2232_v56 = vsub.f32 1.0, %v2231_v57  ;;  %v2573_v16 = vmul.f32 %v9293_v54, %v9277_v0  ;;  %v2734_v11 = vrot.slane %v9243_v40, 1 }
 0x2d6   : > { %v9285_v23 = vmul.f32 %v2228_v15, %v9136_v38  ;;  %vm9299_vm11 = vcmp.lt.s32.totalorder %v2341_v19, 15  ;;  %vm2235_vm9 = vweird.f32 %v9230_v60  ;;  %6353 = vpow2.f32 %v9201_v49  ;;  %v9343_v19 = vld [vmem:[%s11865_s5 + $0x2] ss:$0 sm:$0xff] }
 0x2d7   : > { %v2233_v12 = vmul.f32 %v6352_v39, %v2232_v56  ;;  %v9306_v30 = vmul.f32 %v2183_v33, %v12336_v22  ;;  %vm2237_vm0 = vmor %vm2235_vm9, %vm2236_vm3  ;;  %v2242_v46 = vor.u32 1.1754944e-38, %v2241_v62  ;;  %v5769_v28 = vmul.f32 -1.442695, %v9282_v34 }
 0x2d8   : > { %v2735_v38 = vrot.slane %v9285_v23, 1  ;;  %vm2240_vm14 = vcmp.eq.f32.partialorder %v2239_v18, 8.507059e+37  ;;  %v2340_v60 = vand.u32 15, %v2308_v5  ;;  %v2605_v36 = vadd.f32 %v9323_v24, %v2573_v16 }
 0x2d9   : > { %v2234_v10 = vadd.f32 %v6352_v39, %v2233_v12  ;;  %12337 = vst [vmem:[#allocation23_spill] sm:$0xff] %v9306_v30  ;;  %v2156_v7 = vmul.f32 %v9236_v48, %v9174_v53  ;;  %v2375_v57 = vrot.slane %v9306_v30, 7  ;;  %v2671_v41 = vmul.f32 %v9336_v8, %v9243_v40 }
 0x2da   : > { %v9314_v29 = vsel %vm2737_vm12, %v2734_v11, %v2735_v38  ;;  %6355 = vpow2.f32 %v5769_v28  ;;  %v2378_v15 = vrot.slane %v9285_v23, 7  ;;  %vm9355_vm1 = vcmp.ge.s32.totalorder %v2340_v60, 1 }
 0x2db   : > { %12338 = vst [vmem:[#allocation10_spill] sm:$0xff] %v9314_v29  ;;  %v2238_v32 = vsel %vm2237_vm0, %v6352_v39, %v2234_v10  ;;  %v2865_v49 = vsel %vm9299_vm11, %v9314_v29, 0.0  ;;  %v12339_v39 = vld [vmem:[#allocation14_spill] sm:$0xff]  ;;  %v9353_v5 = vsel %vm2380_vm7, %v2375_v57, %v2376_v63  ;;  %v2703_v18 = vadd.f32 %v2671_v41, %v2605_v36 }
 0x2dc   : > { %v2243_v43 = vsel %vm2240_vm14, %v2242_v46, %v2238_v32  ;;  %v11984_v13 = vrot.slane %v12339_v39, 1  ;;  %v6354_v62 = vpop.eup %6353  ;;  %12340 = vst [vmem:[#allocation9_spill] sm:$0xff] %v9353_v5  ;;  %v2157_v16 = vsub.f32 1.0, %v2156_v7  ;;  %v12343_v63 = vld [vmem:[#allocation18_spill] sm:$0xff]  ;;  %v2539_v60 = vsel %vm9355_vm1, %v9353_v5, 0.0 }
 0x2dd   : > { %v9329_v1 = vmul.f32 %v2243_v43, %v9171_v31  ;;  %v2898_v31 = vmul.f32 %v9343_v19, %v2865_v49  ;;  %v9373_v46 = vadd.f32 %v8750_v4, %v12343_v63  ;;  %v9377_v49 = vadd.f32 1.0, %v6354_v62 }
 0x2de   : > { %v2158_v41 = vmul.f32 %v9236_v48, %v2157_v16  ;;  %v3321_v16 = vmul.f32 0.0, %v8758_v21  ;;  %vm2161_vm13 = vweird.f32 %v9236_v48  ;;  %vm2160_vm4 = vweird.f32 %v9174_v53 }
 0x2df   : > { %v11983_v56 = vrot.slane %v9329_v1, 7  ;;  %v2736_v33 = vrot.slane %v9329_v1, 1  ;;  %v2930_v28 = vadd.f32 %v2898_v31, %v2703_v18  ;;  %v3062_v43 = vmul.f32 %v8735_v27, %v9329_v1  ;;  %vm9419_vm6 = vmor %vm2160_vm4, %vm2161_vm13 }
 0x2e0   : > { %v6356_v4 = vpop.eup %6355  ;;  %v5768_v31 = vmul.f32 -1.442695, %v9373_v46  ;;  %6357 = vrcp.f32 %v9377_v49  ;;  %v9398_v27 = vsel %vm2380_vm7, %v2377_v61, %v2378_v15  ;;  %v2164_v61 = vand.u32 2147483647, %v9174_v53 }
 0x2e1   : > { %v9363_v10 = vsel %vm2380_vm7, %v2378_v15, %v11983_v56  ;;  %v9369_v22 = vsel %vm2737_vm12, %v2736_v33, %v11984_v13  ;;  %v9392_v63 = vadd.f32 1.0, %v6356_v4  ;;  %v2962_v15 = vsel %vm9355_vm1, %v9398_v27, 0.0 }
 0x2e2   : > { %v2996_v32 = vmul.f32 %v8699_v58, %v9363_v10  ;;  %v3127_v36 = vsel %vm9299_vm11, %v9369_v22, 0.0  ;;  %v2572_v58 = vmul.f32 %v9293_v54, %v2539_v60  ;;  %6359 = vpow2.f32 %v5768_v31 }
 0x2e3   : > { %v3160_v18 = vmul.f32 %v8742_v17, %v3127_v36  ;;  %v2733_v17 = vrot.slane %v9250_v51, 1  ;;  %6361 = vrcp.f32 %v9392_v63  ;;  %v3549_v4 = vmul.f32 0.0, %v8811_v50 }
 0x2e4   : > { %v3028_v7 = vadd.f32 %v2996_v32, %v2930_v28  ;;  %v2159_v28 = vadd.f32 %v9236_v48, %v2158_v41  ;;  %v2166_v32 = vand.u32 2147483648, %v9174_v53  ;;  %v2604_v60 = vadd.f32 %v9323_v24, %v2572_v58 }
 0x2e5   : > { %v9413_v21 = vsel %vm2737_vm12, %v2733_v17, %v2734_v11  ;;  %vm2165_vm2 = vcmp.eq.f32.partialorder %v2164_v61, 8.507059e+37  ;;  %vm2055_vm8 = vweird.f32 %v9377_v49  ;;  %vm2145_vm11 = vweird.f32 %v9392_v63 }
 0x2e6   : > { %v3094_v62 = vadd.f32 %v3062_v43, %v3028_v7  ;;  %v3419_v43 = vmul.f32 0.0, %v8801_v20  ;;  %12344 = vst [vmem:[#allocation8_spill] sm:$0xff] %v9413_v21  ;;  %v2670_v20 = vmul.f32 %v9336_v8, %v9250_v51  ;;  %v9426_v41 = vpop.eup %6357  ;;  %v2163_v11 = vsel %vm9419_vm6, %v9236_v48, %v2159_v28  ;;  %v9453_v7 = vld [vmem:[%s11865_s5 + $0x4] ss:$0 sm:$0xff] }
 0x2e7   : > { %v2167_v12 = vor.u32 1.1754944e-38, %v2166_v32  ;;  %v9445_v48 = vsel %vm2737_vm12, %v2735_v38, %v2736_v33  ;;  %v3061_v61 = vmul.f32 %v9453_v7, %v9285_v23  ;;  %v9460_v38 = vld [vmem:[%s11865_s5 + $0x5] ss:$0 sm:$0xff]  ;;  %vm2056_vm10 = vweird.f32 %v9426_v41 }
 0x2e8   : > { %v3192_v44 = vadd.f32 %v3160_v18, %v3094_v62  ;;  %v2702_v31 = vadd.f32 %v2670_v20, %v2604_v60  ;;  %v2897_v62 = vmul.f32 %v9343_v19, %v9413_v21  ;;  %v9438_v18 = vld [vmem:[%s11865_s5 + $0x3] ss:$0 sm:$0xff]  ;;  %v3159_v33 = vmul.f32 %v9460_v38, %v9445_v48  ;;  %vm9530_vm3 = vmor %vm2055_vm8, %vm2056_vm10 }
 0x2e9   : > { %v2995_v50 = vmul.f32 %v9438_v18, %v2962_v15  ;;  %v2168_v28 = vsel %vm2165_vm2, %v2167_v12, %v2163_v11  ;;  %v2051_v20 = vmul.f32 %v9426_v41, %v9377_v49  ;;  %v2149_v45 = vand.u32 2147483647, %v9392_v63 }
 0x2ea   : > { %v3354_v36 = vadd.f32 %v3321_v16, %v3192_v44  ;;  %v6360_v44 = vpop.eup %6359  ;;  %v2929_v60 = vadd.f32 %v2897_v62, %v2702_v31  ;;  %v2151_v37 = vand.u32 2147483648, %v9392_v63 }
 0x2eb   : > { %v9469_v11 = vadd.f32 1.0, %v6360_v44  ;;  %vm2150_vm14 = vcmp.eq.f32.partialorder %v2149_v45, 8.507059e+37  ;;  %v5777_v45 = vmul.f32 -1.442695, %v9196_v26 }
 0x2ec   : > { %v3452_v53 = vadd.f32 %v3419_v43, %v3354_v36  ;;  %v9448_v36 = vpop.eup %6361  ;;  %v3027_v15 = vadd.f32 %v2995_v50, %v2929_v60  ;;  %v2052_v50 = vsub.f32 1.0, %v2051_v20 }
 0x2ed   : > { %v2141_v31 = vmul.f32 %v9448_v36, %v9392_v63  ;;  %vm2146_vm5 = vweird.f32 %v9448_v36  ;;  %vm2130_vm2 = vweird.f32 %v9469_v11 }
 0x2ee   : > { %v9431_v58 = vadd.f32 %v3549_v4, %v3452_v53  ;;  %v9467_v53 = vmul.f32 %v2168_v28, %v9012_v14  ;;  %v3093_v12 = vadd.f32 %v3061_v61, %v3027_v15  ;;  %v2053_v61 = vmul.f32 %v9426_v41, %v2052_v50  ;;  %vm9543_vm9 = vmor %vm2145_vm11, %vm2146_vm5 }
 0x2ef   : > { %v2142_v13 = vsub.f32 1.0, %v2141_v31  ;;  %v11985_v15 = vrot.slane %v9306_v30, 1 }
 0x2f0   : > { %v5807_v32 = vmul.f32 -1.442695, %v9431_v58  ;;  %v3191_v62 = vadd.f32 %v3159_v33, %v3093_v12  ;;  %v2054_v50 = vadd.f32 %v9426_v41, %v2053_v61 }
 0x2f1   : > { %v2143_v12 = vmul.f32 %v9448_v36, %v2142_v13  ;;  %v2061_v13 = vand.u32 2147483648, %v9377_v49 }
 0x2f2   : > { %6363 = vpow2.f32 %v5807_v32  ;;  %v11986_v32 = vrot.slane %v9467_v53, 7  ;;  %v3353_v56 = vadd.f32 %v3321_v16, %v3191_v62  ;;  %v2307_v16 = vadd.s32 232, %v7290_v6 }
 0x2f3   : > { %6365 = vrcp.f32 %v9469_v11  ;;  %v2059_v62 = vand.u32 2147483647, %v9377_v49 }
 0x2f4   : > { %v9481_v14 = vsel %vm2380_vm7, %v11986_v32, %v2375_v57  ;;  %v3451_v28 = vadd.f32 %v3419_v43, %v3353_v56  ;;  %v2339_v56 = vand.u32 15, %v2307_v16 }
 0x2f5   : > { %12347 = vst [vmem:[#allocation4_spill] sm:$0xff] %v9481_v14  ;;  %v2571_v20 = vmul.f32 %v9293_v54, %v9481_v14  ;;  %vm2060_vm4 = vcmp.eq.f32.partialorder %v2059_v62, 8.507059e+37  ;;  %v9580_v62 = vld [vmem:[%s11865_s5 + $0x7] ss:$0 sm:$0xff] }
 0x2f6   : > { %v9488_v33 = vadd.f32 %v3549_v4, %v3451_v28  ;;  %v9502_v4 = vsel %vm2737_vm12, %v11985_v15, %v2733_v17  ;;  %vm9511_vm15 = vcmp.lt.s32.totalorder %v2339_v56, 15  ;;  %v2994_v56 = vmul.f32 %v9438_v18, %v9277_v0 }
 0x2f7   : > { %v2603_v43 = vadd.f32 %v9323_v24, %v2571_v20  ;;  %12348 = vst [vmem:[#allocation5_spill] sm:$0xff] %v9502_v4  ;;  %v2144_v20 = vadd.f32 %v9448_v36, %v2143_v12  ;;  %v2863_v61 = vsel %vm9511_vm15, %v9502_v4, 0.0  ;;  %v3515_v49 = vsel %vm9511_vm15, %v9369_v22, 0.0 }
 0x2f8   : > { %v6364_v60 = vpop.eup %6363  ;;  %v5806_v31 = vmul.f32 -1.442695, %v9488_v33 }
 0x2f9   : > { %v9483_v44 = vadd.f32 1.0, %v6364_v60  ;;  %v9494_v57 = vpop.eup %6365  ;;  %v2669_v60 = vmul.f32 %v9336_v8, %v9306_v30  ;;  %v2148_v47 = vsel %vm9543_vm9, %v9448_v36, %v2144_v20  ;;  %v9561_v20 = vld [vmem:[%s11865_s5 + $0x6] ss:$0 sm:$0xff] }
 0x2fa   : > { %v2126_v16 = vmul.f32 %v9494_v57, %v9469_v11  ;;  %vm2131_vm8 = vweird.f32 %v9494_v57 }
 0x2fb   : > { %6367 = vrcp.f32 %v9483_v44  ;;  %v2701_v32 = vadd.f32 %v2669_v60, %v2603_v43  ;;  %v3125_v43 = vsel %vm9511_vm15, %v9314_v29, 0.0  ;;  %v2058_v60 = vsel %vm9530_vm3, %v9426_v41, %v2054_v50  ;;  %vm9629_vm10 = vmor %vm2130_vm2, %vm2131_vm8 }
 0x2fc   : > { %6369 = vpow2.f32 %v5806_v31  ;;  %v2896_v31 = vmul.f32 %v9343_v19, %v2863_v61  ;;  %v2062_v61 = vor.u32 1.1754944e-38, %v2061_v13  ;;  %v4185_v63 = vand.u32 2147483647, %v9483_v44 }
 0x2fd   : > { %v4187_v0 = vand.u32 2147483648, %v9483_v44  ;;  %v3060_v29 = vmul.f32 %v9453_v7, %v9243_v40  ;;  %v3158_v50 = vmul.f32 %v9460_v38, %v3125_v43  ;;  %v2127_v4 = vsub.f32 1.0, %v2126_v16 }
 0x2fe   : > { %v2928_v52 = vadd.f32 %v2896_v31, %v2701_v32  ;;  %v2152_v32 = vor.u32 1.1754944e-38, %v2151_v37  ;;  %vm4181_vm1 = vweird.f32 %v9483_v44  ;;  %vm4186_vm6 = vcmp.eq.f32.partialorder %v4185_v63, 8.507059e+37 }
 0x2ff   : > { %v2296_v16 = vadd.s32 144, %v7290_v6  ;;  %v12356_v63 = vrot.slane %v8290_v42, 1 }
 0x300   : > { %v3026_v13 = vadd.f32 %v2994_v56, %v2928_v52  ;;  %v2153_v52 = vsel %vm2150_vm14, %v2152_v32, %v2148_v47  ;;  %v4188_v56 = vor.u32 1.1754944e-38, %v4187_v0 }
 0x301   : > { %v6368_v17 = vpop.eup %6367  ;;  %v9572_v47 = vmul.f32 %v2153_v52, %v9282_v34  ;;  %v9589_v34 = vld [vmem:[%s11865_s5 + $0x8] ss:$0 sm:$0xff] }
 0x302   : > { %v4177_v15 = vmul.f32 %v6368_v17, %v9483_v44  ;;  %v6370_v12 = vpop.eup %6369  ;;  %vm4182_vm0 = vweird.f32 %v6368_v17  ;;  %v3092_v36 = vadd.f32 %v3060_v29, %v3026_v13  ;;  %v2063_v29 = vsel %vm2060_vm4, %v2062_v61, %v2058_v60 }
 0x303   : > { %vm4183_vm13 = vmor %vm4181_vm1, %vm4182_vm0  ;;  %v2128_v60 = vmul.f32 %v9494_v57, %v2127_v4  ;;  %v9594_v61 = vmul.f32 %v9336_v8, %v12339_v39  ;;  %v12357_v4 = vrot.slane %v12339_v39, 1  ;;  %v2328_v13 = vand.u32 15, %v2296_v16 }
 0x304   : > { %v4178_v59 = vsub.f32 1.0, %v4177_v15  ;;  %v9555_v15 = vadd.f32 1.0, %v6370_v12  ;;  %v3190_v44 = vadd.f32 %v3158_v50, %v3092_v36  ;;  %v11998_v50 = vrot.slane %v9572_v47, 7 }
 0x305   : > { %v9602_v12 = vsel %vm2737_vm12, %v12357_v4, %v12356_v63  ;;  %v2306_v36 = vadd.s32 224, %v7290_v6  ;;  %v2129_v42 = vadd.f32 %v9494_v57, %v2128_v60  ;;  %v11996_v16 = vrot.slane %v9467_v53, 1 }
 0x306   : > { %v4179_v41 = vmul.f32 %v6368_v17, %v4178_v59  ;;  %v3320_v59 = vmul.f32 %v9561_v20, %v9363_v10  ;;  %6371 = vrcp.f32 %v9555_v15  ;;  %vm4166_vm11 = vweird.f32 %v9555_v15 }
 0x307   : > { %6373 = vpow2.f32 %v5777_v45  ;;  %v12359_v45 = vrot.slane %v9467_v53, 7  ;;  %vm9673_vm14 = vcmp.ge.s32.totalorder %v2328_v13, 1 }
 0x308   : > { %v4180_v31 = vadd.f32 %v6368_v17, %v4179_v41  ;;  %v3352_v10 = vadd.f32 %v3320_v59, %v3190_v44  ;;  %v9605_v41 = vmul.f32 %v2063_v29, %v9168_v25  ;;  %v2134_v59 = vand.u32 2147483647, %v9469_v11 }
 0x309   : > { %v2136_v29 = vand.u32 2147483648, %v9469_v11  ;;  %v2133_v11 = vsel %vm9629_vm10, %v9494_v57, %v2129_v42 }
 0x30a   : > { %v4184_v37 = vsel %vm4183_vm13, %v6368_v17, %v4180_v31  ;;  %v3418_v17 = vmul.f32 %v9580_v62, %v9329_v1  ;;  %12358 = vst [vmem:[#allocation15_spill] sm:$0xff] %v9605_v41  ;;  %vm9640_vm3 = vcmp.eq.f32.partialorder %v2134_v59, 8.507059e+37  ;;  %v2668_v59 = vmul.f32 %v9336_v8, %v9467_v53 }
 0x30b   : > { %v4189_v43 = vsel %vm4186_vm6, %v4188_v56, %v4184_v37  ;;  %v2338_v56 = vand.u32 15, %v2306_v36  ;;  %v9623_v37 = vsel %vm2380_vm7, %v11998_v50, %v12359_v45  ;;  %v2137_v42 = vor.u32 1.1754944e-38, %v2136_v29  ;;  %v12382_v50 = vld [vmem:[#allocation46_spill] sm:$0xff] }
 0x30c   : > { %v9575_v0 = vmul.f32 %v4189_v43, %v9431_v58  ;;  %v3450_v22 = vadd.f32 %v3418_v17, %v3352_v10  ;;  %v3548_v58 = vmul.f32 %v9589_v34, %v3515_v49  ;;  %v6372_v28 = vpop.eup %6371  ;;  %12360 = vst [vmem:[#allocation14_spill] sm:$0xff] %v9623_v37  ;;  %v4170_v43 = vand.u32 2147483647, %v9555_v15 }
 0x30d   : > { %v4162_v32 = vmul.f32 %v6372_v28, %v9555_v15  ;;  %v6374_v44 = vpop.eup %6373  ;;  %v4172_v49 = vand.u32 2147483648, %v9555_v15  ;;  %vm4167_vm15 = vweird.f32 %v6372_v28  ;;  %vm9633_vm5 = vcmp.ge.s32.totalorder %v2338_v56, 1 }
 0x30e   : > { %12355 = vst [vmem:[#allocation27_spill] sm:$0xff] %v9575_v0  ;;  %4243 = vmatpush.msrb.mxu1 %v9575_v0  ;;  %v9609_v31 = vadd.f32 %v3548_v58, %v3450_v22  ;;  %v12367_v58 = vrot.slane %v9306_v30, 1  ;;  %v2537_v4 = vsel %vm9633_vm5, %v9623_v37, 0.0  ;;  %v9657_v36 = vadd.f32 1.0, %v6374_v44  ;;  %vm4168_vm9 = vmor %vm4166_vm11, %vm4167_vm15 }
 0x30f   : > { %v4163_v52 = vsub.f32 1.0, %v4162_v32  ;;  %v2570_v57 = vmul.f32 %v9293_v54, %v2537_v4  ;;  %vm4171_vm0 = vcmp.eq.f32.partialorder %v4170_v43, 8.507059e+37  ;;  %v9669_v44 = vmul.f32 %v9453_v7, %v12339_v39 }
 0x310   : > { %v5805_v25 = vmul.f32 -1.442695, %v9609_v31  ;;  %v9650_v63 = vsel %vm2737_vm12, %v11996_v16, %v12367_v58  ;;  %v2138_v29 = vsel %vm9640_vm3, %v2137_v42, %v2133_v11  ;;  %v9684_v4 = vmul.f32 %v9343_v19, %v9602_v12  ;;  %v12381_v16 = vld [vmem:[#allocation43_spill] sm:$0xff] }
 0x311   : > { %v4164_v17 = vmul.f32 %v6372_v28, %v4163_v52  ;;  %12368 = vst [vmem:[#allocation18_spill] sm:$0xff] %v9650_v63  ;;  %v4173_v52 = vor.u32 1.1754944e-38, %v4172_v49  ;;  %v2602_v45 = vadd.f32 %v9323_v24, %v2570_v57  ;;  %v2895_v15 = vmul.f32 %v9343_v19, %v9650_v63 }
 0x312   : > { %6375 = vpow2.f32 %v5805_v25  ;;  %v2960_v25 = vsel %vm9633_vm5, %v9353_v5, 0.0  ;;  %12369 = vst [vmem:[#allocation52_spill] sm:$0xff] %v9669_v44  ;;  %v12370_v49 = vmov 0  ;;  %v11997_v11 = vrot.slane %v9605_v41, 7 }
 0x313   : > { %v4165_v32 = vadd.f32 %v6372_v28, %v4164_v17  ;;  %v12371_v49 = vsel %vm9673_vm14, 4294967295, %v12370_v49  ;;  %v2700_v43 = vadd.f32 %v2668_v59, %v2602_v45  ;;  %v2993_v58 = vmul.f32 %v9438_v18, %v2960_v25 }
 0x314   : > { %12372 = vst [vmem:[#allocation53_spill] sm:$0xff] %v12371_v49  ;;  %6377 = vrcp.f32 %v9657_v36  ;;  %v12004_v13 = vrot.slane %v9605_v41, 1  ;;  %v9700_v25 = vmul.f32 %v2138_v29, %v9373_v46  ;;  %v2280_v45 = vadd.s32 16, %v7290_v6 }
 0x315   : > { %v4169_v56 = vsel %vm4168_vm9, %v6372_v28, %v4165_v32  ;;  %v12374_v32 = vld [vmem:[#allocation34_spill] sm:$0xff]  ;;  %v3059_v59 = vmul.f32 %v9453_v7, %v9250_v51  ;;  %v3157_v46 = vmul.f32 %v9460_v38, %v9413_v21  ;;  %v9742_v0 = vmul.f32 %v9336_v8, %v12382_v50 }
 0x316   : > { %v4174_v10 = vsel %vm4171_vm0, %v4173_v52, %v4169_v56  ;;  %v2366_v57 = vrot.slane %v12374_v32, 7  ;;  %v2927_v52 = vadd.f32 %v2895_v15, %v2700_v43  ;;  %12376 = vst [vmem:[#allocation55_spill] sm:$0xff] %v9700_v25  ;;  %v3286_v56 = vsel %vm9633_vm5, %v9398_v27, 0.0  ;;  %v12378_v27 = vld [vmem:[#allocation42_spill] sm:$0xff] }
 0x317   : > { %v9678_v28 = vmul.f32 %v4174_v10, %v9488_v33  ;;  %v9693_v33 = vmul.f32 %v9336_v8, %v12374_v32  ;;  %v9709_v10 = vmul.f32 %v9336_v8, %v9605_v41  ;;  %v9723_v60 = vmul.f32 %v9336_v8, %v12378_v27  ;;  %12383 = vst [vmem:[#allocation58_spill] sm:$0xff] %v9742_v0 }
 0x318   : > { %v6376_v17 = vpop.eup %6375  ;;  %v9719_v15 = vsel %vm2380_vm7, %v2366_v57, %v11997_v11  ;;  %v12379_v43 = vrot.slane %v12374_v32, 1  ;;  %v9738_v11 = vmul.f32 %v9336_v8, %v12381_v16  ;;  %v3319_v29 = vmul.f32 %v9561_v20, %v3286_v56 }
 0x319   : > { %12373 = vst [vmem:[#allocation54_spill] sm:$0xff] %v9678_v28  ;;  %v9688_v22 = vadd.f32 1.0, %v6376_v17  ;;  %4244 = vmatpush.msrb.mxu1 %v9678_v28  ;;  %v3025_v17 = vadd.f32 %v2993_v58, %v2927_v52  ;;  %v2312_v49 = vand.u32 15, %v2280_v45  ;;  %v9754_v21 = vmul.f32 %v9336_v8, %v9700_v25 }
 0x31a   : > { %12377 = vst [vmem:[#allocation56_spill] sm:$0xff] %v9719_v15  ;;  %v9732_v58 = vsel %vm2737_vm12, %v12379_v43, %v12004_v13  ;;  %v9734_v52 = vpop.eup %6377  ;;  %v2298_v43 = vadd.s32 160, %v7290_v6  ;;  %v12384_v13 = vld [vmem:[#allocation48_spill] sm:$0xff]  ;;  %v12387_v42 = vrot.slane %v9572_v47, 7  ;;  %v12388_v45 = vrot.slane %v9700_v25, 7 }
 0x31b   : > { %6379 = vrcp.f32 %v9688_v22  ;;  %12380 = vst [vmem:[#allocation57_spill] sm:$0xff] %v9732_v58  ;;  %v3091_v28 = vadd.f32 %v3059_v59, %v3025_v17  ;;  %v9750_v44 = vmul.f32 %v9336_v8, %v12384_v13  ;;  %v9758_v59 = vmul.f32 %v9336_v8, %v9572_v47 }
 0x31c   : > { %12386 = vst [vmem:[#allocation59_spill] sm:$0xff] %v9754_v21  ;;  %v9766_v32 = vsel %vm2380_vm7, %v12388_v45, %v12387_v42  ;;  %v12389_v51 = vrot.slane %v9572_v47, 1  ;;  %v12390_v5 = vrot.slane %v9700_v25, 1  ;;  %v3727_v8 = vmul.f32 %v9734_v52, %v9657_v36 }
 0x31d   : > { %12385 = vst [vmem:[#allocation48_spill] sm:$0xff] %v9750_v44  ;;  %v3189_v56 = vadd.f32 %v3157_v46, %v3091_v28  ;;  %v2330_v28 = vand.u32 15, %v2298_v43  ;;  %v3417_v37 = vmul.f32 %v9580_v62, %v9285_v23  ;;  %v3547_v42 = vmul.f32 %v9589_v34, %v9445_v48 }
 0x31e   : > { %v9774_v21 = vsel %vm2737_vm12, %v12390_v5, %v12389_v51  ;;  %v12392_v45 = vrot.slane %v12339_v39, 7  ;;  %v12393_v44 = vrot.slane %v9329_v1, 7  ;;  %vm9791_vm1 = vcmp.ge.s32.totalorder %v2312_v49, 1  ;;  %v12397_v39 = vld [vmem:[#allocation29_spill] sm:$0xff] }
 0x31f   : > { %12391 = vst [vmem:[#allocation60_spill] sm:$0xff] %v9774_v21  ;;  %v3351_v63 = vadd.f32 %v3319_v29, %v3189_v56  ;;  %v3033_v29 = vmul.f32 %v9453_v7, %v8631_v9  ;;  %v9799_v23 = vmul.f32 %v9460_v38, %v8987_v3  ;;  %v12398_v56 = vrot.slane %v12397_v39, 7 }
 0x320   : > { %v9789_v51 = vsel %vm2380_vm7, %v12393_v44, %v12392_v45  ;;  %vm9807_vm13 = vcmp.ge.s32.totalorder %v2330_v28, 1  ;;  %v4155_v49 = vand.u32 2147483647, %v9688_v22  ;;  %v4157_v45 = vand.u32 2147483648, %v9688_v22 }
 0x321   : > { %v6380_v17 = vpop.eup %6379  ;;  %12394 = vst [vmem:[#allocation61_spill] sm:$0xff] %v9789_v51  ;;  %v3449_v43 = vadd.f32 %v3417_v37, %v3351_v63  ;;  %v9805_v1 = vsel %vm2380_vm7, %v12398_v56, %v2366_v57  ;;  %v9815_v21 = vmul.f32 %v9580_v62, %v8588_v55  ;;  %v2511_v57 = vsel %vm9791_vm1, %v9789_v51, 0.0  ;;  %v12402_v51 = vld [vmem:[#allocation7_spill] sm:$0xff] }
 0x322   : > { %v4147_v46 = vmul.f32 %v6380_v17, %v9688_v22  ;;  %12399 = vst [vmem:[#allocation62_spill] sm:$0xff] %v9805_v1  ;;  %vm4152_vm4 = vweird.f32 %v6380_v17  ;;  %v2544_v28 = vmul.f32 %v9293_v54, %v2511_v57  ;;  %v2934_v56 = vsel %vm9791_vm1, %v8958_v35, 0.0 }
 0x323   : > { %v9817_v63 = vadd.f32 %v3547_v42, %v3449_v43  ;;  %v3260_v55 = vsel %vm9791_vm1, %v8829_v2, 0.0  ;;  %vm4151_vm6 = vweird.f32 %v9688_v22  ;;  %v2310_v43 = vand.u32 15, %v7290_v6 }
 0x324   : > { %v4148_v48 = vsub.f32 1.0, %v4147_v46  ;;  %v3728_v46 = vsub.f32 1.0, %v3727_v8  ;;  %v2529_v8 = vsel %vm9807_vm13, %v9805_v1, 0.0  ;;  %vm4153_vm2 = vmor %vm4151_vm6, %vm4152_vm4  ;;  %v4158_v57 = vor.u32 1.1754944e-38, %v4157_v45 }
 0x325   : > { %v2576_v39 = vadd.f32 %v9323_v24, %v2544_v28  ;;  %v9838_v25 = vmul.f32 %v9589_v34, %v12402_v51  ;;  %vm4156_vm8 = vcmp.eq.f32.partialorder %v4155_v49, 8.507059e+37  ;;  %v2967_v0 = vmul.f32 %v9438_v18, %v2934_v56 }
 0x326   : > { %v4149_v37 = vmul.f32 %v6380_v17, %v4148_v48  ;;  %v5804_v48 = vmul.f32 -1.442695, %v9817_v63  ;;  %v3729_v2 = vmul.f32 %v9734_v52, %v3728_v46  ;;  %v3293_v45 = vmul.f32 %v9561_v20, %v3260_v55 }
 0x327   : > { %v2674_v1 = vadd.f32 %v9594_v61, %v2576_v39  ;;  %vm9848_vm10 = vcmp.ge.s32.totalorder %v2310_v43, 1  ;;  %v2299_v49 = vadd.s32 168, %v7290_v6  ;;  %vm3731_vm15 = vweird.f32 %v9657_v36 }
 0x328   : > { %v4150_v42 = vadd.f32 %v6380_v17, %v4149_v37  ;;  %6381 = vpow2.f32 %v5804_v48  ;;  %v2562_v37 = vmul.f32 %v9293_v54, %v2529_v8  ;;  %v3730_v8 = vadd.f32 %v9734_v52, %v3729_v2 }
 0x329   : > { %v2901_v46 = vadd.f32 %v9684_v4, %v2674_v1  ;;  %vm3732_vm5 = vweird.f32 %v9734_v52  ;;  %v3737_v61 = vand.u32 2147483648, %v9657_v36  ;;  %v2331_v39 = vand.u32 15, %v2299_v49 }
 0x32a   : > { %v4154_v5 = vsel %vm4153_vm2, %v6380_v17, %v4150_v42  ;;  %v2300_v17 = vadd.s32 176, %v7290_v6  ;;  %v2594_v56 = vadd.f32 %v9323_v24, %v2562_v37  ;;  %v3735_v42 = vand.u32 2147483647, %v9657_v36  ;;  %vm9866_vm3 = vmor %vm3731_vm15, %vm3732_vm5 }
 0x32b   : > { %v4159_v22 = vsel %vm4156_vm8, %v4158_v57, %v4154_v5  ;;  %v2999_v55 = vadd.f32 %v2967_v0, %v2901_v46  ;;  %v2563_v4 = vmul.f32 %v9293_v54, %v9719_v15  ;;  %v2887_v1 = vmul.f32 %v9343_v19, %v9732_v58 }
 0x32c   : > { %v9846_v28 = vmul.f32 %v4159_v22, %v9609_v31  ;;  %v2332_v31 = vand.u32 15, %v2300_v17  ;;  %v12408_v57 = vrot.slane %v12378_v27, 7  ;;  %v12409_v2 = vrot.slane %v9605_v41, 7 }
 0x32d   : > { %v12413_v5 = vrot.slane %v12378_v27, 1  ;;  %v12414_v37 = vrot.slane %v9605_v41, 1  ;;  %vm9890_vm9 = vcmp.lt.s32.totalorder %v2331_v39, 15  ;;  %v3065_v46 = vadd.f32 %v3033_v29, %v2999_v55 }
 0x32e   : > { %12403 = vst [vmem:[#allocation7_spill] sm:$0xff] %v9846_v28  ;;  %4245 = vmatpush.msrb.mxu1 %v9846_v28  ;;  %v6382_v48 = vpop.eup %6381  ;;  %v9876_v0 = vsel %vm2380_vm7, %v12409_v2, %v12408_v57  ;;  %vm9878_vm11 = vcmp.ge.s32.totalorder %v2332_v31, 1  ;;  %v3734_v31 = vsel %vm9866_vm3, %v9734_v52, %v3730_v8  ;;  %v3738_v2 = vor.u32 1.1754944e-38, %v3737_v61 }
 0x32f   : > { %12410 = vst [vmem:[#allocation63_spill] sm:$0xff] %v9876_v0  ;;  %v9888_v22 = vsel %vm2737_vm12, %v12414_v37, %v12413_v5  ;;  %v9894_v49 = vadd.f32 1.0, %v6382_v48  ;;  %v2531_v57 = vsel %vm9878_vm11, %v9876_v0, 0.0  ;;  %v2692_v5 = vadd.f32 %v9693_v33, %v2594_v56 }
 0x330   : > { %12415 = vst [vmem:[#allocation64_spill] sm:$0xff] %v9888_v22  ;;  %v2564_v28 = vmul.f32 %v9293_v54, %v2531_v57  ;;  %v2855_v39 = vsel %vm9890_vm9, %v9888_v22, 0.0  ;;  %vm3736_vm0 = vcmp.eq.f32.partialorder %v3735_v42, 8.507059e+37  ;;  %v3258_v52 = vsel %vm9848_vm10, %v8958_v35, 0.0 }
 0x331   : > { %6383 = vrcp.f32 %v9894_v49  ;;  %v2595_v29 = vadd.f32 %v9323_v24, %v2563_v4  ;;  %v3163_v8 = vadd.f32 %v9799_v23, %v3065_v46  ;;  %v3739_v61 = vsel %vm3736_vm0, %v3738_v2, %v3734_v31 }
 0x332   : > { %v2919_v55 = vadd.f32 %v2887_v1, %v2692_v5  ;;  %v2952_v48 = vsel %vm9807_vm13, %v9876_v0, 0.0  ;;  %v4142_v43 = vand.u32 2147483648, %v9894_v49  ;;  %v2596_v33 = vadd.f32 %v9323_v24, %v2564_v28  ;;  %v12430_v0 = vld [vmem:[#allocation10_spill] sm:$0xff] }
 0x333   : > { %v2888_v56 = vmul.f32 %v9343_v19, %v2855_v39  ;;  %v2985_v42 = vmul.f32 %v9438_v18, %v2952_v48  ;;  %v4140_v35 = vand.u32 2147483647, %v9894_v49  ;;  %v3325_v37 = vadd.f32 %v3293_v45, %v3163_v8 }
 0x334   : > { %v9923_v23 = vmul.f32 %v9460_v38, %v9602_v12  ;;  %v9927_v4 = vmul.f32 %v9580_v62, %v8631_v9  ;;  %v9930_v1 = vmul.f32 %v9561_v20, %v3258_v52  ;;  %v2693_v28 = vadd.f32 %v9709_v10, %v2595_v29 }
 0x335   : > { %v3017_v46 = vadd.f32 %v2985_v42, %v2919_v55  ;;  %v3051_v31 = vmul.f32 %v9453_v7, %v12378_v27  ;;  %vm4136_vm1 = vweird.f32 %v9894_v49  ;;  %v3423_v45 = vadd.f32 %v9815_v21, %v3325_v37  ;;  %v12429_v27 = vld [vmem:[#allocation5_spill] sm:$0xff] }
 0x336   : > { %12418 = vst [vmem:[#allocation65_spill] sm:$0xff] %v9927_v4  ;;  %v9938_v12 = vmul.f32 %v3739_v61, %v9196_v26  ;;  %v9942_v9 = vmul.f32 %v9589_v34, %v8987_v3  ;;  %v4143_v2 = vor.u32 1.1754944e-38, %v4142_v43  ;;  %v2694_v39 = vadd.f32 %v9723_v60, %v2596_v33  ;;  %v12423_v3 = vld [vmem:[#allocation44_spill] sm:$0xff]  ;;  %v12424_v61 = vld [vmem:[#allocation45_spill] sm:$0xff] }
 0x337   : > { %v6384_v57 = vpop.eup %6383  ;;  %v2920_v10 = vadd.f32 %v2888_v56, %v2693_v28  ;;  %v9945_v5 = vadd.f32 %v3051_v31, %v3017_v46  ;;  %vm9948_vm4 = vcmp.eq.f32.partialorder %v4140_v35, 8.507059e+37  ;;  %v9953_v26 = vadd.f32 %v9838_v25, %v3423_v45  ;;  %v12457_v4 = vld [vmem:[#allocation9_spill] sm:$0xff] }
 0x338   : > { %12419 = vst [vmem:[#allocation66_spill] sm:$0xff] %v9942_v9  ;;  %v4132_v52 = vmul.f32 %v6384_v57, %v9894_v49  ;;  %v2305_v21 = vadd.s32 216, %v7290_v6  ;;  %v2565_v8 = vmul.f32 %v9293_v54, %v12423_v3  ;;  %vm4137_vm6 = vweird.f32 %v6384_v57 }
 0x339   : > { %12420 = vst [vmem:[#allocation67_spill] sm:$0xff] %v9945_v5  ;;  %v2569_v60 = vmul.f32 %v9293_v54, %v9766_v32  ;;  %v2889_v55 = vmul.f32 %v9343_v19, %v12424_v61  ;;  %v2986_v48 = vmul.f32 %v9438_v18, %v12423_v3  ;;  %v5778_v33 = vmul.f32 -1.442695, %v9953_v26  ;;  %vm4138_vm8 = vmor %vm4136_vm1, %vm4137_vm6 }
 0x33a   : > { %v4133_v43 = vsub.f32 1.0, %v4132_v52  ;;  %v2337_v25 = vand.u32 15, %v2305_v21  ;;  %v12425_v56 = vrot.slane %v9467_v53, 1  ;;  %v12426_v42 = vrot.slane %v9572_v47, 1 }
 0x33b   : > { %v2601_v37 = vadd.f32 %v9323_v24, %v2569_v60  ;;  %v2992_v28 = vmul.f32 %v9438_v18, %v9481_v14  ;;  %v2302_v46 = vadd.s32 192, %v7290_v6  ;;  %v2301_v31 = vadd.s32 184, %v7290_v6 }
 0x33c   : > { %v9971_v35 = vsel %vm2737_vm12, %v12426_v42, %v12425_v56  ;;  %v4134_v45 = vmul.f32 %v6384_v57, %v4133_v43  ;;  %6385 = vpow2.f32 %v5778_v33  ;;  %vm9978_vm2 = vcmp.lt.s32.totalorder %v2337_v25, 15 }
 0x33d   : > { %v2597_v21 = vadd.f32 %v9323_v24, %v2565_v8  ;;  %v2699_v56 = vadd.f32 %v9758_v59, %v2601_v37  ;;  %v2861_v60 = vsel %vm9978_vm2, %v9971_v35, 0.0  ;;  %v3058_v42 = vmul.f32 %v9453_v7, %v9306_v30 }
 0x33e   : > { %v3123_v43 = vsel %vm9978_vm2, %v12429_v27, 0.0  ;;  %v4135_v33 = vadd.f32 %v6384_v57, %v4134_v45  ;;  %v2894_v25 = vmul.f32 %v9343_v19, %v2861_v60  ;;  %v3513_v59 = vsel %vm9978_vm2, %v12430_v0, 0.0  ;;  %v12444_v27 = vld [vmem:[#allocation55_spill] sm:$0xff] }
 0x33f   : > { %v3156_v58 = vmul.f32 %v9460_v38, %v3123_v43  ;;  %v2334_v8 = vand.u32 15, %v2302_v46  ;;  %v12431_v37 = vrot.slane %v12382_v50, 7  ;;  %v12432_v3 = vrot.slane %v12381_v16, 7 }
 0x340   : > { %v2333_v60 = vand.u32 15, %v2301_v31  ;;  %v2695_v43 = vadd.f32 %v9738_v11, %v2597_v21  ;;  %v4139_v41 = vsel %vm4138_vm8, %v6384_v57, %v4135_v33  ;;  %v2926_v22 = vadd.f32 %v2894_v25, %v2699_v56  ;;  %v12470_v44 = vld [vmem:[#allocation67_spill] sm:$0xff] }
 0x341   : > { %v10006_v45 = vsel %vm2380_vm7, %v12432_v3, %v12431_v37  ;;  %v12433_v0 = vrot.slane %v12382_v50, 1  ;;  %v12434_v52 = vrot.slane %v12381_v16, 1  ;;  %v2921_v46 = vadd.f32 %v2889_v55, %v2694_v39  ;;  %v12467_v3 = vld [vmem:[#allocation3_spill] sm:$0xff] }
 0x342   : > { %v4144_v15 = vsel %vm9948_vm4, %v4143_v2, %v4139_v41  ;;  %vm10019_vm15 = vcmp.ge.s32.totalorder %v2334_v8, 1  ;;  %vm10023_vm5 = vcmp.lt.s32.totalorder %v2333_v60, 15  ;;  %v2954_v57 = vsel %vm9878_vm11, %v10006_v45, 0.0  ;;  %v6386_v31 = vpop.eup %6385 }
 0x343   : > { %v10015_v49 = vsel %vm2737_vm12, %v12434_v52, %v12433_v0  ;;  %v10031_v21 = vmul.f32 %v4144_v15, %v9817_v63  ;;  %v3024_v39 = vadd.f32 %v2992_v28, %v2926_v22  ;;  %v2533_v41 = vsel %vm10019_vm15, %v10006_v45, 0.0  ;;  %v12440_v63 = vld [vmem:[#allocation22_spill] sm:$0xff] }
 0x344   : > { %v2857_v2 = vsel %vm10023_vm5, %v10015_v49, 0.0  ;;  %v10039_v29 = vadd.f32 1.0, %v6386_v31  ;;  %v2566_v55 = vmul.f32 %v9293_v54, %v2533_v41  ;;  %v3052_v33 = vmul.f32 %v9453_v7, %v12381_v16  ;;  %v12441_v41 = vld [vmem:[#allocation49_spill] sm:$0xff] }
 0x345   : > { %12439 = vst [vmem:[#allocation45_spill] sm:$0xff] %v10031_v21  ;;  %v2890_v56 = vmul.f32 %v9343_v19, %v2857_v2  ;;  %4246 = vmatpush.msrb.mxu1 %v10031_v21  ;;  %v3090_v15 = vadd.f32 %v3058_v42, %v3024_v39  ;;  %v3318_v22 = vmul.f32 %v9561_v20, %v12440_v63  ;;  %v2304_v52 = vadd.s32 208, %v7290_v6 }
 0x346   : > { %v3416_v28 = vmul.f32 %v9580_v62, %v9243_v40  ;;  %v3018_v25 = vadd.f32 %v2986_v48, %v2920_v10  ;;  %6387 = vrcp.f32 %v10039_v29  ;;  %v3546_v8 = vmul.f32 %v9589_v34, %v3513_v59  ;;  %v12442_v10 = vld [vmem:[#allocation50_spill] sm:$0xff] }
 0x347   : > { %v3054_v37 = vmul.f32 %v9453_v7, %v12384_v13  ;;  %v2987_v60 = vmul.f32 %v9438_v18, %v2954_v57  ;;  %v3188_v0 = vadd.f32 %v3156_v58, %v3090_v15  ;;  %v2598_v42 = vadd.f32 %v9323_v24, %v2566_v55  ;;  %v12443_v57 = vld [vmem:[#allocation58_spill] sm:$0xff] }
 0x348   : > { %v2922_v31 = vadd.f32 %v2890_v56, %v2695_v43  ;;  %v3750_v39 = vand.u32 2147483647, %v10039_v29  ;;  %v2567_v40 = vmul.f32 %v9293_v54, %v12441_v41  ;;  %v2891_v48 = vmul.f32 %v9343_v19, %v12442_v10 }
 0x349   : > { %v3053_v59 = vmul.f32 %v9453_v7, %v12382_v50  ;;  %v3350_v2 = vadd.f32 %v3318_v22, %v3188_v0  ;;  %v2336_v63 = vand.u32 15, %v2304_v52  ;;  %v2696_v58 = vadd.f32 %v12443_v57, %v2598_v42  ;;  %v12453_v50 = vld [vmem:[#allocation14_spill] sm:$0xff] }
 0x34a   : > { %v2988_v15 = vmul.f32 %v9438_v18, %v12441_v41  ;;  %v3752_v43 = vand.u32 2147483648, %v10039_v29  ;;  %v2599_v55 = vadd.f32 %v9323_v24, %v2567_v40  ;;  %v3019_v56 = vadd.f32 %v2987_v60, %v2921_v46 }
 0x34b   : > { %v10069_v21 = vadd.f32 %v3052_v33, %v3018_v25  ;;  %vm3746_vm3 = vweird.f32 %v10039_v29  ;;  %v3448_v16 = vadd.f32 %v3416_v28, %v3350_v2  ;;  %v12445_v9 = vrot.slane %v12444_v27, 7  ;;  %v12449_v28 = vld [vmem:[#allocation48_spill] sm:$0xff] }
 0x34c   : > { %v12446_v22 = vrot.slane %v12384_v13, 7  ;;  %vm10080_vm0 = vcmp.ge.s32.totalorder %v2336_v63, 1  ;;  %v2303_v42 = vadd.s32 200, %v7290_v6  ;;  %v6388_v46 = vpop.eup %6387  ;;  %v2697_v25 = vadd.f32 %v12449_v28, %v2599_v55 }
 0x34d   : > { %v2923_v60 = vadd.f32 %v2891_v48, %v2696_v58  ;;  %v3020_v40 = vadd.f32 %v2988_v15, %v2922_v31  ;;  %v3742_v2 = vmul.f32 %v6388_v46, %v10039_v29  ;;  %vm10090_vm1 = vcmp.eq.f32.partialorder %v3750_v39, 8.507059e+37  ;;  %v12454_v15 = vld [vmem:[#allocation60_spill] sm:$0xff] }
 0x34e   : > { %v10078_v0 = vsel %vm2380_vm7, %v12446_v22, %v12445_v9  ;;  %v10094_v63 = vadd.f32 %v3546_v8, %v3448_v16  ;;  %vm3747_vm7 = vweird.f32 %v6388_v46  ;;  %v3753_v22 = vor.u32 1.1754944e-38, %v3752_v43  ;;  %v12455_v43 = vld [vmem:[#allocation18_spill] sm:$0xff] }
 0x34f   : > { %v2535_v33 = vsel %vm10080_vm0, %v10078_v0, 0.0  ;;  %v2958_v30 = vsel %vm10080_vm0, %v12453_v50, 0.0  ;;  %v3151_v48 = vmul.f32 %v9460_v38, %v12442_v10  ;;  %v3743_v31 = vsub.f32 1.0, %v3742_v2  ;;  %v12456_v10 = vld [vmem:[#allocation59_spill] sm:$0xff] }
 0x350   : > { %12452 = vst [vmem:[#allocation10_spill] sm:$0xff] %v10094_v63  ;;  %v2568_v57 = vmul.f32 %v9293_v54, %v2535_v33  ;;  %v5803_v58 = vmul.f32 -1.442695, %v10094_v63  ;;  %v2893_v16 = vmul.f32 %v9343_v19, %v12454_v15  ;;  %v2991_v8 = vmul.f32 %v9438_v18, %v2958_v30 }
 0x351   : > { %v3057_v54 = vmul.f32 %v9453_v7, %v9467_v53  ;;  %v3155_v55 = vmul.f32 %v9460_v38, %v12455_v43  ;;  %v2335_v33 = vand.u32 15, %v2303_v42  ;;  %v3744_v28 = vmul.f32 %v6388_v46, %v3743_v31  ;;  %v10286_v42 = vld [vmem:[%s11866_s6] ss:$0 sm:$0xff] }
 0x352   : > { %v2600_v39 = vadd.f32 %v9323_v24, %v2568_v57  ;;  %6389 = vpow2.f32 %v5803_v58  ;;  %v3284_v24 = vsel %vm10080_vm0, %v12457_v4, 0.0  ;;  %v12458_v57 = vld [vmem:[#allocation12_spill] sm:$0xff]  ;;  %v12459_v30 = vrot.slane %v12444_v27, 1 }
 0x353   : > { %v3415_v63 = vmul.f32 %v9580_v62, %v12458_v57  ;;  %v12460_v5 = vrot.slane %v12384_v13, 1  ;;  %vm10125_vm4 = vcmp.lt.s32.totalorder %v2335_v33, 15  ;;  %v3745_v4 = vadd.f32 %v6388_v46, %v3744_v28 }
 0x354   : > { %v2698_v2 = vadd.f32 %v12456_v10, %v2600_v39  ;;  %v2956_v10 = vsel %vm10019_vm15, %v10078_v0, 0.0  ;;  %v3086_v39 = vadd.f32 %v3054_v37, %v3020_v40  ;;  %v3085_v57 = vadd.f32 %v3053_v59, %v3019_v56 }
 0x355   : > { %v10123_v14 = vsel %vm2737_vm12, %v12460_v5, %v12459_v30  ;;  %v2989_v58 = vmul.f32 %v9438_v18, %v2956_v10  ;;  %vm3748_vm12 = vmor %vm3746_vm3, %vm3747_vm7  ;;  %v3055_v30 = vmul.f32 %v9453_v7, %v12444_v27  ;;  %v3317_v29 = vmul.f32 %v9561_v20, %v3284_v24 }
 0x356   : > { %v2925_v52 = vadd.f32 %v2893_v16, %v2698_v2  ;;  %v2859_v31 = vsel %vm10125_vm4, %v10123_v14, 0.0  ;;  %v3119_v33 = vsel %vm10023_vm5, %v10123_v14, 0.0  ;;  %v3749_v28 = vsel %vm3748_vm12, %v6388_v46, %v3745_v4 }
 0x357   : > { %v2892_v5 = vmul.f32 %v9343_v19, %v2859_v31  ;;  %v3021_v2 = vadd.f32 %v2989_v58, %v2923_v60  ;;  %v3754_v10 = vsel %vm10090_vm1, %v3753_v22, %v3749_v28  ;;  %v3152_v19 = vmul.f32 %v9460_v38, %v3119_v33 }
 0x358   : > { %v3023_v16 = vadd.f32 %v2991_v8, %v2925_v52  ;;  %v6390_v37 = vpop.eup %6389  ;;  %v10150_v40 = vmul.f32 %v3754_v10, %v9953_v26  ;;  %v3183_v56 = vadd.f32 %v3151_v48, %v3085_v57  ;;  %v2990_v60 = vmul.f32 %v9438_v18, %v9766_v32  ;;  %v12463_v8 = vld [vmem:[#allocation8_spill] sm:$0xff] }
 0x359   : > { %v2924_v6 = vadd.f32 %v2892_v5, %v2697_v25  ;;  %v3087_v59 = vadd.f32 %v3055_v30, %v3021_v2  ;;  %v10152_v46 = vadd.f32 1.0, %v6390_v37  ;;  %v3153_v9 = vmul.f32 %v9460_v38, %v12454_v15 }
 0x35a   : > { %v3089_v31 = vadd.f32 %v3057_v54, %v3023_v16  ;;  %v3184_v22 = vadd.f32 %v3152_v19, %v3086_v39  ;;  %4236 = vmatpush.msrb.mxu0 %v10150_v40  ;;  %v3545_v24 = vmul.f32 %v9589_v34, %v12463_v8  ;;  %v3314_v26 = vmul.f32 %v9561_v20, %v9766_v32 }
 0x35b   : > { %v3280_v48 = vsel %vm9878_vm11, %v10078_v0, 0.0  ;;  %6391 = vrcp.f32 %v10152_v46  ;;  %v4127_v54 = vand.u32 2147483648, %v10152_v46  ;;  %v3056_v4 = vmul.f32 %v9453_v7, %v9572_v47 }
 0x35c   : > { %v3187_v25 = vadd.f32 %v3155_v55, %v3089_v31  ;;  %v3412_v55 = vmul.f32 %v9580_v62, %v9572_v47  ;;  %4237 = vmatpush.msrb.mxu0 %v9938_v12  ;;  %v3022_v58 = vadd.f32 %v2990_v60, %v2924_v6  ;;  %v3185_v5 = vadd.f32 %v3153_v9, %v3087_v59  ;;  %v12478_v59 = vld [vmem:[#allocation5_spill] sm:$0xff] }
 0x35d   : > { %v3346_v32 = vadd.f32 %v3314_v26, %v3184_v22  ;;  %v4125_v39 = vand.u32 2147483647, %v10152_v46  ;;  %v4128_v36 = vor.u32 1.1754944e-38, %v4127_v54  ;;  %v3313_v0 = vmul.f32 %v9561_v20, %v3280_v48 }
 0x35e   : > { %v3349_v52 = vadd.f32 %v3317_v29, %v3187_v25  ;;  %v3411_v33 = vmul.f32 %v9580_v62, %v12444_v27  ;;  %v3088_v28 = vadd.f32 %v3056_v4, %v3022_v58  ;;  %v3413_v7 = vmul.f32 %v9580_v62, %v9467_v53  ;;  %v12468_v25 = vld [vmem:[#allocation52_spill] sm:$0xff] }
 0x35f   : > { %v3541_v47 = vmul.f32 %v9589_v34, %v12454_v15  ;;  %v3444_v16 = vadd.f32 %v3412_v55, %v3346_v32  ;;  %v3345_v6 = vadd.f32 %v3313_v0, %v3183_v56  ;;  %v3117_v2 = vsel %vm9890_vm9, %v10015_v49, 0.0 }
 0x360   : > { %v3447_v57 = vadd.f32 %v3415_v63, %v3349_v52  ;;  %v3312_v30 = vmul.f32 %v9561_v20, %v12441_v41  ;;  %vm4121_vm11 = vweird.f32 %v10152_v46  ;;  %v12464_v63 = vld [vmem:[#allocation61_spill] sm:$0xff]  ;;  %v3150_v10 = vmul.f32 %v9460_v38, %v3117_v2 }
 0x361   : > { %v2932_v53 = vsel %vm9848_vm10, %v12464_v63, 0.0  ;;  %v3410_v15 = vmul.f32 %v9580_v62, %v12384_v13  ;;  %v6392_v29 = vpop.eup %6391  ;;  %v3121_v41 = vsel %vm10125_vm4, %v9971_v35, 0.0  ;;  %v3282_v37 = vsel %vm10019_vm15, %v12453_v50, 0.0 }
 0x362   : > { %v10187_v27 = vadd.f32 %v3545_v24, %v3447_v57  ;;  %v2965_v19 = vmul.f32 %v9438_v18, %v2932_v53  ;;  %v3509_v51 = vsel %vm10023_vm5, %v9971_v35, 0.0  ;;  %v4117_v31 = vmul.f32 %v6392_v29, %v10152_v46 }
 0x363   : > { %vm10206_vm10 = vcmp.eq.f32.partialorder %v4125_v39, 8.507059e+37  ;;  %v3154_v13 = vmul.f32 %v9460_v38, %v3121_v41  ;;  %v3507_v56 = vsel %vm9890_vm9, %v10123_v14, 0.0  ;;  %v3315_v60 = vmul.f32 %v9561_v20, %v3282_v37  ;;  %v12476_v37 = vld [vmem:[#allocation23_spill] sm:$0xff] }
 0x364   : > { %v5802_v18 = vmul.f32 -1.442695, %v10187_v27  ;;  %v2997_v50 = vadd.f32 %v2965_v19, %v12467_v3  ;;  %v3542_v35 = vmul.f32 %v9589_v34, %v3509_v51  ;;  %v3443_v11 = vadd.f32 %v3411_v33, %v3345_v6  ;;  %v12469_v33 = vld [vmem:[#allocation4_spill] sm:$0xff] }
 0x365   : > { %v4118_v9 = vsub.f32 1.0, %v4117_v31  ;;  %vm4122_vm6 = vweird.f32 %v6392_v29  ;;  %v3182_v22 = vadd.f32 %v3150_v10, %v10069_v21  ;;  %v3347_v24 = vadd.f32 %v3315_v60, %v3185_v5  ;;  %v12477_v31 = vld [vmem:[#allocation66_spill] sm:$0xff]  ;;  %v12479_v3 = vld [vmem:[#allocation32_spill] sm:$0xff] }
 0x366   : > { %6393 = vpow2.f32 %v5802_v18  ;;  %v3063_v8 = vadd.f32 %v12468_v25, %v2997_v50  ;;  %v10220_v26 = vadd.f32 %v3542_v35, %v3444_v16  ;;  %v10222_v48 = vadd.f32 %v3541_v47, %v3443_v11  ;;  %vm4123_vm9 = vmor %vm4121_vm11, %vm4122_vm6 }
 0x367   : > { %v4119_v14 = vmul.f32 %v6392_v29, %v4118_v9  ;;  %v3186_v17 = vadd.f32 %v3154_v13, %v3088_v28  ;;  %v3344_v54 = vadd.f32 %v3312_v30, %v3182_v22  ;;  %v3540_v4 = vmul.f32 %v9589_v34, %v3507_v56  ;;  %v12472_v30 = vld [vmem:[#allocation10_spill] sm:$0xff] }
 0x368   : > { %v3161_v55 = vadd.f32 %v9923_v23, %v3063_v8  ;;  %v3445_v52 = vadd.f32 %v3413_v7, %v3347_v24  ;;  %v5799_v58 = vmul.f32 -1.442695, %v10220_v26  ;;  %v5798_v32 = vmul.f32 -1.442695, %v10222_v48 }
 0x369   : > { %v4120_v21 = vadd.f32 %v6392_v29, %v4119_v14  ;;  %v3442_v39 = vadd.f32 %v3410_v15, %v3344_v54  ;;  %v3149_v5 = vmul.f32 %v9460_v38, %v12424_v61  ;;  %v3278_v0 = vsel %vm9807_vm13, %v10006_v45, 0.0  ;;  %v10259_v15 = vld [vmem:[%s11865_s5] ss:$0 sm:$0xff]  ;;  %v10294_v14 = vld [vmem:[%s11865_s5 + $0x1] ss:$0 sm:$0xff] }
 0x36a   : > { %v3323_v23 = vadd.f32 %v9930_v1, %v3161_v55  ;;  %v3316_v57 = vmul.f32 %v9561_v20, %v12469_v33  ;;  %v3543_v28 = vmul.f32 %v9589_v34, %v12455_v43  ;;  %6395 = vpow2.f32 %v5799_v58  ;;  %v12471_v1 = vld [vmem:[#allocation65_spill] sm:$0xff]  ;;  %v12481_v58 = vld [vmem:[#allocation46_spill] sm:$0xff] }
 0x36b   : > { %v4124_v47 = vsel %vm4123_vm9, %v6392_v29, %v4120_v21  ;;  %6397 = vpow2.f32 %v5798_v32  ;;  %v10241_v38 = vadd.f32 %v3540_v4, %v3442_v39  ;;  %v3181_v45 = vadd.f32 %v3149_v5, %v12470_v44  ;;  %v12474_v29 = vld [vmem:[#allocation38_spill] sm:$0xff]  ;;  %v12483_v5 = vld [vmem:[#allocation29_spill] sm:$0xff] }
 0x36c   : > { %v6394_v7 = vpop.eup %6393  ;;  %v4129_v46 = vsel %vm10206_vm10, %v4128_v36, %v4124_v47  ;;  %v3421_v6 = vadd.f32 %v12471_v1, %v3323_v23  ;;  %v3348_v2 = vadd.f32 %v3316_v57, %v3186_v17  ;;  %v10252_v43 = vadd.f32 %v3543_v28, %v3445_v52  ;;  %v12480_v17 = vld [vmem:[#allocation26_spill] sm:$0xff]  ;;  %v12484_v47 = vld [vmem:[#allocation39_spill] sm:$0xff] }
 0x36d   : > { %v10246_v16 = vadd.f32 1.0, %v6394_v7  ;;  %v10250_v63 = vmul.f32 %v4129_v46, %v12472_v30  ;;  %v5797_v53 = vmul.f32 -1.442695, %v10241_v38  ;;  %v3311_v10 = vmul.f32 %v9561_v20, %v3278_v0  ;;  %v12482_v21 = vld [vmem:[#allocation50_spill] sm:$0xff]  ;;  %v10313_v7 = vld [vmem:[%s11865_s5 + $0x2] ss:$0 sm:$0xff] }
 0x36e   : > { %v12475_v19 = vsel %vm9673_vm14, %v12474_v29, 0.0  ;;  %v3414_v51 = vmul.f32 %v9580_v62, %v12476_v37  ;;  %v10271_v20 = vadd.f32 %v12477_v31, %v3421_v6  ;;  %v3511_v18 = vsel %vm10125_vm4, %v12478_v59, 0.0 }
 0x36f   : > { %v2560_v41 = vmul.f32 %v10259_v15, %v12475_v19  ;;  %6399 = vrcp.f32 %v10246_v16  ;;  %4247 = vmatpush.msrb.mxu1 %v10250_v63  ;;  %v5800_v13 = vmul.f32 -1.442695, %v10252_v43  ;;  %v2561_v50 = vmul.f32 %v10259_v15, %v12479_v3 }
 0x370   : > { %v6396_v56 = vpop.eup %6395  ;;  %v3446_v60 = vadd.f32 %v3414_v51, %v3348_v2  ;;  %v3544_v35 = vmul.f32 %v9589_v34, %v3511_v18  ;;  %6401 = vpow2.f32 %v5797_v53  ;;  %v5776_v9 = vmul.f32 -1.442695, %v10271_v20  ;;  %v12485_v53 = vld [vmem:[#allocation6_spill] sm:$0xff] }
 0x371   : > { %v6398_v11 = vpop.eup %6397  ;;  %6403 = vpow2.f32 %v5800_v13  ;;  %v10281_v22 = vadd.f32 1.0, %v6396_v56  ;;  %v3343_v25 = vadd.f32 %v3311_v10, %v3181_v45  ;;  %v2592_v8 = vadd.f32 %v10286_v42, %v2560_v41 }
 0x372   : > { %v10289_v24 = vadd.f32 %v3544_v35, %v3446_v60  ;;  %v2658_v54 = vmul.f32 %v10294_v14, %v12480_v17  ;;  %6405 = vpow2.f32 %v5776_v9  ;;  %v10298_v4 = vadd.f32 1.0, %v6398_v11 }
 0x373   : > { %6407 = vrcp.f32 %v10281_v22  ;;  %v3409_v32 = vmul.f32 %v9580_v62, %v12481_v58  ;;  %v3539_v39 = vmul.f32 %v9589_v34, %v12482_v21  ;;  %v2659_v0 = vmul.f32 %v10294_v14, %v12483_v5 }
 0x374   : > { %v5801_v52 = vmul.f32 -1.442695, %v10289_v24  ;;  %v2593_v23 = vadd.f32 %v10286_v42, %v2561_v50  ;;  %v2690_v28 = vadd.f32 %v2658_v54, %v2592_v8  ;;  %v2885_v62 = vmul.f32 %v10313_v7, %v12484_v47 }
 0x375   : > { %v6400_v55 = vpop.eup %6399  ;;  %v3441_v44 = vadd.f32 %v3409_v32, %v3343_v25  ;;  %v4110_v46 = vand.u32 2147483647, %v10246_v16  ;;  %v4112_v6 = vand.u32 2147483648, %v10246_v16  ;;  %v10327_v10 = vadd.s32 152, %v12485_v53 }
 0x376   : > { %v4102_v33 = vmul.f32 %v6400_v55, %v10246_v16  ;;  %v6402_v57 = vpop.eup %6401  ;;  %6409 = vpow2.f32 %v5801_v52  ;;  %vm4107_vm13 = vweird.f32 %v6400_v55  ;;  %v4067_v37 = vand.u32 2147483648, %v10281_v22 }
 0x377   : > { %v6404_v34 = vpop.eup %6403  ;;  %6411 = vrcp.f32 %v10298_v4  ;;  %v10319_v1 = vadd.f32 1.0, %v6402_v57  ;;  %v10324_v30 = vadd.f32 %v3539_v39, %v3441_v44  ;;  %v10333_v31 = vadd.f32 %v2885_v62, %v2690_v28 }
 0x378   : > { %v4103_v45 = vsub.f32 1.0, %v4102_v33  ;;  %v10322_v2 = vadd.f32 1.0, %v6404_v34  ;;  %v6406_v19 = vpop.eup %6405  ;;  %v4052_v18 = vand.u32 2147483648, %v10298_v4  ;;  %vm4106_vm2 = vweird.f32 %v10246_v16 }
 0x379   : > { %6413 = vrcp.f32 %v10319_v1  ;;  %v10331_v51 = vpop.eup %6407  ;;  %v10335_v59 = vadd.f32 1.0, %v6406_v19  ;;  %vm4111_vm8 = vcmp.eq.f32.partialorder %v4110_v46, 8.507059e+37  ;;  %vm4108_vm15 = vmor %vm4106_vm2, %vm4107_vm13  ;;  %v4113_v60 = vor.u32 1.1754944e-38, %v4112_v6 }
 0x37a   : > { %v4104_v41 = vmul.f32 %v6400_v55, %v4103_v45  ;;  %6415 = vrcp.f32 %v10322_v2  ;;  %v4057_v56 = vmul.f32 %v10331_v51, %v10281_v22  ;;  %v4065_v35 = vand.u32 2147483647, %v10281_v22 }
 0x37b   : > { %6417 = vrcp.f32 %v10335_v59  ;;  %v4050_v11 = vand.u32 2147483647, %v10298_v4  ;;  %v10349_v54 = vor.u32 1.1754944e-38, %v4067_v37  ;;  %v2329_v16 = vand.u32 15, %v10327_v10 }
 0x37c   : > { %v4105_v13 = vadd.f32 %v6400_v55, %v4104_v41  ;;  %v6410_v50 = vpop.eup %6409  ;;  %v4058_v58 = vsub.f32 1.0, %v4057_v56  ;;  %v10352_v32 = vor.u32 1.1754944e-38, %v4052_v18  ;;  %v10354_v21 = vadd.f32 %v2659_v0, %v2593_v23 }
 0x37d   : > { %v10345_v9 = vpop.eup %6411  ;;  %v10347_v8 = vadd.f32 1.0, %v6410_v50  ;;  %vm4061_vm5 = vweird.f32 %v10281_v22  ;;  %v4035_v57 = vand.u32 2147483647, %v10319_v1  ;;  %v3720_v62 = vand.u32 2147483647, %v10335_v59  ;;  %v12523_v22 = vld [vmem:[#allocation43_spill] sm:$0xff] }
 0x37e   : > { %v4109_v25 = vsel %vm4108_vm15, %v6400_v55, %v4105_v13  ;;  %v4082_v55 = vand.u32 2147483648, %v10322_v2  ;;  %v3722_v0 = vand.u32 2147483648, %v10335_v59  ;;  %v4080_v23 = vand.u32 2147483647, %v10322_v2 }
 0x37f   : > { %v4114_v52 = vsel %vm4111_vm8, %v4113_v60, %v4109_v25  ;;  %v10356_v39 = vpop.eup %6413  ;;  %6419 = vrcp.f32 %v10347_v8  ;;  %vm4076_vm3 = vweird.f32 %v10322_v2  ;;  %v4059_v34 = vmul.f32 %v10331_v51, %v4058_v58 }
 0x380   : > { %v10359_v33 = vmul.f32 %v4114_v52, %v10187_v27  ;;  %v10365_v28 = vpop.eup %6415  ;;  %v4042_v27 = vmul.f32 %v10345_v9, %v10298_v4  ;;  %v4027_v45 = vmul.f32 %v10356_v39, %v10319_v1  ;;  %vm3716_vm0 = vweird.f32 %v10335_v59 }
 0x381   : > { %v4072_v44 = vmul.f32 %v10365_v28, %v10322_v2  ;;  %v6418_v46 = vpop.eup %6417  ;;  %v4095_v6 = vand.u32 2147483647, %v10347_v8  ;;  %vm4062_vm1 = vweird.f32 %v10331_v51  ;;  %v4083_v37 = vor.u32 1.1754944e-38, %v4082_v55 }
 0x382   : > { %4248 = vmatpush.msrb.mxu1 %v10359_v33  ;;  %v4043_v10 = vsub.f32 1.0, %v4042_v27  ;;  %v3712_v19 = vmul.f32 %v6418_v46, %v10335_v59  ;;  %v4028_v18 = vsub.f32 1.0, %v4027_v45  ;;  %vm10384_vm4 = vcmp.eq.f32.partialorder %v3720_v62, 8.507059e+37  ;;  %vm10419_vm11 = vmor %vm4061_vm5, %vm4062_vm1  ;;  %v12515_v27 = vld [vmem:[#allocation62_spill] sm:$0xff] }
 0x383   : > { %v4073_v41 = vsub.f32 1.0, %v4072_v44  ;;  %v3723_v56 = vor.u32 1.1754944e-38, %v3722_v0  ;;  %v4097_v50 = vand.u32 2147483648, %v10347_v8  ;;  %vm10389_vm12 = vcmp.eq.f32.partialorder %v4080_v23, 8.507059e+37 }
 0x384   : > { %v4044_v25 = vmul.f32 %v10345_v9, %v4043_v10  ;;  %v3713_v58 = vsub.f32 1.0, %v3712_v19  ;;  %v4060_v62 = vadd.f32 %v10331_v51, %v4059_v34  ;;  %vm10397_vm10 = vcmp.eq.f32.partialorder %v4065_v35, 8.507059e+37  ;;  %v12511_v19 = vld [vmem:[#allocation64_spill] sm:$0xff] }
 0x385   : > { %v6420_v52 = vpop.eup %6419  ;;  %v4074_v55 = vmul.f32 %v10365_v28, %v4073_v41  ;;  %vm10402_vm6 = vcmp.eq.f32.partialorder %v4095_v6, 8.507059e+37  ;;  %vm4077_vm9 = vweird.f32 %v10365_v28  ;;  %vm10408_vm2 = vcmp.eq.f32.partialorder %v4050_v11, 8.507059e+37 }
 0x386   : > { %v4087_v0 = vmul.f32 %v6420_v52, %v10347_v8  ;;  %v3714_v35 = vmul.f32 %v6418_v46, %v3713_v58  ;;  %vm3717_vm15 = vweird.f32 %v6418_v46  ;;  %v4029_v45 = vmul.f32 %v10356_v39, %v4028_v18  ;;  %vm10427_vm8 = vmor %vm4076_vm3, %vm4077_vm9 }
 0x387   : > { %v4075_v34 = vadd.f32 %v10365_v28, %v4074_v55  ;;  %v4098_v10 = vor.u32 1.1754944e-38, %v4097_v50  ;;  %v4045_v11 = vadd.f32 %v10345_v9, %v4044_v25  ;;  %v5796_v41 = vmul.f32 -1.442695, %v10324_v30  ;;  %vm3718_vm7 = vmor %vm3716_vm0, %vm3717_vm15  ;;  %v12516_v55 = vld [vmem:[#allocation15_spill] sm:$0xff] }
 0x388   : > { %v4088_v6 = vsub.f32 1.0, %v4087_v0  ;;  %v3715_v58 = vadd.f32 %v6418_v46, %v3714_v35  ;;  %v4064_v18 = vsel %vm10419_vm11, %v10331_v51, %v4060_v62  ;;  %vm4032_vm5 = vweird.f32 %v10356_v39  ;;  %v12518_v51 = vld [vmem:[#allocation34_spill] sm:$0xff] }
 0x389   : > { %vm10435_vm1 = vcmp.lt.s32.totalorder %v2329_v16, 15  ;;  %vm4092_vm13 = vweird.f32 %v6420_v52  ;;  %v4079_v2 = vsel %vm10427_vm8, %v10365_v28, %v4075_v34  ;;  %v4037_v25 = vand.u32 2147483648, %v10319_v1  ;;  %v10569_v16 = vld [vmem:[%s11865_s5 + $0x7] ss:$0 sm:$0xff] }
 0x38a   : > { %v4089_v50 = vmul.f32 %v6420_v52, %v4088_v6  ;;  %v3719_v0 = vsel %vm3718_vm7, %v6418_v46, %v3715_v58  ;;  %vm12502_vm3 = vweird.f32 %v10345_v9  ;;  %vm12503_vm11 = vweird.f32 %v10298_v4  ;;  %v12508_v4 = vld [vmem:[#allocation36_spill] sm:$0xff] }
 0x38b   : > { %vm10449_vm9 = vmor %vm12503_vm11, %vm12502_vm3  ;;  %v4030_v59 = vadd.f32 %v10356_v39, %v4029_v45  ;;  %vm10454_vm0 = vcmp.eq.f32.partialorder %v4035_v57, 8.507059e+37  ;;  %6421 = vpow2.f32 %v5796_v41  ;;  %v3724_v28 = vsel %vm10384_vm4, %v3723_v56, %v3719_v0  ;;  %v10477_v56 = vld [vmem:[%s11865_s5 + $0x3] ss:$0 sm:$0xff] }
 0x38c   : > { %v4090_v62 = vadd.f32 %v6420_v52, %v4089_v50  ;;  %v4049_v46 = vsel %vm10449_vm9, %v10345_v9, %v4045_v11  ;;  %v2853_v35 = vsel %vm10435_vm1, %v12508_v4, 0.0  ;;  %v10467_v34 = vmul.f32 %v3724_v28, %v10271_v20  ;;  %v12510_v9 = vld [vmem:[#allocation56_spill] sm:$0xff]  ;;  %v12519_v28 = vld [vmem:[#allocation63_spill] sm:$0xff] }
 0x38d   : > { %vm12509_vm7 = vweird.f32 %v10347_v8  ;;  %v4084_v57 = vsel %vm10389_vm12, %v4083_v37, %v4079_v2  ;;  %v2886_v13 = vmul.f32 %v10313_v7, %v2853_v35  ;;  %v2984_v45 = vmul.f32 %v10477_v56, %v12510_v9  ;;  %v12517_v50 = vld [vmem:[#allocation44_spill] sm:$0xff]  ;;  %v12520_v35 = vld [vmem:[#allocation57_spill] sm:$0xff] }
 0x38e   : > { %vm4093_vm8 = vmor %vm12509_vm7, %vm4092_vm13  ;;  %v4069_v20 = vsel %vm10397_vm10, %v10349_v54, %v4064_v18  ;;  %v4038_v8 = vor.u32 1.1754944e-38, %v4037_v25  ;;  %v3115_v37 = vsel %vm10435_vm1, %v12511_v19, 0.0  ;;  %4238 = vmatpush.msrb.mxu0 %v10467_v34  ;;  %v4054_v11 = vsel %vm10408_vm2, %v10352_v32, %v4049_v46 }
 0x38f   : > { %v4094_v6 = vsel %vm4093_vm8, %v6420_v52, %v4090_v62  ;;  %vm12512_vm4 = vweird.f32 %v10319_v1  ;;  %v2918_v52 = vadd.f32 %v2886_v13, %v10354_v21  ;;  %v2950_v41 = vsel %vm9673_vm14, %v12515_v27, 0.0  ;;  %v10518_v21 = vld [vmem:[%s11865_s5 + $0x4] ss:$0 sm:$0xff] }
 0x390   : > { %v4099_v60 = vsel %vm10402_vm6, %v4098_v10, %v4094_v6  ;;  %vm10497_vm12 = vmor %vm12512_vm4, %vm4032_vm5  ;;  %v10509_v44 = vmul.f32 %v4084_v57, %v10252_v43  ;;  %v2983_v32 = vmul.f32 %v10477_v56, %v2950_v41  ;;  %v10525_v43 = vld [vmem:[%s11865_s5 + $0x5] ss:$0 sm:$0xff]  ;;  %v3276_v62 = vsel %vm9673_vm14, %v12519_v28, 0.0 }
 0x391   : > { %v10506_v23 = vmul.f32 %v4099_v60, %v10289_v24  ;;  %v4034_v1 = vsel %vm10497_vm12, %v10356_v39, %v4030_v59  ;;  %v6422_v10 = vpop.eup %6421  ;;  %v3016_v58 = vadd.f32 %v2984_v45, %v2918_v52  ;;  %v3050_v24 = vmul.f32 %v10518_v21, %v12516_v55  ;;  %v10531_v39 = vld [vmem:[%s11865_s5 + $0x6] ss:$0 sm:$0xff]  ;;  %v12521_v45 = vld [vmem:[#allocation30_spill] sm:$0xff] }
 0x392   : > { %v3148_v18 = vmul.f32 %v10525_v43, %v3115_v37  ;;  %v3310_v2 = vmul.f32 %v10531_v39, %v12517_v50  ;;  %v10536_v25 = vadd.f32 1.0, %v6422_v10  ;;  %v3015_v0 = vadd.f32 %v2983_v32, %v10333_v31  ;;  %v12522_v32 = vld [vmem:[#allocation25_spill] sm:$0xff] }
 0x393   : > { %4249 = vmatpush.msrb.mxu1 %v10506_v23  ;;  %v3049_v59 = vmul.f32 %v10518_v21, %v12518_v51  ;;  %v3082_v46 = vadd.f32 %v3050_v24, %v3016_v58  ;;  %v3147_v57 = vmul.f32 %v10525_v43, %v12520_v35  ;;  %v2295_v13 = vadd.s32 136, %v12485_v53 }
 0x394   : > { %v2559_v6 = vmul.f32 %v10259_v15, %v12521_v45  ;;  %v10551_v31 = vmul.f32 %v4069_v20, %v10220_v26  ;;  %v4039_v37 = vsel %vm10454_vm0, %v4038_v8, %v4034_v1  ;;  %6423 = vrcp.f32 %v10536_v25  ;;  %v10577_v1 = vld [vmem:[%s11865_s5 + $0x8] ss:$0 sm:$0xff]  ;;  %v12528_v45 = vld [vmem:[#allocation24_spill] sm:$0xff] }
 0x395   : > { %4250 = vmatpush.msrb.mxu1 %v10509_v44  ;;  %v3505_v36 = vsel %vm10435_vm1, %v10015_v49, 0.0  ;;  %v3180_v60 = vadd.f32 %v3148_v18, %v3082_v46  ;;  %v3081_v54 = vadd.f32 %v3049_v59, %v3015_v0  ;;  %v3309_v52 = vmul.f32 %v10531_v39, %v3276_v62  ;;  %v12526_v18 = vld [vmem:[#allocation42_spill] sm:$0xff] }
 0x396   : > { %v2327_v41 = vand.u32 15, %v2295_v13  ;;  %v2657_v10 = vmul.f32 %v10294_v14, %v12522_v32  ;;  %v10564_v26 = vmul.f32 %v4054_v11, %v10222_v48  ;;  %v3408_v49 = vmul.f32 %v10569_v16, %v12523_v22 }
 0x397   : > { %4251 = vmatpush.msrb.mxu1 %v10551_v31  ;;  %v2591_v20 = vadd.f32 %v10286_v42, %v2559_v6  ;;  %v3342_v8 = vadd.f32 %v3310_v2, %v3180_v60  ;;  %v3538_v58 = vmul.f32 %v10577_v1, %v3505_v36  ;;  %v3179_v48 = vadd.f32 %v3147_v57, %v3081_v54  ;;  %v12527_v2 = vld [vmem:[#allocation31_spill] sm:$0xff] }
 0x398   : > { %vm10580_vm14 = vcmp.lt.s32.totalorder %v2327_v41, 15  ;;  %v10586_v24 = vmul.f32 %v4039_v37, %v10241_v38  ;;  %v3407_v50 = vmul.f32 %v10569_v16, %v12526_v18  ;;  %v2294_v59 = vadd.s32 128, %v12485_v53 }
 0x399   : > { %4252 = vmatpush.msrb.mxu1 %v10564_v26  ;;  %v2851_v0 = vsel %vm10580_vm14, %v12527_v2, 0.0  ;;  %v3440_v28 = vadd.f32 %v3408_v49, %v3342_v8  ;;  %v3341_v62 = vadd.f32 %v3309_v52, %v3179_v48  ;;  %v3537_v46 = vmul.f32 %v10577_v1, %v12424_v61  ;;  %v12531_v8 = vld [vmem:[#allocation35_spill] sm:$0xff] }
 0x39a   : > { %v2884_v57 = vmul.f32 %v10313_v7, %v2851_v0  ;;  %v6424_v13 = vpop.eup %6423  ;;  %v2656_v38 = vmul.f32 %v10294_v14, %v12528_v45  ;;  %v2982_v6 = vmul.f32 %v10477_v56, %v12479_v3  ;;  %v2689_v37 = vadd.f32 %v2657_v10, %v2591_v20 }
 0x39b   : > { %4253 = vmatpush.msrb.mxu1 %v10586_v24  ;;  %v2326_v36 = vand.u32 15, %v2294_v59  ;;  %v4012_v53 = vmul.f32 %v6424_v13, %v10536_v25  ;;  %v10603_v60 = vadd.f32 %v3538_v58, %v3440_v28  ;;  %v3439_v54 = vadd.f32 %v3407_v50, %v3341_v62  ;;  %v12532_v50 = vld [vmem:[#allocation37_spill] sm:$0xff] }
 0x39c   : > { %v3113_v61 = vsel %vm10580_vm14, %v12508_v4, 0.0  ;;  %v4020_v52 = vand.u32 2147483647, %v10536_v25  ;;  %v2916_v41 = vadd.f32 %v2884_v57, %v2689_v37  ;;  %v3048_v14 = vmul.f32 %v10518_v21, %v12483_v5 }
 0x39d   : > { %vm10611_vm10 = vcmp.ge.s32.totalorder %v2326_v36, 1  ;;  %v4013_v32 = vsub.f32 1.0, %v4012_v53  ;;  %v4022_v10 = vand.u32 2147483648, %v10536_v25  ;;  %v5795_v22 = vmul.f32 -1.442695, %v10603_v60 }
 0x39e   : > { %v10617_v49 = vadd.f32 %v3537_v46, %v3439_v54  ;;  %vm4017_vm6 = vweird.f32 %v6424_v13  ;;  %v3014_v20 = vadd.f32 %v2982_v6, %v2916_v41  ;;  %v3146_v4 = vmul.f32 %v10525_v43, %v3113_v61 }
 0x39f   : > { %v2525_v58 = vsel %vm10611_vm10, %v12531_v8, 0.0  ;;  %v4014_v5 = vmul.f32 %v6424_v13, %v4013_v32  ;;  %6425 = vpow2.f32 %v5795_v22  ;;  %v2883_v2 = vmul.f32 %v10313_v7, %v12532_v50 }
 0x3a0   : > { %v5794_v48 = vmul.f32 -1.442695, %v10617_v49  ;;  %v2558_v18 = vmul.f32 %v10259_v15, %v2525_v58  ;;  %v3080_v0 = vadd.f32 %v3048_v14, %v3014_v20  ;;  %v3308_v59 = vmul.f32 %v10531_v39, %v12510_v9 }
 0x3a1   : > { %v2948_v28 = vsel %vm10611_vm10, %v12474_v29, 0.0  ;;  %v4015_v62 = vadd.f32 %v6424_v13, %v4014_v5  ;;  %vm4016_vm13 = vweird.f32 %v10536_v25  ;;  %v4023_v15 = vor.u32 1.1754944e-38, %v4022_v10 }
 0x3a2   : > { %6427 = vpow2.f32 %v5794_v48  ;;  %v2590_v46 = vadd.f32 %v10286_v42, %v2558_v18  ;;  %vm4018_vm2 = vmor %vm4016_vm13, %vm4017_vm6  ;;  %v3178_v57 = vadd.f32 %v3146_v4, %v3080_v0  ;;  %v3503_v7 = vsel %vm10580_vm14, %v12511_v19, 0.0 }
 0x3a3   : > { %v4019_v45 = vsel %vm4018_vm2, %v6424_v13, %v4015_v62  ;;  %vm4021_vm15 = vcmp.eq.f32.partialorder %v4020_v52, 8.507059e+37  ;;  %v2981_v6 = vmul.f32 %v10477_v56, %v2948_v28  ;;  %v3406_v42 = vmul.f32 %v10569_v16, %v12516_v55 }
 0x3a4   : > { %v2688_v9 = vadd.f32 %v2656_v38, %v2590_v46  ;;  %v4024_v29 = vsel %vm4021_vm15, %v4023_v15, %v4019_v45  ;;  %v3340_v37 = vadd.f32 %v3308_v59, %v3178_v57  ;;  %v3536_v53 = vmul.f32 %v10577_v1, %v3503_v7  ;;  %v6005_v59 = vld [vmem:[%s11867_s7 + $0x30] sm:$0xff] }
 0x3a5   : > { %v6426_v36 = vpop.eup %6425  ;;  %v10640_v25 = vmul.f32 %v4024_v29, %v10324_v30  ;;  %v3274_v56 = vsel %vm10611_vm10, %v12515_v27, 0.0  ;;  %v3145_v30 = vmul.f32 %v10525_v43, %v12484_v47  ;;  %v3047_v55 = vmul.f32 %v10518_v21, %v12480_v17 }
 0x3a6   : > { %v2915_v54 = vadd.f32 %v2883_v2, %v2688_v9  ;;  %v3698_v61 = vadd.f32 1.0, %v6426_v36  ;;  %v3438_v19 = vadd.f32 %v3406_v42, %v3340_v37  ;;  %v3307_v14 = vmul.f32 %v10531_v39, %v3274_v56  ;;  %v6004_v9 = vld [vmem:[%s11867_s7 + $0x28] sm:$0xff] }
 0x3a7   : > { %4254 = vmatpush.msrb.mxu1 %v10640_v25  ;;  %v3405_v47 = vmul.f32 %v10569_v16, %v12518_v51  ;;  %v3535_v43 = vmul.f32 %v10577_v1, %v12520_v35  ;;  %v12039_v48 = vmov 1.0   ;;  %v6006_v51 = vld [vmem:[%s11867_s7 + $0x38] sm:$0xff] }
 0x3a8   : > { %v6428_v11 = vpop.eup %6427  ;;  %v3013_v13 = vadd.f32 %v2981_v6, %v2915_v54  ;;  %6429 = vrcp.f32 %v3698_v61  ;;  %v10653_v52 = vadd.f32 %v3536_v53, %v3438_v19  ;;  %v4007_v4 = vand.u32 2147483648, %v3698_v61  ;;  %4239 = vmatmul.f32.vlgmr.msrb.gmra.mxu0 %v12039_v48  ;;  %4333 = vmatpush.bf16.msra.mxu2 %v6006_v51  ;;  %v6002_v19 = vld [vmem:[%s11867_s7 + $0x18] sm:$0xff] }
 0x3a9   : > { %v3697_v38 = vadd.f32 1.0, %v6428_v11  ;;  %v4005_v5 = vand.u32 2147483647, %v3698_v61  ;;  %vm4001_vm1 = vweird.f32 %v3698_v61 }
 0x3aa   : > { %v3079_v41 = vadd.f32 %v3047_v55, %v3013_v13  ;;  %v5793_v32 = vmul.f32 -1.442695, %v10653_v52  ;;  %v4008_v50 = vor.u32 1.1754944e-38, %v4007_v4 }
 0x3ab   : > { %6431 = vrcp.f32 %v3697_v38  ;;  %v3992_v2 = vand.u32 2147483648, %v3697_v38  ;;  %v3990_v62 = vand.u32 2147483647, %v3697_v38  ;;  %vm4006_vm9 = vcmp.eq.f32.partialorder %v4005_v5, 8.507059e+37 }
 0x3ac   : > { %v3177_v10 = vadd.f32 %v3145_v30, %v3079_v41  ;;  %6433 = vpow2.f32 %v5793_v32  ;;  %vm3986_vm0 = vweird.f32 %v3697_v38  ;;  %4334 = vmatpush.bf16.msra.mxu2 %v6005_v59 }
 0x3ad   : > { %v3993_v45 = vor.u32 1.1754944e-38, %v3992_v2  ;;  %vm3991_vm8 = vcmp.eq.f32.partialorder %v3990_v62, 8.507059e+37  ;;  %v6010_v2 = vld [vmem:[%s11869_s9 + $0x18] sm:$0xff] }
 0x3ae   : > { %v6430_v22 = vpop.eup %6429  ;;  %v3339_v27 = vadd.f32 %v3307_v14, %v3177_v10 }
 0x3af   : > { %v3997_v17 = vmul.f32 %v6430_v22, %v3698_v61  ;;  %vm4002_vm5 = vweird.f32 %v6430_v22 }
 0x3b0   : > { %v3437_v21 = vadd.f32 %v3405_v47, %v3339_v27  ;;  %vm4003_vm3 = vmor %vm4001_vm1, %vm4002_vm5  ;;  %4335 = vmatpush.bf16.msra.mxu2 %v6004_v9 }
 0x3b1   : > { %v6432_v3 = vpop.eup %6431  ;;  %v3998_v20 = vsub.f32 1.0, %v3997_v17 }
 0x3b2   : > { %v3982_v8 = vmul.f32 %v6432_v3, %v3697_v38  ;;  %v10661_v39 = vadd.f32 %v3535_v43, %v3437_v21  ;;  %v6434_v16 = vpop.eup %6433  ;;  %vm3987_vm11 = vweird.f32 %v6432_v3  ;;  %v6001_v38 = vld [vmem:[%s11867_s7 + $0x10] sm:$0xff] }
 0x3b3   : > { %v3999_v58 = vmul.f32 %v6430_v22, %v3998_v20  ;;  %v3696_v0 = vadd.f32 1.0, %v6434_v16  ;;  %vm3988_vm7 = vmor %vm3986_vm0, %vm3987_vm11 }
 0x3b4   : > { %v3983_v35 = vsub.f32 1.0, %v3982_v8  ;;  %v5792_v1 = vmul.f32 -1.442695, %v10661_v39  ;;  %v5999_v8 = vld [vmem:[%s11867_s7] sm:$0xff] }
 0x3b5   : > { %v4000_v18 = vadd.f32 %v6430_v22, %v3999_v58  ;;  %v3977_v11 = vand.u32 2147483648, %v3696_v0  ;;  %v3975_v13 = vand.u32 2147483647, %v3696_v0  ;;  %vm3971_vm12 = vweird.f32 %v3696_v0 }
 0x3b6   : > { %v3984_v28 = vmul.f32 %v6432_v3, %v3983_v35  ;;  %6435 = vpow2.f32 %v5792_v1  ;;  %v6014_v35 = vld [vmem:[%s11869_s9 + $0x38] sm:$0xff]  ;;  %v6013_v1 = vld [vmem:[%s11869_s9 + $0x30] sm:$0xff] }
 0x3b7   : > { %v4004_v46 = vsel %vm4003_vm3, %v6430_v22, %v4000_v18  ;;  %6437 = vrcp.f32 %v3696_v0  ;;  %v3978_v55 = vor.u32 1.1754944e-38, %v3977_v11  ;;  %vm3976_vm10 = vcmp.eq.f32.partialorder %v3975_v13, 8.507059e+37  ;;  %4435 = vmatpush.bf16.msra.mxu3 %v6014_v35  ;;  %v6012_v18 = vld [vmem:[%s11869_s9 + $0x28] sm:$0xff] }
 0x3b8   : > { %v4009_v15 = vsel %vm4006_vm9, %v4008_v50, %v4004_v46  ;;  %v3985_v57 = vadd.f32 %v6432_v3, %v3984_v28  ;;  %v6011_v50 = vld [vmem:[%s11869_s9 + $0x20] sm:$0xff]  ;;  %v6009_v28 = vld [vmem:[%s11869_s9 + $0x10] sm:$0xff] }
 0x3b9   : > { %v10673_v7 = vmul.f32 %v4009_v15, %v10603_v60  ;;  %v6003_v60 = vld [vmem:[%s11867_s7 + $0x20] sm:$0xff]  ;;  %v6008_v15 = vld [vmem:[%s11869_s9 + $0x8] sm:$0xff] }
 0x3ba   : > { %v3989_v6 = vsel %vm3988_vm7, %v6432_v3, %v3985_v57  ;;  %4336 = vmatpush.bf16.msra.mxu2 %v6003_v60  ;;  %v6007_v57 = vld [vmem:[%s11869_s9] sm:$0xff] }
 0x3bb   : > { %4255 = vmatpush.msrb.mxu1 %v10673_v7  ;;  %v3994_v29 = vsel %vm3991_vm8, %v3993_v45, %v3989_v6  ;;  %4436 = vmatpush.bf16.msra.mxu3 %v6013_v1 }
 0x3bc   : > { %v6436_v37 = vpop.eup %6435  ;;  %v10680_v36 = vmul.f32 %v3994_v29, %v10617_v49 }
 0x3bd   : > { %v6438_v42 = vpop.eup %6437  ;;  %v3695_v53 = vadd.f32 1.0, %v6436_v37 }
 0x3be   : > { %4256 = vmatpush.msrb.mxu1 %v10680_v36  ;;  %v3967_v54 = vmul.f32 %v6438_v42, %v3696_v0  ;;  %vm3972_vm4 = vweird.f32 %v6438_v42  ;;  %4337 = vmatpush.bf16.msra.mxu2 %v6002_v19  ;;  %v6053_v0 = vld [vmem:[%s11868_s8] ss:$0 sm:$0xff] }
 0x3bf   : > { %6439 = vrcp.f32 %v3695_v53  ;;  %vm3973_vm14 = vmor %vm3971_vm12, %vm3972_vm4  ;;  %v3962_v27 = vand.u32 2147483648, %v3695_v53  ;;  %v3960_v43 = vand.u32 2147483647, %v3695_v53  ;;  %vm3956_vm13 = vweird.f32 %v3695_v53  ;;  %4437 = vmatpush.bf16.msra.mxu3 %v6012_v18  ;;  %v6015_v18 = vld [vmem:[%s11871_s11] sm:$0xff] }
 0x3c0   : > { %v3968_v61 = vsub.f32 1.0, %v3967_v54 }
 0x3c1   : > { %v3963_v21 = vor.u32 1.1754944e-38, %v3962_v27  ;;  %vm3961_vm15 = vcmp.eq.f32.partialorder %v3960_v43, 8.507059e+37  ;;  %v6020_v27 = vld [vmem:[%s11871_s11 + $0x28] sm:$0xff] }
 0x3c2   : > { %v3969_v49 = vmul.f32 %v6438_v42, %v3968_v61  ;;  %4338 = vmatpush.bf16.msra.mxu2 %v6001_v38 }
 0x3c3   : > { %4438 = vmatpush.bf16.msra.mxu3 %v6011_v50 }
 0x3c4   : > { %v3970_v56 = vadd.f32 %v6438_v42, %v3969_v49 }
 0x3c5   : > { %v6440_v30 = vpop.eup %6439 }
 0x3c6   : > { %v3974_v41 = vsel %vm3973_vm14, %v6438_v42, %v3970_v56  ;;  %v3952_v14 = vmul.f32 %v6440_v30, %v3695_v53  ;;  %vm3957_vm6 = vweird.f32 %v6440_v30 }
 0x3c7   : > { %v3979_v32 = vsel %vm3976_vm10, %v3978_v55, %v3974_v41  ;;  %vm3958_vm2 = vmor %vm3956_vm13, %vm3957_vm6  ;;  %4439 = vmatpush.bf16.msra.mxu3 %v6010_v2 }
 0x3c8   : > { %v10693_v10 = vmul.f32 %v3979_v32, %v10653_v52  ;;  %v3953_v22 = vsub.f32 1.0, %v3952_v14  ;;  %v6000_v52 = vld [vmem:[%s11867_s7 + $0x8] sm:$0xff]  ;;  %v6022_v14 = vld [vmem:[%s11871_s11 + $0x38] sm:$0xff]  ;;  %v6021_v32 = vld [vmem:[%s11871_s11 + $0x30] sm:$0xff] }
 0x3c9   : > { %4339 = vmatpush.bf16.msra.mxu2 %v6000_v52  ;;  %v6017_v52 = vld [vmem:[%s11871_s11 + $0x10] sm:$0xff] }
 0x3ca   : > { %4257 = vmatpush.msrb.mxu1 %v10693_v10  ;;  %v3954_v47 = vmul.f32 %v6440_v30, %v3953_v22 }
 0x3cb   : > { %4440 = vmatpush.bf16.msra.mxu3 %v6009_v28 }
 0x3cc   : > { %v3955_v17 = vadd.f32 %v6440_v30, %v3954_v47 }
 0x3cd   : > { %4340 = vmatpush.bf16.msra.mxu2 %v5999_v8 }
 0x3ce   : > { %v3959_v3 = vsel %vm3958_vm2, %v6440_v30, %v3955_v17  ;;  %v6054_v30 = vld [vmem:[%s11870_s10] ss:$0 sm:$0xff] }
 0x3cf   : > { %v3964_v20 = vsel %vm3961_vm15, %v3963_v21, %v3959_v3  ;;  %4441 = vmatpush.bf16.msra.mxu3 %v6008_v15  ;;  %v6019_v17 = vld [vmem:[%s11871_s11 + $0x20] sm:$0xff]  ;;  %v6018_v21 = vld [vmem:[%s11871_s11 + $0x18] sm:$0xff] }
 0x3d0   : > { %v10697_v4 = vmul.f32 %v3964_v20, %v10661_v39 }
 0x3d1   : > { %4584 = vmatpush.bf16.msrb.mxu2 %v6022_v14  ;;  %v6028_v14 = vld [vmem:[%s11873_s13 + $0x28] sm:$0xff] }
 0x3d2   : > { %4258 = vmatpush.msrb.mxu1 %v10697_v4 }
 0x3d3   : > { %4259 = vmatmul.f32.vlgmr.msrb.gmra.mxu1 %v12039_v48  ;;  %4442 = vmatpush.bf16.msra.mxu3 %v6007_v57 }
 0x3d5   : > { %4585 = vmatpush.bf16.msrb.mxu2 %v6021_v32  ;;  %v12542_v32 = vld [vmem:[#allocation16_spill] sm:$0xff] }
 0x3d9   : > { %4586 = vmatpush.bf16.msrb.mxu2 %v6020_v27  ;;  %v12543_v27 = vld [vmem:[#allocation19_spill] sm:$0xff] }
 0x3dd   : > { %4587 = vmatpush.bf16.msrb.mxu2 %v6019_v17 }
 0x3e1   : > { %4588 = vmatpush.bf16.msrb.mxu2 %v6018_v21  ;;  %v6026_v21 = vld [vmem:[%s11873_s13 + $0x18] sm:$0xff] }
 0x3e5   : > { %4589 = vmatpush.bf16.msrb.mxu2 %v6017_v52  ;;  %v12544_v52 = vld [vmem:[#allocation51_spill] sm:$0xff] }
 0x425   : > { %v4240_v58 = vpop.f32.mrf.mxu0 }
 0x450   : > { %v4260_v5 = vpop.f32.mrf.mxu1 }
 0x451   : > { %v4261_v51 = vadd.f32 %v4260_v5, %v4240_v58 }
 0x453   : > { %v4263_v16 = vmul.f32 0.00390625, %v4261_v51 }
 0x455   : > { %v4264_v39 = vpack.c.bf16 %v4263_v16, %v4263_v16  ;;  %v6016_v16 = vld [vmem:[%s11871_s11 + $0x8] sm:$0xff] }
 0x456   : > { %4590 = vmatpush.bf16.msrb.mxu2 %v6016_v16  ;;  %v6023_v16 = vld [vmem:[%s11873_s13] sm:$0xff] }
 0x457   : > { %4341 = vmatmul.bf16.vlgmr.msra.gmra.mxu2 %v4264_v39 }
 0x45a   : > { %4591 = vmatpush.bf16.msrb.mxu2 %v6015_v18 }
 0x4da   : > { %v4342_v59 = vpop.f32.mrf.mxu2 }
 0x4db   : > { %v4343_v62 = vadd.f32 %v6053_v0, %v4342_v59 }
 0x4dd   : > { %v5840_v46 = vmul.f32 -1.442695, %v4343_v62 }
 0x4df   : > { %6441 = vpow2.f32 %v5840_v46  ;;  %v12533_v46 = vld [vmem:[#allocation41_spill] sm:$0xff] }
 0x4e2   : > { %v4344_v45 = vpop.f32.mrf.mxu2 }
 0x4e3   : > { %v12534_v45 = vld [vmem:[#allocation40_spill] sm:$0xff] }
 0x4e5   : > { %v6442_v9 = vpop.eup %6441 }
 0x4e6   : > { %v4349_v6 = vadd.f32 1.0, %v6442_v9 }
 0x4e8   : > { %6443 = vrcp.f32 %v4349_v6  ;;  %v4361_v53 = vand.u32 2147483648, %v4349_v6  ;;  %v4359_v54 = vand.u32 2147483647, %v4349_v6  ;;  %vm4355_vm1 = vweird.f32 %v4349_v6 }
 0x4ea   : > { %v4362_v11 = vor.u32 1.1754944e-38, %v4361_v53  ;;  %vm4360_vm11 = vcmp.eq.f32.partialorder %v4359_v54, 8.507059e+37 }
 0x4ee   : > { %v6444_v29 = vpop.eup %6443 }
 0x4ef   : > { %v4351_v37 = vmul.f32 %v6444_v29, %v4349_v6  ;;  %vm4356_vm5 = vweird.f32 %v6444_v29  ;;  %v12535_v6 = vld [vmem:[#allocation28_spill] sm:$0xff] }
 0x4f0   : > { %vm4357_vm3 = vmor %vm4355_vm1, %vm4356_vm5 }
 0x4f1   : > { %v4352_v42 = vsub.f32 1.0, %v4351_v37 }
 0x4f3   : > { %v4353_v60 = vmul.f32 %v6444_v29, %v4352_v42  ;;  %v12537_v42 = vld [vmem:[#allocation17_spill] sm:$0xff] }
 0x4f5   : > { %v4354_v61 = vadd.f32 %v6444_v29, %v4353_v60  ;;  %v12538_v60 = vld [vmem:[#allocation13_spill] sm:$0xff] }
 0x4f7   : > { %v4358_v19 = vsel %vm4357_vm3, %v6444_v29, %v4354_v61  ;;  %v12539_v61 = vld [vmem:[#allocation33_spill] sm:$0xff] }
 0x4f8   : > { %v4363_v49 = vsel %vm4360_vm11, %v4362_v11, %v4358_v19 }
 0x4f9   : > { %v4365_v13 = vmul.f32 %v4363_v49, %v4343_v62  ;;  %v12540_v49 = vld [vmem:[#allocation20_spill] sm:$0xff] }
 0x4fb   : > { %v4366_v56 = vpack.c.bf16 %v4365_v13, %v4365_v13 }
 0x4fd   : > { %4443 = vmatmul.bf16.vlgmr.msra.gmra.mxu3 %v4366_v56  ;;  %v12541_v56 = vld [vmem:[#allocation11_spill] sm:$0xff] }
 0x580   : > { %v4444_v55 = vpop.f32.mrf.mxu3 }
 0x581   : > { %v4445_v38 = vadd.f32 %v6054_v30, %v4444_v55 }
 0x583   : > { %v5873_v41 = vmul.f32 -1.442695, %v4445_v38  ;;  %v6030_v38 = vld [vmem:[%s11873_s13 + $0x38] sm:$0xff] }
 0x584   : > { %4757 = vmatpush.bf16.msrb.mxu3 %v6030_v38 }
 0x585   : > { %6445 = vpow2.f32 %v5873_v41  ;;  %v6029_v41 = vld [vmem:[%s11873_s13 + $0x30] sm:$0xff] }
 0x588   : > { %v4446_v22 = vpop.f32.mrf.mxu3  ;;  %4758 = vmatpush.bf16.msrb.mxu3 %v6029_v41 }
 0x58b   : > { %v6446_v47 = vpop.eup %6445 }
 0x58c   : > { %v4451_v43 = vadd.f32 1.0, %v6446_v47  ;;  %4759 = vmatpush.bf16.msrb.mxu3 %v6028_v14 }
 0x58e   : > { %6447 = vrcp.f32 %v4451_v43  ;;  %v4463_v58 = vand.u32 2147483648, %v4451_v43  ;;  %v4461_v51 = vand.u32 2147483647, %v4451_v43  ;;  %vm4457_vm0 = vweird.f32 %v4451_v43 }
 0x590   : > { %v4464_v35 = vor.u32 1.1754944e-38, %v4463_v58  ;;  %vm4462_vm8 = vcmp.eq.f32.partialorder %v4461_v51, 8.507059e+37  ;;  %v12545_v58 = vld [vmem:[#allocation47_spill] sm:$0xff] }
 0x594   : > { %v6448_v3 = vpop.eup %6447 }
 0x595   : > { %v4453_v20 = vmul.f32 %v6448_v3, %v4451_v43  ;;  %vm4458_vm9 = vweird.f32 %v6448_v3  ;;  %v6027_v43 = vld [vmem:[%s11873_s13 + $0x20] sm:$0xff] }
 0x596   : > { %vm4459_vm7 = vmor %vm4457_vm0, %vm4458_vm9  ;;  %4760 = vmatpush.bf16.msrb.mxu3 %v6027_v43 }
 0x597   : > { %v4454_v8 = vsub.f32 1.0, %v4453_v20  ;;  %v6024_v20 = vld [vmem:[%s11873_s13 + $0x8] sm:$0xff] }
 0x599   : > { %v4455_v5 = vmul.f32 %v6448_v3, %v4454_v8 }
 0x59a   : > { %4761 = vmatpush.bf16.msrb.mxu3 %v6026_v21 }
 0x59b   : > { %v4456_v39 = vadd.f32 %v6448_v3, %v4455_v5 }
 0x59d   : > { %v4460_v1 = vsel %vm4459_vm7, %v6448_v3, %v4456_v39  ;;  %v6025_v3 = vld [vmem:[%s11873_s13 + $0x10] sm:$0xff] }
 0x59e   : > { %v4465_v50 = vsel %vm4462_vm8, %v4464_v35, %v4460_v1  ;;  %4762 = vmatpush.bf16.msrb.mxu3 %v6025_v3 }
 0x59f   : > { %v10761_v2 = vperm.slane %v4465_v50, 0  ;;  %v10826_v50 = vld [vmem:[%s11872_s12] ss:$0 sm:$0xff] }
 0x5a1   : > { %v4468_v0 = vmul.f32 %v10761_v2, %v10467_v34  ;;  %v4469_v59 = vmul.f32 %v10761_v2, %v9938_v12  ;;  %v4470_v62 = vmul.f32 %v10761_v2, %v10150_v40  ;;  %v4471_v15 = vmul.f32 %v10761_v2, %v12533_v46  ;;  %v12536_v12 = vld [vmem:[#allocation21_spill] sm:$0xff] }
 0x5a2   : > { %v4472_v9 = vmul.f32 %v10761_v2, %v12534_v45  ;;  %v4473_v34 = vmul.f32 %v10761_v2, %v12535_v6  ;;  %v4474_v37 = vmul.f32 %v10761_v2, %v12536_v12  ;;  %v4475_v53 = vmul.f32 %v10761_v2, %v12537_v42  ;;  %4763 = vmatpush.bf16.msrb.mxu3 %v6024_v20  ;;  %v12548_v20 = vld [vmem:[#allocation54_spill] sm:$0xff] }
 0x5a3   : > { %v4500_v28 = vpack.c.bf16 %v4469_v59, %v4468_v0  ;;  %v4501_v57 = vpack.c.bf16 %v4471_v15, %v4470_v62  ;;  %v4476_v54 = vmul.f32 %v10761_v2, %v12538_v60  ;;  %v4477_v11 = vmul.f32 %v10761_v2, %v12539_v61 }
 0x5a4   : > { %v4502_v29 = vpack.c.bf16 %v4473_v34, %v4472_v9  ;;  %v4503_v40 = vpack.c.bf16 %v4475_v53, %v4474_v37  ;;  %v4478_v13 = vmul.f32 %v10761_v2, %v12540_v49  ;;  %v4479_v30 = vmul.f32 %v10761_v2, %v12541_v56 }
 0x5a5   : > { %4592 = vmatmul.bf16.vlgmr.msrb.gmra.mxu2 %v4500_v28  ;;  %v4504_v19 = vpack.c.bf16 %v4477_v11, %v4476_v54  ;;  %v4480_v22 = vmul.f32 %v10761_v2, %v12542_v32  ;;  %v4481_v47 = vmul.f32 %v10761_v2, %v12543_v27  ;;  %v4482_v8 = vmul.f32 %v10761_v2, %v12544_v52  ;;  %v12546_v32 = vld [vmem:[#allocation45_spill] sm:$0xff]  ;;  %v12547_v27 = vld [vmem:[#allocation7_spill] sm:$0xff] }
 0x5a6   : > { %v4505_v55 = vpack.c.bf16 %v4479_v30, %v4478_v13  ;;  %v4483_v5 = vmul.f32 %v10761_v2, %v12545_v58  ;;  %4764 = vmatpush.bf16.msrb.mxu3 %v6023_v16  ;;  %v4484_v39 = vmul.f32 %v10761_v2, %v10697_v4  ;;  %v4485_v35 = vmul.f32 %v10761_v2, %v10693_v10 }
 0x5a7   : > { %v4506_v17 = vpack.c.bf16 %v4481_v47, %v4480_v22  ;;  %v4486_v0 = vmul.f32 %v10761_v2, %v10680_v36  ;;  %v4487_v59 = vmul.f32 %v10761_v2, %v10673_v7  ;;  %v4489_v45 = vmul.f32 %v10761_v2, %v10586_v24 }
 0x5a8   : > { %v4507_v51 = vpack.c.bf16 %v4483_v5, %v4482_v8  ;;  %v4508_v1 = vpack.c.bf16 %v4485_v35, %v4484_v39  ;;  %v4490_v12 = vmul.f32 %v10761_v2, %v10564_v26  ;;  %v4491_v37 = vmul.f32 %v10761_v2, %v10551_v31  ;;  %v12549_v8 = vld [vmem:[#allocation27_spill] sm:$0xff] }
 0x5a9   : > { %v4509_v46 = vpack.c.bf16 %v4487_v59, %v4486_v0  ;;  %v4492_v54 = vmul.f32 %v10761_v2, %v10509_v44  ;;  %v4493_v61 = vmul.f32 %v10761_v2, %v10506_v23  ;;  %v4494_v56 = vmul.f32 %v10761_v2, %v10359_v33 }
 0x5aa   : > { %v4511_v53 = vpack.c.bf16 %v4491_v37, %v4490_v12  ;;  %v4495_v30 = vmul.f32 %v10761_v2, %v10250_v63  ;;  %v4496_v22 = vmul.f32 %v10761_v2, %v12546_v32  ;;  %v4497_v47 = vmul.f32 %v10761_v2, %v12547_v27 }
 0x5ab   : > { %v4498_v52 = vmul.f32 %v10761_v2, %v12548_v20  ;;  %v4499_v58 = vmul.f32 %v10761_v2, %v12549_v8 }
 0x5ac   : > { %v4513_v38 = vpack.c.bf16 %v4495_v30, %v4494_v56 }
 0x5ad   : > { %v4515_v39 = vpack.c.bf16 %v4499_v58, %v4498_v52 }
 0x5b5   : > { %4597 = vmatmul.bf16.gmra.mxu2 %v4501_v57  ;;  %v4488_v57 = vmul.f32 %v10761_v2, %v10640_v25 }
 0x5b7   : > { %v4510_v6 = vpack.c.bf16 %v4489_v45, %v4488_v57 }
 0x5c5   : > { %4602 = vmatmul.bf16.gmra.mxu2 %v4502_v29 }
 0x5d5   : > { %4607 = vmatmul.bf16.gmra.mxu2 %v4503_v40 }
 0x5e5   : > { %4612 = vmatmul.bf16.gmra.mxu2 %v4504_v19  ;;  %v4512_v19 = vpack.c.bf16 %v4493_v61, %v4492_v54 }
 0x5f5   : > { %4617 = vmatmul.bf16.gmra.mxu2 %v4505_v55 }
 0x605   : > { %4622 = vmatmul.bf16.gmra.mxu2 %v4506_v17  ;;  %v4514_v17 = vpack.c.bf16 %v4497_v47, %v4496_v22 }
 0x615   : > { %4627 = vmatmul.bf16.gmra.mxu2 %v4507_v51 }
 0x625   : > { %4632 = vmatmul.bf16.gmra.mxu2 %v4508_v1 }
 0x628   : > { %v4593_v18 = vpop.f32.mrf.mxu2 }
 0x629   : > { %v4594_v4 = vadd.f32 %v10826_v50, %v4593_v18 }
 0x630   : > { %v4595_v28 = vpop.f32.mrf.mxu2 }
 0x631   : > { %v4596_v62 = vadd.f32 %v10826_v50, %v4595_v28 }
 0x633   : > { %v4673_v10 = vpack.c.bf16 %v4596_v62, %v4594_v4 }
 0x635   : > { %4637 = vmatmul.bf16.gmra.mxu2 %v4509_v46  ;;  %4765 = vmatmul.bf16.vlgmr.msrb.gmra.mxu3 %v4673_v10 }
 0x638   : > { %v4598_v15 = vpop.f32.mrf.mxu2 }
 0x639   : > { %v4599_v9 = vadd.f32 %v10826_v50, %v4598_v15 }
 0x640   : > { %v4600_v36 = vpop.f32.mrf.mxu2 }
 0x641   : > { %v4601_v7 = vadd.f32 %v10826_v50, %v4600_v36 }
 0x643   : > { %v4674_v34 = vpack.c.bf16 %v4601_v7, %v4599_v9 }
 0x645   : > { %4642 = vmatmul.bf16.gmra.mxu2 %v4510_v6  ;;  %4770 = vmatmul.bf16.gmra.mxu3 %v4674_v34 }
 0x648   : > { %v4603_v29 = vpop.f32.mrf.mxu2 }
 0x649   : > { %v4604_v42 = vadd.f32 %v10826_v50, %v4603_v29 }
 0x650   : > { %v4605_v25 = vpop.f32.mrf.mxu2 }
 0x651   : > { %v4606_v24 = vadd.f32 %v10826_v50, %v4605_v25 }
 0x653   : > { %v4675_v40 = vpack.c.bf16 %v4606_v24, %v4604_v42 }
 0x655   : > { %4647 = vmatmul.bf16.gmra.mxu2 %v4511_v53  ;;  %4775 = vmatmul.bf16.gmra.mxu3 %v4675_v40 }
 0x658   : > { %v4608_v60 = vpop.f32.mrf.mxu2 }
 0x659   : > { %v4609_v11 = vadd.f32 %v10826_v50, %v4608_v60 }
 0x660   : > { %v4610_v26 = vpop.f32.mrf.mxu2 }
 0x661   : > { %v4611_v31 = vadd.f32 %v10826_v50, %v4610_v26 }
 0x663   : > { %v4676_v49 = vpack.c.bf16 %v4611_v31, %v4609_v11 }
 0x665   : > { %4652 = vmatmul.bf16.gmra.mxu2 %v4512_v19  ;;  %4780 = vmatmul.bf16.gmra.mxu3 %v4676_v49 }
 0x668   : > { %v4613_v13 = vpop.f32.mrf.mxu2 }
 0x669   : > { %v4614_v55 = vadd.f32 %v10826_v50, %v4613_v13 }
 0x670   : > { %v4615_v44 = vpop.f32.mrf.mxu2 }
 0x671   : > { %v4616_v23 = vadd.f32 %v10826_v50, %v4615_v44 }
 0x673   : > { %v4677_v41 = vpack.c.bf16 %v4616_v23, %v4614_v55 }
 0x675   : > { %4657 = vmatmul.bf16.gmra.mxu2 %v4513_v38  ;;  %4785 = vmatmul.bf16.gmra.mxu3 %v4677_v41  ;;  %v10885_v38 = vld [vmem:[%s11874_s14] ss:$0 sm:$0xff] }
 0x676   : > { %12550 = vst [vmem:[#allocation22_spill] sm:$0xff] %v10885_v38 }
 0x678   : > { %v4618_v14 = vpop.f32.mrf.mxu2 }
 0x679   : > { %v4619_v43 = vadd.f32 %v10826_v50, %v4618_v14 }
 0x680   : > { %v4620_v33 = vpop.f32.mrf.mxu2 }
 0x681   : > { %v4621_v63 = vadd.f32 %v10826_v50, %v4620_v33 }
 0x683   : > { %v4678_v21 = vpack.c.bf16 %v4621_v63, %v4619_v43 }
 0x685   : > { %4662 = vmatmul.bf16.gmra.mxu2 %v4514_v17  ;;  %4790 = vmatmul.bf16.gmra.mxu3 %v4678_v21 }
 0x688   : > { %v4623_v3 = vpop.f32.mrf.mxu2 }
 0x689   : > { %v4624_v51 = vadd.f32 %v10826_v50, %v4623_v3 }
 0x690   : > { %v4625_v5 = vpop.f32.mrf.mxu2 }
 0x691   : > { %v4626_v16 = vadd.f32 %v10826_v50, %v4625_v5 }
 0x693   : > { %v4679_v35 = vpack.c.bf16 %v4626_v16, %v4624_v51 }
 0x695   : > { %4667 = vmatmul.bf16.gmra.mxu2 %v4515_v39  ;;  %4795 = vmatmul.bf16.gmra.mxu3 %v4679_v35 }
 0x698   : > { %v4628_v1 = vpop.f32.mrf.mxu2 }
 0x699   : > { %v4629_v0 = vadd.f32 %v10826_v50, %v4628_v1 }
 0x6a0   : > { %v4630_v18 = vpop.f32.mrf.mxu2 }
 0x6a1   : > { %v4631_v59 = vadd.f32 %v10826_v50, %v4630_v18 }
 0x6a3   : > { %v4680_v28 = vpack.c.bf16 %v4631_v59, %v4629_v0 }
 0x6a5   : > { %4800 = vmatmul.bf16.gmra.mxu3 %v4680_v28 }
 0x6a8   : > { %v4633_v4 = vpop.f32.mrf.mxu2 }
 0x6a9   : > { %v4634_v2 = vadd.f32 %v10826_v50, %v4633_v4 }
 0x6b0   : > { %v4635_v62 = vpop.f32.mrf.mxu2 }
 0x6b1   : > { %v4636_v10 = vadd.f32 %v10826_v50, %v4635_v62 }
 0x6b3   : > { %v4681_v46 = vpack.c.bf16 %v4636_v10, %v4634_v2 }
 0x6b5   : > { %4805 = vmatmul.bf16.gmra.mxu3 %v4681_v46 }
 0x6b8   : > { %v4638_v15 = vpop.f32.mrf.mxu2  ;;  %v4766_v57 = vpop.f32.mrf.mxu3 }
 0x6b9   : > { %v4639_v9 = vadd.f32 %v10826_v50, %v4638_v15  ;;  %v10890_v47 = vadd.f32 %v10885_v38, %v4766_v57 }
 0x6bb   : > { %12551 = vst [vmem:[#allocation49_spill] sm:$0xff] %v10890_v47  ;;  %v5938_v43 = vmul.f32 -1.442695, %v10890_v47 }
 0x6bd   : > { %6449 = vpow2.f32 %v5938_v43 }
 0x6c0   : > { %v4640_v45 = vpop.f32.mrf.mxu2  ;;  %v4768_v36 = vpop.f32.mrf.mxu3 }
 0x6c1   : > { %v4641_v7 = vadd.f32 %v10826_v50, %v4640_v45  ;;  %v10893_v33 = vadd.f32 %v10885_v38, %v4768_v36 }
 0x6c3   : > { %v4682_v6 = vpack.c.bf16 %v4641_v7, %v4639_v9  ;;  %12552 = vst [vmem:[#allocation58_spill] sm:$0xff] %v10893_v33  ;;  %v5939_v21 = vmul.f32 -1.442695, %v10893_v33  ;;  %v6450_v58 = vpop.eup %6449 }
 0x6c4   : > { %v10905_v35 = vadd.f32 1.0, %v6450_v58 }
 0x6c5   : > { %4810 = vmatmul.bf16.gmra.mxu3 %v4682_v6  ;;  %6451 = vpow2.f32 %v5939_v21 }
 0x6c6   : > { %12555 = vst [vmem:[#allocation14_spill] sm:$0xff] %v10905_v35  ;;  %6453 = vrcp.f32 %v10905_v35 }
 0x6c8   : > { %v4643_v34 = vpop.f32.mrf.mxu2  ;;  %v4771_v29 = vpop.f32.mrf.mxu3 }
 0x6c9   : > { %v4644_v25 = vadd.f32 %v10826_v50, %v4643_v34  ;;  %v10900_v5 = vadd.f32 %v10885_v38, %v4771_v29 }
 0x6cb   : > { %12553 = vst [vmem:[#allocation55_spill] sm:$0xff] %v10900_v5  ;;  %v6452_v16 = vpop.eup %6451  ;;  %v5940_v18 = vmul.f32 -1.442695, %v10900_v5 }
 0x6cc   : > { %v10914_v59 = vadd.f32 1.0, %v6452_v16 }
 0x6cd   : > { %6455 = vpow2.f32 %v5940_v18 }
 0x6ce   : > { %6457 = vrcp.f32 %v10914_v59 }
 0x6d0   : > { %v4645_v12 = vpop.f32.mrf.mxu2  ;;  %v4773_v37 = vpop.f32.mrf.mxu3 }
 0x6d1   : > { %v4646_v42 = vadd.f32 %v10826_v50, %v4645_v12  ;;  %v10903_v39 = vadd.f32 %v10885_v38, %v4773_v37  ;;  %v10945_v12 = vpop.eup %6453 }
 0x6d3   : > { %v4683_v24 = vpack.c.bf16 %v4646_v42, %v4644_v25  ;;  %12554 = vst [vmem:[#allocation48_spill] sm:$0xff] %v10903_v39  ;;  %v5941_v4 = vmul.f32 -1.442695, %v10903_v39  ;;  %v6456_v25 = vpop.eup %6455 }
 0x6d5   : > { %4815 = vmatmul.bf16.gmra.mxu3 %v4683_v24  ;;  %6459 = vpow2.f32 %v5941_v4 }
 0x6d8   : > { %v4648_v53 = vpop.f32.mrf.mxu2  ;;  %v4776_v40 = vpop.f32.mrf.mxu3 }
 0x6d9   : > { %v4649_v61 = vadd.f32 %v10826_v50, %v4648_v53  ;;  %v10908_v1 = vadd.f32 %v10885_v38, %v4776_v40  ;;  %v10949_v40 = vpop.eup %6457 }
 0x6db   : > { %12556 = vst [vmem:[#allocation60_spill] sm:$0xff] %v10908_v1  ;;  %v5942_v46 = vmul.f32 -1.442695, %v10908_v1 }
 0x6dd   : > { %6461 = vpow2.f32 %v5942_v46 }
 0x6e0   : > { %v4650_v60 = vpop.f32.mrf.mxu2  ;;  %v4778_v54 = vpop.f32.mrf.mxu3 }
 0x6e1   : > { %v4651_v26 = vadd.f32 %v10826_v50, %v4650_v60  ;;  %v10912_v0 = vadd.f32 %v10885_v38, %v4778_v54 }
 0x6e3   : > { %v4684_v11 = vpack.c.bf16 %v4651_v26, %v4649_v61  ;;  %12557 = vst [vmem:[#allocation18_spill] sm:$0xff] %v10912_v0  ;;  %v5943_v15 = vmul.f32 -1.442695, %v10912_v0 }
 0x6e5   : > { %4820 = vmatmul.bf16.gmra.mxu3 %v4684_v11  ;;  %6463 = vpow2.f32 %v5943_v15  ;;  %v6460_v11 = vpop.eup %6459 }
 0x6e8   : > { %v4653_v31 = vpop.f32.mrf.mxu2  ;;  %v4781_v19 = vpop.f32.mrf.mxu3 }
 0x6e9   : > { %v4654_v56 = vadd.f32 %v10826_v50, %v4653_v31  ;;  %v10917_v28 = vadd.f32 %v10885_v38, %v4781_v19  ;;  %v6462_v19 = vpop.eup %6461 }
 0x6eb   : > { %12558 = vst [vmem:[#allocation59_spill] sm:$0xff] %v10917_v28  ;;  %v5944_v45 = vmul.f32 -1.442695, %v10917_v28 }
 0x6ed   : > { %6465 = vpow2.f32 %v5944_v45 }
 0x6f0   : > { %v4655_v49 = vpop.f32.mrf.mxu2  ;;  %v4783_v13 = vpop.f32.mrf.mxu3 }
 0x6f1   : > { %v4656_v30 = vadd.f32 %v10826_v50, %v4655_v49  ;;  %v10921_v62 = vadd.f32 %v10885_v38, %v4783_v13 }
 0x6f3   : > { %v4685_v44 = vpack.c.bf16 %v4656_v30, %v4654_v56  ;;  %12559 = vst [vmem:[#allocation9_spill] sm:$0xff] %v10921_v62  ;;  %v5945_v9 = vmul.f32 -1.442695, %v10921_v62  ;;  %v6464_v56 = vpop.eup %6463  ;;  %v10959_v30 = vadd.f32 1.0, %v6456_v25 }
 0x6f5   : > { %4825 = vmatmul.bf16.gmra.mxu3 %v4685_v44  ;;  %6467 = vpow2.f32 %v5945_v9  ;;  %v6466_v44 = vpop.eup %6465 }
 0x6f8   : > { %v4658_v55 = vpop.f32.mrf.mxu2  ;;  %v4786_v23 = vpop.f32.mrf.mxu3 }
 0x6f9   : > { %v4659_v32 = vadd.f32 %v10826_v50, %v4658_v55  ;;  %v10927_v57 = vadd.f32 %v10885_v38, %v4786_v23  ;;  %v10961_v55 = vadd.f32 1.0, %v6460_v11  ;;  %v10963_v23 = vadd.f32 1.0, %v6462_v19 }
 0x6fa   : > { %v4990_v11 = vmul.f32 %v10949_v40, %v10914_v59 }
 0x6fb   : > { %12560 = vst [vmem:[#allocation12_spill] sm:$0xff] %v10927_v57  ;;  %v5946_v34 = vmul.f32 -1.442695, %v10927_v57 }
 0x6fd   : > { %6469 = vpow2.f32 %v5946_v34 }
 0x700   : > { %v4660_v41 = vpop.f32.mrf.mxu2  ;;  %v4788_v14 = vpop.f32.mrf.mxu3 }
 0x701   : > { %v4661_v22 = vadd.f32 %v10826_v50, %v4660_v41  ;;  %v10932_v36 = vadd.f32 %v10885_v38, %v4788_v14  ;;  %v10965_v41 = vadd.f32 1.0, %v6464_v56 }
 0x703   : > { %v4686_v27 = vpack.c.bf16 %v4661_v22, %v4659_v32  ;;  %12561 = vst [vmem:[#allocation8_spill] sm:$0xff] %v10932_v36  ;;  %v5947_v37 = vmul.f32 -1.442695, %v10932_v36  ;;  %v10968_v32 = vadd.f32 1.0, %v6466_v44 }
 0x705   : > { %4830 = vmatmul.bf16.gmra.mxu3 %v4686_v27  ;;  %6471 = vpow2.f32 %v5947_v37 }
 0x708   : > { %v4663_v63 = vpop.f32.mrf.mxu2  ;;  %v4791_v17 = vpop.f32.mrf.mxu3 }
 0x709   : > { %v4664_v52 = vadd.f32 %v10826_v50, %v4663_v63  ;;  %v10936_v7 = vadd.f32 %v10885_v38, %v4791_v17 }
 0x70b   : > { %v5948_v42 = vmul.f32 -1.442695, %v10936_v7 }
 0x70d   : > { %6473 = vpow2.f32 %v5948_v42 }
 0x710   : > { %v4665_v3 = vpop.f32.mrf.mxu2  ;;  %v4793_v20 = vpop.f32.mrf.mxu3 }
 0x711   : > { %v4666_v8 = vadd.f32 %v10826_v50, %v4665_v3  ;;  %v10939_v6 = vadd.f32 %v10885_v38, %v4793_v20 }
 0x713   : > { %v4687_v51 = vpack.c.bf16 %v4666_v8, %v4664_v52  ;;  %v5949_v60 = vmul.f32 -1.442695, %v10939_v6 }
 0x715   : > { %4835 = vmatmul.bf16.gmra.mxu3 %v4687_v51  ;;  %6475 = vpow2.f32 %v5949_v60 }
 0x718   : > { %v4668_v2 = vpop.f32.mrf.mxu2  ;;  %v4796_v10 = vpop.f32.mrf.mxu3 }
 0x719   : > { %v10943_v29 = vadd.f32 %v10885_v38, %v4796_v10  ;;  %v4669_v54 = vadd.f32 %v10826_v50, %v4668_v2 }
 0x71b   : > { %v5950_v31 = vmul.f32 -1.442695, %v10943_v29 }
 0x71d   : > { %6477 = vpow2.f32 %v5950_v31 }
 0x720   : > { %v4670_v24 = vpop.f32.mrf.mxu2  ;;  %v4798_v53 = vpop.f32.mrf.mxu3 }
 0x721   : > { %v4671_v61 = vadd.f32 %v10826_v50, %v4670_v24  ;;  %v10955_v26 = vadd.f32 %v10885_v38, %v4798_v53  ;;  %v6468_v50 = vpop.eup %6467 }
 0x722   : > { %v6470_v14 = vpop.eup %6469  ;;  %v10975_v17 = vadd.f32 1.0, %v6468_v50 }
 0x723   : > { %v4688_v49 = vpack.c.bf16 %v4671_v61, %v4669_v54  ;;  %v5951_v13 = vmul.f32 -1.442695, %v10955_v26  ;;  %v6472_v27 = vpop.eup %6471  ;;  %v10978_v3 = vadd.f32 1.0, %v6470_v14  ;;  %v4975_v54 = vmul.f32 %v10945_v12, %v10905_v35 }
 0x724   : > { %v6474_v63 = vpop.eup %6473  ;;  %v10982_v8 = vadd.f32 1.0, %v6472_v27 }
 0x725   : > { %4840 = vmatmul.bf16.gmra.mxu3 %v4688_v49  ;;  %6479 = vpow2.f32 %v5951_v13  ;;  %v6476_v21 = vpop.eup %6475  ;;  %v10984_v51 = vadd.f32 1.0, %v6474_v63  ;;  %v4976_v44 = vsub.f32 1.0, %v4975_v54 }
 0x726   : > { %6481 = vrcp.f32 %v10959_v30  ;;  %v6478_v52 = vpop.eup %6477  ;;  %v10989_v18 = vadd.f32 1.0, %v6476_v21 }
 0x727   : > { %6483 = vrcp.f32 %v10961_v55  ;;  %v10994_v2 = vadd.f32 1.0, %v6478_v52  ;;  %v11070_v28 = vmul.f32 %v10945_v12, %v4976_v44  ;;  %vm5129_vm5 = vweird.f32 %v10984_v51 }
 0x728   : > { %v4801_v22 = vpop.f32.mrf.mxu3  ;;  %6485 = vrcp.f32 %v10963_v23  ;;  %vm5144_vm10 = vweird.f32 %v10989_v18 }
 0x729   : > { %v10972_v43 = vadd.f32 %v10885_v38, %v4801_v22  ;;  %6487 = vrcp.f32 %v10965_v41  ;;  %v4991_v22 = vsub.f32 1.0, %v4990_v11  ;;  %12564 = vst [vmem:[#allocation52_spill] sm:$0xff] %v11070_v28  ;;  %vm5159_vm12 = vweird.f32 %v10994_v2 }
 0x72a   : > { %6489 = vrcp.f32 %v10968_v32 }
 0x72b   : > { %v5952_v20 = vmul.f32 -1.442695, %v10972_v43  ;;  %v6480_v58 = vpop.eup %6479 }
 0x72c   : > { %v10986_v16 = vpop.eup %6481  ;;  %v10999_v46 = vadd.f32 1.0, %v6480_v58 }
 0x72d   : > { %6491 = vpow2.f32 %v5952_v20  ;;  %v10991_v4 = vpop.eup %6483  ;;  %v5005_v13 = vmul.f32 %v10986_v16, %v10959_v30 }
 0x72e   : > { %6493 = vrcp.f32 %v10975_v17  ;;  %v10996_v10 = vpop.eup %6485  ;;  %v5020_v50 = vmul.f32 %v10991_v4, %v10961_v55  ;;  %vm5174_vm11 = vweird.f32 %v10999_v46 }
 0x72f   : > { %6495 = vrcp.f32 %v10978_v3  ;;  %v11001_v45 = vpop.eup %6487  ;;  %v5035_v27 = vmul.f32 %v10996_v10, %v10963_v23 }
 0x730   : > { %6497 = vrcp.f32 %v10982_v8  ;;  %v4803_v15 = vpop.f32.mrf.mxu3  ;;  %v11007_v34 = vpop.eup %6489  ;;  %v5050_v63 = vmul.f32 %v11001_v45, %v10965_v41 }
 0x731   : > { %6499 = vrcp.f32 %v10984_v51  ;;  %v11005_v9 = vadd.f32 %v10885_v38, %v4803_v15  ;;  %v5065_v21 = vmul.f32 %v11007_v34, %v10968_v32  ;;  %v5021_v38 = vsub.f32 1.0, %v5020_v50 }
 0x732   : > { %6501 = vrcp.f32 %v10989_v18  ;;  %v11073_v50 = vmul.f32 %v10949_v40, %v4991_v22 }
 0x733   : > { %v6492_v37 = vpop.eup %6491  ;;  %6503 = vrcp.f32 %v10994_v2  ;;  %v5953_v25 = vmul.f32 -1.442695, %v11005_v9  ;;  %v5066_v33 = vsub.f32 1.0, %v5065_v21 }
 0x734   : > { %v11012_v42 = vpop.eup %6493  ;;  %6505 = vrcp.f32 %v10999_v46  ;;  %v11015_v24 = vadd.f32 1.0, %v6492_v37 }
 0x735   : > { %v11017_v53 = vpop.eup %6495  ;;  %6507 = vpow2.f32 %v5953_v25  ;;  %v5080_v52 = vmul.f32 %v11012_v42, %v10975_v17  ;;  %v5006_v25 = vsub.f32 1.0, %v5005_v13  ;;  %v5051_v13 = vsub.f32 1.0, %v5050_v63 }
 0x736   : > { %v11019_v60 = vpop.eup %6497  ;;  %6509 = vrcp.f32 %v11015_v24  ;;  %v5095_v58 = vmul.f32 %v11017_v53, %v10978_v3  ;;  %v11088_v44 = vmul.f32 %v11007_v34, %v5066_v33  ;;  %vm5189_vm2 = vweird.f32 %v11015_v24 }
 0x737   : > { %v11024_v61 = vpop.eup %6499  ;;  %v5110_v15 = vmul.f32 %v11019_v60, %v10982_v8  ;;  %v5081_v39 = vsub.f32 1.0, %v5080_v52  ;;  %v11076_v36 = vmul.f32 %v10986_v16, %v5006_v25  ;;  %v11085_v52 = vmul.f32 %v11001_v45, %v5051_v13 }
 0x738   : > { %v11028_v31 = vpop.eup %6501  ;;  %v11030_v19 = vpop.f32.mrf.mxu3  ;;  %v5125_v54 = vmul.f32 %v11024_v61, %v10984_v51  ;;  %v5096_v1 = vsub.f32 1.0, %v5095_v58  ;;  %vm5130_vm14 = vweird.f32 %v11024_v61  ;;  %vm5115_vm15 = vweird.f32 %v11019_v60 }
 0x739   : > { %12562 = vst [vmem:[#allocation61_spill] sm:$0xff] %v11030_v19  ;;  %v11032_v49 = vpop.eup %6503  ;;  %v5140_v19 = vmul.f32 %v11028_v31, %v10989_v18  ;;  %v5111_v35 = vsub.f32 1.0, %v5110_v15  ;;  %v11092_v15 = vmul.f32 %v11012_v42, %v5081_v39  ;;  %vm5145_vm4 = vweird.f32 %v11028_v31 }
 0x73a   : > { %v11036_v56 = vpop.eup %6505  ;;  %v5155_v47 = vmul.f32 %v11032_v49, %v10994_v2  ;;  %v5126_v62 = vsub.f32 1.0, %v5125_v54  ;;  %vm5160_vm3 = vweird.f32 %v11032_v49 }
 0x73b   : > { %v6508_v14 = vpop.eup %6507  ;;  %v5170_v11 = vmul.f32 %v11036_v56, %v10999_v46  ;;  %vm5175_vm6 = vweird.f32 %v11036_v56  ;;  %vm11162_vm7 = vmor %vm5159_vm12, %vm5160_vm3  ;;  %vm5055_vm3 = vweird.f32 %v11001_v45 }
 0x73c   : > { %v11046_v20 = vpop.eup %6509  ;;  %v11054_v37 = vadd.f32 1.0, %v6508_v14  ;;  %v5036_v14 = vsub.f32 1.0, %v5035_v27  ;;  %v11079_v27 = vmul.f32 %v10991_v4, %v5021_v38  ;;  %v5156_v63 = vsub.f32 1.0, %v5155_v47  ;;  %vm11141_vm8 = vmor %vm5174_vm11, %vm5175_vm6 }
 0x73d   : > { %v5185_v48 = vmul.f32 %v11046_v20, %v11015_v24  ;;  %v5171_v57 = vsub.f32 1.0, %v5170_v11  ;;  %v11095_v38 = vmul.f32 %v11017_v53, %v5096_v1  ;;  %v11098_v47 = vmul.f32 %v11019_v60, %v5111_v35  ;;  %vm11179_vm12 = vmor %vm5144_vm10, %vm5145_vm4 }
 0x73e   : > { %6511 = vrcp.f32 %v11054_v37  ;;  %v11082_v21 = vmul.f32 %v10996_v10, %v5036_v14  ;;  %v5127_v25 = vmul.f32 %v11024_v61, %v5126_v62  ;;  %v5157_v39 = vmul.f32 %v11032_v49, %v5156_v63  ;;  %vm11201_vm10 = vmor %vm5129_vm5, %vm5130_vm14 }
 0x73f   : > { %v5186_v5 = vsub.f32 1.0, %v5185_v48  ;;  %v5141_v48 = vsub.f32 1.0, %v5140_v19  ;;  %v5172_v33 = vmul.f32 %v11036_v56, %v5171_v57  ;;  %vm5190_vm13 = vweird.f32 %v11046_v20 }
 0x740   : > { %v11067_v0 = vpop.f32.mrf.mxu3  ;;  %v5193_v57 = vand.u32 2147483647, %v11015_v24  ;;  %v5195_v11 = vand.u32 2147483648, %v11015_v24  ;;  %v5210_v14 = vand.u32 2147483648, %v11054_v37  ;;  %v5180_v19 = vand.u32 2147483648, %v10999_v46  ;;  %vm11132_vm9 = vmor %vm5189_vm2, %vm5190_vm13 }
 0x741   : > { %12563 = vst [vmem:[#allocation3_spill] sm:$0xff] %v11067_v0  ;;  %v5187_v22 = vmul.f32 %v11046_v20, %v5186_v5  ;;  %v5142_v54 = vmul.f32 %v11028_v31, %v5141_v48  ;;  %v5173_v48 = vadd.f32 %v11036_v56, %v5172_v33  ;;  %v5158_v33 = vadd.f32 %v11032_v49, %v5157_v39 }
 0x742   : > { %vm5204_vm13 = vweird.f32 %v11054_v37  ;;  %v5165_v0 = vand.u32 2147483648, %v10994_v2  ;;  %v5196_v28 = vor.u32 1.1754944e-38, %v5195_v11  ;;  %v5211_v39 = vor.u32 1.1754944e-38, %v5210_v14 }
 0x743   : > { %v5188_v35 = vadd.f32 %v11046_v20, %v5187_v22  ;;  %v5208_v22 = vand.u32 2147483647, %v11054_v37  ;;  %vm5085_vm6 = vweird.f32 %v11012_v42  ;;  %vm5099_vm11 = vweird.f32 %v10978_v3 }
 0x744   : > { %v6512_v58 = vpop.eup %6511  ;;  %v5177_v1 = vsel %vm11141_vm8, %v11036_v56, %v5173_v48  ;;  %vm5084_vm8 = vweird.f32 %v10975_v17  ;;  %v5128_v56 = vadd.f32 %v11024_v61, %v5127_v25  ;;  %v5133_v48 = vand.u32 2147483647, %v10984_v51 }
 0x745   : > { %v5200_v5 = vmul.f32 %v6512_v58, %v11054_v37  ;;  %vm5205_vm1 = vweird.f32 %v6512_v58  ;;  %vm5209_vm0 = vcmp.eq.f32.partialorder %v5208_v22, 8.507059e+37  ;;  %v5150_v37 = vand.u32 2147483648, %v10989_v18 }
 0x746   : > { %vm5206_vm2 = vmor %vm5204_vm13, %vm5205_vm1  ;;  %vm5070_vm1 = vweird.f32 %v11007_v34  ;;  %vm12578_vm14 = vweird.f32 %v10982_v8 }
 0x747   : > { %v5201_v62 = vsub.f32 1.0, %v5200_v5  ;;  %v5178_v5 = vand.u32 2147483647, %v10999_v46  ;;  %v5192_v46 = vsel %vm11132_vm9, %v11046_v20, %v5188_v35  ;;  %vm5194_vm9 = vcmp.eq.f32.partialorder %v5193_v57, 8.507059e+37  ;;  %vm11221_vm5 = vmor %vm12578_vm14, %vm5115_vm15 }
 0x748   : > { %v11118_v13 = vpop.f32.mrf.mxu3  ;;  %v5181_v35 = vor.u32 1.1754944e-38, %v5180_v19  ;;  %v5197_v11 = vsel %vm5194_vm9, %v5196_v28, %v5192_v46  ;;  %v5166_v19 = vor.u32 1.1754944e-38, %v5165_v0  ;;  %v5118_v0 = vand.u32 2147483647, %v10982_v8 }
 0x749   : > { %12565 = vst [vmem:[#allocation4_spill] sm:$0xff] %v11118_v13  ;;  %v5202_v63 = vmul.f32 %v6512_v58, %v5201_v62  ;;  %v5143_v13 = vadd.f32 %v11028_v31, %v5142_v54  ;;  %vm5179_vm13 = vcmp.eq.f32.partialorder %v5178_v5, 8.507059e+37  ;;  %v12574_v5 = vand.u32 2147483647, %v10994_v2  ;;  %v12600_v54 = vld [vmem:[#allocation52_spill] sm:$0xff] }
 0x74a   : > { %v5182_v25 = vsel %vm5179_vm13, %v5181_v35, %v5177_v1  ;;  %v5120_v62 = vand.u32 2147483648, %v10982_v8  ;;  %v5151_v46 = vor.u32 1.1754944e-38, %v5150_v37  ;;  %v5132_v2 = vsel %vm11201_vm10, %v11024_v61, %v5128_v56 }
 0x74b   : > { %v5203_v24 = vadd.f32 %v6512_v58, %v5202_v63  ;;  %v5135_v63 = vand.u32 2147483648, %v10984_v51  ;;  %vm5164_vm4 = vcmp.eq.f32.partialorder %v12574_v5, 8.507059e+37  ;;  %v5467_v51 = vmul.f32 %v5182_v25, %v10955_v26  ;;  %v12588_v25 = vld [vmem:[#allocation8_spill] sm:$0xff] }
 0x74c   : > { %vm5025_vm13 = vweird.f32 %v10991_v4  ;;  %v5083_v26 = vadd.f32 %v11012_v42, %v11092_v15  ;;  %v5090_v37 = vand.u32 2147483648, %v10975_v17  ;;  %vm12581_vm15 = vweird.f32 %v11017_v53 }
 0x74d   : > { %v5207_v20 = vsel %vm5206_vm2, %v6512_v58, %v5203_v24  ;;  %v5162_v58 = vsel %vm11162_vm7, %v11032_v49, %v5158_v33  ;;  %v5147_v49 = vsel %vm11179_vm12, %v11028_v31, %v5143_v13  ;;  %v5468_v33 = vmul.f32 %v5197_v11, %v10972_v43  ;;  %vm11239_vm10 = vmor %vm5099_vm11, %vm12581_vm15 }
 0x74e   : > { %v5212_v14 = vsel %vm5209_vm0, %v5211_v39, %v5207_v20  ;;  %vm5069_vm0 = vweird.f32 %v10968_v32  ;;  %v5167_v31 = vsel %vm5164_vm4, %v5166_v19, %v5162_v58  ;;  %vm5040_vm7 = vweird.f32 %v10996_v10  ;;  %vm11257_vm11 = vmor %vm5084_vm8, %vm5085_vm6 }
 0x74f   : > { %v5469_v57 = vmul.f32 %v5212_v14, %v11005_v9  ;;  %v5113_v9 = vadd.f32 %v11019_v60, %v11098_v47  ;;  %vm5054_vm2 = vweird.f32 %v10965_v41  ;;  %v5098_v43 = vadd.f32 %v11017_v53, %v11095_v38  ;;  %vm11277_vm6 = vmor %vm5069_vm0, %vm5070_vm1 }
 0x750   : > { %v11183_v22 = vpop.f32.mrf.mxu3  ;;  %v12577_v13 = vand.u32 2147483647, %v10989_v18  ;;  %v5103_v24 = vand.u32 2147483647, %v10978_v3  ;;  %v5105_v39 = vand.u32 2147483648, %v10978_v3  ;;  %v5136_v1 = vor.u32 1.1754944e-38, %v5135_v63  ;;  %vm11295_vm1 = vmor %vm5054_vm2, %vm5055_vm3 }
 0x751   : > { %5486 = vmatpush.msra.mxu0 %v5469_v57  ;;  %vm5039_vm12 = vweird.f32 %v10963_v23  ;;  %v5117_v18 = vsel %vm11221_vm5, %v11019_v60, %v5113_v9  ;;  %vm5134_vm4 = vcmp.eq.f32.partialorder %v5133_v48, 8.507059e+37  ;;  %v5466_v8 = vmul.f32 %v5167_v31, %v10943_v29 }
 0x752   : > { %vm5149_vm9 = vcmp.eq.f32.partialorder %v12577_v13, 8.507059e+37  ;;  %v5088_v20 = vand.u32 2147483647, %v10975_v17  ;;  %v5121_v15 = vor.u32 1.1754944e-38, %v5120_v62  ;;  %v5137_v35 = vsel %vm5134_vm4, %v5136_v1, %v5132_v2  ;;  %v12591_v62 = vld [vmem:[#allocation12_spill] sm:$0xff]  ;;  %vm11311_vm3 = vmor %vm5039_vm12, %vm5040_vm7  ;;  %v12594_v13 = vld [vmem:[#allocation9_spill] sm:$0xff] }
 0x753   : > { %5487 = vmatpush.msra.mxu0 %v5468_v33  ;;  %v5152_v61 = vsel %vm5149_vm9, %v5151_v46, %v5147_v49  ;;  %vm5010_vm9 = vweird.f32 %v10986_v16  ;;  %vm5024_vm14 = vweird.f32 %v10961_v55  ;;  %v5068_v29 = vadd.f32 %v11007_v34, %v11088_v44 }
 0x754   : > { %v5102_v60 = vsel %vm11239_vm10, %v11017_v53, %v5098_v43  ;;  %vm5119_vm5 = vcmp.eq.f32.partialorder %v5118_v0, 8.507059e+37  ;;  %v5465_v3 = vmul.f32 %v5152_v61, %v10939_v6  ;;  %v5073_v11 = vand.u32 2147483647, %v10968_v32  ;;  %vm11327_vm7 = vmor %vm5024_vm14, %vm5025_vm13 }
 0x755   : > { %5488 = vmatpush.msra.mxu0 %v5467_v51  ;;  %v5075_v14 = vand.u32 2147483648, %v10968_v32  ;;  %v5106_v44 = vor.u32 1.1754944e-38, %v5105_v39  ;;  %v5122_v58 = vsel %vm5119_vm5, %v5121_v15, %v5117_v18  ;;  %vm4995_vm4 = vweird.f32 %v10949_v40 }
 0x756   : > { %vm5009_vm15 = vweird.f32 %v10959_v30  ;;  %v5053_v6 = vadd.f32 %v11001_v45, %v11085_v52  ;;  %v5087_v53 = vsel %vm11257_vm11, %v11012_v42, %v5083_v26  ;;  %vm5104_vm10 = vcmp.eq.f32.partialorder %v5103_v24, 8.507059e+37  ;;  %v12597_v26 = vld [vmem:[#allocation59_spill] sm:$0xff] }
 0x757   : > { %5489 = vmatpush.msra.mxu0 %v5466_v8  ;;  %v5464_v17 = vmul.f32 %v5137_v35, %v10936_v7  ;;  %v5058_v48 = vand.u32 2147483647, %v10965_v41  ;;  %v5060_v63 = vand.u32 2147483648, %v10965_v41  ;;  %v5091_v52 = vor.u32 1.1754944e-38, %v5090_v37  ;;  %vm11343_vm13 = vmor %vm5009_vm15, %vm5010_vm9  ;;  %v12601_v35 = vld [vmem:[#allocation18_spill] sm:$0xff] }
 0x758   : > { %v11261_v57 = vpop.f32.mrf.mxu3  ;;  %v5107_v19 = vsel %vm5104_vm10, %v5106_v44, %v5102_v60  ;;  %vm4980_vm8 = vweird.f32 %v10945_v12  ;;  %vm4994_vm5 = vweird.f32 %v10914_v59  ;;  %v5038_v7 = vadd.f32 %v10996_v10, %v11082_v21  ;;  %v12602_v60 = vld [vmem:[#allocation14_spill] sm:$0xff]  ;;  %v12605_v44 = vld [vmem:[#allocation60_spill] sm:$0xff] }
 0x759   : > { %5490 = vmatpush.msra.mxu0 %v5465_v3  ;;  %v5072_v42 = vsel %vm11277_vm6, %v11007_v34, %v5068_v29  ;;  %vm5089_vm11 = vcmp.eq.f32.partialorder %v5088_v20, 8.507059e+37  ;;  %v5463_v32 = vmul.f32 %v5122_v58, %v12588_v25  ;;  %v5043_v9 = vand.u32 2147483647, %v10963_v23  ;;  %vm11359_vm9 = vmor %vm4994_vm5, %vm4995_vm4 }
 0x75a   : > { %v5045_v49 = vand.u32 2147483648, %v10963_v23  ;;  %v5076_v21 = vor.u32 1.1754944e-38, %v5075_v14  ;;  %v5092_v33 = vsel %vm5089_vm11, %v5091_v52, %v5087_v53  ;;  %v5023_v34 = vadd.f32 %v10991_v4, %v11079_v27 }
 0x75b   : > { %5491 = vmatpush.msra.mxu0 %v5464_v17  ;;  %v5057_v0 = vsel %vm11295_vm1, %v11001_v45, %v5053_v6  ;;  %vm5074_vm0 = vcmp.eq.f32.partialorder %v5073_v11, 8.507059e+37  ;;  %v5462_v47 = vmul.f32 %v5107_v19, %v12591_v62  ;;  %v5028_v46 = vand.u32 2147483647, %v10961_v55  ;;  %v12606_v17 = vld [vmem:[#allocation48_spill] sm:$0xff] }
 0x75c   : > { %v5030_v41 = vand.u32 2147483648, %v10961_v55  ;;  %v5061_v27 = vor.u32 1.1754944e-38, %v5060_v63  ;;  %v5077_v43 = vsel %vm5074_vm0, %v5076_v21, %v5072_v42  ;;  %v5008_v45 = vadd.f32 %v10986_v16, %v11076_v36  ;;  %v12608_v42 = vld [vmem:[#allocation58_spill] sm:$0xff] }
 0x75d   : > { %5492 = vmatpush.msra.mxu0 %v5463_v32  ;;  %v5042_v2 = vsel %vm11311_vm3, %v10996_v10, %v5038_v7  ;;  %vm5059_vm2 = vcmp.eq.f32.partialorder %v5058_v48, 8.507059e+37  ;;  %v5461_v51 = vmul.f32 %v5092_v33, %v12594_v13  ;;  %v5013_v24 = vand.u32 2147483647, %v10959_v30  ;;  %v12609_v32 = vld [vmem:[#allocation49_spill] sm:$0xff] }
 0x75e   : > { %v5015_v23 = vand.u32 2147483648, %v10959_v30  ;;  %v5046_v36 = vor.u32 1.1754944e-38, %v5045_v49  ;;  %v5062_v38 = vsel %vm5059_vm2, %v5061_v27, %v5057_v0  ;;  %v4993_v10 = vadd.f32 %v10949_v40, %v11073_v50  ;;  %v12611_v33 = vld [vmem:[#allocation61_spill] sm:$0xff] }
 0x75f   : > { %5493 = vmatpush.msra.mxu0 %v5462_v47  ;;  %v5027_v61 = vsel %vm11327_vm7, %v10991_v4, %v5023_v34  ;;  %vm5044_vm12 = vcmp.eq.f32.partialorder %v5043_v9, 8.507059e+37  ;;  %v5460_v18 = vmul.f32 %v5077_v43, %v12597_v26  ;;  %v4998_v55 = vand.u32 2147483647, %v10914_v59  ;;  %v12612_v34 = vld [vmem:[#allocation22_spill] sm:$0xff] }
 0x760   : > { %v4818_v1 = vpop.f32.mrf.mxu3  ;;  %v5000_v8 = vand.u32 2147483648, %v10914_v59  ;;  %v5031_v50 = vor.u32 1.1754944e-38, %v5030_v41  ;;  %v5047_v37 = vsel %vm5044_vm12, %v5046_v36, %v5042_v2  ;;  %v4978_v4 = vadd.f32 %v10945_v12, %v12600_v54 }
 0x761   : > { %5494 = vmatpush.msra.mxu0 %v5461_v51  ;;  %v5012_v15 = vsel %vm11343_vm13, %v10986_v16, %v5008_v45  ;;  %vm5029_vm14 = vcmp.eq.f32.partialorder %v5028_v46, 8.507059e+37  ;;  %v5459_v29 = vmul.f32 %v5062_v38, %v12601_v35  ;;  %vm4979_vm10 = vweird.f32 %v12602_v60  ;;  %v12614_v46 = vld [vmem:[#allocation3_spill] sm:$0xff]  ;;  %v12616_v45 = vld [vmem:[#allocation4_spill] sm:$0xff] }
 0x762   : > { %v4985_v30 = vand.u32 2147483648, %v12602_v60  ;;  %v5016_v11 = vor.u32 1.1754944e-38, %v5015_v23  ;;  %v5032_v14 = vsel %vm5029_vm14, %v5031_v50, %v5027_v61  ;;  %v4983_v16 = vand.u32 2147483647, %v12602_v60  ;;  %vm4981_vm6 = vmor %vm4979_vm10, %vm4980_vm8 }
 0x763   : > { %5495 = vmatpush.msra.mxu0 %v5460_v18  ;;  %v4997_v56 = vsel %vm11359_vm9, %v10949_v40, %v4993_v10  ;;  %vm5014_vm15 = vcmp.eq.f32.partialorder %v5013_v24, 8.507059e+37  ;;  %v5458_v58 = vmul.f32 %v5047_v37, %v12605_v44  ;;  %v5001_v59 = vor.u32 1.1754944e-38, %v5000_v8  ;;  %v12607_v40 = vld [vmem:[#allocation55_spill] sm:$0xff] }
 0x764   : > { %v5017_v6 = vsel %vm5014_vm15, %v5016_v11, %v5012_v15  ;;  %v4982_v53 = vsel %vm4981_vm6, %v10945_v12, %v4978_v4  ;;  %vm4999_vm4 = vcmp.eq.f32.partialorder %v4998_v55, 8.507059e+37  ;;  %v5457_v48 = vmul.f32 %v5032_v14, %v12606_v17 }
 0x765   : > { %5496 = vmatpush.msra.mxu0 %v5459_v29  ;;  %v4986_v63 = vor.u32 1.1754944e-38, %v4985_v30  ;;  %v5002_v28 = vsel %vm4999_vm4, %v5001_v59, %v4997_v56  ;;  %vm4984_vm5 = vcmp.eq.f32.partialorder %v4983_v16, 8.507059e+37  ;;  %v5456_v19 = vmul.f32 %v5017_v6, %v12607_v40 }
 0x766   : > { %v5455_v25 = vmul.f32 %v5002_v28, %v12608_v42  ;;  %v12610_v49 = vmov 1.0   ;;  %v11378_v0 = vadd.f32 %v12612_v34, %v12611_v33  ;;  %v11383_v41 = vadd.f32 %v12612_v34, %v12614_v46 }
 0x767   : > { %5497 = vmatpush.msra.mxu0 %v5458_v58  ;;  %v4987_v7 = vsel %vm4984_vm5, %v4986_v63, %v4982_v53  ;;  %v11388_v2 = vadd.f32 %v12612_v34, %v12616_v45  ;;  %v11392_v13 = vadd.f32 %v12612_v34, %v11183_v22  ;;  %v11396_v51 = vadd.f32 %v12612_v34, %v11261_v57 }
 0x768   : > { %v4821_v52 = vpop.f32.mrf.mxu3  ;;  %v5454_v9 = vmul.f32 %v4987_v7, %v12609_v32  ;;  %12613 = vst [vmem:[#allocation67_spill] sm:$0xff] %v11378_v0  ;;  %v5954_v47 = vmul.f32 -1.442695, %v11378_v0  ;;  %v5955_v31 = vmul.f32 -1.442695, %v11383_v41  ;;  %v11401_v23 = vadd.f32 %v12612_v34, %v4818_v1 }
 0x769   : > { %5498 = vmatpush.msra.mxu0 %v5457_v48  ;;  %12615 = vst [vmem:[#allocation65_spill] sm:$0xff] %v11383_v41  ;;  %v5956_v39 = vmul.f32 -1.442695, %v11388_v2  ;;  %v11405_v36 = vadd.f32 %v12612_v34, %v4821_v52  ;;  %v5957_v38 = vmul.f32 -1.442695, %v11392_v13 }
 0x76a   : > { %6513 = vpow2.f32 %v5954_v47  ;;  %12617 = vst [vmem:[#allocation10_spill] sm:$0xff] %v11388_v2  ;;  %v5958_v22 = vmul.f32 -1.442695, %v11396_v51  ;;  %v5959_v57 = vmul.f32 -1.442695, %v11401_v23 }
 0x76b   : > { %5499 = vmatpush.msra.mxu0 %v5456_v19  ;;  %6515 = vpow2.f32 %v5955_v31  ;;  %12618 = vst [vmem:[#allocation53_spill] sm:$0xff] %v11392_v13  ;;  %v5960_v18 = vmul.f32 -1.442695, %v11405_v36 }
 0x76c   : > { %12619 = vst [vmem:[#allocation38_spill] sm:$0xff] %v11396_v51 }
 0x76d   : > { %5500 = vmatpush.msra.mxu0 %v5455_v25  ;;  %12621 = vst [vmem:[#allocation66_spill] sm:$0xff] %v11401_v23 }
 0x76e   : > { %12622 = vst [vmem:[#allocation5_spill] sm:$0xff] %v11405_v36 }
 0x76f   : > { %5501 = vmatpush.msra.mxu0 %v5454_v9 }
 0x770   : > { %v4823_v12 = vpop.f32.mrf.mxu3  ;;  %5502 = vmatmul.f32.vlgmr.msra.gmra.mxu0 %v12610_v49  ;;  %v6514_v43 = vpop.eup %6513 }
 0x771   : > { %v11398_v24 = vadd.f32 1.0, %v6514_v43  ;;  %v6516_v61 = vpop.eup %6515  ;;  %v11410_v26 = vadd.f32 %v12612_v34, %v4823_v12 }
 0x772   : > { %v11421_v8 = vadd.f32 1.0, %v6516_v61 }
 0x773   : > { %12620 = vst [vmem:[#allocation23_spill] sm:$0xff] %v11398_v24  ;;  %6517 = vrcp.f32 %v11398_v24  ;;  %v5961_v50 = vmul.f32 -1.442695, %v11410_v26 }
 0x774   : > { %12623 = vst [vmem:[#allocation32_spill] sm:$0xff] %v11410_v26  ;;  %6519 = vpow2.f32 %v5956_v39 }
 0x775   : > { %6521 = vpow2.f32 %v5957_v38 }
 0x776   : > { %6523 = vpow2.f32 %v5958_v22 }
 0x777   : > { %6525 = vpow2.f32 %v5959_v57 }
 0x778   : > { %v4826_v5 = vpop.f32.mrf.mxu3  ;;  %6527 = vpow2.f32 %v5960_v18 }
 0x779   : > { %v11415_v1 = vadd.f32 %v12612_v34, %v4826_v5  ;;  %v11435_v35 = vpop.eup %6517  ;;  %6529 = vrcp.f32 %v11421_v8 }
 0x77a   : > { %v6520_v30 = vpop.eup %6519  ;;  %6531 = vpow2.f32 %v5961_v50 }
 0x77b   : > { %12624 = vst [vmem:[#allocation26_spill] sm:$0xff] %v11415_v1  ;;  %v5962_v54 = vmul.f32 -1.442695, %v11415_v1  ;;  %v6522_v14 = vpop.eup %6521  ;;  %v11445_v59 = vadd.f32 1.0, %v6520_v30 }
 0x77c   : > { %v6524_v56 = vpop.eup %6523  ;;  %v11447_v53 = vadd.f32 1.0, %v6522_v14 }
 0x77d   : > { %6533 = vpow2.f32 %v5962_v54  ;;  %v6526_v58 = vpop.eup %6525  ;;  %v11451_v48 = vadd.f32 1.0, %v6524_v56 }
 0x77e   : > { %v6528_v6 = vpop.eup %6527  ;;  %v11453_v28 = vadd.f32 1.0, %v6526_v58 }
 0x77f   : > { %v11449_v17 = vpop.eup %6529  ;;  %v11456_v40 = vadd.f32 1.0, %v6528_v6 }
 0x780   : > { %v4828_v21 = vpop.f32.mrf.mxu3  ;;  %v6532_v63 = vpop.eup %6531  ;;  %v5230_v30 = vmul.f32 %v11449_v17, %v11421_v8 }
 0x781   : > { %v11419_v55 = vadd.f32 %v12612_v34, %v4828_v21  ;;  %v11463_v32 = vadd.f32 1.0, %v6532_v63 }
 0x782   : > { %v5231_v63 = vsub.f32 1.0, %v5230_v30 }
 0x783   : > { %12625 = vst [vmem:[#allocation46_spill] sm:$0xff] %v11419_v55  ;;  %v5963_v15 = vmul.f32 -1.442695, %v11419_v55  ;;  %v6534_v52 = vpop.eup %6533 }
 0x784   : > { %v11466_v12 = vadd.f32 1.0, %v6534_v52 }
 0x785   : > { %6535 = vpow2.f32 %v5963_v15 }
 0x788   : > { %v4831_v62 = vpop.f32.mrf.mxu3 }
 0x789   : > { %v11424_v20 = vadd.f32 %v12612_v34, %v4831_v62 }
 0x78b   : > { %v5964_v29 = vmul.f32 -1.442695, %v11424_v20  ;;  %v6536_v7 = vpop.eup %6535 }
 0x78c   : > { %v11470_v33 = vadd.f32 1.0, %v6536_v7 }
 0x78d   : > { %6537 = vpow2.f32 %v5964_v29  ;;  %v5215_v29 = vmul.f32 %v11435_v35, %v11398_v24 }
 0x790   : > { %v4833_v27 = vpop.f32.mrf.mxu3 }
 0x791   : > { %v11428_v37 = vadd.f32 %v12612_v34, %v4833_v27 }
 0x793   : > { %v5965_v3 = vmul.f32 -1.442695, %v11428_v37  ;;  %v6538_v25 = vpop.eup %6537 }
 0x794   : > { %v11472_v47 = vadd.f32 1.0, %v6538_v25 }
 0x795   : > { %6539 = vpow2.f32 %v5965_v3 }
 0x796   : > { %vm5369_vm13 = vweird.f32 %v11472_v47 }
 0x798   : > { %v4836_v10 = vpop.f32.mrf.mxu3 }
 0x799   : > { %v11432_v4 = vadd.f32 %v12612_v34, %v4836_v10 }
 0x79b   : > { %v5966_v16 = vmul.f32 -1.442695, %v11432_v4  ;;  %v6540_v9 = vpop.eup %6539 }
 0x79c   : > { %v11477_v31 = vadd.f32 1.0, %v6540_v9 }
 0x79d   : > { %6541 = vpow2.f32 %v5966_v16 }
 0x79e   : > { %vm5384_vm0 = vweird.f32 %v11477_v31 }
 0x7a0   : > { %v4838_v60 = vpop.f32.mrf.mxu3 }
 0x7a1   : > { %v11441_v11 = vadd.f32 %v12612_v34, %v4838_v60 }
 0x7a3   : > { %v5967_v44 = vmul.f32 -1.442695, %v11441_v11  ;;  %v6542_v21 = vpop.eup %6541 }
 0x7a4   : > { %v11482_v43 = vadd.f32 1.0, %v6542_v21 }
 0x7a5   : > { %6543 = vpow2.f32 %v5967_v44  ;;  %v5216_v44 = vsub.f32 1.0, %v5215_v29 }
 0x7a6   : > { %6545 = vrcp.f32 %v11445_v59  ;;  %vm5399_vm11 = vweird.f32 %v11482_v43 }
 0x7a7   : > { %6547 = vrcp.f32 %v11447_v53  ;;  %v11554_v23 = vmul.f32 %v11435_v35, %v5216_v44 }
 0x7a8   : > { %v4841_v19 = vpop.f32.mrf.mxu3  ;;  %6549 = vrcp.f32 %v11451_v48 }
 0x7a9   : > { %v11460_v42 = vadd.f32 %v12612_v34, %v4841_v19  ;;  %6551 = vrcp.f32 %v11453_v28  ;;  %12626 = vst [vmem:[#allocation50_spill] sm:$0xff] %v11554_v23  ;;  %v5405_v23 = vand.u32 2147483648, %v11482_v43 }
 0x7aa   : > { %6553 = vrcp.f32 %v11456_v40 }
 0x7ab   : > { %v5968_v5 = vmul.f32 -1.442695, %v11460_v42  ;;  %v6544_v62 = vpop.eup %6543 }
 0x7ac   : > { %v11474_v46 = vpop.eup %6545  ;;  %v11487_v39 = vadd.f32 1.0, %v6544_v62 }
 0x7ad   : > { %6555 = vpow2.f32 %v5968_v5  ;;  %v11479_v27 = vpop.eup %6547  ;;  %v5245_v16 = vmul.f32 %v11474_v46, %v11445_v59 }
 0x7ae   : > { %6557 = vrcp.f32 %v11463_v32  ;;  %v11484_v45 = vpop.eup %6549  ;;  %v5260_v58 = vmul.f32 %v11479_v27, %v11447_v53  ;;  %vm5414_vm9 = vweird.f32 %v11487_v39 }
 0x7af   : > { %6559 = vrcp.f32 %v11466_v12  ;;  %v11489_v10 = vpop.eup %6551  ;;  %v5275_v52 = vmul.f32 %v11484_v45, %v11451_v48 }
 0x7b0   : > { %6561 = vrcp.f32 %v11470_v33  ;;  %v4843_v38 = vpop.f32.mrf.mxu3  ;;  %v11495_v22 = vpop.eup %6553  ;;  %v5290_v19 = vmul.f32 %v11489_v10, %v11453_v28  ;;  %v5261_v30 = vsub.f32 1.0, %v5260_v58  ;;  %v11557_v58 = vmul.f32 %v11449_v17, %v5231_v63 }
 0x7b1   : > { %6563 = vrcp.f32 %v11472_v47  ;;  %v11493_v61 = vadd.f32 %v12612_v34, %v4843_v38  ;;  %v5305_v7 = vmul.f32 %v11495_v22, %v11456_v40  ;;  %v5246_v38 = vsub.f32 1.0, %v5245_v16 }
 0x7b2   : > { %6565 = vrcp.f32 %v11477_v31  ;;  %v5291_v16 = vsub.f32 1.0, %v5290_v19  ;;  %12627 = vst [vmem:[#allocation29_spill] sm:$0xff] %v11557_v58  ;;  %v11563_v55 = vmul.f32 %v11479_v27, %v5261_v30 }
 0x7b3   : > { %v6556_v57 = vpop.eup %6555  ;;  %6567 = vrcp.f32 %v11482_v43  ;;  %v5969_v18 = vmul.f32 -1.442695, %v11493_v61  ;;  %v5306_v41 = vsub.f32 1.0, %v5305_v7  ;;  %v11560_v1 = vmul.f32 %v11474_v46, %v5246_v38 }
 0x7b4   : > { %v11500_v50 = vpop.eup %6557  ;;  %6569 = vrcp.f32 %v11487_v39  ;;  %v11503_v54 = vadd.f32 1.0, %v6556_v57 }
 0x7b5   : > { %v11505_v15 = vpop.eup %6559  ;;  %6571 = vpow2.f32 %v5969_v18  ;;  %v5320_v9 = vmul.f32 %v11500_v50, %v11463_v32  ;;  %v11572_v44 = vmul.f32 %v11495_v22, %v5306_v41 }
 0x7b6   : > { %v11507_v34 = vpop.eup %6561  ;;  %6573 = vrcp.f32 %v11503_v54  ;;  %v5335_v5 = vmul.f32 %v11505_v15, %v11466_v12  ;;  %vm5429_vm7 = vweird.f32 %v11503_v54 }
 0x7b7   : > { %v11512_v60 = vpop.eup %6563  ;;  %v5350_v21 = vmul.f32 %v11507_v34, %v11470_v33  ;;  %v5321_v13 = vsub.f32 1.0, %v5320_v9  ;;  %v11569_v9 = vmul.f32 %v11489_v10, %v5291_v16  ;;  %vm5355_vm12 = vweird.f32 %v11507_v34 }
 0x7b8   : > { %v11516_v3 = vpop.eup %6565  ;;  %v5365_v57 = vmul.f32 %v11512_v60, %v11472_v47  ;;  %v5336_v51 = vsub.f32 1.0, %v5335_v5  ;;  %vm5370_vm1 = vweird.f32 %v11512_v60 }
 0x7b9   : > { %v11518_v14 = vpop.eup %6567  ;;  %v5380_v49 = vmul.f32 %v11516_v3, %v11477_v31  ;;  %v5351_v24 = vsub.f32 1.0, %v5350_v21  ;;  %v11576_v21 = vmul.f32 %v11500_v50, %v5321_v13  ;;  %vm5385_vm8 = vweird.f32 %v11516_v3 }
 0x7ba   : > { %v11522_v56 = vpop.eup %6569  ;;  %v5395_v0 = vmul.f32 %v11518_v14, %v11482_v43  ;;  %v5366_v36 = vsub.f32 1.0, %v5365_v57  ;;  %v11579_v38 = vmul.f32 %v11505_v15, %v5336_v51  ;;  %v5403_v51 = vand.u32 2147483647, %v11482_v43 }
 0x7bb   : > { %v6572_v6 = vpop.eup %6571  ;;  %v5410_v18 = vmul.f32 %v11522_v56, %v11487_v39  ;;  %vm5415_vm3 = vweird.f32 %v11522_v56  ;;  %vm5400_vm10 = vweird.f32 %v11518_v14 }
 0x7bc   : > { %v11532_v25 = vpop.eup %6573  ;;  %v11540_v62 = vadd.f32 1.0, %v6572_v6  ;;  %v5276_v6 = vsub.f32 1.0, %v5275_v52  ;;  %v5381_v52 = vsub.f32 1.0, %v5380_v49  ;;  %v5396_v19 = vsub.f32 1.0, %v5395_v0  ;;  %vm11621_vm5 = vmor %vm5414_vm9, %vm5415_vm3 }
 0x7bd   : > { %v5425_v29 = vmul.f32 %v11532_v25, %v11503_v54  ;;  %v5411_v26 = vsub.f32 1.0, %v5410_v18  ;;  %v11582_v49 = vmul.f32 %v11507_v34, %v5351_v24  ;;  %v5367_v57 = vmul.f32 %v11512_v60, %v5366_v36  ;;  %vm11642_vm4 = vmor %vm5399_vm11, %vm5400_vm10 }
 0x7be   : > { %6575 = vrcp.f32 %v11540_v62  ;;  %v11566_v7 = vmul.f32 %v11484_v45, %v5276_v6  ;;  %v5382_v18 = vmul.f32 %v11516_v3, %v5381_v52  ;;  %v5397_v13 = vmul.f32 %v11518_v14, %v5396_v19  ;;  %vm11659_vm11 = vmor %vm5384_vm0, %vm5385_vm8 }
 0x7bf   : > { %v5426_v2 = vsub.f32 1.0, %v5425_v29  ;;  %v5412_v41 = vmul.f32 %v11522_v56, %v5411_v26  ;;  %vm5430_vm2 = vweird.f32 %v11532_v25  ;;  %v5433_v26 = vand.u32 2147483647, %v11503_v54  ;;  %vm11677_vm8 = vmor %vm5369_vm13, %vm5370_vm1 }
 0x7c0   : > { %v5435_v29 = vand.u32 2147483648, %v11503_v54  ;;  %v5450_v30 = vand.u32 2147483648, %v11540_v62  ;;  %v5448_v52 = vand.u32 2147483647, %v11540_v62  ;;  %v5418_v19 = vand.u32 2147483647, %v11487_v39  ;;  %vm11612_vm15 = vmor %vm5429_vm7, %vm5430_vm2 }
 0x7c1   : > { %v5427_v63 = vmul.f32 %v11532_v25, %v5426_v2  ;;  %v5413_v6 = vadd.f32 %v11522_v56, %v5412_v41  ;;  %v5420_v54 = vand.u32 2147483648, %v11487_v39  ;;  %v5398_v41 = vadd.f32 %v11518_v14, %v5397_v13 }
 0x7c2   : > { %vm5444_vm2 = vweird.f32 %v11540_v62  ;;  %v5383_v0 = vadd.f32 %v11516_v3, %v5382_v18  ;;  %v5436_v58 = vor.u32 1.1754944e-38, %v5435_v29  ;;  %v5451_v13 = vor.u32 1.1754944e-38, %v5450_v30 }
 0x7c3   : > { %v5428_v24 = vadd.f32 %v11532_v25, %v5427_v63  ;;  %vm5325_vm3 = vweird.f32 %v11500_v50  ;;  %vm5339_vm9 = vweird.f32 %v11466_v12  ;;  %v5417_v63 = vsel %vm11621_vm5, %v11522_v56, %v5413_v6 }
 0x7c4   : > { %v6576_v5 = vpop.eup %6575  ;;  %vm5449_vm6 = vcmp.eq.f32.partialorder %v5448_v52, 8.507059e+37  ;;  %vm5324_vm5 = vweird.f32 %v11463_v32  ;;  %v5368_v56 = vadd.f32 %v11512_v60, %v5367_v57  ;;  %v5375_v6 = vand.u32 2147483648, %v11472_v47 }
 0x7c5   : > { %v5440_v2 = vmul.f32 %v6576_v5, %v11540_v62  ;;  %vm5445_vm14 = vweird.f32 %v6576_v5  ;;  %v5432_v39 = vsel %vm11612_vm15, %v11532_v25, %v5428_v24  ;;  %vm5434_vm15 = vcmp.eq.f32.partialorder %v5433_v26, 8.507059e+37 }
 0x7c6   : > { %vm5446_vm7 = vmor %vm5444_vm2, %vm5445_vm14  ;;  %v5390_v62 = vand.u32 2147483648, %v11477_v31  ;;  %v5421_v24 = vor.u32 1.1754944e-38, %v5420_v54  ;;  %v5437_v29 = vsel %vm5434_vm15, %v5436_v58, %v5432_v39  ;;  %vm5310_vm14 = vweird.f32 %v11495_v22 }
 0x7c7   : > { %v5441_v36 = vsub.f32 1.0, %v5440_v2  ;;  %vm5419_vm2 = vcmp.eq.f32.partialorder %v5418_v19, 8.507059e+37  ;;  %v5373_v26 = vand.u32 2147483647, %v11472_v47  ;;  %v5406_v57 = vor.u32 1.1754944e-38, %v5405_v23 }
 0x7c8   : > { %vm5295_vm10 = vweird.f32 %v11489_v10  ;;  %v5484_v52 = vmul.f32 %v5437_v29, %v11460_v42  ;;  %v5358_v19 = vand.u32 2147483647, %v11470_v33  ;;  %v5360_v23 = vand.u32 2147483648, %v11470_v33 }
 0x7c9   : > { %v5442_v16 = vmul.f32 %v6576_v5, %v5441_v36  ;;  %vm5280_vm0 = vweird.f32 %v11484_v45  ;;  %v5338_v42 = vadd.f32 %v11505_v15, %v11579_v38  ;;  %v5345_v2 = vand.u32 2147483648, %v11466_v12  ;;  %v12659_v38 = vld [vmem:[#allocation5_spill] sm:$0xff] }
 0x7ca   : > { %vm12639_vm1 = vweird.f32 %v11470_v33  ;;  %v5376_v39 = vor.u32 1.1754944e-38, %v5375_v6  ;;  %v5315_v18 = vand.u32 2147483648, %v11456_v40  ;;  %v5283_v6 = vand.u32 2147483647, %v11451_v48 }
 0x7cb   : > { %v5443_v36 = vadd.f32 %v6576_v5, %v5442_v16  ;;  %v5422_v16 = vsel %vm5419_vm2, %v5421_v24, %v5417_v63  ;;  %vm11697_vm13 = vmor %vm12639_vm1, %vm5355_vm12  ;;  %vm5265_vm2 = vweird.f32 %v11479_v27  ;;  %vm12642_vm12 = vweird.f32 %v11505_v15  ;;  %v12663_v63 = vld [vmem:[#allocation66_spill] sm:$0xff] }
 0x7cc   : > { %v5483_v47 = vmul.f32 %v5422_v16, %v11441_v11  ;;  %v5323_v11 = vadd.f32 %v11500_v50, %v11576_v21  ;;  %v5361_v21 = vor.u32 1.1754944e-38, %v5360_v23  ;;  %vm5264_vm1 = vweird.f32 %v11447_v53 }
 0x7cd   : > { %v5447_v25 = vsel %vm5446_vm7, %v6576_v5, %v5443_v36  ;;  %v5402_v5 = vsel %vm11642_vm4, %v11518_v14, %v5398_v41  ;;  %v5387_v14 = vsel %vm11659_vm11, %v11516_v3, %v5383_v0  ;;  %vm5404_vm4 = vcmp.eq.f32.partialorder %v5403_v51, 8.507059e+37 }
 0x7ce   : > { %v5452_v30 = vsel %vm5449_vm6, %v5451_v13, %v5447_v25  ;;  %vm5309_vm6 = vweird.f32 %v11456_v40  ;;  %v5407_v41 = vsel %vm5404_vm4, %v5406_v57, %v5402_v5  ;;  %vm5294_vm7 = vweird.f32 %v11453_v28 }
 0x7cf   : > { %v5485_v43 = vmul.f32 %v5452_v30, %v11493_v61  ;;  %v5353_v61 = vadd.f32 %v11507_v34, %v11582_v49  ;;  %v5391_v49 = vor.u32 1.1754944e-38, %v5390_v62  ;;  %v5372_v3 = vsel %vm11677_vm8, %v11512_v60, %v5368_v56  ;;  %vm11715_vm8 = vmor %vm5339_vm9, %vm12642_vm12 }
 0x7d0   : > { %v12638_v0 = vand.u32 2147483647, %v11477_v31  ;;  %v5343_v51 = vand.u32 2147483647, %v11466_v12  ;;  %vm5279_vm11 = vweird.f32 %v11451_v48  ;;  %vm5374_vm4 = vcmp.eq.f32.partialorder %v5373_v26, 8.507059e+37  ;;  %vm11733_vm9 = vmor %vm5324_vm5, %vm5325_vm3  ;;  %v12649_v26 = vld [vmem:[#allocation46_spill] sm:$0xff] }
 0x7d1   : > { %5506 = vmatpush.msra.mxu1 %v5485_v43  ;;  %v5357_v31 = vsel %vm11697_vm13, %v11507_v34, %v5353_v61  ;;  %v5482_v33 = vmul.f32 %v5407_v41, %v11432_v4  ;;  %v5328_v36 = vand.u32 2147483647, %v11463_v32  ;;  %v5330_v13 = vand.u32 2147483648, %v11463_v32  ;;  %vm11751_vm3 = vmor %vm5309_vm6, %vm5310_vm14  ;;  %v12655_v41 = vld [vmem:[#allocation32_spill] sm:$0xff] }
 0x7d2   : > { %vm5389_vm15 = vcmp.eq.f32.partialorder %v12638_v0, 8.507059e+37  ;;  %v5377_v25 = vsel %vm5374_vm4, %v5376_v39, %v5372_v3  ;;  %v5308_v4 = vadd.f32 %v11495_v22, %v11572_v44  ;;  %v5342_v34 = vsel %vm11715_vm8, %v11505_v15, %v5338_v42  ;;  %vm11769_vm14 = vmor %vm5294_vm7, %vm5295_vm10 }
 0x7d3   : > { %5507 = vmatpush.msra.mxu1 %v5484_v52  ;;  %v5392_v60 = vsel %vm5389_vm15, %v5391_v49, %v5387_v14  ;;  %vm5250_vm15 = vweird.f32 %v11474_v46  ;;  %vm5359_vm13 = vcmp.eq.f32.partialorder %v5358_v19, 8.507059e+37  ;;  %v5313_v62 = vand.u32 2147483647, %v11456_v40  ;;  %v12652_v14 = vld [vmem:[#allocation26_spill] sm:$0xff]  ;;  %vm11785_vm10 = vmor %vm5279_vm11, %vm5280_vm0 }
 0x7d4   : > { %v5481_v12 = vmul.f32 %v5392_v60, %v11428_v37  ;;  %v5346_v44 = vor.u32 1.1754944e-38, %v5345_v2  ;;  %v5362_v29 = vsel %vm5359_vm13, %v5361_v21, %v5357_v31  ;;  %vm5235_vm4 = vweird.f32 %v11449_v17  ;;  %vm11801_vm0 = vmor %vm5264_vm1, %vm5265_vm2 }
 0x7d5   : > { %5508 = vmatpush.msra.mxu1 %v5483_v47  ;;  %vm5249_vm12 = vweird.f32 %v11445_v59  ;;  %v5293_v37 = vadd.f32 %v11489_v10, %v11569_v9  ;;  %v5327_v15 = vsel %vm11733_vm9, %v11500_v50, %v5323_v11  ;;  %vm5344_vm8 = vcmp.eq.f32.partialorder %v5343_v51, 8.507059e+37  ;;  %v12658_v51 = vld [vmem:[#allocation29_spill] sm:$0xff] }
 0x7d6   : > { %v5480_v32 = vmul.f32 %v5377_v25, %v11424_v20  ;;  %v5298_v30 = vand.u32 2147483647, %v11453_v28  ;;  %v5300_v56 = vand.u32 2147483648, %v11453_v28  ;;  %v5331_v9 = vor.u32 1.1754944e-38, %v5330_v13  ;;  %vm11817_vm2 = vmor %vm5249_vm12, %vm5250_vm15  ;;  %v12664_v25 = vld [vmem:[#allocation23_spill] sm:$0xff] }
 0x7d7   : > { %5509 = vmatpush.msra.mxu1 %v5482_v33  ;;  %v5347_v43 = vsel %vm5344_vm8, %v5346_v44, %v5342_v34  ;;  %vm5220_vm5 = vweird.f32 %v11435_v35  ;;  %vm5234_vm13 = vweird.f32 %v11421_v8  ;;  %v5278_v20 = vadd.f32 %v11484_v45, %v11566_v7 }
 0x7d8   : > { %v5312_v50 = vsel %vm11751_vm3, %v11495_v22, %v5308_v4  ;;  %vm5329_vm9 = vcmp.eq.f32.partialorder %v5328_v36, 8.507059e+37  ;;  %v5479_v40 = vmul.f32 %v5362_v29, %v12649_v26  ;;  %v5285_v58 = vand.u32 2147483648, %v11451_v48  ;;  %v12662_v36 = vld [vmem:[#allocation50_spill] sm:$0xff]  ;;  %vm11833_vm15 = vmor %vm5234_vm13, %vm5235_vm4 }
 0x7d9   : > { %5510 = vmatpush.msra.mxu1 %v5481_v12  ;;  %v5316_v7 = vor.u32 1.1754944e-38, %v5315_v18  ;;  %v5332_v16 = vsel %vm5329_vm9, %v5331_v9, %v5327_v15  ;;  %v5263_v22 = vadd.f32 %v11479_v27, %v11563_v55  ;;  %v5297_v61 = vsel %vm11769_vm14, %v11489_v10, %v5293_v37  ;;  %v12667_v18 = vld [vmem:[#allocation38_spill] sm:$0xff]  ;;  %v12668_v37 = vld [vmem:[#allocation53_spill] sm:$0xff] }
 0x7da   : > { %vm5314_vm6 = vcmp.eq.f32.partialorder %v5313_v62, 8.507059e+37  ;;  %v5478_v52 = vmul.f32 %v5347_v43, %v12652_v14  ;;  %v5268_v19 = vand.u32 2147483647, %v11447_v53  ;;  %v5270_v28 = vand.u32 2147483648, %v11447_v53  ;;  %v12670_v9 = vld [vmem:[#allocation65_spill] sm:$0xff] }
 0x7db   : > { %5511 = vmatpush.msra.mxu1 %v5480_v32  ;;  %v5301_v55 = vor.u32 1.1754944e-38, %v5300_v56  ;;  %v5317_v54 = vsel %vm5314_vm6, %v5316_v7, %v5312_v50  ;;  %v5248_v10 = vadd.f32 %v11474_v46, %v11560_v1  ;;  %v5282_v49 = vsel %vm11785_vm10, %v11484_v45, %v5278_v20  ;;  %v12669_v56 = vld [vmem:[#allocation10_spill] sm:$0xff]  ;;  %v12671_v20 = vld [vmem:[#allocation67_spill] sm:$0xff] }
 0x7dc   : > { %vm5299_vm7 = vcmp.eq.f32.partialorder %v5298_v30, 8.507059e+37  ;;  %v5477_v42 = vmul.f32 %v5332_v16, %v12655_v41  ;;  %v5253_v3 = vand.u32 2147483647, %v11445_v59  ;;  %v5255_v48 = vand.u32 2147483648, %v11445_v59 }
 0x7dd   : > { %5512 = vmatpush.msra.mxu1 %v5479_v40  ;;  %v5286_v1 = vor.u32 1.1754944e-38, %v5285_v58  ;;  %v5302_v47 = vsel %vm5299_vm7, %v5301_v55, %v5297_v61  ;;  %v5233_v45 = vadd.f32 %v11449_v17, %v12658_v51  ;;  %v5267_v2 = vsel %vm11801_vm0, %v11479_v27, %v5263_v22  ;;  %v5527_v58 = vld [vmem:[%s11875_s15] sm:$0x1] }
 0x7de   : > { %vm5284_vm11 = vcmp.eq.f32.partialorder %v5283_v6, 8.507059e+37  ;;  %v5476_v39 = vmul.f32 %v5317_v54, %v12659_v38  ;;  %v5238_v60 = vand.u32 2147483647, %v11421_v8  ;;  %v5240_v53 = vand.u32 2147483648, %v11421_v8  ;;  %v5533_v22 = vld [vmem:[#allocation2] sm:$0x1] }
 0x7df   : > { %5513 = vmatpush.msra.mxu1 %v5478_v52  ;;  %v5271_v31 = vor.u32 1.1754944e-38, %v5270_v28  ;;  %v5287_v33 = vsel %vm5284_vm11, %v5286_v1, %v5282_v49  ;;  %v5218_v27 = vadd.f32 %v11435_v35, %v12662_v36  ;;  %v5252_v13 = vsel %vm11817_vm2, %v11474_v46, %v5248_v10 }
 0x7e0   : > { %vm5269_vm1 = vcmp.eq.f32.partialorder %v5268_v19, 8.507059e+37  ;;  %v5475_v21 = vmul.f32 %v5302_v47, %v12663_v63  ;;  %vm5219_vm8 = vweird.f32 %v12664_v25  ;;  %v5225_v59 = vand.u32 2147483648, %v12664_v25 }
 0x7e1   : > { %5514 = vmatpush.msra.mxu1 %v5477_v42  ;;  %v5256_v34 = vor.u32 1.1754944e-38, %v5255_v48  ;;  %v5272_v12 = vsel %vm5269_vm1, %v5271_v31, %v5267_v2  ;;  %v5223_v46 = vand.u32 2147483647, %v12664_v25  ;;  %v5237_v62 = vsel %vm11833_vm15, %v11449_v17, %v5233_v45  ;;  %vm5221_vm3 = vmor %vm5219_vm8, %vm5220_vm5 }
 0x7e2   : > { %vm5254_vm12 = vcmp.eq.f32.partialorder %v5253_v3, 8.507059e+37  ;;  %v5474_v24 = vmul.f32 %v5287_v33, %v12667_v18  ;;  %v5241_v8 = vor.u32 1.1754944e-38, %v5240_v53  ;;  %v5222_v29 = vsel %vm5221_vm3, %v11435_v35, %v5218_v27 }
 0x7e3   : > { %5515 = vmatpush.msra.mxu1 %v5476_v39  ;;  %v5257_v44 = vsel %vm5254_vm12, %v5256_v34, %v5252_v13  ;;  %vm5239_vm4 = vcmp.eq.f32.partialorder %v5238_v60, 8.507059e+37  ;;  %v5473_v15 = vmul.f32 %v5272_v12, %v12668_v37  ;;  %v5226_v32 = vor.u32 1.1754944e-38, %v5225_v59 }
 0x7e4   : > { %v5242_v30 = vsel %vm5239_vm4, %v5241_v8, %v5237_v62  ;;  %vm5224_vm13 = vcmp.eq.f32.partialorder %v5223_v46, 8.507059e+37  ;;  %v5472_v17 = vmul.f32 %v5257_v44, %v12669_v56  ;;  %v12672_v35 = vmov 1.0  }
 0x7e5   : > { %5516 = vmatpush.msra.mxu1 %v5475_v21  ;;  %v5227_v5 = vsel %vm5224_vm13, %v5226_v32, %v5222_v29  ;;  %v5471_v43 = vmul.f32 %v5242_v30, %v12670_v9  ;;  %vm5529_vm5 = vcmask 1040384   ;;  %vm5536_vm9 = vcmask 0  }
 0x7e6   : > { %v5470_v50 = vmul.f32 %v5227_v5, %v12671_v20 }
 0x7e7   : > { %5517 = vmatpush.msra.mxu1 %v5474_v24 }
 0x7e9   : > { %5518 = vmatpush.msra.mxu1 %v5473_v15 }
 0x7eb   : > { %5519 = vmatpush.msra.mxu1 %v5472_v17 }
 0x7ed   : > { %5520 = vmatpush.msra.mxu1 %v5471_v43  ;;  %v5503_v26 = vpop.f32.mrf.mxu0 }
 0x7ef   : > { %5521 = vmatpush.msra.mxu1 %v5470_v50 }
 0x7f0   : > { %5522 = vmatmul.f32.vlgmr.msra.gmra.mxu1 %v12672_v35 }
 0x86d   : > { %v5523_v40 = vpop.f32.mrf.mxu1 }
 0x86e   : > { %v5524_v6 = vadd.f32 %v5523_v40, %v5503_v26 }
 0x870   : > { %v5526_v57 = vmul.f32 0.00390625, %v5524_v6 }
 0x872   : > { %v5528_v7 = vmul.f32 %v5527_v58, %v5526_v57 }
 0x874   : > { %v5530_v16 = vsel %vm5529_vm5, %v5528_v7, 0.0 }
 0x875   : > { %5531 = vadd.xlane.f32.xlu0 %v5530_v16 }
 0x8e8   : > { %v5532_v61 = vpop.xlane.xlu0 %5531 }
 0x8e9   : > { %v5534_v14 = vadd.f32 %v5533_v22, %v5532_v61 }
 0x8eb   : > { %v5535_v52 = vmax.f32 %v5534_v14, 0.0 }
 0x8ed   : > { %5537 = vst.msk [vmem:[%s546_s25] sm:$0x1] %vm5536_vm9, %v5535_v52 }
 0x8ee PF: > { %s29_s26 = sadd.s32 1, %s6616_s26  }
 0x8ef   : > { %p26_p4 = scmp.ge.s32.totalorder %s29_s26, 4  }
 0x8f1   :  { %28 = sbr.rel (!%p26_p4) target bundleno = 3 (0x3), region = 118 }

</bundles_post_ra>
